<compile_context>
chip_gen: v7x
topology: tpu7x:2x2x1
jax: 0.10.0
libtpu: 0.0.40
codegen_flags: <defaults>
</compile_context>

<pallas_src>
import functools

import jax
import jax.numpy as jnp
from jax.experimental import pallas as pl
from jax.experimental.pallas import tpu as pltpu


# ----------------------------- Pallas kernels ------------------------------

def _conv_mm_kernel(a_ref, w_ref, o_ref):
    # (TM, K) @ (K, Cout) on the MXU, f32 accumulate, fused ReLU, bf16 store.
    # TODO(synk): Cout=32/64 keeps output stores lane-masked; a transposed
    # (Cout, M) product would be lane-dense but needs a different downstream
    # im2col layout.
    acc = jnp.dot(a_ref[...], w_ref[...], preferred_element_type=jnp.float32)
    o_ref[...] = jnp.maximum(acc, 0.0).astype(o_ref.dtype)


def _head_kernel(x_ref, w1_ref, b1_ref, w2_ref, b2_ref, q_ref):
    # Fused dueling head:
    #   h = relu(flat @ W1 + b1)   # [value_hidden | adv_hidden], 1024 wide
    #   Q = h @ W2 + b2            # W2/b2 already encode fc2_value, fc2_adv
    #                              # and (value + adv - mean(adv))
    h = jnp.dot(x_ref[...], w1_ref[...], preferred_element_type=jnp.float32)
    h = jnp.maximum(h + b1_ref[...], 0.0)
    q = jnp.dot(h.astype(w2_ref.dtype), w2_ref[...],
                preferred_element_type=jnp.float32)
    q_ref[...] = q + b2_ref[...]


def _row_tile(m, max_tile=1024):
    # Full extent when it fits (always a legal block shape), else a
    # multiple-of-8 tile; the trailing partial block is masked by Pallas.
    return m if m <= max_tile else max_tile


def conv_matmul(patches, w_mat):
    # patches: (M, K) bf16 ; w_mat: (K, Cout) bf16  ->  relu(patches @ w_mat) bf16
    M, K = patches.shape
    K2, Cout = w_mat.shape
    assert K == K2
    tm = _row_tile(M)
    return pl.pallas_call(
        _conv_mm_kernel,
        out_shape=jax.ShapeDtypeStruct((M, Cout), jnp.bfloat16),
        grid=(pl.cdiv(M, tm),),
        in_specs=[
            pl.BlockSpec((tm, K), lambda i: (i, 0)),
            pl.BlockSpec((K, Cout), lambda i: (0, 0)),
        ],
        out_specs=pl.BlockSpec((tm, Cout), lambda i: (i, 0)),
        compiler_params=pltpu.CompilerParams(
            dimension_semantics=("parallel",)),
    )(patches, w_mat)


def dueling_head(flat, w1, b1, w2, b2):
    # flat: (B, 3136) bf16 -> Q: (B, A) f32, single fused kernel.
    B, K = flat.shape
    A = w2.shape[1]
    tb = _row_tile(B, max_tile=256)
    return pl.pallas_call(
        _head_kernel,
        out_shape=jax.ShapeDtypeStruct((B, A), jnp.float32),
        grid=(pl.cdiv(B, tb),),
        in_specs=[
            pl.BlockSpec((tb, K), lambda i: (i, 0)),
            pl.BlockSpec(w1.shape, lambda i: (0, 0)),
            pl.BlockSpec(b1.shape, lambda i: (0, 0)),
            pl.BlockSpec(w2.shape, lambda i: (0, 0)),
            pl.BlockSpec(b2.shape, lambda i: (0, 0)),
        ],
        out_specs=pl.BlockSpec((tb, A), lambda i: (i, 0)),
        compiler_params=pltpu.CompilerParams(
            dimension_semantics=("parallel",)),
    )(flat, w1, b1, w2, b2)


# ------------------------------- JAX glue ----------------------------------

def im2col_nhwc(x, kh, kw, stride):
    # x: (N, H, W, C) -> (N*Ho*Wo, kh*kw*C) patches, column order (kh, kw, C).
    # Pure strided slicing + one concat — no transposes.
    # TODO(synk): patch extraction could move inside the Pallas kernel (pl.ds
    # row-slab gathers on a VMEM-resident image) to remove this XLA glue too.
    N, H, W, C = x.shape
    Ho = (H - kh) // stride + 1
    Wo = (W - kw) // stride + 1
    cols = []
    for i in range(kh):
        for j in range(kw):
            cols.append(x[:, i:i + stride * Ho:stride,
                          j:j + stride * Wo:stride, :])
    patches = jnp.concatenate(cols, axis=-1)              # (N, Ho, Wo, kh*kw*C)
    return patches.reshape(N * Ho * Wo, kh * kw * C), Ho, Wo


def conv_relu_nhwc(x, w_mat, kh, kw, stride):
    # x: (N, H, W, Cin); w_mat: (kh*kw*Cin, Cout) prepped bf16.
    N = x.shape[0]
    patches, Ho, Wo = im2col_nhwc(x, kh, kw, stride)
    out = conv_matmul(patches.astype(jnp.bfloat16), w_mat)  # (N*Ho*Wo, Cout)
    return out.reshape(N, Ho, Wo, w_mat.shape[1])           # NHWC, no transpose


def _conv_w_to_mat(w, scale=1.0):
    # PyTorch (Cout, Cin, kh, kw) -> (kh*kw*Cin, Cout) matching the (kh, kw, C)
    # patch column order.  `scale` folds the /255 normalization (conv1 only).
    Cout, Cin, kh, kw = w.shape
    w_mat = w.transpose(2, 3, 1, 0).reshape(kh * kw * Cin, Cout)
    return (w_mat * scale).astype(jnp.bfloat16)


def prepare_params(p, action_dim):
    """One-time weight prep: layout permutes, fusions, folds, bf16 casts."""
    A = action_dim
    c1 = _conv_w_to_mat(p["conv1_w"], scale=1.0 / 255.0)
    c2 = _conv_w_to_mat(p["conv2_w"])
    c3 = _conv_w_to_mat(p["conv3_w"])

    # fc1_value | fc1_adv fused into one (3136, 1024) weight, columns permuted
    # from PyTorch's NCHW flatten order (c, h, w) to our NHWC order (h, w, c).
    perm = jnp.arange(64 * 7 * 7).reshape(64, 7, 7).transpose(1, 2, 0).reshape(-1)
    w1 = jnp.concatenate([p["fc1v_w"], p["fc1a_w"]], axis=0)     # (1024, 3136)
    w1 = w1[:, perm].T.astype(jnp.bfloat16)                      # (3136, 1024)
    b1 = jnp.concatenate([p["fc1v_b"], p["fc1a_b"]], axis=1)     # (1, 1024) f32

    # fc2 + dueling combine folded into one (1024, A) linear layer (exact,
    # since Q_j = value + adv_j - mean_k(adv_k) is linear in [hv | ha]):
    #   W2[:512, j]  = Wv[0, :]
    #   W2[512:, j]  = Wa[j, :] - mean_k Wa[k, :]
    #   b2[j]        = bv + ba[j] - mean(ba)
    wv, bv = p["fc2v_w"], p["fc2v_b"]            # (1, 512), (1, 1)
    wa, ba = p["fc2a_w"], p["fc2a_b"]            # (A, 512), (1, A)
    w2_top = jnp.broadcast_to(wv.T, (512, A))
    w2_bot = (wa - jnp.mean(wa, axis=0, keepdims=True)).T        # (512, A)
    w2 = jnp.concatenate([w2_top, w2_bot], axis=0).astype(jnp.bfloat16)
    b2 = (bv + ba - jnp.mean(ba, axis=1, keepdims=True)).astype(jnp.float32)

    return {"c1": c1, "c2": c2, "c3": c3,
            "w1": w1, "b1": b1.astype(jnp.float32), "w2": w2, "b2": b2}


def init_params(key, action_dim):
    def kaiming(k, shape, fan_in):
        return jnp.sqrt(2.0 / fan_in) * jax.random.normal(k, shape, jnp.float32)

    ks = jax.random.split(key, 7)
    return {
        "conv1_w": kaiming(ks[0], (32, 4, 8, 8), 4 * 8 * 8),
        "conv2_w": kaiming(ks[1], (64, 32, 4, 4), 32 * 4 * 4),
        "conv3_w": kaiming(ks[2], (64, 64, 3, 3), 64 * 3 * 3),
        "fc1v_w": kaiming(ks[3], (512, 64 * 7 * 7), 64 * 7 * 7),
        "fc1v_b": jnp.zeros((1, 512), jnp.float32),
        "fc1a_w": kaiming(ks[4], (512, 64 * 7 * 7), 64 * 7 * 7),
        "fc1a_b": jnp.zeros((1, 512), jnp.float32),
        "fc2v_w": kaiming(ks[5], (1, 512), 512),
        "fc2v_b": jnp.zeros((1, 1), jnp.float32),
        "fc2a_w": kaiming(ks[6], (action_dim, 512), 512),
        "fc2a_b": jnp.zeros((1, action_dim), jnp.float32),
    }


def dqn_forward(prep, x):
    # x: (N, 4, 84, 84) uint8 NCHW, same convention as the PyTorch module.
    N = x.shape[0]
    x = jnp.transpose(x, (0, 2, 3, 1))            # one cheap uint8 NCHW->NHWC
    j = conv_relu_nhwc(x, prep["c1"], 8, 8, 4)    # (N, 20, 20, 32)
    j = conv_relu_nhwc(j, prep["c2"], 4, 4, 2)    # (N,  9,  9, 64)
    j = conv_relu_nhwc(j, prep["c3"], 3, 3, 1)    # (N,  7,  7, 64)
    flat = j.reshape(N, 7 * 7 * 64)               # NHWC flatten (fc1 permuted to match)
    return dueling_head(flat, prep["w1"], prep["b1"], prep["w2"], prep["b2"])


if __name__ == "__main__":
    action_dim = 6
    batch = 2

    key = jax.random.PRNGKey(0)
    k_params, k_x = jax.random.split(key)
    raw = init_params(k_params, action_dim)
    prep = prepare_params(raw, action_dim)        # one-time weight prep

    # Atari-style frames: uint8 in [0, 255], NCHW (batch, 4 frames, 84, 84).
    x = jax.random.randint(k_x, (batch, 4, 84, 84), 0, 256,
                           dtype=jnp.int32).astype(jnp.uint8)

    q = jax.jit(dqn_forward)(prep, x)
    jax.block_until_ready(q)
    assert q.shape == (batch, action_dim)
    print("KERNEL_OK")
</pallas_src>

<mosaic_0001>
module attributes {stable_mosaic.version = 11 : i64} {
  func.func @_conv_mm_kernel(%arg0: i32, %arg1: memref<800x256xbf16, #tpu.memory_space<vmem>>, %arg2: memref<256x32xbf16, #tpu.memory_space<vmem>>, %arg3: memref<800x32xbf16, #tpu.memory_space<vmem>>) attributes {dimension_semantics = [#tpu.dimension_semantics<parallel>], iteration_bounds = array<i64: 1>, scalar_prefetch = 0 : i64, scratch_operands = 0 : i64, tpu.core_type = #tpu.core_type<tc>, window_params = [{transform_indices = @transform_0, window_bounds = array<i64: 800, 256>}, {pipeline_mode = #tpu.pipeline_mode<synchronous>, transform_indices = @transform_1, window_bounds = array<i64: 256, 32>}, {transform_indices = @transform_2, window_bounds = array<i64: 800, 32>}]} {
    %c0 = arith.constant 0 : index
    %c0_0 = arith.constant 0 : index
    %0 = vector.load %arg1[%c0, %c0_0] : memref<800x256xbf16, #tpu.memory_space<vmem>>, vector<800x256xbf16>
    %c0_1 = arith.constant 0 : index
    %c0_2 = arith.constant 0 : index
    %1 = vector.load %arg2[%c0_1, %c0_2] : memref<256x32xbf16, #tpu.memory_space<vmem>>, vector<256x32xbf16>
    %cst = arith.constant dense<0.000000e+00> : vector<800x32xf32>
    %2 = tpu.matmul %0, %1, %cst {dimension_numbers = #tpu.dot_dimension_numbers<[1], [0], [0], [1], [0, 0, 1, 1], [], []>} : vector<800x256xbf16>, vector<256x32xbf16>, vector<800x32xf32> -> vector<800x32xf32>
    %cst_3 = arith.constant 0.000000e+00 : f32
    %3 = vector.broadcast %cst_3 : f32 to vector<800x32xf32>
    %4 = arith.maximumf %2, %3 : vector<800x32xf32>
    %5 = arith.truncf %4 : vector<800x32xf32> to vector<800x32xbf16>
    %c0_4 = arith.constant 0 : index
    %c0_5 = arith.constant 0 : index
    %6 = vector.load %arg3[%c0_4, %c0_5] : memref<800x32xbf16, #tpu.memory_space<vmem>>, vector<800x32xbf16>
    tpu.vector_store %arg3[%c0_4, %c0_5], %5 {strides = array<i32>} : memref<800x32xbf16, #tpu.memory_space<vmem>>, vector<800x32xbf16>,
    return
  }
  func.func @transform_0(%arg0: i32) -> (i32, i32) {
    %c0_i32 = arith.constant 0 : i32
    %c0_i32_0 = arith.constant 0 : i32
    return %arg0, %c0_i32 : i32, i32
  }
  func.func @transform_1(%arg0: i32) -> (i32, i32) {
    %c0_i32 = arith.constant 0 : i32
    %c0_i32_0 = arith.constant 0 : i32
    %c0_i32_1 = arith.constant 0 : i32
    return %c0_i32, %c0_i32_0 : i32, i32
  }
  func.func @transform_2(%arg0: i32) -> (i32, i32) {
    %c0_i32 = arith.constant 0 : i32
    %c0_i32_0 = arith.constant 0 : i32
    return %arg0, %c0_i32 : i32, i32
  }
}

module attributes {stable_mosaic.version = 11 : i64} {
  func.func @_conv_mm_kernel(%arg0: i32, %arg1: memref<162x512xbf16, #tpu.memory_space<vmem>>, %arg2: memref<512x64xbf16, #tpu.memory_space<vmem>>, %arg3: memref<162x64xbf16, #tpu.memory_space<vmem>>) attributes {dimension_semantics = [#tpu.dimension_semantics<parallel>], iteration_bounds = array<i64: 1>, scalar_prefetch = 0 : i64, scratch_operands = 0 : i64, tpu.core_type = #tpu.core_type<tc>, window_params = [{transform_indices = @transform_0, window_bounds = array<i64: 162, 512>}, {pipeline_mode = #tpu.pipeline_mode<synchronous>, transform_indices = @transform_1, window_bounds = array<i64: 512, 64>}, {transform_indices = @transform_2, window_bounds = array<i64: 162, 64>}]} {
    %c0 = arith.constant 0 : index
    %c0_0 = arith.constant 0 : index
    %0 = vector.load %arg1[%c0, %c0_0] : memref<162x512xbf16, #tpu.memory_space<vmem>>, vector<162x512xbf16>
    %c0_1 = arith.constant 0 : index
    %c0_2 = arith.constant 0 : index
    %1 = vector.load %arg2[%c0_1, %c0_2] : memref<512x64xbf16, #tpu.memory_space<vmem>>, vector<512x64xbf16>
    %cst = arith.constant dense<0.000000e+00> : vector<162x64xf32>
    %2 = tpu.matmul %0, %1, %cst {dimension_numbers = #tpu.dot_dimension_numbers<[1], [0], [0], [1], [0, 0, 1, 1], [], []>} : vector<162x512xbf16>, vector<512x64xbf16>, vector<162x64xf32> -> vector<162x64xf32>
    %cst_3 = arith.constant 0.000000e+00 : f32
    %3 = vector.broadcast %cst_3 : f32 to vector<162x64xf32>
    %4 = arith.maximumf %2, %3 : vector<162x64xf32>
    %5 = arith.truncf %4 : vector<162x64xf32> to vector<162x64xbf16>
    %c0_4 = arith.constant 0 : index
    %c0_5 = arith.constant 0 : index
    %6 = vector.load %arg3[%c0_4, %c0_5] : memref<162x64xbf16, #tpu.memory_space<vmem>>, vector<162x64xbf16>
    tpu.vector_store %arg3[%c0_4, %c0_5], %5 {strides = array<i32>} : memref<162x64xbf16, #tpu.memory_space<vmem>>, vector<162x64xbf16>,
    return
  }
  func.func @transform_0(%arg0: i32) -> (i32, i32) {
    %c0_i32 = arith.constant 0 : i32
    %c0_i32_0 = arith.constant 0 : i32
    return %arg0, %c0_i32 : i32, i32
  }
  func.func @transform_1(%arg0: i32) -> (i32, i32) {
    %c0_i32 = arith.constant 0 : i32
    %c0_i32_0 = arith.constant 0 : i32
    %c0_i32_1 = arith.constant 0 : i32
    return %c0_i32, %c0_i32_0 : i32, i32
  }
  func.func @transform_2(%arg0: i32) -> (i32, i32) {
    %c0_i32 = arith.constant 0 : i32
    %c0_i32_0 = arith.constant 0 : i32
    return %arg0, %c0_i32 : i32, i32
  }
}

module attributes {stable_mosaic.version = 11 : i64} {
  func.func @_conv_mm_kernel(%arg0: i32, %arg1: memref<98x576xbf16, #tpu.memory_space<vmem>>, %arg2: memref<576x64xbf16, #tpu.memory_space<vmem>>, %arg3: memref<98x64xbf16, #tpu.memory_space<vmem>>) attributes {dimension_semantics = [#tpu.dimension_semantics<parallel>], iteration_bounds = array<i64: 1>, scalar_prefetch = 0 : i64, scratch_operands = 0 : i64, tpu.core_type = #tpu.core_type<tc>, window_params = [{transform_indices = @transform_0, window_bounds = array<i64: 98, 576>}, {pipeline_mode = #tpu.pipeline_mode<synchronous>, transform_indices = @transform_1, window_bounds = array<i64: 576, 64>}, {transform_indices = @transform_2, window_bounds = array<i64: 98, 64>}]} {
    %c0 = arith.constant 0 : index
    %c0_0 = arith.constant 0 : index
    %0 = vector.load %arg1[%c0, %c0_0] : memref<98x576xbf16, #tpu.memory_space<vmem>>, vector<98x576xbf16>
    %c0_1 = arith.constant 0 : index
    %c0_2 = arith.constant 0 : index
    %1 = vector.load %arg2[%c0_1, %c0_2] : memref<576x64xbf16, #tpu.memory_space<vmem>>, vector<576x64xbf16>
    %cst = arith.constant dense<0.000000e+00> : vector<98x64xf32>
    %2 = tpu.matmul %0, %1, %cst {dimension_numbers = #tpu.dot_dimension_numbers<[1], [0], [0], [1], [0, 0, 1, 1], [], []>} : vector<98x576xbf16>, vector<576x64xbf16>, vector<98x64xf32> -> vector<98x64xf32>
    %cst_3 = arith.constant 0.000000e+00 : f32
    %3 = vector.broadcast %cst_3 : f32 to vector<98x64xf32>
    %4 = arith.maximumf %2, %3 : vector<98x64xf32>
    %5 = arith.truncf %4 : vector<98x64xf32> to vector<98x64xbf16>
    %c0_4 = arith.constant 0 : index
    %c0_5 = arith.constant 0 : index
    %6 = vector.load %arg3[%c0_4, %c0_5] : memref<98x64xbf16, #tpu.memory_space<vmem>>, vector<98x64xbf16>
    tpu.vector_store %arg3[%c0_4, %c0_5], %5 {strides = array<i32>} : memref<98x64xbf16, #tpu.memory_space<vmem>>, vector<98x64xbf16>,
    return
  }
  func.func @transform_0(%arg0: i32) -> (i32, i32) {
    %c0_i32 = arith.constant 0 : i32
    %c0_i32_0 = arith.constant 0 : i32
    return %arg0, %c0_i32 : i32, i32
  }
  func.func @transform_1(%arg0: i32) -> (i32, i32) {
    %c0_i32 = arith.constant 0 : i32
    %c0_i32_0 = arith.constant 0 : i32
    %c0_i32_1 = arith.constant 0 : i32
    return %c0_i32, %c0_i32_0 : i32, i32
  }
  func.func @transform_2(%arg0: i32) -> (i32, i32) {
    %c0_i32 = arith.constant 0 : i32
    %c0_i32_0 = arith.constant 0 : i32
    return %arg0, %c0_i32 : i32, i32
  }
}

module attributes {stable_mosaic.version = 11 : i64} {
  func.func @_head_kernel(%arg0: i32, %arg1: memref<2x3136xbf16, #tpu.memory_space<vmem>>, %arg2: memref<3136x1024xbf16, #tpu.memory_space<vmem>>, %arg3: memref<1x1024xf32, #tpu.memory_space<vmem>>, %arg4: memref<1024x6xbf16, #tpu.memory_space<vmem>>, %arg5: memref<1x6xf32, #tpu.memory_space<vmem>>, %arg6: memref<2x6xf32, #tpu.memory_space<vmem>>) attributes {dimension_semantics = [#tpu.dimension_semantics<parallel>], iteration_bounds = array<i64: 1>, scalar_prefetch = 0 : i64, scratch_operands = 0 : i64, tpu.core_type = #tpu.core_type<tc>, window_params = [{transform_indices = @transform_0, window_bounds = array<i64: 2, 3136>}, {pipeline_mode = #tpu.pipeline_mode<synchronous>, transform_indices = @transform_1, window_bounds = array<i64: 3136, 1024>}, {pipeline_mode = #tpu.pipeline_mode<synchronous>, transform_indices = @transform_2, window_bounds = array<i64: 1, 1024>}, {pipeline_mode = #tpu.pipeline_mode<synchronous>, transform_indices = @transform_3, window_bounds = array<i64: 1024, 6>}, {pipeline_mode = #tpu.pipeline_mode<synchronous>, transform_indices = @transform_4, window_bounds = array<i64: 1, 6>}, {transform_indices = @transform_5, window_bounds = array<i64: 2, 6>}]} {
    %c0 = arith.constant 0 : index
    %c0_0 = arith.constant 0 : index
    %0 = vector.load %arg1[%c0, %c0_0] : memref<2x3136xbf16, #tpu.memory_space<vmem>>, vector<2x3136xbf16>
    %c0_1 = arith.constant 0 : index
    %c0_2 = arith.constant 0 : index
    %1 = vector.load %arg2[%c0_1, %c0_2] : memref<3136x1024xbf16, #tpu.memory_space<vmem>>, vector<3136x1024xbf16>
    %cst = arith.constant dense<0.000000e+00> : vector<2x1024xf32>
    %2 = tpu.matmul %0, %1, %cst {dimension_numbers = #tpu.dot_dimension_numbers<[1], [0], [0], [1], [0, 0, 1, 1], [], []>} : vector<2x3136xbf16>, vector<3136x1024xbf16>, vector<2x1024xf32> -> vector<2x1024xf32>
    %c0_3 = arith.constant 0 : index
    %c0_4 = arith.constant 0 : index
    %3 = vector.load %arg3[%c0_3, %c0_4] : memref<1x1024xf32, #tpu.memory_space<vmem>>, vector<1x1024xf32>
    %4 = vector.broadcast %3 : vector<1x1024xf32> to vector<2x1024xf32>
    %5 = arith.addf %2, %4 : vector<2x1024xf32>
    %cst_5 = arith.constant 0.000000e+00 : f32
    %6 = vector.broadcast %cst_5 : f32 to vector<2x1024xf32>
    %7 = arith.maximumf %5, %6 : vector<2x1024xf32>
    %8 = arith.truncf %7 : vector<2x1024xf32> to vector<2x1024xbf16>
    %c0_6 = arith.constant 0 : index
    %c0_7 = arith.constant 0 : index
    %9 = vector.load %arg4[%c0_6, %c0_7] : memref<1024x6xbf16, #tpu.memory_space<vmem>>, vector<1024x6xbf16>
    %cst_8 = arith.constant dense<0.000000e+00> : vector<2x6xf32>
    %10 = tpu.matmul %8, %9, %cst_8 {dimension_numbers = #tpu.dot_dimension_numbers<[1], [0], [0], [1], [0, 0, 1, 1], [], []>} : vector<2x1024xbf16>, vector<1024x6xbf16>, vector<2x6xf32> -> vector<2x6xf32>
    %c0_9 = arith.constant 0 : index
    %c0_10 = arith.constant 0 : index
    %11 = vector.load %arg5[%c0_9, %c0_10] : memref<1x6xf32, #tpu.memory_space<vmem>>, vector<1x6xf32>
    %12 = vector.broadcast %11 : vector<1x6xf32> to vector<2x6xf32>
    %13 = arith.addf %10, %12 : vector<2x6xf32>
    %c0_11 = arith.constant 0 : index
    %c0_12 = arith.constant 0 : index
    %14 = vector.load %arg6[%c0_11, %c0_12] : memref<2x6xf32, #tpu.memory_space<vmem>>, vector<2x6xf32>
    tpu.vector_store %arg6[%c0_11, %c0_12], %13 {strides = array<i32>} : memref<2x6xf32, #tpu.memory_space<vmem>>, vector<2x6xf32>,
    return
  }
  func.func @transform_0(%arg0: i32) -> (i32, i32) {
    %c0_i32 = arith.constant 0 : i32
    %c0_i32_0 = arith.constant 0 : i32
    return %arg0, %c0_i32 : i32, i32
  }
  func.func @transform_1(%arg0: i32) -> (i32, i32) {
    %c0_i32 = arith.constant 0 : i32
    %c0_i32_0 = arith.constant 0 : i32
    %c0_i32_1 = arith.constant 0 : i32
    return %c0_i32, %c0_i32_0 : i32, i32
  }
  func.func @transform_2(%arg0: i32) -> (i32, i32) {
    %c0_i32 = arith.constant 0 : i32
    %c0_i32_0 = arith.constant 0 : i32
    %c0_i32_1 = arith.constant 0 : i32
    return %c0_i32, %c0_i32_0 : i32, i32
  }
  func.func @transform_3(%arg0: i32) -> (i32, i32) {
    %c0_i32 = arith.constant 0 : i32
    %c0_i32_0 = arith.constant 0 : i32
    %c0_i32_1 = arith.constant 0 : i32
    return %c0_i32, %c0_i32_0 : i32, i32
  }
  func.func @transform_4(%arg0: i32) -> (i32, i32) {
    %c0_i32 = arith.constant 0 : i32
    %c0_i32_0 = arith.constant 0 : i32
    %c0_i32_1 = arith.constant 0 : i32
    return %c0_i32, %c0_i32_0 : i32, i32
  }
  func.func @transform_5(%arg0: i32) -> (i32, i32) {
    %c0_i32 = arith.constant 0 : i32
    %c0_i32_0 = arith.constant 0 : i32
    return %arg0, %c0_i32 : i32, i32
  }
}

</mosaic_0001>

<bundles_post_ra>
// kernel: dqn_forward.4
= control target key start
LH: loop header
LB: loop body
LE: loop exit
PB: predicated region body
PF: predicated region fallthrough
CT: control target
= control target key end

     0   :  { %v2293_v0 = vmov 0   ;;  %vm1673_vm0 = vcmask 257024   ;;  %s3089_s1 = inlined_call_operand.vmem [shape: bf16[256,32], index: 1, kind: input, shape index: {}]   ;;  %s3090_s0 = inlined_call_operand.vmem [shape: bf16[800,256], index: 0, kind: input, shape index: {}]   ;;  %s3091_s2 = inlined_call_operand.vmem [shape: bf16[800,32], index: 2, kind: output, shape index: {}]  }
   0x1   :  { %740 = vmatprep.subr.bf16.mxu0 %v2293_v0  ;;  %2094 = vmatprep.subr.bf16.mxu1 %v2293_v0  ;;  %v2127_v1 = vld [vmem:[%s3089_s1] sm:$0xff]   ;;  %v2128_v2 = vld [vmem:[%s3089_s1 + $0x8] sm:$0xff]   ;;  %v2129_v3 = vld [vmem:[%s3089_s1 + $0x10] sm:$0xff]  }
   0x2   :  { %741 = vmatpush1.bf16.msra.mxu0 %v2127_v1  ;;  %2110 = vmatpush1.bf16.msra.mxu1 %v2127_v1  ;;  %v2130_v4 = vld [vmem:[%s3089_s1 + $0x18] sm:$0xff]   ;;  %v2131_v5 = vld [vmem:[%s3089_s1 + $0x20] sm:$0xff]   ;;  %v2132_v7 = vld [vmem:[%s3089_s1 + $0x28] sm:$0xff]  }
   0x3   :  { %742 = vmatprep.subr.bf16.mxu0 %v2293_v0  ;;  %2095 = vmatprep.subr.bf16.mxu1 %v2293_v0  ;;  %v2145_v6 = vld [vmem:[%s3090_s0 + $0x4] ss:$8 sps:$4 sm:$0xff]   ;;  %v2148_v8 = vld [vmem:[%s3090_s0 + $0x194] ss:$8 sps:$4 sm:$0xff]   ;;  %v2143_v19 = vld [vmem:[%s3090_s0] ss:$8 sps:$4 sm:$0xff]  }
   0x4   :  { %772 = vmatprep.mubr.bf16.mxu0 %v2145_v6  ;;  %972 = vmatprep.mubr.bf16.mxu1 %v2148_v8  ;;  %v2133_v9 = vld [vmem:[%s3089_s1 + $0x30] sm:$0xff]   ;;  %v2134_v10 = vld [vmem:[%s3089_s1 + $0x38] sm:$0xff]   ;;  %v2135_v11 = vld [vmem:[%s3089_s1 + $0x40] sm:$0xff]  }
   0x5   :  { %v2136_v12 = vld [vmem:[%s3089_s1 + $0x48] sm:$0xff]   ;;  %v2137_v13 = vld [vmem:[%s3089_s1 + $0x50] sm:$0xff]   ;;  %v2138_v14 = vld [vmem:[%s3089_s1 + $0x58] sm:$0xff]  }
   0x6   :  { %743 = vmatpush1.bf16.msra.mxu0 %v2128_v2  ;;  %2111 = vmatpush1.bf16.msra.mxu1 %v2128_v2  ;;  %v2139_v15 = vld [vmem:[%s3089_s1 + $0x60] sm:$0xff]   ;;  %v2140_v16 = vld [vmem:[%s3089_s1 + $0x68] sm:$0xff]   ;;  %v2141_v17 = vld [vmem:[%s3089_s1 + $0x70] sm:$0xff]  }
   0x7   :  { %744 = vmatprep.subr.bf16.mxu0 %v2293_v0  ;;  %2096 = vmatprep.subr.bf16.mxu1 %v2293_v0  ;;  %v2142_v18 = vld [vmem:[%s3089_s1 + $0x78] sm:$0xff]   ;;  %v2151_v22 = vld [vmem:[%s3090_s0 + $0x1a4] ss:$8 sps:$4 sm:$0xff]   ;;  %v2154_v24 = vld [vmem:[%s3090_s0 + $0x1a0] ss:$8 sps:$4 sm:$0xff]  }
   0x8   :  { %v2146_v20 = vld [vmem:[%s3090_s0 + $0x190] ss:$8 sps:$4 sm:$0xff]   ;;  %v2149_v21 = vld [vmem:[%s3090_s0 + $0x14] ss:$8 sps:$4 sm:$0xff]   ;;  %v2155_v25 = vld [vmem:[%s3090_s0 + $0x24] ss:$8 sps:$4 sm:$0xff]  }
   0x9   :  { %v2153_v23 = vld [vmem:[%s3090_s0 + $0x10] ss:$8 sps:$4 sm:$0xff]   ;;  %v2157_v26 = vld [vmem:[%s3090_s0 + $0x1b4] ss:$8 sps:$4 sm:$0xff]   ;;  %v2159_v27 = vld [vmem:[%s3090_s0 + $0x20] ss:$8 sps:$4 sm:$0xff]  }
   0xa   :  { %745 = vmatpush1.bf16.msra.mxu0 %v2129_v3  ;;  %2112 = vmatpush1.bf16.msra.mxu1 %v2129_v3  ;;  %v2160_v28 = vld [vmem:[%s3090_s0 + $0x1b0] ss:$8 sps:$4 sm:$0xff]   ;;  %v2161_v29 = vld [vmem:[%s3090_s0 + $0x34] ss:$8 sps:$4 sm:$0xff]   ;;  %v2163_v30 = vld [vmem:[%s3090_s0 + $0x1c4] ss:$8 sps:$4 sm:$0xff]  }
   0xb   :  { %746 = vmatprep.subr.bf16.mxu0 %v2293_v0  ;;  %2097 = vmatprep.subr.bf16.mxu1 %v2293_v0  ;;  %v2165_v31 = vld [vmem:[%s3090_s0 + $0x30] ss:$8 sps:$4 sm:$0xff]   ;;  %v2166_v32 = vld [vmem:[%s3090_s0 + $0x1c0] ss:$8 sps:$4 sm:$0xff]   ;;  %v2167_v33 = vld [vmem:[%s3090_s0 + $0x44] ss:$8 sps:$4 sm:$0xff]  }
   0xc   :  { %v2169_v34 = vld [vmem:[%s3090_s0 + $0x1d4] ss:$8 sps:$4 sm:$0xff]   ;;  %v2171_v35 = vld [vmem:[%s3090_s0 + $0x40] ss:$8 sps:$4 sm:$0xff]   ;;  %v2172_v36 = vld [vmem:[%s3090_s0 + $0x1d0] ss:$8 sps:$4 sm:$0xff]  }
   0xd   :  { %v2173_v37 = vld [vmem:[%s3090_s0 + $0x54] ss:$8 sps:$4 sm:$0xff]   ;;  %v2175_v38 = vld [vmem:[%s3090_s0 + $0x1e4] ss:$8 sps:$4 sm:$0xff]   ;;  %v2177_v39 = vld [vmem:[%s3090_s0 + $0x50] ss:$8 sps:$4 sm:$0xff]  }
   0xe   :  { %747 = vmatpush1.bf16.msra.mxu0 %v2130_v4  ;;  %2113 = vmatpush1.bf16.msra.mxu1 %v2130_v4  ;;  %v2178_v40 = vld [vmem:[%s3090_s0 + $0x1e0] ss:$8 sps:$4 sm:$0xff]   ;;  %v2179_v41 = vld [vmem:[%s3090_s0 + $0x64] ss:$8 sps:$4 sm:$0xff]   ;;  %v2181_v42 = vld [vmem:[%s3090_s0 + $0x1f4] ss:$8 sps:$4 sm:$0xff]  }
   0xf   :  { %748 = vmatprep.subr.bf16.mxu0 %v2293_v0  ;;  %2098 = vmatprep.subr.bf16.mxu1 %v2293_v0  ;;  %v2183_v43 = vld [vmem:[%s3090_s0 + $0x60] ss:$8 sps:$4 sm:$0xff]   ;;  %v2184_v44 = vld [vmem:[%s3090_s0 + $0x1f0] ss:$8 sps:$4 sm:$0xff]   ;;  %v2185_v45 = vld [vmem:[%s3090_s0 + $0x74] ss:$8 sps:$4 sm:$0xff]  }
  0x10   :  { %v2187_v46 = vld [vmem:[%s3090_s0 + $0x204] ss:$8 sps:$4 sm:$0xff]   ;;  %v2189_v47 = vld [vmem:[%s3090_s0 + $0x70] ss:$8 sps:$4 sm:$0xff]   ;;  %v2190_v48 = vld [vmem:[%s3090_s0 + $0x200] ss:$8 sps:$4 sm:$0xff]  }
  0x11   :  { %v2191_v49 = vld [vmem:[%s3090_s0 + $0x84] ss:$8 sps:$4 sm:$0xff]   ;;  %v2193_v50 = vld [vmem:[%s3090_s0 + $0x214] ss:$8 sps:$4 sm:$0xff]   ;;  %v2195_v51 = vld [vmem:[%s3090_s0 + $0x80] ss:$8 sps:$4 sm:$0xff]  }
  0x12   :  { %749 = vmatpush1.bf16.msra.mxu0 %v2131_v5  ;;  %2114 = vmatpush1.bf16.msra.mxu1 %v2131_v5  ;;  %v2196_v52 = vld [vmem:[%s3090_s0 + $0x210] ss:$8 sps:$4 sm:$0xff]   ;;  %v2197_v53 = vld [vmem:[%s3090_s0 + $0x94] ss:$8 sps:$4 sm:$0xff]   ;;  %v2199_v54 = vld [vmem:[%s3090_s0 + $0x224] ss:$8 sps:$4 sm:$0xff]  }
  0x13   :  { %750 = vmatprep.subr.bf16.mxu0 %v2293_v0  ;;  %2099 = vmatprep.subr.bf16.mxu1 %v2293_v0  ;;  %v2201_v55 = vld [vmem:[%s3090_s0 + $0x90] ss:$8 sps:$4 sm:$0xff]   ;;  %v2202_v56 = vld [vmem:[%s3090_s0 + $0x220] ss:$8 sps:$4 sm:$0xff]   ;;  %v2203_v57 = vld [vmem:[%s3090_s0 + $0xa4] ss:$8 sps:$4 sm:$0xff]  }
  0x14   :  { %v2205_v58 = vld [vmem:[%s3090_s0 + $0x234] ss:$8 sps:$4 sm:$0xff]   ;;  %v2207_v59 = vld [vmem:[%s3090_s0 + $0xa0] ss:$8 sps:$4 sm:$0xff]   ;;  %v2208_v60 = vld [vmem:[%s3090_s0 + $0x230] ss:$8 sps:$4 sm:$0xff]  }
  0x15   :  { %v2209_v61 = vld [vmem:[%s3090_s0 + $0xb4] ss:$8 sps:$4 sm:$0xff]   ;;  %v2211_v62 = vld [vmem:[%s3090_s0 + $0x244] ss:$8 sps:$4 sm:$0xff]   ;;  %v2213_v63 = vld [vmem:[%s3090_s0 + $0xb0] ss:$8 sps:$4 sm:$0xff]  }
  0x16   :  { %751 = vmatpush1.bf16.msra.mxu0 %v2132_v7  ;;  %2115 = vmatpush1.bf16.msra.mxu1 %v2132_v7  ;;  %v2215_v1 = vld [vmem:[%s3090_s0 + $0xc4] ss:$8 sps:$4 sm:$0xff]   ;;  %v2217_v2 = vld [vmem:[%s3090_s0 + $0x254] ss:$8 sps:$4 sm:$0xff]   ;;  %v2219_v3 = vld [vmem:[%s3090_s0 + $0xc0] ss:$8 sps:$4 sm:$0xff]  }
  0x17   :  { %752 = vmatprep.subr.bf16.mxu0 %v2293_v0  ;;  %2100 = vmatprep.subr.bf16.mxu1 %v2293_v0  ;;  %v2220_v4 = vld [vmem:[%s3090_s0 + $0x250] ss:$8 sps:$4 sm:$0xff]   ;;  %v2221_v5 = vld [vmem:[%s3090_s0 + $0xd4] ss:$8 sps:$4 sm:$0xff]   ;;  %v2223_v6 = vld [vmem:[%s3090_s0 + $0x264] ss:$8 sps:$4 sm:$0xff]  }
  0x18   :  { %v2225_v7 = vld [vmem:[%s3090_s0 + $0xd0] ss:$8 sps:$4 sm:$0xff]   ;;  %v2226_v8 = vld [vmem:[%s3090_s0 + $0x260] ss:$8 sps:$4 sm:$0xff]  }
  0x1a   :  { %753 = vmatpush1.bf16.msra.mxu0 %v2133_v9  ;;  %2116 = vmatpush1.bf16.msra.mxu1 %v2133_v9  ;;  %v2227_v9 = vld [vmem:[%s3090_s0 + $0xe4] ss:$8 sps:$4 sm:$0xff]  }
  0x1b   :  { %754 = vmatprep.subr.bf16.mxu0 %v2293_v0  ;;  %2101 = vmatprep.subr.bf16.mxu1 %v2293_v0 }
  0x1e   :  { %755 = vmatpush1.bf16.msra.mxu0 %v2134_v10  ;;  %2117 = vmatpush1.bf16.msra.mxu1 %v2134_v10  ;;  %v2229_v10 = vld [vmem:[%s3090_s0 + $0x274] ss:$8 sps:$4 sm:$0xff]  }
  0x1f   :  { %756 = vmatprep.subr.bf16.mxu0 %v2293_v0  ;;  %2102 = vmatprep.subr.bf16.mxu1 %v2293_v0 }
  0x22   :  { %757 = vmatpush1.bf16.msra.mxu0 %v2135_v11  ;;  %2118 = vmatpush1.bf16.msra.mxu1 %v2135_v11  ;;  %v2231_v11 = vld [vmem:[%s3090_s0 + $0xe0] ss:$8 sps:$4 sm:$0xff]  }
  0x23   :  { %758 = vmatprep.subr.bf16.mxu0 %v2293_v0  ;;  %2103 = vmatprep.subr.bf16.mxu1 %v2293_v0 }
  0x26   :  { %759 = vmatpush1.bf16.msra.mxu0 %v2136_v12  ;;  %2119 = vmatpush1.bf16.msra.mxu1 %v2136_v12  ;;  %v2232_v12 = vld [vmem:[%s3090_s0 + $0x270] ss:$8 sps:$4 sm:$0xff]  }
  0x27   :  { %760 = vmatprep.subr.bf16.mxu0 %v2293_v0  ;;  %2104 = vmatprep.subr.bf16.mxu1 %v2293_v0 }
  0x2a   :  { %761 = vmatpush1.bf16.msra.mxu0 %v2137_v13  ;;  %2120 = vmatpush1.bf16.msra.mxu1 %v2137_v13  ;;  %v2233_v13 = vld [vmem:[%s3090_s0 + $0xf4] ss:$8 sps:$4 sm:$0xff]  }
  0x2b   :  { %762 = vmatprep.subr.bf16.mxu0 %v2293_v0  ;;  %2105 = vmatprep.subr.bf16.mxu1 %v2293_v0 }
  0x2e   :  { %763 = vmatpush1.bf16.msra.mxu0 %v2138_v14  ;;  %2121 = vmatpush1.bf16.msra.mxu1 %v2138_v14  ;;  %v2235_v14 = vld [vmem:[%s3090_s0 + $0x284] ss:$8 sps:$4 sm:$0xff]  }
  0x2f   :  { %764 = vmatprep.subr.bf16.mxu0 %v2293_v0  ;;  %2106 = vmatprep.subr.bf16.mxu1 %v2293_v0 }
  0x32   :  { %765 = vmatpush1.bf16.msra.mxu0 %v2139_v15  ;;  %2122 = vmatpush1.bf16.msra.mxu1 %v2139_v15  ;;  %v2237_v15 = vld [vmem:[%s3090_s0 + $0xf0] ss:$8 sps:$4 sm:$0xff]  }
  0x33   :  { %766 = vmatprep.subr.bf16.mxu0 %v2293_v0  ;;  %2107 = vmatprep.subr.bf16.mxu1 %v2293_v0 }
  0x36   :  { %767 = vmatpush1.bf16.msra.mxu0 %v2140_v16  ;;  %2123 = vmatpush1.bf16.msra.mxu1 %v2140_v16  ;;  %v2238_v16 = vld [vmem:[%s3090_s0 + $0x280] ss:$8 sps:$4 sm:$0xff]  }
  0x37   :  { %768 = vmatprep.subr.bf16.mxu0 %v2293_v0  ;;  %2108 = vmatprep.subr.bf16.mxu1 %v2293_v0 }
  0x3a   :  { %769 = vmatpush1.bf16.msra.mxu0 %v2141_v17  ;;  %2124 = vmatpush1.bf16.msra.mxu1 %v2141_v17  ;;  %v2239_v17 = vld [vmem:[%s3090_s0 + $0x104] ss:$8 sps:$4 sm:$0xff]  }
  0x3b   :  { %770 = vmatprep.subr.bf16.mxu0 %v2293_v0  ;;  %2109 = vmatprep.subr.bf16.mxu1 %v2293_v0  ;;  %v2214_v0 = vld [vmem:[%s3090_s0 + $0x240] ss:$8 sps:$4 sm:$0xff]  }
  0x3e   :  { %771 = vmatpush1.bf16.msra.mxu0 %v2142_v18  ;;  %2125 = vmatpush1.bf16.msra.mxu1 %v2142_v18  ;;  %v2241_v18 = vld [vmem:[%s3090_s0 + $0x294] ss:$8 sps:$4 sm:$0xff]  }
  0x41   :  { %773 = vmatmul.mubr.bf16.vlgmr.msra.gmra.mrb[0].mxu0 %v2143_v19  ;;  %973 = vmatmul.mubr.bf16.vlgmr.msra.gmra.mrb[0].mxu1 %v2146_v20  ;;  %v2243_v19 = vld [vmem:[%s3090_s0 + $0x100] ss:$8 sps:$4 sm:$0xff]   ;;  %v2244_v20 = vld [vmem:[%s3090_s0 + $0x290] ss:$8 sps:$4 sm:$0xff]  }
  0x42   :  { %780 = vmatprep.mubr.bf16.mxu0 %v2149_v21  ;;  %980 = vmatprep.mubr.bf16.mxu1 %v2151_v22  ;;  %v2245_v21 = vld [vmem:[%s3090_s0 + $0x114] ss:$8 sps:$4 sm:$0xff]   ;;  %v2247_v22 = vld [vmem:[%s3090_s0 + $0x2a4] ss:$8 sps:$4 sm:$0xff]  }
  0x49   :  { %781 = vmatmul.mubr.bf16.gmra.mrb[4].mxu0 %v2153_v23  ;;  %981 = vmatmul.mubr.bf16.gmra.mrb[4].mxu1 %v2154_v24  ;;  %v2249_v23 = vld [vmem:[%s3090_s0 + $0x110] ss:$8 sps:$4 sm:$0xff]   ;;  %v2250_v24 = vld [vmem:[%s3090_s0 + $0x2a0] ss:$8 sps:$4 sm:$0xff]  }
  0x4a   :  { %788 = vmatprep.mubr.bf16.mxu0 %v2155_v25  ;;  %988 = vmatprep.mubr.bf16.mxu1 %v2157_v26  ;;  %v2251_v25 = vld [vmem:[%s3090_s0 + $0x124] ss:$8 sps:$4 sm:$0xff]   ;;  %v2253_v26 = vld [vmem:[%s3090_s0 + $0x2b4] ss:$8 sps:$4 sm:$0xff]  }
  0x51   :  { %789 = vmatmul.mubr.bf16.gmra.mrb[8].mxu0 %v2159_v27  ;;  %989 = vmatmul.mubr.bf16.gmra.mrb[8].mxu1 %v2160_v28  ;;  %v2255_v27 = vld [vmem:[%s3090_s0 + $0x120] ss:$8 sps:$4 sm:$0xff]   ;;  %v2256_v28 = vld [vmem:[%s3090_s0 + $0x2b0] ss:$8 sps:$4 sm:$0xff]  }
  0x52   :  { %796 = vmatprep.mubr.bf16.mxu0 %v2161_v29  ;;  %996 = vmatprep.mubr.bf16.mxu1 %v2163_v30  ;;  %v2257_v29 = vld [vmem:[%s3090_s0 + $0x134] ss:$8 sps:$4 sm:$0xff]   ;;  %v2259_v30 = vld [vmem:[%s3090_s0 + $0x2c4] ss:$8 sps:$4 sm:$0xff]  }
  0x59   :  { %797 = vmatmul.mubr.bf16.gmra.mrb[12].mxu0 %v2165_v31  ;;  %997 = vmatmul.mubr.bf16.gmra.mrb[12].mxu1 %v2166_v32  ;;  %v2261_v31 = vld [vmem:[%s3090_s0 + $0x130] ss:$8 sps:$4 sm:$0xff]   ;;  %v2262_v32 = vld [vmem:[%s3090_s0 + $0x2c0] ss:$8 sps:$4 sm:$0xff]  }
  0x5a   :  { %804 = vmatprep.mubr.bf16.mxu0 %v2167_v33  ;;  %1004 = vmatprep.mubr.bf16.mxu1 %v2169_v34  ;;  %v2263_v33 = vld [vmem:[%s3090_s0 + $0x144] ss:$8 sps:$4 sm:$0xff]   ;;  %v2265_v34 = vld [vmem:[%s3090_s0 + $0x2d4] ss:$8 sps:$4 sm:$0xff]  }
  0x61   :  { %805 = vmatmul.mubr.bf16.gmra.mrb[16].mxu0 %v2171_v35  ;;  %1005 = vmatmul.mubr.bf16.gmra.mrb[16].mxu1 %v2172_v36  ;;  %v2267_v35 = vld [vmem:[%s3090_s0 + $0x140] ss:$8 sps:$4 sm:$0xff]   ;;  %v2268_v36 = vld [vmem:[%s3090_s0 + $0x2d0] ss:$8 sps:$4 sm:$0xff]  }
  0x62   :  { %812 = vmatprep.mubr.bf16.mxu0 %v2173_v37  ;;  %1012 = vmatprep.mubr.bf16.mxu1 %v2175_v38  ;;  %v2269_v37 = vld [vmem:[%s3090_s0 + $0x154] ss:$8 sps:$4 sm:$0xff]   ;;  %v2271_v38 = vld [vmem:[%s3090_s0 + $0x2e4] ss:$8 sps:$4 sm:$0xff]  }
  0x69   :  { %813 = vmatmul.mubr.bf16.gmra.mrb[20].mxu0 %v2177_v39  ;;  %1013 = vmatmul.mubr.bf16.gmra.mrb[20].mxu1 %v2178_v40  ;;  %v2273_v39 = vld [vmem:[%s3090_s0 + $0x150] ss:$8 sps:$4 sm:$0xff]   ;;  %v2274_v40 = vld [vmem:[%s3090_s0 + $0x2e0] ss:$8 sps:$4 sm:$0xff]  }
  0x6a   :  { %820 = vmatprep.mubr.bf16.mxu0 %v2179_v41  ;;  %1020 = vmatprep.mubr.bf16.mxu1 %v2181_v42  ;;  %v2275_v41 = vld [vmem:[%s3090_s0 + $0x164] ss:$8 sps:$4 sm:$0xff]   ;;  %v2277_v42 = vld [vmem:[%s3090_s0 + $0x2f4] ss:$8 sps:$4 sm:$0xff]  }
  0x71   :  { %821 = vmatmul.mubr.bf16.gmra.mrb[24].mxu0 %v2183_v43  ;;  %1021 = vmatmul.mubr.bf16.gmra.mrb[24].mxu1 %v2184_v44  ;;  %v2279_v43 = vld [vmem:[%s3090_s0 + $0x160] ss:$8 sps:$4 sm:$0xff]   ;;  %v2280_v44 = vld [vmem:[%s3090_s0 + $0x2f0] ss:$8 sps:$4 sm:$0xff]  }
  0x72   :  { %828 = vmatprep.mubr.bf16.mxu0 %v2185_v45  ;;  %1028 = vmatprep.mubr.bf16.mxu1 %v2187_v46  ;;  %v2281_v45 = vld [vmem:[%s3090_s0 + $0x174] ss:$8 sps:$4 sm:$0xff]   ;;  %v2283_v46 = vld [vmem:[%s3090_s0 + $0x304] ss:$8 sps:$4 sm:$0xff]  }
  0x79   :  { %829 = vmatmul.mubr.bf16.gmra.mrb[28].mxu0 %v2189_v47  ;;  %1029 = vmatmul.mubr.bf16.gmra.mrb[28].mxu1 %v2190_v48  ;;  %v2285_v47 = vld [vmem:[%s3090_s0 + $0x170] ss:$8 sps:$4 sm:$0xff]   ;;  %v2286_v48 = vld [vmem:[%s3090_s0 + $0x300] ss:$8 sps:$4 sm:$0xff]  }
  0x7a   :  { %836 = vmatprep.mubr.bf16.mxu0 %v2191_v49  ;;  %1036 = vmatprep.mubr.bf16.mxu1 %v2193_v50  ;;  %v2287_v49 = vld [vmem:[%s3090_s0 + $0x184] ss:$8 sps:$4 sm:$0xff]   ;;  %v2289_v50 = vld [vmem:[%s3090_s0 + $0x314] ss:$8 sps:$4 sm:$0xff]  }
  0x81   :  { %837 = vmatmul.mubr.bf16.gmra.mrb[32].mxu0 %v2195_v51  ;;  %1037 = vmatmul.mubr.bf16.gmra.mrb[32].mxu1 %v2196_v52  ;;  %v2291_v51 = vld [vmem:[%s3090_s0 + $0x180] ss:$8 sps:$4 sm:$0xff]   ;;  %v2292_v52 = vld [vmem:[%s3090_s0 + $0x310] ss:$8 sps:$4 sm:$0xff]  }
  0x82   :  { %844 = vmatprep.mubr.bf16.mxu0 %v2197_v53  ;;  %1044 = vmatprep.mubr.bf16.mxu1 %v2199_v54 }
  0x89   :  { %845 = vmatmul.mubr.bf16.gmra.mrb[36].mxu0 %v2201_v55  ;;  %1045 = vmatmul.mubr.bf16.gmra.mrb[36].mxu1 %v2202_v56 }
  0x8a   :  { %852 = vmatprep.mubr.bf16.mxu0 %v2203_v57  ;;  %1052 = vmatprep.mubr.bf16.mxu1 %v2205_v58 }
  0x91   :  { %853 = vmatmul.mubr.bf16.gmra.mrb[40].mxu0 %v2207_v59  ;;  %1053 = vmatmul.mubr.bf16.gmra.mrb[40].mxu1 %v2208_v60 }
  0x92   :  { %860 = vmatprep.mubr.bf16.mxu0 %v2209_v61  ;;  %1060 = vmatprep.mubr.bf16.mxu1 %v2211_v62 }
  0x99   :  { %861 = vmatmul.mubr.bf16.gmra.mrb[44].mxu0 %v2213_v63  ;;  %1061 = vmatmul.mubr.bf16.gmra.mrb[44].mxu1 %v2214_v0 }
  0x9a   :  { %868 = vmatprep.mubr.bf16.mxu0 %v2215_v1  ;;  %1068 = vmatprep.mubr.bf16.mxu1 %v2217_v2 }
  0xa1   :  { %869 = vmatmul.mubr.bf16.gmra.mrb[48].mxu0 %v2219_v3  ;;  %1069 = vmatmul.mubr.bf16.gmra.mrb[48].mxu1 %v2220_v4 }
  0xa2   :  { %876 = vmatprep.mubr.bf16.mxu0 %v2221_v5  ;;  %1076 = vmatprep.mubr.bf16.mxu1 %v2223_v6 }
  0xa9   :  { %877 = vmatmul.mubr.bf16.gmra.mrb[52].mxu0 %v2225_v7  ;;  %1077 = vmatmul.mubr.bf16.gmra.mrb[52].mxu1 %v2226_v8 }
  0xaa   :  { %884 = vmatprep.mubr.bf16.mxu0 %v2227_v9  ;;  %1084 = vmatprep.mubr.bf16.mxu1 %v2229_v10 }
  0xb1   :  { %885 = vmatmul.mubr.bf16.gmra.mrb[56].mxu0 %v2231_v11  ;;  %1085 = vmatmul.mubr.bf16.gmra.mrb[56].mxu1 %v2232_v12 }
  0xb2   :  { %892 = vmatprep.mubr.bf16.mxu0 %v2233_v13  ;;  %1092 = vmatprep.mubr.bf16.mxu1 %v2235_v14 }
  0xb9   :  { %893 = vmatmul.mubr.bf16.gmra.mrb[60].mxu0 %v2237_v15  ;;  %1093 = vmatmul.mubr.bf16.gmra.mrb[60].mxu1 %v2238_v16 }
  0xba   :  { %900 = vmatprep.mubr.bf16.mxu0 %v2239_v17  ;;  %1100 = vmatprep.mubr.bf16.mxu1 %v2241_v18 }
  0xc1   :  { %901 = vmatmul.mubr.bf16.gmra.mrb[64].mxu0 %v2243_v19  ;;  %1101 = vmatmul.mubr.bf16.gmra.mrb[64].mxu1 %v2244_v20 }
  0xc2   :  { %908 = vmatprep.mubr.bf16.mxu0 %v2245_v21  ;;  %1108 = vmatprep.mubr.bf16.mxu1 %v2247_v22 }
  0xc9   :  { %909 = vmatmul.mubr.bf16.gmra.mrb[68].mxu0 %v2249_v23  ;;  %1109 = vmatmul.mubr.bf16.gmra.mrb[68].mxu1 %v2250_v24 }
  0xca   :  { %916 = vmatprep.mubr.bf16.mxu0 %v2251_v25  ;;  %1116 = vmatprep.mubr.bf16.mxu1 %v2253_v26 }
  0xd1   :  { %917 = vmatmul.mubr.bf16.gmra.mrb[72].mxu0 %v2255_v27  ;;  %1117 = vmatmul.mubr.bf16.gmra.mrb[72].mxu1 %v2256_v28 }
  0xd2   :  { %924 = vmatprep.mubr.bf16.mxu0 %v2257_v29  ;;  %1124 = vmatprep.mubr.bf16.mxu1 %v2259_v30 }
  0xd9   :  { %925 = vmatmul.mubr.bf16.gmra.mrb[76].mxu0 %v2261_v31  ;;  %1125 = vmatmul.mubr.bf16.gmra.mrb[76].mxu1 %v2262_v32 }
  0xda   :  { %932 = vmatprep.mubr.bf16.mxu0 %v2263_v33  ;;  %1132 = vmatprep.mubr.bf16.mxu1 %v2265_v34 }
  0xe1   :  { %933 = vmatmul.mubr.bf16.gmra.mrb[80].mxu0 %v2267_v35  ;;  %1133 = vmatmul.mubr.bf16.gmra.mrb[80].mxu1 %v2268_v36 }
  0xe2   :  { %940 = vmatprep.mubr.bf16.mxu0 %v2269_v37  ;;  %1140 = vmatprep.mubr.bf16.mxu1 %v2271_v38 }
  0xe9   :  { %941 = vmatmul.mubr.bf16.gmra.mrb[84].mxu0 %v2273_v39  ;;  %1141 = vmatmul.mubr.bf16.gmra.mrb[84].mxu1 %v2274_v40 }
  0xea   :  { %948 = vmatprep.mubr.bf16.mxu0 %v2275_v41  ;;  %1148 = vmatprep.mubr.bf16.mxu1 %v2277_v42 }
  0xf1   :  { %949 = vmatmul.mubr.bf16.gmra.mrb[88].mxu0 %v2279_v43  ;;  %1149 = vmatmul.mubr.bf16.gmra.mrb[88].mxu1 %v2280_v44 }
  0xf2   :  { %956 = vmatprep.mubr.bf16.mxu0 %v2281_v45  ;;  %1156 = vmatprep.mubr.bf16.mxu1 %v2283_v46 }
  0xf9   :  { %957 = vmatmul.mubr.bf16.gmra.mrb[92].mxu0 %v2285_v47  ;;  %1157 = vmatmul.mubr.bf16.gmra.mrb[92].mxu1 %v2286_v48 }
  0xfa   :  { %964 = vmatprep.mubr.bf16.mxu0 %v2287_v49  ;;  %1164 = vmatprep.mubr.bf16.mxu1 %v2289_v50 }
 0x101   :  { %965 = vmatmul.mubr.bf16.gmra.mrb[96].mxu0 %v2291_v51  ;;  %1165 = vmatmul.mubr.bf16.gmra.mrb[96].mxu1 %v2292_v52 }
 0x114   :  { %v774_v53 = vpop.f32.mrb[0].mxu0  ;;  %v974_v54 = vpop.f32.mrb[0].mxu1 }
 0x115   :  { %v1173_v55 = vmax.f32 %v774_v53, 0.0  ;;  %v1223_v56 = vmax.f32 %v974_v54, 0.0  ;;  %v776_v57 = vpop.f32.mrb[1].mxu0  ;;  %v976_v58 = vpop.f32.mrb[1].mxu1 }
 0x116   :  { %v777_v59 = vpop.f32.mrb[2].mxu0  ;;  %v977_v60 = vpop.f32.mrb[2].mxu1 }
 0x117   :  { %v1994_v61 = vpack.c.bf16 %v1173_v55, %v1173_v55  ;;  %v2044_v62 = vpack.c.bf16 %v1223_v56, %v1223_v56  ;;  %v1174_v63 = vmax.f32 %v777_v59, 0.0  ;;  %v1224_v0 = vmax.f32 %v977_v60, 0.0  ;;  %v779_v1 = vpop.f32.mrb[3].mxu0  ;;  %v979_v2 = vpop.f32.mrb[3].mxu1 }
 0x119   :  { %1674 = vst.msk [vmem:[%s3091_s2] sm:$0xf] %vm1673_vm0, %v1994_v61  ;;  %1724 = vst.msk [vmem:[%s3091_s2 + $0xc8] sm:$0xf] %vm1673_vm0, %v2044_v62  ;;  %v1995_v3 = vpack.c.bf16 %v1174_v63, %v1174_v63  ;;  %v2045_v4 = vpack.c.bf16 %v1224_v0, %v1224_v0 }
 0x11b   :  { %1675 = vst.msk [vmem:[%s3091_s2 + $0x4] sm:$0xf] %vm1673_vm0, %v1995_v3  ;;  %1725 = vst.msk [vmem:[%s3091_s2 + $0xcc] sm:$0xf] %vm1673_vm0, %v2045_v4 }
 0x11c   :  { %v782_v5 = vpop.f32.mrb[4].mxu0  ;;  %v982_v6 = vpop.f32.mrb[4].mxu1 }
 0x11d   :  { %v1175_v7 = vmax.f32 %v782_v5, 0.0  ;;  %v1225_v8 = vmax.f32 %v982_v6, 0.0  ;;  %v784_v9 = vpop.f32.mrb[5].mxu0  ;;  %v984_v10 = vpop.f32.mrb[5].mxu1 }
 0x11e   :  { %v785_v11 = vpop.f32.mrb[6].mxu0  ;;  %v985_v12 = vpop.f32.mrb[6].mxu1 }
 0x11f   :  { %v1996_v13 = vpack.c.bf16 %v1175_v7, %v1175_v7  ;;  %v2046_v14 = vpack.c.bf16 %v1225_v8, %v1225_v8  ;;  %v1176_v15 = vmax.f32 %v785_v11, 0.0  ;;  %v1226_v16 = vmax.f32 %v985_v12, 0.0  ;;  %v787_v17 = vpop.f32.mrb[7].mxu0  ;;  %v987_v18 = vpop.f32.mrb[7].mxu1 }
 0x121   :  { %1676 = vst.msk [vmem:[%s3091_s2 + $0x8] sm:$0xf] %vm1673_vm0, %v1996_v13  ;;  %1726 = vst.msk [vmem:[%s3091_s2 + $0xd0] sm:$0xf] %vm1673_vm0, %v2046_v14  ;;  %v1997_v19 = vpack.c.bf16 %v1176_v15, %v1176_v15  ;;  %v2047_v20 = vpack.c.bf16 %v1226_v16, %v1226_v16 }
 0x123   :  { %1677 = vst.msk [vmem:[%s3091_s2 + $0xc] sm:$0xf] %vm1673_vm0, %v1997_v19  ;;  %1727 = vst.msk [vmem:[%s3091_s2 + $0xd4] sm:$0xf] %vm1673_vm0, %v2047_v20 }
 0x124   :  { %v790_v21 = vpop.f32.mrb[8].mxu0  ;;  %v990_v22 = vpop.f32.mrb[8].mxu1 }
 0x125   :  { %v1177_v23 = vmax.f32 %v790_v21, 0.0  ;;  %v1227_v24 = vmax.f32 %v990_v22, 0.0  ;;  %v792_v25 = vpop.f32.mrb[9].mxu0  ;;  %v992_v26 = vpop.f32.mrb[9].mxu1 }
 0x126   :  { %v793_v27 = vpop.f32.mrb[10].mxu0  ;;  %v993_v28 = vpop.f32.mrb[10].mxu1 }
 0x127   :  { %v1998_v29 = vpack.c.bf16 %v1177_v23, %v1177_v23  ;;  %v2048_v30 = vpack.c.bf16 %v1227_v24, %v1227_v24  ;;  %v1178_v31 = vmax.f32 %v793_v27, 0.0  ;;  %v1228_v32 = vmax.f32 %v993_v28, 0.0  ;;  %v795_v33 = vpop.f32.mrb[11].mxu0  ;;  %v995_v34 = vpop.f32.mrb[11].mxu1 }
 0x129   :  { %1678 = vst.msk [vmem:[%s3091_s2 + $0x10] sm:$0xf] %vm1673_vm0, %v1998_v29  ;;  %1728 = vst.msk [vmem:[%s3091_s2 + $0xd8] sm:$0xf] %vm1673_vm0, %v2048_v30  ;;  %v1999_v35 = vpack.c.bf16 %v1178_v31, %v1178_v31  ;;  %v2049_v36 = vpack.c.bf16 %v1228_v32, %v1228_v32 }
 0x12b   :  { %1679 = vst.msk [vmem:[%s3091_s2 + $0x14] sm:$0xf] %vm1673_vm0, %v1999_v35  ;;  %1729 = vst.msk [vmem:[%s3091_s2 + $0xdc] sm:$0xf] %vm1673_vm0, %v2049_v36 }
 0x12c   :  { %v798_v37 = vpop.f32.mrb[12].mxu0  ;;  %v998_v38 = vpop.f32.mrb[12].mxu1 }
 0x12d   :  { %v1179_v39 = vmax.f32 %v798_v37, 0.0  ;;  %v1229_v40 = vmax.f32 %v998_v38, 0.0  ;;  %v800_v41 = vpop.f32.mrb[13].mxu0  ;;  %v1000_v42 = vpop.f32.mrb[13].mxu1 }
 0x12e   :  { %v801_v43 = vpop.f32.mrb[14].mxu0  ;;  %v1001_v44 = vpop.f32.mrb[14].mxu1 }
 0x12f   :  { %v2000_v45 = vpack.c.bf16 %v1179_v39, %v1179_v39  ;;  %v2050_v46 = vpack.c.bf16 %v1229_v40, %v1229_v40  ;;  %v1180_v47 = vmax.f32 %v801_v43, 0.0  ;;  %v1230_v48 = vmax.f32 %v1001_v44, 0.0  ;;  %v803_v49 = vpop.f32.mrb[15].mxu0  ;;  %v1003_v50 = vpop.f32.mrb[15].mxu1 }
 0x131   :  { %1680 = vst.msk [vmem:[%s3091_s2 + $0x18] sm:$0xf] %vm1673_vm0, %v2000_v45  ;;  %1730 = vst.msk [vmem:[%s3091_s2 + $0xe0] sm:$0xf] %vm1673_vm0, %v2050_v46  ;;  %v2001_v51 = vpack.c.bf16 %v1180_v47, %v1180_v47  ;;  %v2051_v52 = vpack.c.bf16 %v1230_v48, %v1230_v48 }
 0x133   :  { %1681 = vst.msk [vmem:[%s3091_s2 + $0x1c] sm:$0xf] %vm1673_vm0, %v2001_v51  ;;  %1731 = vst.msk [vmem:[%s3091_s2 + $0xe4] sm:$0xf] %vm1673_vm0, %v2051_v52 }
 0x134   :  { %v806_v53 = vpop.f32.mrb[16].mxu0  ;;  %v1006_v54 = vpop.f32.mrb[16].mxu1 }
 0x135   :  { %v1181_v55 = vmax.f32 %v806_v53, 0.0  ;;  %v1231_v56 = vmax.f32 %v1006_v54, 0.0  ;;  %v808_v57 = vpop.f32.mrb[17].mxu0  ;;  %v1008_v58 = vpop.f32.mrb[17].mxu1 }
 0x136   :  { %v809_v59 = vpop.f32.mrb[18].mxu0  ;;  %v1009_v60 = vpop.f32.mrb[18].mxu1 }
 0x137   :  { %v2002_v61 = vpack.c.bf16 %v1181_v55, %v1181_v55  ;;  %v2052_v62 = vpack.c.bf16 %v1231_v56, %v1231_v56  ;;  %v1182_v63 = vmax.f32 %v809_v59, 0.0  ;;  %v1232_v0 = vmax.f32 %v1009_v60, 0.0  ;;  %v811_v1 = vpop.f32.mrb[19].mxu0  ;;  %v1011_v2 = vpop.f32.mrb[19].mxu1 }
 0x139   :  { %1682 = vst.msk [vmem:[%s3091_s2 + $0x20] sm:$0xf] %vm1673_vm0, %v2002_v61  ;;  %1732 = vst.msk [vmem:[%s3091_s2 + $0xe8] sm:$0xf] %vm1673_vm0, %v2052_v62  ;;  %v2003_v3 = vpack.c.bf16 %v1182_v63, %v1182_v63  ;;  %v2053_v4 = vpack.c.bf16 %v1232_v0, %v1232_v0 }
 0x13b   :  { %1683 = vst.msk [vmem:[%s3091_s2 + $0x24] sm:$0xf] %vm1673_vm0, %v2003_v3  ;;  %1733 = vst.msk [vmem:[%s3091_s2 + $0xec] sm:$0xf] %vm1673_vm0, %v2053_v4 }
 0x13c   :  { %v814_v5 = vpop.f32.mrb[20].mxu0  ;;  %v1014_v6 = vpop.f32.mrb[20].mxu1 }
 0x13d   :  { %v1183_v7 = vmax.f32 %v814_v5, 0.0  ;;  %v1233_v8 = vmax.f32 %v1014_v6, 0.0  ;;  %v816_v9 = vpop.f32.mrb[21].mxu0  ;;  %v1016_v10 = vpop.f32.mrb[21].mxu1 }
 0x13e   :  { %v817_v11 = vpop.f32.mrb[22].mxu0  ;;  %v1017_v12 = vpop.f32.mrb[22].mxu1 }
 0x13f   :  { %v2004_v13 = vpack.c.bf16 %v1183_v7, %v1183_v7  ;;  %v2054_v14 = vpack.c.bf16 %v1233_v8, %v1233_v8  ;;  %v1184_v15 = vmax.f32 %v817_v11, 0.0  ;;  %v1234_v16 = vmax.f32 %v1017_v12, 0.0  ;;  %v819_v17 = vpop.f32.mrb[23].mxu0  ;;  %v1019_v18 = vpop.f32.mrb[23].mxu1 }
 0x141   :  { %1684 = vst.msk [vmem:[%s3091_s2 + $0x28] sm:$0xf] %vm1673_vm0, %v2004_v13  ;;  %1734 = vst.msk [vmem:[%s3091_s2 + $0xf0] sm:$0xf] %vm1673_vm0, %v2054_v14  ;;  %v2005_v19 = vpack.c.bf16 %v1184_v15, %v1184_v15  ;;  %v2055_v20 = vpack.c.bf16 %v1234_v16, %v1234_v16 }
 0x143   :  { %1685 = vst.msk [vmem:[%s3091_s2 + $0x2c] sm:$0xf] %vm1673_vm0, %v2005_v19  ;;  %1735 = vst.msk [vmem:[%s3091_s2 + $0xf4] sm:$0xf] %vm1673_vm0, %v2055_v20 }
 0x144   :  { %v822_v21 = vpop.f32.mrb[24].mxu0  ;;  %v1022_v22 = vpop.f32.mrb[24].mxu1 }
 0x145   :  { %v1185_v23 = vmax.f32 %v822_v21, 0.0  ;;  %v1235_v24 = vmax.f32 %v1022_v22, 0.0  ;;  %v824_v25 = vpop.f32.mrb[25].mxu0  ;;  %v1024_v26 = vpop.f32.mrb[25].mxu1 }
 0x146   :  { %v825_v27 = vpop.f32.mrb[26].mxu0  ;;  %v1025_v28 = vpop.f32.mrb[26].mxu1 }
 0x147   :  { %v2006_v29 = vpack.c.bf16 %v1185_v23, %v1185_v23  ;;  %v2056_v30 = vpack.c.bf16 %v1235_v24, %v1235_v24  ;;  %v1186_v31 = vmax.f32 %v825_v27, 0.0  ;;  %v1236_v32 = vmax.f32 %v1025_v28, 0.0  ;;  %v827_v33 = vpop.f32.mrb[27].mxu0  ;;  %v1027_v34 = vpop.f32.mrb[27].mxu1 }
 0x149   :  { %1686 = vst.msk [vmem:[%s3091_s2 + $0x30] sm:$0xf] %vm1673_vm0, %v2006_v29  ;;  %1736 = vst.msk [vmem:[%s3091_s2 + $0xf8] sm:$0xf] %vm1673_vm0, %v2056_v30  ;;  %v2007_v35 = vpack.c.bf16 %v1186_v31, %v1186_v31  ;;  %v2057_v36 = vpack.c.bf16 %v1236_v32, %v1236_v32 }
 0x14b   :  { %1687 = vst.msk [vmem:[%s3091_s2 + $0x34] sm:$0xf] %vm1673_vm0, %v2007_v35  ;;  %1737 = vst.msk [vmem:[%s3091_s2 + $0xfc] sm:$0xf] %vm1673_vm0, %v2057_v36 }
 0x14c   :  { %v830_v37 = vpop.f32.mrb[28].mxu0  ;;  %v1030_v38 = vpop.f32.mrb[28].mxu1 }
 0x14d   :  { %v1187_v39 = vmax.f32 %v830_v37, 0.0  ;;  %v1237_v40 = vmax.f32 %v1030_v38, 0.0  ;;  %v832_v41 = vpop.f32.mrb[29].mxu0  ;;  %v1032_v42 = vpop.f32.mrb[29].mxu1 }
 0x14e   :  { %v833_v43 = vpop.f32.mrb[30].mxu0  ;;  %v1033_v44 = vpop.f32.mrb[30].mxu1 }
 0x14f   :  { %v2008_v45 = vpack.c.bf16 %v1187_v39, %v1187_v39  ;;  %v2058_v46 = vpack.c.bf16 %v1237_v40, %v1237_v40  ;;  %v1188_v47 = vmax.f32 %v833_v43, 0.0  ;;  %v1238_v48 = vmax.f32 %v1033_v44, 0.0  ;;  %v835_v49 = vpop.f32.mrb[31].mxu0  ;;  %v1035_v50 = vpop.f32.mrb[31].mxu1 }
 0x151   :  { %1688 = vst.msk [vmem:[%s3091_s2 + $0x38] sm:$0xf] %vm1673_vm0, %v2008_v45  ;;  %1738 = vst.msk [vmem:[%s3091_s2 + $0x100] sm:$0xf] %vm1673_vm0, %v2058_v46  ;;  %v2009_v51 = vpack.c.bf16 %v1188_v47, %v1188_v47  ;;  %v2059_v52 = vpack.c.bf16 %v1238_v48, %v1238_v48 }
 0x153   :  { %1689 = vst.msk [vmem:[%s3091_s2 + $0x3c] sm:$0xf] %vm1673_vm0, %v2009_v51  ;;  %1739 = vst.msk [vmem:[%s3091_s2 + $0x104] sm:$0xf] %vm1673_vm0, %v2059_v52 }
 0x154   :  { %v838_v53 = vpop.f32.mrb[32].mxu0  ;;  %v1038_v54 = vpop.f32.mrb[32].mxu1 }
 0x155   :  { %v1189_v55 = vmax.f32 %v838_v53, 0.0  ;;  %v1239_v56 = vmax.f32 %v1038_v54, 0.0  ;;  %v840_v57 = vpop.f32.mrb[33].mxu0  ;;  %v1040_v58 = vpop.f32.mrb[33].mxu1 }
 0x156   :  { %v841_v59 = vpop.f32.mrb[34].mxu0  ;;  %v1041_v60 = vpop.f32.mrb[34].mxu1 }
 0x157   :  { %v2010_v61 = vpack.c.bf16 %v1189_v55, %v1189_v55  ;;  %v2060_v62 = vpack.c.bf16 %v1239_v56, %v1239_v56  ;;  %v1190_v63 = vmax.f32 %v841_v59, 0.0  ;;  %v1240_v0 = vmax.f32 %v1041_v60, 0.0  ;;  %v843_v1 = vpop.f32.mrb[35].mxu0  ;;  %v1043_v2 = vpop.f32.mrb[35].mxu1 }
 0x159   :  { %1690 = vst.msk [vmem:[%s3091_s2 + $0x40] sm:$0xf] %vm1673_vm0, %v2010_v61  ;;  %1740 = vst.msk [vmem:[%s3091_s2 + $0x108] sm:$0xf] %vm1673_vm0, %v2060_v62  ;;  %v2011_v3 = vpack.c.bf16 %v1190_v63, %v1190_v63  ;;  %v2061_v4 = vpack.c.bf16 %v1240_v0, %v1240_v0 }
 0x15b   :  { %1691 = vst.msk [vmem:[%s3091_s2 + $0x44] sm:$0xf] %vm1673_vm0, %v2011_v3  ;;  %1741 = vst.msk [vmem:[%s3091_s2 + $0x10c] sm:$0xf] %vm1673_vm0, %v2061_v4 }
 0x15c   :  { %v846_v5 = vpop.f32.mrb[36].mxu0  ;;  %v1046_v6 = vpop.f32.mrb[36].mxu1 }
 0x15d   :  { %v1191_v7 = vmax.f32 %v846_v5, 0.0  ;;  %v1241_v8 = vmax.f32 %v1046_v6, 0.0  ;;  %v848_v9 = vpop.f32.mrb[37].mxu0  ;;  %v1048_v10 = vpop.f32.mrb[37].mxu1 }
 0x15e   :  { %v849_v11 = vpop.f32.mrb[38].mxu0  ;;  %v1049_v12 = vpop.f32.mrb[38].mxu1 }
 0x15f   :  { %v2012_v13 = vpack.c.bf16 %v1191_v7, %v1191_v7  ;;  %v2062_v14 = vpack.c.bf16 %v1241_v8, %v1241_v8  ;;  %v1192_v15 = vmax.f32 %v849_v11, 0.0  ;;  %v1242_v16 = vmax.f32 %v1049_v12, 0.0  ;;  %v851_v17 = vpop.f32.mrb[39].mxu0  ;;  %v1051_v18 = vpop.f32.mrb[39].mxu1 }
 0x161   :  { %1692 = vst.msk [vmem:[%s3091_s2 + $0x48] sm:$0xf] %vm1673_vm0, %v2012_v13  ;;  %1742 = vst.msk [vmem:[%s3091_s2 + $0x110] sm:$0xf] %vm1673_vm0, %v2062_v14  ;;  %v2013_v19 = vpack.c.bf16 %v1192_v15, %v1192_v15  ;;  %v2063_v20 = vpack.c.bf16 %v1242_v16, %v1242_v16 }
 0x163   :  { %1693 = vst.msk [vmem:[%s3091_s2 + $0x4c] sm:$0xf] %vm1673_vm0, %v2013_v19  ;;  %1743 = vst.msk [vmem:[%s3091_s2 + $0x114] sm:$0xf] %vm1673_vm0, %v2063_v20 }
 0x164   :  { %v854_v21 = vpop.f32.mrb[40].mxu0  ;;  %v1054_v22 = vpop.f32.mrb[40].mxu1 }
 0x165   :  { %v1193_v23 = vmax.f32 %v854_v21, 0.0  ;;  %v1243_v24 = vmax.f32 %v1054_v22, 0.0  ;;  %v856_v25 = vpop.f32.mrb[41].mxu0  ;;  %v1056_v26 = vpop.f32.mrb[41].mxu1 }
 0x166   :  { %v857_v27 = vpop.f32.mrb[42].mxu0  ;;  %v1057_v28 = vpop.f32.mrb[42].mxu1 }
 0x167   :  { %v2014_v29 = vpack.c.bf16 %v1193_v23, %v1193_v23  ;;  %v2064_v30 = vpack.c.bf16 %v1243_v24, %v1243_v24  ;;  %v1194_v31 = vmax.f32 %v857_v27, 0.0  ;;  %v1244_v32 = vmax.f32 %v1057_v28, 0.0  ;;  %v859_v33 = vpop.f32.mrb[43].mxu0  ;;  %v1059_v34 = vpop.f32.mrb[43].mxu1 }
 0x169   :  { %1694 = vst.msk [vmem:[%s3091_s2 + $0x50] sm:$0xf] %vm1673_vm0, %v2014_v29  ;;  %1744 = vst.msk [vmem:[%s3091_s2 + $0x118] sm:$0xf] %vm1673_vm0, %v2064_v30  ;;  %v2015_v35 = vpack.c.bf16 %v1194_v31, %v1194_v31  ;;  %v2065_v36 = vpack.c.bf16 %v1244_v32, %v1244_v32 }
 0x16b   :  { %1695 = vst.msk [vmem:[%s3091_s2 + $0x54] sm:$0xf] %vm1673_vm0, %v2015_v35  ;;  %1745 = vst.msk [vmem:[%s3091_s2 + $0x11c] sm:$0xf] %vm1673_vm0, %v2065_v36 }
 0x16c   :  { %v862_v37 = vpop.f32.mrb[44].mxu0  ;;  %v1062_v38 = vpop.f32.mrb[44].mxu1 }
 0x16d   :  { %v1195_v39 = vmax.f32 %v862_v37, 0.0  ;;  %v1245_v40 = vmax.f32 %v1062_v38, 0.0  ;;  %v864_v41 = vpop.f32.mrb[45].mxu0  ;;  %v1064_v42 = vpop.f32.mrb[45].mxu1 }
 0x16e   :  { %v865_v43 = vpop.f32.mrb[46].mxu0  ;;  %v1065_v44 = vpop.f32.mrb[46].mxu1 }
 0x16f   :  { %v2016_v45 = vpack.c.bf16 %v1195_v39, %v1195_v39  ;;  %v2066_v46 = vpack.c.bf16 %v1245_v40, %v1245_v40  ;;  %v1196_v47 = vmax.f32 %v865_v43, 0.0  ;;  %v1246_v48 = vmax.f32 %v1065_v44, 0.0  ;;  %v867_v49 = vpop.f32.mrb[47].mxu0  ;;  %v1067_v50 = vpop.f32.mrb[47].mxu1 }
 0x171   :  { %1696 = vst.msk [vmem:[%s3091_s2 + $0x58] sm:$0xf] %vm1673_vm0, %v2016_v45  ;;  %1746 = vst.msk [vmem:[%s3091_s2 + $0x120] sm:$0xf] %vm1673_vm0, %v2066_v46  ;;  %v2017_v51 = vpack.c.bf16 %v1196_v47, %v1196_v47  ;;  %v2067_v52 = vpack.c.bf16 %v1246_v48, %v1246_v48 }
 0x173   :  { %1697 = vst.msk [vmem:[%s3091_s2 + $0x5c] sm:$0xf] %vm1673_vm0, %v2017_v51  ;;  %1747 = vst.msk [vmem:[%s3091_s2 + $0x124] sm:$0xf] %vm1673_vm0, %v2067_v52 }
 0x174   :  { %v870_v53 = vpop.f32.mrb[48].mxu0  ;;  %v1070_v54 = vpop.f32.mrb[48].mxu1 }
 0x175   :  { %v1197_v55 = vmax.f32 %v870_v53, 0.0  ;;  %v1247_v56 = vmax.f32 %v1070_v54, 0.0  ;;  %v872_v57 = vpop.f32.mrb[49].mxu0  ;;  %v1072_v58 = vpop.f32.mrb[49].mxu1 }
 0x176   :  { %v873_v59 = vpop.f32.mrb[50].mxu0  ;;  %v1073_v60 = vpop.f32.mrb[50].mxu1 }
 0x177   :  { %v2018_v61 = vpack.c.bf16 %v1197_v55, %v1197_v55  ;;  %v2068_v62 = vpack.c.bf16 %v1247_v56, %v1247_v56  ;;  %v1198_v63 = vmax.f32 %v873_v59, 0.0  ;;  %v1248_v0 = vmax.f32 %v1073_v60, 0.0  ;;  %v875_v1 = vpop.f32.mrb[51].mxu0  ;;  %v1075_v2 = vpop.f32.mrb[51].mxu1 }
 0x179   :  { %1698 = vst.msk [vmem:[%s3091_s2 + $0x60] sm:$0xf] %vm1673_vm0, %v2018_v61  ;;  %1748 = vst.msk [vmem:[%s3091_s2 + $0x128] sm:$0xf] %vm1673_vm0, %v2068_v62  ;;  %v2019_v3 = vpack.c.bf16 %v1198_v63, %v1198_v63  ;;  %v2069_v4 = vpack.c.bf16 %v1248_v0, %v1248_v0 }
 0x17b   :  { %1699 = vst.msk [vmem:[%s3091_s2 + $0x64] sm:$0xf] %vm1673_vm0, %v2019_v3  ;;  %1749 = vst.msk [vmem:[%s3091_s2 + $0x12c] sm:$0xf] %vm1673_vm0, %v2069_v4 }
 0x17c   :  { %v878_v5 = vpop.f32.mrb[52].mxu0  ;;  %v1078_v6 = vpop.f32.mrb[52].mxu1 }
 0x17d   :  { %v1199_v7 = vmax.f32 %v878_v5, 0.0  ;;  %v1249_v8 = vmax.f32 %v1078_v6, 0.0  ;;  %v880_v9 = vpop.f32.mrb[53].mxu0  ;;  %v1080_v10 = vpop.f32.mrb[53].mxu1 }
 0x17e   :  { %v881_v11 = vpop.f32.mrb[54].mxu0  ;;  %v1081_v12 = vpop.f32.mrb[54].mxu1 }
 0x17f   :  { %v2020_v13 = vpack.c.bf16 %v1199_v7, %v1199_v7  ;;  %v2070_v14 = vpack.c.bf16 %v1249_v8, %v1249_v8  ;;  %v1200_v15 = vmax.f32 %v881_v11, 0.0  ;;  %v1250_v16 = vmax.f32 %v1081_v12, 0.0  ;;  %v883_v17 = vpop.f32.mrb[55].mxu0  ;;  %v1083_v18 = vpop.f32.mrb[55].mxu1 }
 0x181   :  { %1700 = vst.msk [vmem:[%s3091_s2 + $0x68] sm:$0xf] %vm1673_vm0, %v2020_v13  ;;  %1750 = vst.msk [vmem:[%s3091_s2 + $0x130] sm:$0xf] %vm1673_vm0, %v2070_v14  ;;  %v2021_v19 = vpack.c.bf16 %v1200_v15, %v1200_v15  ;;  %v2071_v20 = vpack.c.bf16 %v1250_v16, %v1250_v16 }
 0x183   :  { %1701 = vst.msk [vmem:[%s3091_s2 + $0x6c] sm:$0xf] %vm1673_vm0, %v2021_v19  ;;  %1751 = vst.msk [vmem:[%s3091_s2 + $0x134] sm:$0xf] %vm1673_vm0, %v2071_v20 }
 0x184   :  { %v886_v21 = vpop.f32.mrb[56].mxu0  ;;  %v1086_v22 = vpop.f32.mrb[56].mxu1 }
 0x185   :  { %v1201_v23 = vmax.f32 %v886_v21, 0.0  ;;  %v1251_v24 = vmax.f32 %v1086_v22, 0.0  ;;  %v888_v25 = vpop.f32.mrb[57].mxu0  ;;  %v1088_v26 = vpop.f32.mrb[57].mxu1 }
 0x186   :  { %v889_v27 = vpop.f32.mrb[58].mxu0  ;;  %v1089_v28 = vpop.f32.mrb[58].mxu1 }
 0x187   :  { %v2022_v29 = vpack.c.bf16 %v1201_v23, %v1201_v23  ;;  %v2072_v30 = vpack.c.bf16 %v1251_v24, %v1251_v24  ;;  %v1202_v31 = vmax.f32 %v889_v27, 0.0  ;;  %v1252_v32 = vmax.f32 %v1089_v28, 0.0  ;;  %v891_v33 = vpop.f32.mrb[59].mxu0  ;;  %v1091_v34 = vpop.f32.mrb[59].mxu1 }
 0x189   :  { %1702 = vst.msk [vmem:[%s3091_s2 + $0x70] sm:$0xf] %vm1673_vm0, %v2022_v29  ;;  %1752 = vst.msk [vmem:[%s3091_s2 + $0x138] sm:$0xf] %vm1673_vm0, %v2072_v30  ;;  %v2023_v35 = vpack.c.bf16 %v1202_v31, %v1202_v31  ;;  %v2073_v36 = vpack.c.bf16 %v1252_v32, %v1252_v32 }
 0x18b   :  { %1703 = vst.msk [vmem:[%s3091_s2 + $0x74] sm:$0xf] %vm1673_vm0, %v2023_v35  ;;  %1753 = vst.msk [vmem:[%s3091_s2 + $0x13c] sm:$0xf] %vm1673_vm0, %v2073_v36 }
 0x18c   :  { %v894_v37 = vpop.f32.mrb[60].mxu0  ;;  %v1094_v38 = vpop.f32.mrb[60].mxu1 }
 0x18d   :  { %v1203_v39 = vmax.f32 %v894_v37, 0.0  ;;  %v1253_v40 = vmax.f32 %v1094_v38, 0.0  ;;  %v896_v41 = vpop.f32.mrb[61].mxu0  ;;  %v1096_v42 = vpop.f32.mrb[61].mxu1 }
 0x18e   :  { %v897_v43 = vpop.f32.mrb[62].mxu0  ;;  %v1097_v44 = vpop.f32.mrb[62].mxu1 }
 0x18f   :  { %v2024_v45 = vpack.c.bf16 %v1203_v39, %v1203_v39  ;;  %v2074_v46 = vpack.c.bf16 %v1253_v40, %v1253_v40  ;;  %v1204_v47 = vmax.f32 %v897_v43, 0.0  ;;  %v1254_v48 = vmax.f32 %v1097_v44, 0.0  ;;  %v899_v49 = vpop.f32.mrb[63].mxu0  ;;  %v1099_v50 = vpop.f32.mrb[63].mxu1 }
 0x191   :  { %1704 = vst.msk [vmem:[%s3091_s2 + $0x78] sm:$0xf] %vm1673_vm0, %v2024_v45  ;;  %1754 = vst.msk [vmem:[%s3091_s2 + $0x140] sm:$0xf] %vm1673_vm0, %v2074_v46  ;;  %v2025_v51 = vpack.c.bf16 %v1204_v47, %v1204_v47  ;;  %v2075_v52 = vpack.c.bf16 %v1254_v48, %v1254_v48 }
 0x193   :  { %1705 = vst.msk [vmem:[%s3091_s2 + $0x7c] sm:$0xf] %vm1673_vm0, %v2025_v51  ;;  %1755 = vst.msk [vmem:[%s3091_s2 + $0x144] sm:$0xf] %vm1673_vm0, %v2075_v52 }
 0x194   :  { %v902_v53 = vpop.f32.mrb[64].mxu0  ;;  %v1102_v54 = vpop.f32.mrb[64].mxu1 }
 0x195   :  { %v1205_v55 = vmax.f32 %v902_v53, 0.0  ;;  %v1255_v56 = vmax.f32 %v1102_v54, 0.0  ;;  %v904_v57 = vpop.f32.mrb[65].mxu0  ;;  %v1104_v58 = vpop.f32.mrb[65].mxu1 }
 0x196   :  { %v905_v59 = vpop.f32.mrb[66].mxu0  ;;  %v1105_v60 = vpop.f32.mrb[66].mxu1 }
 0x197   :  { %v2026_v61 = vpack.c.bf16 %v1205_v55, %v1205_v55  ;;  %v2076_v62 = vpack.c.bf16 %v1255_v56, %v1255_v56  ;;  %v1206_v63 = vmax.f32 %v905_v59, 0.0  ;;  %v1256_v0 = vmax.f32 %v1105_v60, 0.0  ;;  %v907_v1 = vpop.f32.mrb[67].mxu0  ;;  %v1107_v2 = vpop.f32.mrb[67].mxu1 }
 0x199   :  { %1706 = vst.msk [vmem:[%s3091_s2 + $0x80] sm:$0xf] %vm1673_vm0, %v2026_v61  ;;  %1756 = vst.msk [vmem:[%s3091_s2 + $0x148] sm:$0xf] %vm1673_vm0, %v2076_v62  ;;  %v2027_v3 = vpack.c.bf16 %v1206_v63, %v1206_v63  ;;  %v2077_v4 = vpack.c.bf16 %v1256_v0, %v1256_v0 }
 0x19b   :  { %1707 = vst.msk [vmem:[%s3091_s2 + $0x84] sm:$0xf] %vm1673_vm0, %v2027_v3  ;;  %1757 = vst.msk [vmem:[%s3091_s2 + $0x14c] sm:$0xf] %vm1673_vm0, %v2077_v4 }
 0x19c   :  { %v910_v5 = vpop.f32.mrb[68].mxu0  ;;  %v1110_v6 = vpop.f32.mrb[68].mxu1 }
 0x19d   :  { %v1207_v7 = vmax.f32 %v910_v5, 0.0  ;;  %v1257_v8 = vmax.f32 %v1110_v6, 0.0  ;;  %v912_v9 = vpop.f32.mrb[69].mxu0  ;;  %v1112_v10 = vpop.f32.mrb[69].mxu1 }
 0x19e   :  { %v913_v11 = vpop.f32.mrb[70].mxu0  ;;  %v1113_v12 = vpop.f32.mrb[70].mxu1 }
 0x19f   :  { %v2028_v13 = vpack.c.bf16 %v1207_v7, %v1207_v7  ;;  %v2078_v14 = vpack.c.bf16 %v1257_v8, %v1257_v8  ;;  %v1208_v15 = vmax.f32 %v913_v11, 0.0  ;;  %v1258_v16 = vmax.f32 %v1113_v12, 0.0  ;;  %v915_v17 = vpop.f32.mrb[71].mxu0  ;;  %v1115_v18 = vpop.f32.mrb[71].mxu1 }
 0x1a1   :  { %1708 = vst.msk [vmem:[%s3091_s2 + $0x88] sm:$0xf] %vm1673_vm0, %v2028_v13  ;;  %1758 = vst.msk [vmem:[%s3091_s2 + $0x150] sm:$0xf] %vm1673_vm0, %v2078_v14  ;;  %v2029_v19 = vpack.c.bf16 %v1208_v15, %v1208_v15  ;;  %v2079_v20 = vpack.c.bf16 %v1258_v16, %v1258_v16 }
 0x1a3   :  { %1709 = vst.msk [vmem:[%s3091_s2 + $0x8c] sm:$0xf] %vm1673_vm0, %v2029_v19  ;;  %1759 = vst.msk [vmem:[%s3091_s2 + $0x154] sm:$0xf] %vm1673_vm0, %v2079_v20 }
 0x1a4   :  { %v918_v21 = vpop.f32.mrb[72].mxu0  ;;  %v1118_v22 = vpop.f32.mrb[72].mxu1 }
 0x1a5   :  { %v1209_v23 = vmax.f32 %v918_v21, 0.0  ;;  %v1259_v24 = vmax.f32 %v1118_v22, 0.0  ;;  %v920_v25 = vpop.f32.mrb[73].mxu0  ;;  %v1120_v26 = vpop.f32.mrb[73].mxu1 }
 0x1a6   :  { %v921_v27 = vpop.f32.mrb[74].mxu0  ;;  %v1121_v28 = vpop.f32.mrb[74].mxu1 }
 0x1a7   :  { %v2030_v29 = vpack.c.bf16 %v1209_v23, %v1209_v23  ;;  %v2080_v30 = vpack.c.bf16 %v1259_v24, %v1259_v24  ;;  %v1210_v31 = vmax.f32 %v921_v27, 0.0  ;;  %v1260_v32 = vmax.f32 %v1121_v28, 0.0  ;;  %v923_v33 = vpop.f32.mrb[75].mxu0  ;;  %v1123_v34 = vpop.f32.mrb[75].mxu1 }
 0x1a9   :  { %1710 = vst.msk [vmem:[%s3091_s2 + $0x90] sm:$0xf] %vm1673_vm0, %v2030_v29  ;;  %1760 = vst.msk [vmem:[%s3091_s2 + $0x158] sm:$0xf] %vm1673_vm0, %v2080_v30  ;;  %v2031_v35 = vpack.c.bf16 %v1210_v31, %v1210_v31  ;;  %v2081_v36 = vpack.c.bf16 %v1260_v32, %v1260_v32 }
 0x1ab   :  { %1711 = vst.msk [vmem:[%s3091_s2 + $0x94] sm:$0xf] %vm1673_vm0, %v2031_v35  ;;  %1761 = vst.msk [vmem:[%s3091_s2 + $0x15c] sm:$0xf] %vm1673_vm0, %v2081_v36 }
 0x1ac   :  { %v926_v37 = vpop.f32.mrb[76].mxu0  ;;  %v1126_v38 = vpop.f32.mrb[76].mxu1 }
 0x1ad   :  { %v1211_v39 = vmax.f32 %v926_v37, 0.0  ;;  %v1261_v40 = vmax.f32 %v1126_v38, 0.0  ;;  %v928_v41 = vpop.f32.mrb[77].mxu0  ;;  %v1128_v42 = vpop.f32.mrb[77].mxu1 }
 0x1ae   :  { %v929_v43 = vpop.f32.mrb[78].mxu0  ;;  %v1129_v44 = vpop.f32.mrb[78].mxu1 }
 0x1af   :  { %v2032_v45 = vpack.c.bf16 %v1211_v39, %v1211_v39  ;;  %v2082_v46 = vpack.c.bf16 %v1261_v40, %v1261_v40  ;;  %v1212_v47 = vmax.f32 %v929_v43, 0.0  ;;  %v1262_v48 = vmax.f32 %v1129_v44, 0.0  ;;  %v931_v49 = vpop.f32.mrb[79].mxu0  ;;  %v1131_v50 = vpop.f32.mrb[79].mxu1 }
 0x1b1   :  { %1712 = vst.msk [vmem:[%s3091_s2 + $0x98] sm:$0xf] %vm1673_vm0, %v2032_v45  ;;  %1762 = vst.msk [vmem:[%s3091_s2 + $0x160] sm:$0xf] %vm1673_vm0, %v2082_v46  ;;  %v2033_v51 = vpack.c.bf16 %v1212_v47, %v1212_v47  ;;  %v2083_v52 = vpack.c.bf16 %v1262_v48, %v1262_v48 }
 0x1b3   :  { %1713 = vst.msk [vmem:[%s3091_s2 + $0x9c] sm:$0xf] %vm1673_vm0, %v2033_v51  ;;  %1763 = vst.msk [vmem:[%s3091_s2 + $0x164] sm:$0xf] %vm1673_vm0, %v2083_v52 }
 0x1b4   :  { %v934_v53 = vpop.f32.mrb[80].mxu0  ;;  %v1134_v54 = vpop.f32.mrb[80].mxu1 }
 0x1b5   :  { %v1213_v55 = vmax.f32 %v934_v53, 0.0  ;;  %v1263_v56 = vmax.f32 %v1134_v54, 0.0  ;;  %v936_v57 = vpop.f32.mrb[81].mxu0  ;;  %v1136_v58 = vpop.f32.mrb[81].mxu1 }
 0x1b6   :  { %v937_v59 = vpop.f32.mrb[82].mxu0  ;;  %v1137_v60 = vpop.f32.mrb[82].mxu1 }
 0x1b7   :  { %v2034_v61 = vpack.c.bf16 %v1213_v55, %v1213_v55  ;;  %v2084_v62 = vpack.c.bf16 %v1263_v56, %v1263_v56  ;;  %v1214_v63 = vmax.f32 %v937_v59, 0.0  ;;  %v1264_v0 = vmax.f32 %v1137_v60, 0.0  ;;  %v939_v1 = vpop.f32.mrb[83].mxu0  ;;  %v1139_v2 = vpop.f32.mrb[83].mxu1 }
 0x1b9   :  { %1714 = vst.msk [vmem:[%s3091_s2 + $0xa0] sm:$0xf] %vm1673_vm0, %v2034_v61  ;;  %1764 = vst.msk [vmem:[%s3091_s2 + $0x168] sm:$0xf] %vm1673_vm0, %v2084_v62  ;;  %v2035_v3 = vpack.c.bf16 %v1214_v63, %v1214_v63  ;;  %v2085_v4 = vpack.c.bf16 %v1264_v0, %v1264_v0 }
 0x1bb   :  { %1715 = vst.msk [vmem:[%s3091_s2 + $0xa4] sm:$0xf] %vm1673_vm0, %v2035_v3  ;;  %1765 = vst.msk [vmem:[%s3091_s2 + $0x16c] sm:$0xf] %vm1673_vm0, %v2085_v4 }
 0x1bc   :  { %v942_v5 = vpop.f32.mrb[84].mxu0  ;;  %v1142_v6 = vpop.f32.mrb[84].mxu1 }
 0x1bd   :  { %v1215_v7 = vmax.f32 %v942_v5, 0.0  ;;  %v1265_v8 = vmax.f32 %v1142_v6, 0.0  ;;  %v944_v9 = vpop.f32.mrb[85].mxu0  ;;  %v1144_v10 = vpop.f32.mrb[85].mxu1 }
 0x1be   :  { %v945_v11 = vpop.f32.mrb[86].mxu0  ;;  %v1145_v12 = vpop.f32.mrb[86].mxu1 }
 0x1bf   :  { %v2036_v13 = vpack.c.bf16 %v1215_v7, %v1215_v7  ;;  %v2086_v14 = vpack.c.bf16 %v1265_v8, %v1265_v8  ;;  %v1216_v15 = vmax.f32 %v945_v11, 0.0  ;;  %v1266_v16 = vmax.f32 %v1145_v12, 0.0  ;;  %v947_v17 = vpop.f32.mrb[87].mxu0  ;;  %v1147_v18 = vpop.f32.mrb[87].mxu1 }
 0x1c1   :  { %1716 = vst.msk [vmem:[%s3091_s2 + $0xa8] sm:$0xf] %vm1673_vm0, %v2036_v13  ;;  %1766 = vst.msk [vmem:[%s3091_s2 + $0x170] sm:$0xf] %vm1673_vm0, %v2086_v14  ;;  %v2037_v19 = vpack.c.bf16 %v1216_v15, %v1216_v15  ;;  %v2087_v20 = vpack.c.bf16 %v1266_v16, %v1266_v16 }
 0x1c3   :  { %1717 = vst.msk [vmem:[%s3091_s2 + $0xac] sm:$0xf] %vm1673_vm0, %v2037_v19  ;;  %1767 = vst.msk [vmem:[%s3091_s2 + $0x174] sm:$0xf] %vm1673_vm0, %v2087_v20 }
 0x1c4   :  { %v950_v21 = vpop.f32.mrb[88].mxu0  ;;  %v1150_v22 = vpop.f32.mrb[88].mxu1 }
 0x1c5   :  { %v1217_v23 = vmax.f32 %v950_v21, 0.0  ;;  %v1267_v24 = vmax.f32 %v1150_v22, 0.0  ;;  %v952_v25 = vpop.f32.mrb[89].mxu0  ;;  %v1152_v26 = vpop.f32.mrb[89].mxu1 }
 0x1c6   :  { %v953_v27 = vpop.f32.mrb[90].mxu0  ;;  %v1153_v28 = vpop.f32.mrb[90].mxu1 }
 0x1c7   :  { %v2038_v29 = vpack.c.bf16 %v1217_v23, %v1217_v23  ;;  %v2088_v30 = vpack.c.bf16 %v1267_v24, %v1267_v24  ;;  %v1218_v31 = vmax.f32 %v953_v27, 0.0  ;;  %v1268_v32 = vmax.f32 %v1153_v28, 0.0  ;;  %v955_v33 = vpop.f32.mrb[91].mxu0  ;;  %v1155_v34 = vpop.f32.mrb[91].mxu1 }
 0x1c9   :  { %1718 = vst.msk [vmem:[%s3091_s2 + $0xb0] sm:$0xf] %vm1673_vm0, %v2038_v29  ;;  %1768 = vst.msk [vmem:[%s3091_s2 + $0x178] sm:$0xf] %vm1673_vm0, %v2088_v30  ;;  %v2039_v35 = vpack.c.bf16 %v1218_v31, %v1218_v31  ;;  %v2089_v36 = vpack.c.bf16 %v1268_v32, %v1268_v32 }
 0x1cb   :  { %1719 = vst.msk [vmem:[%s3091_s2 + $0xb4] sm:$0xf] %vm1673_vm0, %v2039_v35  ;;  %1769 = vst.msk [vmem:[%s3091_s2 + $0x17c] sm:$0xf] %vm1673_vm0, %v2089_v36 }
 0x1cc   :  { %v958_v37 = vpop.f32.mrb[92].mxu0  ;;  %v1158_v38 = vpop.f32.mrb[92].mxu1 }
 0x1cd   :  { %v1219_v39 = vmax.f32 %v958_v37, 0.0  ;;  %v1269_v40 = vmax.f32 %v1158_v38, 0.0  ;;  %v960_v41 = vpop.f32.mrb[93].mxu0  ;;  %v1160_v42 = vpop.f32.mrb[93].mxu1 }
 0x1ce   :  { %v961_v43 = vpop.f32.mrb[94].mxu0  ;;  %v1161_v44 = vpop.f32.mrb[94].mxu1 }
 0x1cf   :  { %v2040_v45 = vpack.c.bf16 %v1219_v39, %v1219_v39  ;;  %v2090_v46 = vpack.c.bf16 %v1269_v40, %v1269_v40  ;;  %v1220_v47 = vmax.f32 %v961_v43, 0.0  ;;  %v1270_v48 = vmax.f32 %v1161_v44, 0.0  ;;  %v963_v49 = vpop.f32.mrb[95].mxu0  ;;  %v1163_v50 = vpop.f32.mrb[95].mxu1 }
 0x1d1   :  { %1720 = vst.msk [vmem:[%s3091_s2 + $0xb8] sm:$0xf] %vm1673_vm0, %v2040_v45  ;;  %1770 = vst.msk [vmem:[%s3091_s2 + $0x180] sm:$0xf] %vm1673_vm0, %v2090_v46  ;;  %v2041_v51 = vpack.c.bf16 %v1220_v47, %v1220_v47  ;;  %v2091_v52 = vpack.c.bf16 %v1270_v48, %v1270_v48 }
 0x1d3   :  { %1721 = vst.msk [vmem:[%s3091_s2 + $0xbc] sm:$0xf] %vm1673_vm0, %v2041_v51  ;;  %1771 = vst.msk [vmem:[%s3091_s2 + $0x184] sm:$0xf] %vm1673_vm0, %v2091_v52 }
 0x1d4   :  { %v966_v53 = vpop.f32.mrb[96].mxu0  ;;  %v1166_v54 = vpop.f32.mrb[96].mxu1 }
 0x1d5   :  { %v1221_v55 = vmax.f32 %v966_v53, 0.0  ;;  %v1271_v56 = vmax.f32 %v1166_v54, 0.0  ;;  %v968_v57 = vpop.f32.mrb[97].mxu0  ;;  %v1168_v58 = vpop.f32.mrb[97].mxu1 }
 0x1d6   :  { %v969_v59 = vpop.f32.mrb[98].mxu0  ;;  %v1169_v60 = vpop.f32.mrb[98].mxu1 }
 0x1d7   :  { %v2042_v61 = vpack.c.bf16 %v1221_v55, %v1221_v55  ;;  %v2092_v62 = vpack.c.bf16 %v1271_v56, %v1271_v56  ;;  %v1222_v63 = vmax.f32 %v969_v59, 0.0  ;;  %v1272_v0 = vmax.f32 %v1169_v60, 0.0  ;;  %v971_v1 = vpop.f32.mrb[99].mxu0  ;;  %v1171_v2 = vpop.f32.mrb[99].mxu1 }
 0x1d9   :  { %1722 = vst.msk [vmem:[%s3091_s2 + $0xc0] sm:$0xf] %vm1673_vm0, %v2042_v61  ;;  %1772 = vst.msk [vmem:[%s3091_s2 + $0x188] sm:$0xf] %vm1673_vm0, %v2092_v62  ;;  %v2043_v3 = vpack.c.bf16 %v1222_v63, %v1222_v63  ;;  %v2093_v4 = vpack.c.bf16 %v1272_v0, %v1272_v0 }
 0x1db   :  { %1723 = vst.msk [vmem:[%s3091_s2 + $0xc4] sm:$0xf] %vm1673_vm0, %v2043_v3  ;;  %1773 = vst.msk [vmem:[%s3091_s2 + $0x18c] sm:$0xf] %vm1673_vm0, %v2093_v4 }

// kernel: dqn_forward.5
= control target key start
LH: loop header
LB: loop body
LE: loop exit
PB: predicated region body
PF: predicated region fallthrough
CT: control target
= control target key end

     0   :  { %vm870_vm0 = vcmask 519168   ;;  %vm891_vm1 = vcmask 516096   ;;  %s1595_s1 = inlined_call_operand.vmem [shape: bf16[512,64], index: 1, kind: input, shape index: {}]   ;;  %s1596_s0 = inlined_call_operand.vmem [shape: bf16[162,512], index: 0, kind: input, shape index: {}]   ;;  %s1597_s2 = inlined_call_operand.vmem [shape: bf16[162,64], index: 2, kind: output, shape index: {}]  }
   0x1   :  { %v1179_v0 = vld [vmem:[%s1595_s1 + $0x40] sm:$0xff]   ;;  %v1183_v4 = vld [vmem:[%s1595_s1 + $0x48] sm:$0xff]   ;;  %v1187_v8 = vld [vmem:[%s1595_s1 + $0x50] sm:$0xff]  }
   0x2   :  { %v1180_v1 = vld [vmem:[%s1595_s1 + $0xc0] sm:$0xff]   ;;  %1015 = vmatprep.subr.bf16.mxu0 %v1179_v0  ;;  %v1184_v5 = vld [vmem:[%s1595_s1 + $0xc8] sm:$0xff]   ;;  %v1188_v9 = vld [vmem:[%s1595_s1 + $0xd0] sm:$0xff]  }
   0x3   :  { %v1181_v2 = vld [vmem:[%s1595_s1] sm:$0xff]   ;;  %1097 = vmatprep.subr.bf16.mxu1 %v1180_v1  ;;  %v1185_v6 = vld [vmem:[%s1595_s1 + $0x8] sm:$0xff]   ;;  %v1189_v10 = vld [vmem:[%s1595_s1 + $0x10] sm:$0xff]  }
   0x4   :  { %v1182_v3 = vld [vmem:[%s1595_s1 + $0x80] sm:$0xff]   ;;  %1016 = vmatpush3.bf16.msra.mxu0 %v1181_v2  ;;  %v1186_v7 = vld [vmem:[%s1595_s1 + $0x88] sm:$0xff]   ;;  %v1190_v11 = vld [vmem:[%s1595_s1 + $0x90] sm:$0xff]  }
   0x5   :  { %1098 = vmatpush3.bf16.msra.mxu1 %v1182_v3  ;;  %1017 = vmatprep.subr.bf16.mxu0 %v1183_v4  ;;  %v1191_v12 = vld [vmem:[%s1595_s1 + $0x58] sm:$0xff]   ;;  %v1195_v16 = vld [vmem:[%s1595_s1 + $0x60] sm:$0xff]   ;;  %v1199_v20 = vld [vmem:[%s1595_s1 + $0x68] sm:$0xff]  }
   0x6   :  { %1099 = vmatprep.subr.bf16.mxu1 %v1184_v5  ;;  %v1192_v13 = vld [vmem:[%s1595_s1 + $0xd8] sm:$0xff]   ;;  %v1196_v17 = vld [vmem:[%s1595_s1 + $0xe0] sm:$0xff]   ;;  %v1200_v21 = vld [vmem:[%s1595_s1 + $0xe8] sm:$0xff]  }
   0x7   :  { %v1193_v14 = vld [vmem:[%s1595_s1 + $0x18] sm:$0xff]   ;;  %v1197_v18 = vld [vmem:[%s1595_s1 + $0x20] sm:$0xff]   ;;  %v1201_v22 = vld [vmem:[%s1595_s1 + $0x28] sm:$0xff]  }
   0x8   :  { %1018 = vmatpush3.bf16.msra.mxu0 %v1185_v6  ;;  %v1194_v15 = vld [vmem:[%s1595_s1 + $0x98] sm:$0xff]   ;;  %v1198_v19 = vld [vmem:[%s1595_s1 + $0xa0] sm:$0xff]   ;;  %v1202_v23 = vld [vmem:[%s1595_s1 + $0xa8] sm:$0xff]  }
   0x9   :  { %1100 = vmatpush3.bf16.msra.mxu1 %v1186_v7  ;;  %1019 = vmatprep.subr.bf16.mxu0 %v1187_v8  ;;  %v1203_v24 = vld [vmem:[%s1595_s1 + $0x70] sm:$0xff]   ;;  %v1207_v28 = vld [vmem:[%s1595_s1 + $0x78] sm:$0xff]   ;;  %v52_v6 = vld [vmem:[%s1596_s0 + $0x140] sm:$0x11] }
   0xa   :  { %1101 = vmatprep.subr.bf16.mxu1 %v1188_v9  ;;  %v1204_v25 = vld [vmem:[%s1595_s1 + $0xf0] sm:$0xff]   ;;  %v1208_v29 = vld [vmem:[%s1595_s1 + $0xf8] sm:$0xff]   ;;  %v53_v7 = vld [vmem:[%s1596_s0 + $0x148] sm:$0x11] }
   0xb   :  { %v1205_v26 = vld [vmem:[%s1595_s1 + $0x30] sm:$0xff]   ;;  %v1209_v30 = vld [vmem:[%s1595_s1 + $0x38] sm:$0xff]  }
   0xc   :  { %1020 = vmatpush3.bf16.msra.mxu0 %v1189_v10  ;;  %v1206_v27 = vld [vmem:[%s1595_s1 + $0xb0] sm:$0xff]   ;;  %v1210_v31 = vld [vmem:[%s1595_s1 + $0xb8] sm:$0xff]   ;;  %v938_v10 = vcombine.high %v52_v6, %v52_v6 }
   0xd   :  { %1102 = vmatpush3.bf16.msra.mxu1 %v1190_v11  ;;  %1021 = vmatprep.subr.bf16.mxu0 %v1191_v12  ;;  %v1211_v32 = vld [vmem:[%s1596_s0] ss:$16 sps:$4 sm:$0xff]   ;;  %v1213_v33 = vld [vmem:[%s1596_s0 + $0x4] ss:$16 sps:$4 sm:$0xff]   ;;  %v1214_v34 = vld [vmem:[%s1596_s0 + $0x8] ss:$16 sps:$4 sm:$0xff]   ;;  %v940_v11 = vcombine.high %v53_v7, %v53_v7  ;;  %v937_v12 = vcombine.low %v52_v6, %v52_v6 }
   0xe   :  { %1103 = vmatprep.subr.bf16.mxu1 %v1192_v13  ;;  %v1216_v35 = vld [vmem:[%s1596_s0 + $0xc] ss:$16 sps:$4 sm:$0xff]   ;;  %556 = vmatprep.mubr.bf16.mxu0 %v1213_v33  ;;  %v1217_v36 = vld [vmem:[%s1596_s0 + $0x24] ss:$16 sps:$4 sm:$0xff]   ;;  %v1221_v38 = vld [vmem:[%s1596_s0 + $0x20] ss:$16 sps:$4 sm:$0xff]   ;;  %v939_v13 = vcombine.low %v53_v7, %v53_v7 }
   0xf   :  { %676 = vmatprep.mubr.bf16.mxu1 %v1216_v35  ;;  %v1219_v37 = vld [vmem:[%s1596_s0 + $0x2c] ss:$16 sps:$4 sm:$0xff]   ;;  %v1222_v39 = vld [vmem:[%s1596_s0 + $0x28] ss:$16 sps:$4 sm:$0xff]   ;;  %v1223_v40 = vld [vmem:[%s1596_s0 + $0x44] ss:$16 sps:$4 sm:$0xff]  }
  0x10   :  { %1022 = vmatpush3.bf16.msra.mxu0 %v1193_v14  ;;  %v1225_v41 = vld [vmem:[%s1596_s0 + $0x4c] ss:$16 sps:$4 sm:$0xff]   ;;  %v1227_v42 = vld [vmem:[%s1596_s0 + $0x40] ss:$16 sps:$4 sm:$0xff]   ;;  %v1228_v43 = vld [vmem:[%s1596_s0 + $0x48] ss:$16 sps:$4 sm:$0xff]  }
  0x11   :  { %1104 = vmatpush3.bf16.msra.mxu1 %v1194_v15  ;;  %1023 = vmatprep.subr.bf16.mxu0 %v1195_v16  ;;  %v1229_v44 = vld [vmem:[%s1596_s0 + $0x64] ss:$16 sps:$4 sm:$0xff]   ;;  %v1231_v45 = vld [vmem:[%s1596_s0 + $0x6c] ss:$16 sps:$4 sm:$0xff]   ;;  %v1233_v46 = vld [vmem:[%s1596_s0 + $0x60] ss:$16 sps:$4 sm:$0xff]  }
  0x12   :  { %1105 = vmatprep.subr.bf16.mxu1 %v1196_v17  ;;  %v1234_v47 = vld [vmem:[%s1596_s0 + $0x68] ss:$16 sps:$4 sm:$0xff]   ;;  %v1235_v48 = vld [vmem:[%s1596_s0 + $0x84] ss:$16 sps:$4 sm:$0xff]   ;;  %v1237_v49 = vld [vmem:[%s1596_s0 + $0x8c] ss:$16 sps:$4 sm:$0xff]  }
  0x13   :  { %v1239_v50 = vld [vmem:[%s1596_s0 + $0x80] ss:$16 sps:$4 sm:$0xff]   ;;  %v1240_v51 = vld [vmem:[%s1596_s0 + $0x88] ss:$16 sps:$4 sm:$0xff]   ;;  %v1241_v52 = vld [vmem:[%s1596_s0 + $0xa4] ss:$16 sps:$4 sm:$0xff]  }
  0x14   :  { %1024 = vmatpush3.bf16.msra.mxu0 %v1197_v18  ;;  %v1243_v53 = vld [vmem:[%s1596_s0 + $0xac] ss:$16 sps:$4 sm:$0xff]   ;;  %v1245_v54 = vld [vmem:[%s1596_s0 + $0xa0] ss:$16 sps:$4 sm:$0xff]   ;;  %v1246_v55 = vld [vmem:[%s1596_s0 + $0xa8] ss:$16 sps:$4 sm:$0xff]  }
  0x15   :  { %1106 = vmatpush3.bf16.msra.mxu1 %v1198_v19  ;;  %1025 = vmatprep.subr.bf16.mxu0 %v1199_v20  ;;  %v1247_v56 = vld [vmem:[%s1596_s0 + $0xc4] ss:$16 sps:$4 sm:$0xff]   ;;  %v1249_v57 = vld [vmem:[%s1596_s0 + $0xcc] ss:$16 sps:$4 sm:$0xff]   ;;  %v1251_v58 = vld [vmem:[%s1596_s0 + $0xc0] ss:$16 sps:$4 sm:$0xff]  }
  0x16   :  { %1107 = vmatprep.subr.bf16.mxu1 %v1200_v21  ;;  %v1252_v59 = vld [vmem:[%s1596_s0 + $0xc8] ss:$16 sps:$4 sm:$0xff]   ;;  %v1253_v60 = vld [vmem:[%s1596_s0 + $0xe4] ss:$16 sps:$4 sm:$0xff]   ;;  %v1255_v61 = vld [vmem:[%s1596_s0 + $0xec] ss:$16 sps:$4 sm:$0xff]  }
  0x17   :  { %v1257_v62 = vld [vmem:[%s1596_s0 + $0xe0] ss:$16 sps:$4 sm:$0xff]   ;;  %v1258_v63 = vld [vmem:[%s1596_s0 + $0xe8] ss:$16 sps:$4 sm:$0xff]   ;;  %v1259_v0 = vld [vmem:[%s1596_s0 + $0x104] ss:$16 sps:$4 sm:$0xff]  }
  0x18   :  { %1026 = vmatpush3.bf16.msra.mxu0 %v1201_v22  ;;  %v1261_v1 = vld [vmem:[%s1596_s0 + $0x10c] ss:$16 sps:$4 sm:$0xff]   ;;  %v1263_v2 = vld [vmem:[%s1596_s0 + $0x100] ss:$16 sps:$4 sm:$0xff]   ;;  %v1264_v3 = vld [vmem:[%s1596_s0 + $0x108] ss:$16 sps:$4 sm:$0xff]  }
  0x19   :  { %1108 = vmatpush3.bf16.msra.mxu1 %v1202_v23  ;;  %1027 = vmatprep.subr.bf16.mxu0 %v1203_v24  ;;  %v1265_v4 = vld [vmem:[%s1596_s0 + $0x124] ss:$16 sps:$4 sm:$0xff]   ;;  %v1267_v5 = vld [vmem:[%s1596_s0 + $0x12c] ss:$16 sps:$4 sm:$0xff]   ;;  %v1269_v8 = vld [vmem:[%s1596_s0 + $0x120] ss:$16 sps:$4 sm:$0xff]  }
  0x1a   :  { %1109 = vmatprep.subr.bf16.mxu1 %v1204_v25  ;;  %v1270_v9 = vld [vmem:[%s1596_s0 + $0x128] ss:$16 sps:$4 sm:$0xff]  }
  0x1c   :  { %1028 = vmatpush3.bf16.msra.mxu0 %v1205_v26 }
  0x1d   :  { %1110 = vmatpush3.bf16.msra.mxu1 %v1206_v27  ;;  %1029 = vmatprep.subr.bf16.mxu0 %v1207_v28 }
  0x1e   :  { %1111 = vmatprep.subr.bf16.mxu1 %v1208_v29 }
  0x20   :  { %1030 = vmatpush3.bf16.msra.mxu0 %v1209_v30 }
  0x21   :  { %1112 = vmatpush3.bf16.msra.mxu1 %v1210_v31 }
  0x23   :  { %557 = vmatmul.mubr.bf16.vlgmr.msra.gmra.mrb[0].mxu0 %v1211_v32 }
  0x24   :  { %677 = vmatmul.mubr.bf16.vlgmr.msra.gmra.mrb[0].mxu1 %v1214_v34  ;;  %564 = vmatprep.mubr.bf16.mxu0 %v1217_v36 }
  0x25   :  { %684 = vmatprep.mubr.bf16.mxu1 %v1219_v37 }
  0x2b   :  { %565 = vmatmul.mubr.bf16.gmra.mrb[4].mxu0 %v1221_v38 }
  0x2c   :  { %685 = vmatmul.mubr.bf16.gmra.mrb[4].mxu1 %v1222_v39  ;;  %572 = vmatprep.mubr.bf16.mxu0 %v1223_v40 }
  0x2d   :  { %692 = vmatprep.mubr.bf16.mxu1 %v1225_v41 }
  0x33   :  { %573 = vmatmul.mubr.bf16.gmra.mrb[8].mxu0 %v1227_v42 }
  0x34   :  { %693 = vmatmul.mubr.bf16.gmra.mrb[8].mxu1 %v1228_v43  ;;  %580 = vmatprep.mubr.bf16.mxu0 %v1229_v44 }
  0x35   :  { %700 = vmatprep.mubr.bf16.mxu1 %v1231_v45 }
  0x3b   :  { %581 = vmatmul.mubr.bf16.gmra.mrb[12].mxu0 %v1233_v46 }
  0x3c   :  { %701 = vmatmul.mubr.bf16.gmra.mrb[12].mxu1 %v1234_v47  ;;  %588 = vmatprep.mubr.bf16.mxu0 %v1235_v48 }
  0x3d   :  { %708 = vmatprep.mubr.bf16.mxu1 %v1237_v49 }
  0x43   :  { %589 = vmatmul.mubr.bf16.gmra.mrb[16].mxu0 %v1239_v50 }
  0x44   :  { %709 = vmatmul.mubr.bf16.gmra.mrb[16].mxu1 %v1240_v51  ;;  %596 = vmatprep.mubr.bf16.mxu0 %v1241_v52 }
  0x45   :  { %716 = vmatprep.mubr.bf16.mxu1 %v1243_v53 }
  0x4b   :  { %597 = vmatmul.mubr.bf16.gmra.mrb[20].mxu0 %v1245_v54 }
  0x4c   :  { %717 = vmatmul.mubr.bf16.gmra.mrb[20].mxu1 %v1246_v55  ;;  %604 = vmatprep.mubr.bf16.mxu0 %v1247_v56 }
  0x4d   :  { %724 = vmatprep.mubr.bf16.mxu1 %v1249_v57 }
  0x53   :  { %605 = vmatmul.mubr.bf16.gmra.mrb[24].mxu0 %v1251_v58 }
  0x54   :  { %725 = vmatmul.mubr.bf16.gmra.mrb[24].mxu1 %v1252_v59  ;;  %612 = vmatprep.mubr.bf16.mxu0 %v1253_v60 }
  0x55   :  { %732 = vmatprep.mubr.bf16.mxu1 %v1255_v61 }
  0x5b   :  { %613 = vmatmul.mubr.bf16.gmra.mrb[28].mxu0 %v1257_v62 }
  0x5c   :  { %733 = vmatmul.mubr.bf16.gmra.mrb[28].mxu1 %v1258_v63  ;;  %620 = vmatprep.mubr.bf16.mxu0 %v1259_v0 }
  0x5d   :  { %740 = vmatprep.mubr.bf16.mxu1 %v1261_v1 }
  0x63   :  { %621 = vmatmul.mubr.bf16.gmra.mrb[32].mxu0 %v1263_v2 }
  0x64   :  { %741 = vmatmul.mubr.bf16.gmra.mrb[32].mxu1 %v1264_v3  ;;  %628 = vmatprep.mubr.bf16.mxu0 %v1265_v4 }
  0x65   :  { %748 = vmatprep.mubr.bf16.mxu1 %v1267_v5 }
  0x6b   :  { %629 = vmatmul.mubr.bf16.gmra.mrb[36].mxu0 %v1269_v8 }
  0x6c   :  { %749 = vmatmul.mubr.bf16.gmra.mrb[36].mxu1 %v1270_v9  ;;  %636 = vmatprep.mubr.bf16.mxu0 %v938_v10 }
  0x6d   :  { %756 = vmatprep.mubr.bf16.mxu1 %v940_v11 }
  0x73   :  { %637 = vmatmul.mubr.bf16.gmra.mrb[40].mxu0 %v937_v12 }
  0x74   :  { %757 = vmatmul.mubr.bf16.gmra.mrb[40].mxu1 %v939_v13 }
  0xf6   :  { %v1031_v14 = vpop.f32.mrb[0].mxu0 }
  0xf7   :  { %v1113_v15 = vpop.f32.mrb[0].mxu1  ;;  %v1032_v16 = vpop.f32.mrb[1].mxu0 }
  0xf8   :  { %v1033_v17 = vadd.f32 %v1032_v16, %v1031_v14  ;;  %v1114_v18 = vpop.f32.mrb[1].mxu1  ;;  %v1034_v19 = vpop.f32.mrb[2].mxu0 }
  0xf9   :  { %v1115_v20 = vadd.f32 %v1114_v18, %v1113_v15  ;;  %v1116_v21 = vpop.f32.mrb[2].mxu1  ;;  %v1035_v22 = vpop.f32.mrb[3].mxu0 }
  0xfa   :  { %v1036_v23 = vadd.f32 %v1035_v22, %v1034_v19  ;;  %v1117_v24 = vpop.f32.mrb[3].mxu1 }
  0xfb   :  { %v679_v25 = vadd.f32 %v1115_v20, %v1033_v17  ;;  %v1118_v26 = vadd.f32 %v1117_v24, %v1116_v21 }
  0xfd   :  { %v764_v27 = vmax.f32 %v679_v25, 0.0  ;;  %v682_v28 = vadd.f32 %v1118_v26, %v1036_v23 }
  0xfe   :  { %v1037_v29 = vpop.f32.mrb[4].mxu0 }
  0xff   :  { %v994_v30 = vpack.c.bf16 %v764_v27, %v764_v27  ;;  %v765_v31 = vmax.f32 %v682_v28, 0.0  ;;  %v1119_v32 = vpop.f32.mrb[4].mxu1  ;;  %v1038_v33 = vpop.f32.mrb[5].mxu0 }
 0x100   :  { %v1039_v34 = vadd.f32 %v1038_v33, %v1037_v29  ;;  %v1120_v35 = vpop.f32.mrb[5].mxu1  ;;  %v1040_v36 = vpop.f32.mrb[6].mxu0 }
 0x101   :  { %871 = vst.msk [vmem:[%s1597_s2] sm:$0xf] %vm870_vm0, %v994_v30  ;;  %v995_v37 = vpack.c.bf16 %v765_v31, %v765_v31  ;;  %v1121_v38 = vadd.f32 %v1120_v35, %v1119_v32  ;;  %v1122_v39 = vpop.f32.mrb[6].mxu1  ;;  %v1041_v40 = vpop.f32.mrb[7].mxu0 }
 0x102   :  { %v1042_v41 = vadd.f32 %v1041_v40, %v1040_v36  ;;  %v1123_v42 = vpop.f32.mrb[7].mxu1 }
 0x103   :  { %872 = vst.msk [vmem:[%s1597_s2 + $0x4] sm:$0xf] %vm870_vm0, %v995_v37  ;;  %v687_v43 = vadd.f32 %v1121_v38, %v1039_v34  ;;  %v1124_v44 = vadd.f32 %v1123_v42, %v1122_v39 }
 0x105   :  { %v766_v45 = vmax.f32 %v687_v43, 0.0  ;;  %v690_v46 = vadd.f32 %v1124_v44, %v1042_v41 }
 0x106   :  { %v1043_v47 = vpop.f32.mrb[8].mxu0 }
 0x107   :  { %v996_v48 = vpack.c.bf16 %v766_v45, %v766_v45  ;;  %v767_v49 = vmax.f32 %v690_v46, 0.0  ;;  %v1125_v50 = vpop.f32.mrb[8].mxu1  ;;  %v1044_v51 = vpop.f32.mrb[9].mxu0 }
 0x108   :  { %v1045_v52 = vadd.f32 %v1044_v51, %v1043_v47  ;;  %v1126_v53 = vpop.f32.mrb[9].mxu1  ;;  %v1046_v54 = vpop.f32.mrb[10].mxu0 }
 0x109   :  { %873 = vst.msk [vmem:[%s1597_s2 + $0x8] sm:$0xf] %vm870_vm0, %v996_v48  ;;  %v997_v55 = vpack.c.bf16 %v767_v49, %v767_v49  ;;  %v1127_v56 = vadd.f32 %v1126_v53, %v1125_v50  ;;  %v1128_v57 = vpop.f32.mrb[10].mxu1  ;;  %v1047_v58 = vpop.f32.mrb[11].mxu0 }
 0x10a   :  { %v1048_v59 = vadd.f32 %v1047_v58, %v1046_v54  ;;  %v1129_v60 = vpop.f32.mrb[11].mxu1 }
 0x10b   :  { %874 = vst.msk [vmem:[%s1597_s2 + $0xc] sm:$0xf] %vm870_vm0, %v997_v55  ;;  %v695_v61 = vadd.f32 %v1127_v56, %v1045_v52  ;;  %v1130_v62 = vadd.f32 %v1129_v60, %v1128_v57 }
 0x10d   :  { %v768_v63 = vmax.f32 %v695_v61, 0.0  ;;  %v698_v0 = vadd.f32 %v1130_v62, %v1048_v59 }
 0x10e   :  { %v1049_v1 = vpop.f32.mrb[12].mxu0 }
 0x10f   :  { %v998_v2 = vpack.c.bf16 %v768_v63, %v768_v63  ;;  %v769_v3 = vmax.f32 %v698_v0, 0.0  ;;  %v1131_v4 = vpop.f32.mrb[12].mxu1  ;;  %v1050_v5 = vpop.f32.mrb[13].mxu0 }
 0x110   :  { %v1051_v6 = vadd.f32 %v1050_v5, %v1049_v1  ;;  %v1132_v7 = vpop.f32.mrb[13].mxu1  ;;  %v1052_v8 = vpop.f32.mrb[14].mxu0 }
 0x111   :  { %875 = vst.msk [vmem:[%s1597_s2 + $0x10] sm:$0xf] %vm870_vm0, %v998_v2  ;;  %v999_v9 = vpack.c.bf16 %v769_v3, %v769_v3  ;;  %v1133_v10 = vadd.f32 %v1132_v7, %v1131_v4  ;;  %v1134_v11 = vpop.f32.mrb[14].mxu1  ;;  %v1053_v12 = vpop.f32.mrb[15].mxu0 }
 0x112   :  { %v1054_v13 = vadd.f32 %v1053_v12, %v1052_v8  ;;  %v1135_v14 = vpop.f32.mrb[15].mxu1 }
 0x113   :  { %876 = vst.msk [vmem:[%s1597_s2 + $0x14] sm:$0xf] %vm870_vm0, %v999_v9  ;;  %v703_v15 = vadd.f32 %v1133_v10, %v1051_v6  ;;  %v1136_v16 = vadd.f32 %v1135_v14, %v1134_v11 }
 0x115   :  { %v770_v17 = vmax.f32 %v703_v15, 0.0  ;;  %v706_v18 = vadd.f32 %v1136_v16, %v1054_v13 }
 0x116   :  { %v1055_v19 = vpop.f32.mrb[16].mxu0 }
 0x117   :  { %v1000_v20 = vpack.c.bf16 %v770_v17, %v770_v17  ;;  %v771_v21 = vmax.f32 %v706_v18, 0.0  ;;  %v1137_v22 = vpop.f32.mrb[16].mxu1  ;;  %v1056_v23 = vpop.f32.mrb[17].mxu0 }
 0x118   :  { %v1057_v24 = vadd.f32 %v1056_v23, %v1055_v19  ;;  %v1138_v25 = vpop.f32.mrb[17].mxu1  ;;  %v1058_v26 = vpop.f32.mrb[18].mxu0 }
 0x119   :  { %877 = vst.msk [vmem:[%s1597_s2 + $0x18] sm:$0xf] %vm870_vm0, %v1000_v20  ;;  %v1001_v27 = vpack.c.bf16 %v771_v21, %v771_v21  ;;  %v1139_v28 = vadd.f32 %v1138_v25, %v1137_v22  ;;  %v1140_v29 = vpop.f32.mrb[18].mxu1  ;;  %v1059_v30 = vpop.f32.mrb[19].mxu0 }
 0x11a   :  { %v1060_v31 = vadd.f32 %v1059_v30, %v1058_v26  ;;  %v1141_v32 = vpop.f32.mrb[19].mxu1 }
 0x11b   :  { %878 = vst.msk [vmem:[%s1597_s2 + $0x1c] sm:$0xf] %vm870_vm0, %v1001_v27  ;;  %v711_v33 = vadd.f32 %v1139_v28, %v1057_v24  ;;  %v1142_v34 = vadd.f32 %v1141_v32, %v1140_v29 }
 0x11d   :  { %v772_v35 = vmax.f32 %v711_v33, 0.0  ;;  %v714_v36 = vadd.f32 %v1142_v34, %v1060_v31 }
 0x11e   :  { %v1061_v37 = vpop.f32.mrb[20].mxu0 }
 0x11f   :  { %v1002_v38 = vpack.c.bf16 %v772_v35, %v772_v35  ;;  %v773_v39 = vmax.f32 %v714_v36, 0.0  ;;  %v1143_v40 = vpop.f32.mrb[20].mxu1  ;;  %v1062_v41 = vpop.f32.mrb[21].mxu0 }
 0x120   :  { %v1063_v42 = vadd.f32 %v1062_v41, %v1061_v37  ;;  %v1144_v43 = vpop.f32.mrb[21].mxu1  ;;  %v1064_v44 = vpop.f32.mrb[22].mxu0 }
 0x121   :  { %879 = vst.msk [vmem:[%s1597_s2 + $0x20] sm:$0xf] %vm870_vm0, %v1002_v38  ;;  %v1003_v45 = vpack.c.bf16 %v773_v39, %v773_v39  ;;  %v1145_v46 = vadd.f32 %v1144_v43, %v1143_v40  ;;  %v1146_v47 = vpop.f32.mrb[22].mxu1  ;;  %v1065_v48 = vpop.f32.mrb[23].mxu0 }
 0x122   :  { %v1066_v49 = vadd.f32 %v1065_v48, %v1064_v44  ;;  %v1147_v50 = vpop.f32.mrb[23].mxu1 }
 0x123   :  { %880 = vst.msk [vmem:[%s1597_s2 + $0x24] sm:$0xf] %vm870_vm0, %v1003_v45  ;;  %v719_v51 = vadd.f32 %v1145_v46, %v1063_v42  ;;  %v1148_v52 = vadd.f32 %v1147_v50, %v1146_v47 }
 0x125   :  { %v774_v53 = vmax.f32 %v719_v51, 0.0  ;;  %v722_v54 = vadd.f32 %v1148_v52, %v1066_v49 }
 0x126   :  { %v1067_v55 = vpop.f32.mrb[24].mxu0 }
 0x127   :  { %v1004_v56 = vpack.c.bf16 %v774_v53, %v774_v53  ;;  %v775_v57 = vmax.f32 %v722_v54, 0.0  ;;  %v1149_v58 = vpop.f32.mrb[24].mxu1  ;;  %v1068_v59 = vpop.f32.mrb[25].mxu0 }
 0x128   :  { %v1069_v60 = vadd.f32 %v1068_v59, %v1067_v55  ;;  %v1150_v61 = vpop.f32.mrb[25].mxu1  ;;  %v1070_v62 = vpop.f32.mrb[26].mxu0 }
 0x129   :  { %881 = vst.msk [vmem:[%s1597_s2 + $0x28] sm:$0xf] %vm870_vm0, %v1004_v56  ;;  %v1005_v63 = vpack.c.bf16 %v775_v57, %v775_v57  ;;  %v1151_v0 = vadd.f32 %v1150_v61, %v1149_v58  ;;  %v1152_v1 = vpop.f32.mrb[26].mxu1  ;;  %v1071_v2 = vpop.f32.mrb[27].mxu0 }
 0x12a   :  { %v1072_v3 = vadd.f32 %v1071_v2, %v1070_v62  ;;  %v1153_v4 = vpop.f32.mrb[27].mxu1 }
 0x12b   :  { %882 = vst.msk [vmem:[%s1597_s2 + $0x2c] sm:$0xf] %vm870_vm0, %v1005_v63  ;;  %v727_v5 = vadd.f32 %v1151_v0, %v1069_v60  ;;  %v1154_v6 = vadd.f32 %v1153_v4, %v1152_v1 }
 0x12d   :  { %v776_v7 = vmax.f32 %v727_v5, 0.0  ;;  %v730_v8 = vadd.f32 %v1154_v6, %v1072_v3 }
 0x12e   :  { %v1073_v9 = vpop.f32.mrb[28].mxu0 }
 0x12f   :  { %v1006_v10 = vpack.c.bf16 %v776_v7, %v776_v7  ;;  %v777_v11 = vmax.f32 %v730_v8, 0.0  ;;  %v1155_v12 = vpop.f32.mrb[28].mxu1  ;;  %v1074_v13 = vpop.f32.mrb[29].mxu0 }
 0x130   :  { %v1075_v14 = vadd.f32 %v1074_v13, %v1073_v9  ;;  %v1156_v15 = vpop.f32.mrb[29].mxu1  ;;  %v1076_v16 = vpop.f32.mrb[30].mxu0 }
 0x131   :  { %883 = vst.msk [vmem:[%s1597_s2 + $0x30] sm:$0xf] %vm870_vm0, %v1006_v10  ;;  %v1007_v17 = vpack.c.bf16 %v777_v11, %v777_v11  ;;  %v1157_v18 = vadd.f32 %v1156_v15, %v1155_v12  ;;  %v1158_v19 = vpop.f32.mrb[30].mxu1  ;;  %v1077_v20 = vpop.f32.mrb[31].mxu0 }
 0x132   :  { %v1078_v21 = vadd.f32 %v1077_v20, %v1076_v16  ;;  %v1159_v22 = vpop.f32.mrb[31].mxu1 }
 0x133   :  { %884 = vst.msk [vmem:[%s1597_s2 + $0x34] sm:$0xf] %vm870_vm0, %v1007_v17  ;;  %v735_v23 = vadd.f32 %v1157_v18, %v1075_v14  ;;  %v1160_v24 = vadd.f32 %v1159_v22, %v1158_v19 }
 0x135   :  { %v778_v25 = vmax.f32 %v735_v23, 0.0  ;;  %v738_v26 = vadd.f32 %v1160_v24, %v1078_v21 }
 0x136   :  { %v1079_v27 = vpop.f32.mrb[32].mxu0 }
 0x137   :  { %v1008_v28 = vpack.c.bf16 %v778_v25, %v778_v25  ;;  %v779_v29 = vmax.f32 %v738_v26, 0.0  ;;  %v1161_v30 = vpop.f32.mrb[32].mxu1  ;;  %v1080_v31 = vpop.f32.mrb[33].mxu0 }
 0x138   :  { %v1081_v32 = vadd.f32 %v1080_v31, %v1079_v27  ;;  %v1162_v33 = vpop.f32.mrb[33].mxu1  ;;  %v1082_v34 = vpop.f32.mrb[34].mxu0 }
 0x139   :  { %885 = vst.msk [vmem:[%s1597_s2 + $0x38] sm:$0xf] %vm870_vm0, %v1008_v28  ;;  %v1009_v35 = vpack.c.bf16 %v779_v29, %v779_v29  ;;  %v1163_v36 = vadd.f32 %v1162_v33, %v1161_v30  ;;  %v1164_v37 = vpop.f32.mrb[34].mxu1  ;;  %v1083_v38 = vpop.f32.mrb[35].mxu0 }
 0x13a   :  { %v1084_v39 = vadd.f32 %v1083_v38, %v1082_v34  ;;  %v1165_v40 = vpop.f32.mrb[35].mxu1 }
 0x13b   :  { %886 = vst.msk [vmem:[%s1597_s2 + $0x3c] sm:$0xf] %vm870_vm0, %v1009_v35  ;;  %v743_v41 = vadd.f32 %v1163_v36, %v1081_v32  ;;  %v1166_v42 = vadd.f32 %v1165_v40, %v1164_v37 }
 0x13d   :  { %v780_v43 = vmax.f32 %v743_v41, 0.0  ;;  %v746_v44 = vadd.f32 %v1166_v42, %v1084_v39 }
 0x13e   :  { %v1085_v45 = vpop.f32.mrb[36].mxu0 }
 0x13f   :  { %v1010_v46 = vpack.c.bf16 %v780_v43, %v780_v43  ;;  %v781_v47 = vmax.f32 %v746_v44, 0.0  ;;  %v1167_v48 = vpop.f32.mrb[36].mxu1  ;;  %v1086_v49 = vpop.f32.mrb[37].mxu0 }
 0x140   :  { %v1087_v50 = vadd.f32 %v1086_v49, %v1085_v45  ;;  %v1168_v51 = vpop.f32.mrb[37].mxu1  ;;  %v1088_v52 = vpop.f32.mrb[38].mxu0 }
 0x141   :  { %887 = vst.msk [vmem:[%s1597_s2 + $0x40] sm:$0xf] %vm870_vm0, %v1010_v46  ;;  %v1011_v53 = vpack.c.bf16 %v781_v47, %v781_v47  ;;  %v1169_v54 = vadd.f32 %v1168_v51, %v1167_v48  ;;  %v1170_v55 = vpop.f32.mrb[38].mxu1  ;;  %v1089_v56 = vpop.f32.mrb[39].mxu0 }
 0x142   :  { %v1090_v57 = vadd.f32 %v1089_v56, %v1088_v52  ;;  %v1171_v58 = vpop.f32.mrb[39].mxu1 }
 0x143   :  { %888 = vst.msk [vmem:[%s1597_s2 + $0x44] sm:$0xf] %vm870_vm0, %v1011_v53  ;;  %v751_v59 = vadd.f32 %v1169_v54, %v1087_v50  ;;  %v1172_v60 = vadd.f32 %v1171_v58, %v1170_v55 }
 0x145   :  { %v782_v61 = vmax.f32 %v751_v59, 0.0  ;;  %v754_v62 = vadd.f32 %v1172_v60, %v1090_v57 }
 0x146   :  { %v1091_v63 = vpop.f32.mrb[40].mxu0 }
 0x147   :  { %v1012_v0 = vpack.c.bf16 %v782_v61, %v782_v61  ;;  %v783_v1 = vmax.f32 %v754_v62, 0.0  ;;  %v1173_v2 = vpop.f32.mrb[40].mxu1  ;;  %v1092_v3 = vpop.f32.mrb[41].mxu0 }
 0x148   :  { %v1093_v4 = vadd.f32 %v1092_v3, %v1091_v63  ;;  %v1174_v5 = vpop.f32.mrb[41].mxu1  ;;  %v1094_v6 = vpop.f32.mrb[42].mxu0 }
 0x149   :  { %889 = vst.msk [vmem:[%s1597_s2 + $0x48] sm:$0xf] %vm870_vm0, %v1012_v0  ;;  %v1013_v7 = vpack.c.bf16 %v783_v1, %v783_v1  ;;  %v1175_v8 = vadd.f32 %v1174_v5, %v1173_v2  ;;  %v1176_v9 = vpop.f32.mrb[42].mxu1  ;;  %v1095_v10 = vpop.f32.mrb[43].mxu0 }
 0x14a   :  { %v1177_v11 = vpop.f32.mrb[43].mxu1 }
 0x14b   :  { %890 = vst.msk [vmem:[%s1597_s2 + $0x4c] sm:$0xf] %vm870_vm0, %v1013_v7  ;;  %v759_v12 = vadd.f32 %v1175_v8, %v1093_v4 }
 0x14d   :  { %v784_v13 = vmax.f32 %v759_v12, 0.0 }
 0x14f   :  { %v1014_v14 = vpack.c.bf16 %v784_v13, %v784_v13 }
 0x151   :  { %892 = vst.msk [vmem:[%s1597_s2 + $0x50] sm:$0x1] %vm891_vm1, %v1014_v14 }

// kernel: dqn_forward.6
= control target key start
LH: loop header
LB: loop body
LE: loop exit
PB: predicated region body
PF: predicated region fallthrough
CT: control target
= control target key end

     0   :  { %v1237_v34 = vmov 0.0   ;;  %vm1238_vm0 = vmmov 0   ;;  %vm506_vm1 = vcmask 523264   ;;  %vm858_vm2 = vcmask 519168   ;;  %s1565_s1 = inlined_call_operand.vmem [shape: bf16[576,64], index: 1, kind: input, shape index: {}]   ;;  %s1566_s0 = inlined_call_operand.vmem [shape: bf16[98,576], index: 0, kind: input, shape index: {}]   ;;  %s1567_s2 = inlined_call_operand.vmem [shape: bf16[98,64], index: 2, kind: output, shape index: {}]  }
   0x1   :  { %v1154_v0 = vld [vmem:[%s1565_s1 + $0x40] sm:$0xff]   ;;  %v1158_v4 = vld [vmem:[%s1565_s1 + $0x48] sm:$0xff]   ;;  %v1162_v8 = vld [vmem:[%s1565_s1 + $0x50] sm:$0xff]   ;;  %vm871_vm3 = vcmask 516096  }
   0x2   :  { %v1155_v1 = vld [vmem:[%s1565_s1 + $0xc0] sm:$0xff]   ;;  %981 = vmatprep.subr.bf16.mxu0 %v1154_v0  ;;  %v1159_v5 = vld [vmem:[%s1565_s1 + $0xc8] sm:$0xff]   ;;  %v1163_v9 = vld [vmem:[%s1565_s1 + $0xd0] sm:$0xff]  }
   0x3   :  { %v1156_v2 = vld [vmem:[%s1565_s1] sm:$0xff]   ;;  %1039 = vmatprep.subr.bf16.mxu1 %v1155_v1  ;;  %v1160_v6 = vld [vmem:[%s1565_s1 + $0x8] sm:$0xff]   ;;  %v1164_v10 = vld [vmem:[%s1565_s1 + $0x10] sm:$0xff]  }
   0x4   :  { %v1157_v3 = vld [vmem:[%s1565_s1 + $0x80] sm:$0xff]   ;;  %982 = vmatpush3.bf16.msra.mxu0 %v1156_v2  ;;  %v1161_v7 = vld [vmem:[%s1565_s1 + $0x88] sm:$0xff]   ;;  %v1165_v11 = vld [vmem:[%s1565_s1 + $0x90] sm:$0xff]  }
   0x5   :  { %1040 = vmatpush3.bf16.msra.mxu1 %v1157_v3  ;;  %983 = vmatprep.subr.bf16.mxu0 %v1158_v4  ;;  %v1166_v12 = vld [vmem:[%s1565_s1 + $0x58] sm:$0xff]   ;;  %v1170_v16 = vld [vmem:[%s1565_s1 + $0x60] sm:$0xff]   ;;  %v1174_v20 = vld [vmem:[%s1565_s1 + $0x68] sm:$0xff]  }
   0x6   :  { %1041 = vmatprep.subr.bf16.mxu1 %v1159_v5  ;;  %v1167_v13 = vld [vmem:[%s1565_s1 + $0xd8] sm:$0xff]   ;;  %v1171_v17 = vld [vmem:[%s1565_s1 + $0xe0] sm:$0xff]   ;;  %v1175_v21 = vld [vmem:[%s1565_s1 + $0xe8] sm:$0xff]  }
   0x7   :  { %v1168_v14 = vld [vmem:[%s1565_s1 + $0x18] sm:$0xff]   ;;  %v1172_v18 = vld [vmem:[%s1565_s1 + $0x20] sm:$0xff]   ;;  %v1176_v22 = vld [vmem:[%s1565_s1 + $0x28] sm:$0xff]  }
   0x8   :  { %984 = vmatpush3.bf16.msra.mxu0 %v1160_v6  ;;  %v1169_v15 = vld [vmem:[%s1565_s1 + $0x98] sm:$0xff]   ;;  %v1173_v19 = vld [vmem:[%s1565_s1 + $0xa0] sm:$0xff]   ;;  %v1177_v23 = vld [vmem:[%s1565_s1 + $0xa8] sm:$0xff]  }
   0x9   :  { %1042 = vmatpush3.bf16.msra.mxu1 %v1161_v7  ;;  %985 = vmatprep.subr.bf16.mxu0 %v1162_v8  ;;  %v1178_v24 = vld [vmem:[%s1565_s1 + $0x70] sm:$0xff]   ;;  %v1182_v28 = vld [vmem:[%s1565_s1 + $0x78] sm:$0xff]   ;;  %v1191_v36 = vld [vmem:[%s1566_s0 + $0xc] ss:$20 sps:$4 sm:$0xff]  }
   0xa   :  { %1043 = vmatprep.subr.bf16.mxu1 %v1163_v9  ;;  %v1179_v25 = vld [vmem:[%s1565_s1 + $0xf0] sm:$0xff]   ;;  %v1183_v29 = vld [vmem:[%s1565_s1 + $0xf8] sm:$0xff]   ;;  %v1192_v37 = vld [vmem:[%s1565_s1 + $0x100] sm:$0xff]   ;;  %648 = vmatprep.mubr.bf16.mxu1 %v1191_v36 }
   0xb   :  { %v1180_v26 = vld [vmem:[%s1565_s1 + $0x30] sm:$0xff]   ;;  %v1184_v30 = vld [vmem:[%s1565_s1 + $0x38] sm:$0xff]   ;;  %v1193_v38 = vld [vmem:[%s1566_s0 + $0x2c] ss:$20 sps:$4 sm:$0xff]  }
   0xc   :  { %986 = vmatpush3.bf16.msra.mxu0 %v1164_v10  ;;  %v1181_v27 = vld [vmem:[%s1565_s1 + $0xb0] sm:$0xff]   ;;  %v1185_v31 = vld [vmem:[%s1565_s1 + $0xb8] sm:$0xff]   ;;  %v1203_v43 = vld [vmem:[%s1565_s1 + $0x108] sm:$0xff]  }
   0xd   :  { %1044 = vmatpush3.bf16.msra.mxu1 %v1165_v11  ;;  %987 = vmatprep.subr.bf16.mxu0 %v1166_v12  ;;  %v1186_v32 = vld [vmem:[%s1566_s0] ss:$20 sps:$4 sm:$0xff]   ;;  %v1188_v33 = vld [vmem:[%s1566_s0 + $0x4] ss:$20 sps:$4 sm:$0xff]   ;;  %v1189_v35 = vld [vmem:[%s1566_s0 + $0x8] ss:$20 sps:$4 sm:$0xff]  }
   0xe   :  { %1045 = vmatprep.subr.bf16.mxu1 %v1167_v13  ;;  %560 = vmatprep.mubr.bf16.mxu0 %v1188_v33  ;;  %v1195_v39 = vld [vmem:[%s1566_s0 + $0x34] ss:$20 sps:$4 sm:$0xff]   ;;  %v1198_v41 = vld [vmem:[%s1566_s0 + $0x30] ss:$20 sps:$4 sm:$0xff]   ;;  %v1205_v47 = vld [vmem:[%s1566_s0 + $0x58] ss:$20 sps:$4 sm:$0xff]  }
   0xf   :  { %v1197_v40 = vld [vmem:[%s1566_s0 + $0x28] ss:$20 sps:$4 sm:$0xff]   ;;  %v1212_v45 = vld [vmem:[%s1565_s1 + $0x110] sm:$0xff]   ;;  %v1208_v49 = vld [vmem:[%s1566_s0 + $0x84] ss:$20 sps:$4 sm:$0xff]  }
  0x10   :  { %988 = vmatpush3.bf16.msra.mxu0 %v1168_v14  ;;  %v1199_v42 = vld [vmem:[%s1566_s0 + $0x54] ss:$20 sps:$4 sm:$0xff]   ;;  %v1201_v44 = vld [vmem:[%s1566_s0 + $0x5c] ss:$20 sps:$4 sm:$0xff]   ;;  %v1210_v51 = vld [vmem:[%s1566_s0 + $0x78] ss:$20 sps:$4 sm:$0xff]  }
  0x11   :  { %1046 = vmatpush3.bf16.msra.mxu1 %v1169_v15  ;;  %989 = vmatprep.subr.bf16.mxu0 %v1170_v16  ;;  %v1204_v46 = vld [vmem:[%s1566_s0 + $0x50] ss:$20 sps:$4 sm:$0xff]   ;;  %v1225_v50 = vld [vmem:[%s1565_s1 + $0x118] sm:$0xff]   ;;  %v1211_v52 = vld [vmem:[%s1566_s0 + $0x80] ss:$20 sps:$4 sm:$0xff]  }
  0x12   :  { %1047 = vmatprep.subr.bf16.mxu1 %v1171_v17  ;;  %v1206_v48 = vld [vmem:[%s1566_s0 + $0x7c] ss:$20 sps:$4 sm:$0xff]   ;;  %v1213_v53 = vld [vmem:[%s1566_s0 + $0xa4] ss:$20 sps:$4 sm:$0xff]   ;;  %v1215_v54 = vld [vmem:[%s1566_s0 + $0xac] ss:$20 sps:$4 sm:$0xff]  }
  0x13   :  { %v1217_v55 = vld [vmem:[%s1566_s0 + $0xa0] ss:$20 sps:$4 sm:$0xff]   ;;  %v1218_v56 = vld [vmem:[%s1566_s0 + $0xa8] ss:$20 sps:$4 sm:$0xff]   ;;  %v1224_v62 = vld [vmem:[%s1566_s0 + $0xd0] ss:$20 sps:$4 sm:$0xff]  }
  0x14   :  { %990 = vmatpush3.bf16.msra.mxu0 %v1172_v18  ;;  %v1219_v57 = vld [vmem:[%s1566_s0 + $0xcc] ss:$20 sps:$4 sm:$0xff]   ;;  %v1221_v58 = vld [vmem:[%s1566_s0 + $0xd4] ss:$20 sps:$4 sm:$0xff]   ;;  %v49_v60 = vld [vmem:[%s1566_s0 + $0xf8] sm:$0x11] }
  0x15   :  { %1048 = vmatpush3.bf16.msra.mxu1 %v1173_v19  ;;  %991 = vmatprep.subr.bf16.mxu0 %v1174_v20  ;;  %v48_v59 = vld [vmem:[%s1566_s0 + $0xf0] sm:$0x11]  ;;  %v1223_v61 = vld [vmem:[%s1566_s0 + $0xc8] ss:$20 sps:$4 sm:$0xff]   ;;  %v910_v0 = vcombine.high %v49_v60, %v49_v60  ;;  %v909_v2 = vcombine.low %v49_v60, %v49_v60  ;;  %v1232_v5 = vld [vmem:[%s1566_s0 + $0x38] ss:$20 sps:$4 sm:$0xff]  }
  0x16   :  { %1049 = vmatprep.subr.bf16.mxu1 %v1175_v21  ;;  %v908_v63 = vcombine.high %v48_v59, %v48_v59  ;;  %v907_v1 = vcombine.low %v48_v59, %v48_v59  ;;  %v1230_v3 = vld [vmem:[%s1566_s0 + $0x10] ss:$20 sps:$4 sm:$0xff]   ;;  %v1233_v6 = vld [vmem:[%s1566_s0 + $0xd8] ss:$20 sps:$4 sm:$0xff]   ;;  %v1234_v7 = vld [vmem:[%s1566_s0 + $0x60] ss:$20 sps:$4 sm:$0xff]  }
  0x17   :  { %v1231_v4 = vld [vmem:[%s1566_s0 + $0xb0] ss:$20 sps:$4 sm:$0xff]   ;;  %v1235_v8 = vld [vmem:[%s1566_s0 + $0x100] ss:$0 sps:$4 sm:$0x11]  }
  0x18   :  { %992 = vmatpush3.bf16.msra.mxu0 %v1176_v22  ;;  %v1236_v9 = vld [vmem:[%s1566_s0 + $0x88] ss:$20 sps:$4 sm:$0xff]  }
  0x19   :  { %1050 = vmatpush3.bf16.msra.mxu1 %v1177_v23  ;;  %993 = vmatprep.subr.bf16.mxu0 %v1178_v24 }
  0x1a   :  { %1051 = vmatprep.subr.bf16.mxu1 %v1179_v25 }
  0x1c   :  { %994 = vmatpush3.bf16.msra.mxu0 %v1180_v26 }
  0x1d   :  { %1052 = vmatpush3.bf16.msra.mxu1 %v1181_v27  ;;  %995 = vmatprep.subr.bf16.mxu0 %v1182_v28 }
  0x1e   :  { %1053 = vmatprep.subr.bf16.mxu1 %v1183_v29 }
  0x20   :  { %996 = vmatpush3.bf16.msra.mxu0 %v1184_v30 }
  0x21   :  { %1054 = vmatpush3.bf16.msra.mxu1 %v1185_v31  ;;  %1108 = vmatprep.subr.bf16.mxu0 %v1237_v34 }
  0x22   :  { %1144 = vmatprep.subr.bf16.mxu1 %v1237_v34 }
  0x23   :  { %561 = vmatmul.mubr.bf16.vlgmr.msra.gmra.mrb[0].mxu0 %v1186_v32 }
  0x24   :  { %649 = vmatmul.mubr.bf16.vlgmr.msra.gmra.mrb[0].mxu1 %v1189_v35  ;;  %1109 = vmatpush3.bf16.msra.mxu0 %v1192_v37 }
  0x25   :  { %568 = vmatprep.mubr.bf16.mxu0 %v1193_v38  ;;  %1148 = vmatpush3.bf16.msra.mxu1 %v1192_v37 }
  0x26   :  { %656 = vmatprep.mubr.bf16.mxu1 %v1195_v39  ;;  %1110 = vmatprep.subr.bf16.mxu0 %v1237_v34 }
  0x27   :  { %1145 = vmatprep.subr.bf16.mxu1 %v1237_v34 }
  0x28   :  { %1111 = vmatpush3.bf16.msra.mxu0 %v1203_v43 }
  0x29   :  { %1149 = vmatpush3.bf16.msra.mxu1 %v1203_v43  ;;  %1112 = vmatprep.subr.bf16.mxu0 %v1237_v34 }
  0x2a   :  { %1146 = vmatprep.subr.bf16.mxu1 %v1237_v34 }
  0x2b   :  { %569 = vmatmul.mubr.bf16.gmra.mrb[4].mxu0 %v1197_v40 }
  0x2c   :  { %657 = vmatmul.mubr.bf16.gmra.mrb[4].mxu1 %v1198_v41  ;;  %576 = vmatprep.mubr.bf16.mxu0 %v1199_v42 }
  0x2d   :  { %664 = vmatprep.mubr.bf16.mxu1 %v1201_v44  ;;  %1113 = vmatpush3.bf16.msra.mxu0 %v1212_v45 }
  0x2e   :  { %1150 = vmatpush3.bf16.msra.mxu1 %v1212_v45  ;;  %1114 = vmatprep.subr.bf16.mxu0 %v1237_v34 }
  0x2f   :  { %1147 = vmatprep.subr.bf16.mxu1 %v1237_v34 }
  0x31   :  { %1115 = vmatpush3.bf16.msra.mxu0 %v1225_v50 }
  0x32   :  { %1151 = vmatpush3.bf16.msra.mxu1 %v1225_v50 }
  0x33   :  { %577 = vmatmul.mubr.bf16.gmra.mrb[8].mxu0 %v1204_v46 }
  0x34   :  { %665 = vmatmul.mubr.bf16.gmra.mrb[8].mxu1 %v1205_v47  ;;  %584 = vmatprep.mubr.bf16.mxu0 %v1206_v48 }
  0x35   :  { %672 = vmatprep.mubr.bf16.mxu1 %v1208_v49 }
  0x3b   :  { %585 = vmatmul.mubr.bf16.gmra.mrb[12].mxu0 %v1210_v51 }
  0x3c   :  { %673 = vmatmul.mubr.bf16.gmra.mrb[12].mxu1 %v1211_v52  ;;  %592 = vmatprep.mubr.bf16.mxu0 %v1213_v53 }
  0x3d   :  { %680 = vmatprep.mubr.bf16.mxu1 %v1215_v54 }
  0x43   :  { %593 = vmatmul.mubr.bf16.gmra.mrb[16].mxu0 %v1217_v55 }
  0x44   :  { %681 = vmatmul.mubr.bf16.gmra.mrb[16].mxu1 %v1218_v56  ;;  %600 = vmatprep.mubr.bf16.mxu0 %v1219_v57 }
  0x45   :  { %688 = vmatprep.mubr.bf16.mxu1 %v1221_v58 }
  0x4b   :  { %601 = vmatmul.mubr.bf16.gmra.mrb[20].mxu0 %v1223_v61 }
  0x4c   :  { %689 = vmatmul.mubr.bf16.gmra.mrb[20].mxu1 %v1224_v62  ;;  %608 = vmatprep.mubr.bf16.mxu0 %v908_v63 }
  0x4d   :  { %696 = vmatprep.mubr.bf16.mxu1 %v910_v0 }
  0x53   :  { %609 = vmatmul.mubr.bf16.gmra.mrb[24].mxu0 %v907_v1 }
  0x54   :  { %697 = vmatmul.mubr.bf16.gmra.mrb[24].mxu1 %v909_v2  ;;  %1116 = vmatprep.mubr.msk.bf16.mxu0 %vm1238_vm0, %v1237_v34 }
  0x55   :  { %1132 = vmatprep.mubr.msk.bf16.mxu1 %vm1238_vm0, %v1237_v34 }
  0x5b   :  { %1117 = vmatmul.mubr.msk.bf16.vlgmr.msra.gmra.mrb[28].mxu0 %vm506_vm1, %v1230_v3 }
  0x5c   :  { %1133 = vmatmul.mubr.msk.bf16.vlgmr.msra.gmra.mrb[28].mxu1 %vm506_vm1, %v1231_v4  ;;  %1120 = vmatprep.mubr.msk.bf16.mxu0 %vm1238_vm0, %v1237_v34 }
  0x5d   :  { %1136 = vmatprep.mubr.msk.bf16.mxu1 %vm1238_vm0, %v1237_v34 }
  0x63   :  { %1121 = vmatmul.mubr.msk.bf16.gmra.mrb[32].mxu0 %vm506_vm1, %v1232_v5 }
  0x64   :  { %1137 = vmatmul.mubr.msk.bf16.gmra.mrb[32].mxu1 %vm506_vm1, %v1233_v6  ;;  %1124 = vmatprep.mubr.msk.bf16.mxu0 %vm1238_vm0, %v1237_v34 }
  0x65   :  { %1140 = vmatprep.mubr.msk.bf16.mxu1 %vm1238_vm0, %v1237_v34 }
  0x6b   :  { %1125 = vmatmul.mubr.msk.bf16.gmra.mrb[36].mxu0 %vm506_vm1, %v1234_v7 }
  0x6c   :  { %1141 = vmatmul.mubr.msk.bf16.gmra.mrb[36].mxu1 %vm506_vm1, %v1235_v8  ;;  %1128 = vmatprep.mubr.msk.bf16.mxu0 %vm1238_vm0, %v1237_v34 }
  0x73   :  { %1129 = vmatmul.mubr.msk.bf16.gmra.mrb[40].mxu0 %vm506_vm1, %v1236_v9 }
  0xf6   :  { %v997_v10 = vpop.f32.mrb[0].mxu0 }
  0xf7   :  { %v1055_v11 = vpop.f32.mrb[0].mxu1  ;;  %v998_v12 = vpop.f32.mrb[1].mxu0 }
  0xf8   :  { %v999_v13 = vadd.f32 %v998_v12, %v997_v10  ;;  %v1056_v14 = vpop.f32.mrb[1].mxu1  ;;  %v1000_v15 = vpop.f32.mrb[2].mxu0 }
  0xf9   :  { %v1057_v16 = vadd.f32 %v1056_v14, %v1055_v11  ;;  %v1058_v17 = vpop.f32.mrb[2].mxu1  ;;  %v1001_v18 = vpop.f32.mrb[3].mxu0 }
  0xfa   :  { %v1002_v19 = vadd.f32 %v1001_v18, %v1000_v15  ;;  %v1059_v20 = vpop.f32.mrb[3].mxu1 }
  0xfb   :  { %v1060_v21 = vadd.f32 %v1059_v20, %v1058_v17  ;;  %v1490_v22 = vadd.f32 %v1057_v16, %v999_v13 }
  0xfd   :  { %v1492_v23 = vadd.f32 %v1060_v21, %v1002_v19 }
  0xfe   :  { %v1003_v24 = vpop.f32.mrb[4].mxu0 }
  0xff   :  { %v1061_v25 = vpop.f32.mrb[4].mxu1  ;;  %v1004_v26 = vpop.f32.mrb[5].mxu0 }
 0x100   :  { %v1005_v27 = vadd.f32 %v1004_v26, %v1003_v24  ;;  %v1062_v28 = vpop.f32.mrb[5].mxu1  ;;  %v1006_v29 = vpop.f32.mrb[6].mxu0 }
 0x101   :  { %v1063_v30 = vadd.f32 %v1062_v28, %v1061_v25  ;;  %v1064_v31 = vpop.f32.mrb[6].mxu1  ;;  %v1007_v32 = vpop.f32.mrb[7].mxu0 }
 0x102   :  { %v1008_v33 = vadd.f32 %v1007_v32, %v1006_v29  ;;  %v1065_v34 = vpop.f32.mrb[7].mxu1 }
 0x103   :  { %v1066_v35 = vadd.f32 %v1065_v34, %v1064_v31  ;;  %v1494_v36 = vadd.f32 %v1063_v30, %v1005_v27 }
 0x105   :  { %v1496_v37 = vadd.f32 %v1066_v35, %v1008_v33 }
 0x106   :  { %v1009_v38 = vpop.f32.mrb[8].mxu0 }
 0x107   :  { %v1067_v39 = vpop.f32.mrb[8].mxu1  ;;  %v1010_v40 = vpop.f32.mrb[9].mxu0 }
 0x108   :  { %v1011_v41 = vadd.f32 %v1010_v40, %v1009_v38  ;;  %v1068_v42 = vpop.f32.mrb[9].mxu1  ;;  %v1012_v43 = vpop.f32.mrb[10].mxu0 }
 0x109   :  { %v1069_v44 = vadd.f32 %v1068_v42, %v1067_v39  ;;  %v1070_v45 = vpop.f32.mrb[10].mxu1  ;;  %v1013_v46 = vpop.f32.mrb[11].mxu0 }
 0x10a   :  { %v1014_v47 = vadd.f32 %v1013_v46, %v1012_v43  ;;  %v1071_v48 = vpop.f32.mrb[11].mxu1 }
 0x10b   :  { %v1072_v49 = vadd.f32 %v1071_v48, %v1070_v45  ;;  %v1498_v50 = vadd.f32 %v1069_v44, %v1011_v41 }
 0x10d   :  { %v1500_v51 = vadd.f32 %v1072_v49, %v1014_v47 }
 0x10e   :  { %v1015_v52 = vpop.f32.mrb[12].mxu0 }
 0x10f   :  { %v1073_v53 = vpop.f32.mrb[12].mxu1  ;;  %v1016_v54 = vpop.f32.mrb[13].mxu0 }
 0x110   :  { %v1017_v55 = vadd.f32 %v1016_v54, %v1015_v52  ;;  %v1074_v56 = vpop.f32.mrb[13].mxu1  ;;  %v1018_v57 = vpop.f32.mrb[14].mxu0 }
 0x111   :  { %v1075_v58 = vadd.f32 %v1074_v56, %v1073_v53  ;;  %v1076_v59 = vpop.f32.mrb[14].mxu1  ;;  %v1019_v60 = vpop.f32.mrb[15].mxu0 }
 0x112   :  { %v1020_v61 = vadd.f32 %v1019_v60, %v1018_v57  ;;  %v1077_v62 = vpop.f32.mrb[15].mxu1 }
 0x113   :  { %v1078_v63 = vadd.f32 %v1077_v62, %v1076_v59  ;;  %v1502_v0 = vadd.f32 %v1075_v58, %v1017_v55 }
 0x115   :  { %v1504_v1 = vadd.f32 %v1078_v63, %v1020_v61 }
 0x116   :  { %v1021_v2 = vpop.f32.mrb[16].mxu0 }
 0x117   :  { %v1079_v3 = vpop.f32.mrb[16].mxu1  ;;  %v1022_v4 = vpop.f32.mrb[17].mxu0 }
 0x118   :  { %v1023_v5 = vadd.f32 %v1022_v4, %v1021_v2  ;;  %v1080_v6 = vpop.f32.mrb[17].mxu1  ;;  %v1024_v7 = vpop.f32.mrb[18].mxu0 }
 0x119   :  { %v1081_v8 = vadd.f32 %v1080_v6, %v1079_v3  ;;  %v1082_v9 = vpop.f32.mrb[18].mxu1  ;;  %v1025_v10 = vpop.f32.mrb[19].mxu0 }
 0x11a   :  { %v1026_v11 = vadd.f32 %v1025_v10, %v1024_v7  ;;  %v1083_v12 = vpop.f32.mrb[19].mxu1 }
 0x11b   :  { %v1084_v13 = vadd.f32 %v1083_v12, %v1082_v9  ;;  %v683_v14 = vadd.f32 %v1081_v8, %v1023_v5 }
 0x11d   :  { %v686_v15 = vadd.f32 %v1084_v13, %v1026_v11 }
 0x11e   :  { %v1027_v16 = vpop.f32.mrb[20].mxu0 }
 0x11f   :  { %v1085_v17 = vpop.f32.mrb[20].mxu1  ;;  %v1028_v18 = vpop.f32.mrb[21].mxu0 }
 0x120   :  { %v1029_v19 = vadd.f32 %v1028_v18, %v1027_v16  ;;  %v1086_v20 = vpop.f32.mrb[21].mxu1  ;;  %v1030_v21 = vpop.f32.mrb[22].mxu0 }
 0x121   :  { %v1087_v24 = vadd.f32 %v1086_v20, %v1085_v17  ;;  %v1088_v25 = vpop.f32.mrb[22].mxu1  ;;  %v1031_v26 = vpop.f32.mrb[23].mxu0 }
 0x122   :  { %v1032_v27 = vadd.f32 %v1031_v26, %v1030_v21  ;;  %v1089_v28 = vpop.f32.mrb[23].mxu1 }
 0x123   :  { %v1090_v29 = vadd.f32 %v1089_v28, %v1088_v25  ;;  %v691_v30 = vadd.f32 %v1087_v24, %v1029_v19 }
 0x125   :  { %v694_v31 = vadd.f32 %v1090_v29, %v1032_v27 }
 0x126   :  { %v1033_v32 = vpop.f32.mrb[24].mxu0 }
 0x127   :  { %v1091_v33 = vpop.f32.mrb[24].mxu1  ;;  %v1034_v34 = vpop.f32.mrb[25].mxu0 }
 0x128   :  { %v1035_v35 = vadd.f32 %v1034_v34, %v1033_v32  ;;  %v1092_v38 = vpop.f32.mrb[25].mxu1  ;;  %v1036_v39 = vpop.f32.mrb[26].mxu0 }
 0x129   :  { %v1093_v40 = vadd.f32 %v1092_v38, %v1091_v33  ;;  %v1037_v41 = vpop.f32.mrb[27].mxu0  ;;  %v1094_v42 = vpop.f32.mrb[26].mxu1 }
 0x12a   :  { %v1095_v43 = vpop.f32.mrb[27].mxu1 }
 0x12b   :  { %v699_v44 = vadd.f32 %v1093_v40, %v1035_v35 }
 0x12e   :  { %v738_v45 = vpop.f32.mrb[28].mxu0 }
 0x12f   :  { %v739_v46 = vadd.f32 %v738_v45, %v1490_v22  ;;  %v770_v47 = vpop.f32.mrb[28].mxu1  ;;  %v1118_v48 = vpop.f32.mrb[29].mxu0 }
 0x130   :  { %v771_v49 = vadd.f32 %v770_v47, %v683_v14  ;;  %v1134_v52 = vpop.f32.mrb[29].mxu1  ;;  %v741_v53 = vpop.f32.mrb[30].mxu0 }
 0x131   :  { %v792_v54 = vmax.f32 %v739_v46, 0.0  ;;  %v742_v55 = vadd.f32 %v741_v53, %v1492_v23  ;;  %v773_v56 = vpop.f32.mrb[30].mxu1  ;;  %v1119_v57 = vpop.f32.mrb[31].mxu0 }
 0x132   :  { %v800_v58 = vmax.f32 %v771_v49, 0.0  ;;  %v774_v59 = vadd.f32 %v773_v56, %v686_v15  ;;  %v1135_v60 = vpop.f32.mrb[31].mxu1 }
 0x133   :  { %v968_v61 = vpack.c.bf16 %v792_v54, %v792_v54  ;;  %v793_v62 = vmax.f32 %v742_v55, 0.0 }
 0x134   :  { %v976_v63 = vpack.c.bf16 %v800_v58, %v800_v58  ;;  %v801_v2 = vmax.f32 %v774_v59, 0.0 }
 0x135   :  { %859 = vst.msk [vmem:[%s1567_s2] sm:$0xf] %vm858_vm2, %v968_v61  ;;  %v969_v22 = vpack.c.bf16 %v793_v62, %v793_v62 }
 0x136   :  { %867 = vst.msk [vmem:[%s1567_s2 + $0x20] sm:$0xf] %vm858_vm2, %v976_v63  ;;  %v977_v23 = vpack.c.bf16 %v801_v2, %v801_v2  ;;  %v746_v3 = vpop.f32.mrb[32].mxu0 }
 0x137   :  { %860 = vst.msk [vmem:[%s1567_s2 + $0x4] sm:$0xf] %vm858_vm2, %v969_v22  ;;  %v747_v4 = vadd.f32 %v746_v3, %v1494_v36  ;;  %v778_v5 = vpop.f32.mrb[32].mxu1  ;;  %v1122_v6 = vpop.f32.mrb[33].mxu0 }
 0x138   :  { %868 = vst.msk [vmem:[%s1567_s2 + $0x24] sm:$0xf] %vm858_vm2, %v977_v23  ;;  %v779_v7 = vadd.f32 %v778_v5, %v691_v30  ;;  %v1138_v8 = vpop.f32.mrb[33].mxu1  ;;  %v749_v9 = vpop.f32.mrb[34].mxu0 }
 0x139   :  { %v794_v10 = vmax.f32 %v747_v4, 0.0  ;;  %v750_v11 = vadd.f32 %v749_v9, %v1496_v37  ;;  %v781_v12 = vpop.f32.mrb[34].mxu1  ;;  %v1123_v13 = vpop.f32.mrb[35].mxu0 }
 0x13a   :  { %v802_v14 = vmax.f32 %v779_v7, 0.0  ;;  %v782_v15 = vadd.f32 %v781_v12, %v694_v31  ;;  %v1139_v16 = vpop.f32.mrb[35].mxu1 }
 0x13b   :  { %v970_v17 = vpack.c.bf16 %v794_v10, %v794_v10  ;;  %v795_v36 = vmax.f32 %v750_v11, 0.0 }
 0x13c   :  { %v978_v18 = vpack.c.bf16 %v802_v14, %v802_v14  ;;  %v803_v19 = vmax.f32 %v782_v15, 0.0 }
 0x13d   :  { %861 = vst.msk [vmem:[%s1567_s2 + $0x8] sm:$0xf] %vm858_vm2, %v970_v17  ;;  %v971_v20 = vpack.c.bf16 %v795_v36, %v795_v36 }
 0x13e   :  { %869 = vst.msk [vmem:[%s1567_s2 + $0x28] sm:$0xf] %vm858_vm2, %v978_v18  ;;  %v979_v37 = vpack.c.bf16 %v803_v19, %v803_v19  ;;  %v754_v21 = vpop.f32.mrb[36].mxu0 }
 0x13f   :  { %862 = vst.msk [vmem:[%s1567_s2 + $0xc] sm:$0xf] %vm858_vm2, %v971_v20  ;;  %v755_v24 = vadd.f32 %v754_v21, %v1498_v50  ;;  %v786_v25 = vpop.f32.mrb[36].mxu1  ;;  %v1126_v26 = vpop.f32.mrb[37].mxu0 }
 0x140   :  { %870 = vst.msk [vmem:[%s1567_s2 + $0x2c] sm:$0xf] %vm858_vm2, %v979_v37  ;;  %v787_v27 = vadd.f32 %v786_v25, %v699_v44  ;;  %v757_v28 = vpop.f32.mrb[38].mxu0  ;;  %v1142_v29 = vpop.f32.mrb[37].mxu1 }
 0x141   :  { %v796_v30 = vmax.f32 %v755_v24, 0.0  ;;  %v758_v31 = vadd.f32 %v757_v28, %v1500_v51  ;;  %v1127_v32 = vpop.f32.mrb[39].mxu0  ;;  %v789_v33 = vpop.f32.mrb[38].mxu1 }
 0x142   :  { %v804_v34 = vmax.f32 %v787_v27, 0.0  ;;  %v1143_v35 = vpop.f32.mrb[39].mxu1 }
 0x143   :  { %v972_v38 = vpack.c.bf16 %v796_v30, %v796_v30  ;;  %v797_v50 = vmax.f32 %v758_v31, 0.0 }
 0x144   :  { %v980_v39 = vpack.c.bf16 %v804_v34, %v804_v34 }
 0x145   :  { %863 = vst.msk [vmem:[%s1567_s2 + $0x10] sm:$0xf] %vm858_vm2, %v972_v38  ;;  %v973_v40 = vpack.c.bf16 %v797_v50, %v797_v50 }
 0x146   :  { %872 = vst.msk [vmem:[%s1567_s2 + $0x30] sm:$0x1] %vm871_vm3, %v980_v39  ;;  %v762_v41 = vpop.f32.mrb[40].mxu0 }
 0x147   :  { %864 = vst.msk [vmem:[%s1567_s2 + $0x14] sm:$0xf] %vm858_vm2, %v973_v40  ;;  %v763_v51 = vadd.f32 %v762_v41, %v1502_v0  ;;  %v1130_v42 = vpop.f32.mrb[41].mxu0 }
 0x148   :  { %v765_v43 = vpop.f32.mrb[42].mxu0 }
 0x149   :  { %v798_v44 = vmax.f32 %v763_v51, 0.0  ;;  %v766_v45 = vadd.f32 %v765_v43, %v1504_v1  ;;  %v1131_v46 = vpop.f32.mrb[43].mxu0 }
 0x14b   :  { %v974_v47 = vpack.c.bf16 %v798_v44, %v798_v44  ;;  %v799_v48 = vmax.f32 %v766_v45, 0.0 }
 0x14d   :  { %865 = vst.msk [vmem:[%s1567_s2 + $0x18] sm:$0xf] %vm858_vm2, %v974_v47  ;;  %v975_v49 = vpack.c.bf16 %v799_v48, %v799_v48 }
 0x14f   :  { %866 = vst.msk [vmem:[%s1567_s2 + $0x1c] sm:$0xf] %vm858_vm2, %v975_v49 }

// kernel: dqn_forward.7
= control target key start
LH: loop header
LB: loop body
LE: loop exit
PB: predicated region body
PF: predicated region fallthrough
CT: control target
= control target key end

     0   :  { %v1596_v32 = vlaneseq  ;;  %v14532_v33 = vmov 1966171168   ;;  %s19772_s0 = inlined_call_operand.vmem [shape: bf16[2,3136], index: 0, kind: input, shape index: {}]   ;;  %s19773_s1 = inlined_call_operand.vmem [shape: bf16[3136,1024], index: 1, kind: input, shape index: {}]   ;;  %s19774_s2 = inlined_call_operand.vmem [shape: f32[1,1024], index: 2, kind: input, shape index: {}]   ;;  %s19775_s3 = inlined_call_operand.vmem [shape: bf16[1024,6], index: 3, kind: input, shape index: {}]   ;;  %s19776_s4 = inlined_call_operand.vmem [shape: f32[1,6], index: 4, kind: input, shape index: {}]   ;;  %s19777_s5 = inlined_call_operand.hbm [shape: f32[2,6], index: 5, kind: output, shape index: {}]  }
   0x1   :  { %v26_v0 = vld [vmem:[%s19773_s1] sm:$0xff]  ;;  %v27_v2 = vld [vmem:[%s19773_s1 + $0x8] sm:$0xff]  ;;  %v1642_v34 = vunpack.c.l.s4 %v14532_v33 }
   0x2   :  { %v30_v1 = vld [vmem:[%s19773_s1 + $0x20] sm:$0xff]  ;;  %v31_v4 = vld [vmem:[%s19773_s1 + $0x28] sm:$0xff]  ;;  %v14631_v43 = vshrl.u32 %v1596_v32, 7 }
   0x3   :  { %v12514_v3 = vcombine.high %v26_v0, %v30_v1  ;;  %v12513_v5 = vcombine.low %v26_v0, %v30_v1  ;;  %v34_v6 = vld [vmem:[%s19773_s1 + $0x40] sm:$0xff]  ;;  %v12516_v8 = vcombine.high %v27_v2, %v31_v4  ;;  %v12515_v9 = vcombine.low %v27_v2, %v31_v4  ;;  %v35_v11 = vld [vmem:[%s19773_s1 + $0x48] sm:$0xff] }
   0x4   :  { %v38_v7 = vld [vmem:[%s19773_s1 + $0x60] sm:$0xff]  ;;  %v39_v12 = vld [vmem:[%s19773_s1 + $0x68] sm:$0xff]  ;;  %v1643_v44 = vunpack.c.0.s8 %v1642_v34 }
   0x5   :  { %v12522_v10 = vcombine.high %v34_v6, %v38_v7  ;;  %v42_v13 = vld [vmem:[%s19773_s1 + $0x80] sm:$0xff]  ;;  %9669 = vmatprep.subr.bf16.mxu0 %v12514_v3  ;;  %v12524_v14 = vcombine.high %v35_v11, %v39_v12  ;;  %v43_v16 = vld [vmem:[%s19773_s1 + $0x88] sm:$0xff]  ;;  %10202 = vmatprep.subr.bf16.mxu1 %v12516_v8  ;;  %v12521_v18 = vcombine.low %v34_v6, %v38_v7 }
   0x6   :  { %v46_v15 = vld [vmem:[%s19773_s1 + $0xa0] sm:$0xff]  ;;  %v47_v17 = vld [vmem:[%s19773_s1 + $0xa8] sm:$0xff]  ;;  %9670 = vmatpush1.bf16.msra.mxu0 %v12513_v5  ;;  %10203 = vmatpush1.bf16.msra.mxu1 %v12515_v9  ;;  %v12523_v19 = vcombine.low %v35_v11, %v39_v12  ;;  %v14646_v53 = vsub.s32 %v1643_v44, %v14631_v43 }
   0x7   :  { %9671 = vmatprep.subr.bf16.mxu0 %v12522_v10  ;;  %v12530_v20 = vcombine.high %v42_v13, %v46_v15  ;;  %10204 = vmatprep.subr.bf16.mxu1 %v12524_v14  ;;  %v12532_v21 = vcombine.high %v43_v16, %v47_v17  ;;  %v50_v22 = vld [vmem:[%s19773_s1 + $0xc0] sm:$0xff]  ;;  %v51_v24 = vld [vmem:[%s19773_s1 + $0xc8] sm:$0xff]  ;;  %v12529_v26 = vcombine.low %v42_v13, %v46_v15 }
   0x8   :  { %v54_v23 = vld [vmem:[%s19773_s1 + $0xe0] sm:$0xff]  ;;  %v55_v25 = vld [vmem:[%s19773_s1 + $0xe8] sm:$0xff]  ;;  %v12531_v27 = vcombine.low %v43_v16, %v47_v17 }
   0x9   :  { %v12538_v28 = vcombine.high %v50_v22, %v54_v23  ;;  %v12540_v29 = vcombine.high %v51_v24, %v55_v25  ;;  %v58_v30 = vld [vmem:[%s19773_s1 + $0x100] sm:$0xff]  ;;  %v59_v35 = vld [vmem:[%s19773_s1 + $0x108] sm:$0xff]  ;;  %v12537_v37 = vcombine.low %v50_v22, %v54_v23  ;;  %v12539_v38 = vcombine.low %v51_v24, %v55_v25 }
   0xa   :  { %9672 = vmatpush1.bf16.msra.mxu0 %v12521_v18  ;;  %10205 = vmatpush1.bf16.msra.mxu1 %v12523_v19  ;;  %v62_v31 = vld [vmem:[%s19773_s1 + $0x120] sm:$0xff]  ;;  %v63_v36 = vld [vmem:[%s19773_s1 + $0x128] sm:$0xff] }
   0xb   :  { %9673 = vmatprep.subr.bf16.mxu0 %v12530_v20  ;;  %10206 = vmatprep.subr.bf16.mxu1 %v12532_v21  ;;  %v12546_v39 = vcombine.high %v58_v30, %v62_v31  ;;  %v12548_v40 = vcombine.high %v59_v35, %v63_v36  ;;  %v66_v41 = vld [vmem:[%s19773_s1 + $0x140] sm:$0xff]  ;;  %v67_v45 = vld [vmem:[%s19773_s1 + $0x148] sm:$0xff]  ;;  %v12545_v47 = vcombine.low %v58_v30, %v62_v31 }
   0xc   :  { %v70_v42 = vld [vmem:[%s19773_s1 + $0x160] sm:$0xff]  ;;  %v71_v46 = vld [vmem:[%s19773_s1 + $0x168] sm:$0xff]  ;;  %v12547_v48 = vcombine.low %v59_v35, %v63_v36 }
   0xd   :  { %v12554_v49 = vcombine.high %v66_v41, %v70_v42  ;;  %v12556_v50 = vcombine.high %v67_v45, %v71_v46  ;;  %v74_v51 = vld [vmem:[%s19773_s1 + $0x180] sm:$0xff]  ;;  %v75_v54 = vld [vmem:[%s19773_s1 + $0x188] sm:$0xff]  ;;  %v12553_v56 = vcombine.low %v66_v41, %v70_v42  ;;  %v12555_v57 = vcombine.low %v67_v45, %v71_v46 }
   0xe   :  { %9674 = vmatpush1.bf16.msra.mxu0 %v12529_v26  ;;  %10207 = vmatpush1.bf16.msra.mxu1 %v12531_v27  ;;  %v78_v52 = vld [vmem:[%s19773_s1 + $0x1a0] sm:$0xff]  ;;  %v79_v55 = vld [vmem:[%s19773_s1 + $0x1a8] sm:$0xff] }
   0xf   :  { %9675 = vmatprep.subr.bf16.mxu0 %v12538_v28  ;;  %10208 = vmatprep.subr.bf16.mxu1 %v12540_v29  ;;  %v12562_v58 = vcombine.high %v74_v51, %v78_v52  ;;  %v14657_v59 = vld [vmem:[%s19772_s0] sm:$0xff]  ;;  %v12564_v60 = vcombine.high %v75_v54, %v79_v55  ;;  %v83_v0 = vld [vmem:[%s19773_s1 + $0x1c8] sm:$0xff]  ;;  %v12561_v2 = vcombine.low %v74_v51, %v78_v52 }
  0x10   :  { %v82_v61 = vld [vmem:[%s19773_s1 + $0x1c0] sm:$0xff]  ;;  %v14667_v63 = vrot.slane %v14657_v59, %v14646_v53  ;;  %v87_v1 = vld [vmem:[%s19773_s1 + $0x1e8] sm:$0xff]  ;;  %v12563_v4 = vcombine.low %v75_v54, %v79_v55 }
  0x11   :  { %v86_v62 = vld [vmem:[%s19773_s1 + $0x1e0] sm:$0xff]  ;;  %v12572_v6 = vcombine.high %v83_v0, %v87_v1  ;;  %v91_v10 = vld [vmem:[%s19773_s1 + $0x208] sm:$0xff]  ;;  %v12571_v13 = vcombine.low %v83_v0, %v87_v1 }
  0x12   :  { %9676 = vmatpush1.bf16.msra.mxu0 %v12537_v37  ;;  %10209 = vmatpush1.bf16.msra.mxu1 %v12539_v38  ;;  %v1655_v3 = vcombine.high %v14667_v63, %v14667_v63  ;;  %v12570_v5 = vcombine.high %v82_v61, %v86_v62  ;;  %v90_v7 = vld [vmem:[%s19773_s1 + $0x200] sm:$0xff]  ;;  %v95_v11 = vld [vmem:[%s19773_s1 + $0x228] sm:$0xff]  ;;  %v12569_v12 = vcombine.low %v82_v61, %v86_v62 }
  0x13   :  { %9677 = vmatprep.subr.bf16.mxu0 %v12546_v39  ;;  %10210 = vmatprep.subr.bf16.mxu1 %v12548_v40  ;;  %v94_v8 = vld [vmem:[%s19773_s1 + $0x220] sm:$0xff]  ;;  %v12580_v15 = vcombine.high %v91_v10, %v95_v11  ;;  %v99_v18 = vld [vmem:[%s19773_s1 + $0x248] sm:$0xff]  ;;  %v12579_v21 = vcombine.low %v91_v10, %v95_v11 }
  0x14   :  { %v14684_v9 = vrot.slane %v1655_v3, %v14646_v53  ;;  %v12578_v14 = vcombine.high %v90_v7, %v94_v8  ;;  %v98_v16 = vld [vmem:[%s19773_s1 + $0x240] sm:$0xff]  ;;  %v103_v19 = vld [vmem:[%s19773_s1 + $0x268] sm:$0xff]  ;;  %v12577_v20 = vcombine.low %v90_v7, %v94_v8 }
  0x15   :  { %v102_v17 = vld [vmem:[%s19773_s1 + $0x260] sm:$0xff]  ;;  %v12588_v23 = vcombine.high %v99_v18, %v103_v19  ;;  %v107_v26 = vld [vmem:[%s19773_s1 + $0x288] sm:$0xff]  ;;  %v12587_v29 = vcombine.low %v99_v18, %v103_v19 }
  0x16   :  { %9678 = vmatpush1.bf16.msra.mxu0 %v12545_v47  ;;  %10211 = vmatpush1.bf16.msra.mxu1 %v12547_v48  ;;  %v12586_v22 = vcombine.high %v98_v16, %v102_v17  ;;  %v106_v24 = vld [vmem:[%s19773_s1 + $0x280] sm:$0xff]  ;;  %v111_v27 = vld [vmem:[%s19773_s1 + $0x2a8] sm:$0xff]  ;;  %v12585_v28 = vcombine.low %v98_v16, %v102_v17 }
  0x17   :  { %9679 = vmatprep.subr.bf16.mxu0 %v12554_v49  ;;  %10212 = vmatprep.subr.bf16.mxu1 %v12556_v50  ;;  %v110_v25 = vld [vmem:[%s19773_s1 + $0x2a0] sm:$0xff]  ;;  %v12596_v31 = vcombine.high %v107_v26, %v111_v27  ;;  %v115_v34 = vld [vmem:[%s19773_s1 + $0x2c8] sm:$0xff]  ;;  %v12595_v37 = vcombine.low %v107_v26, %v111_v27 }
  0x18   :  { %9701 = vmatprep.mubr.bf16.mxu0 %v14684_v9  ;;  %10234 = vmatprep.mubr.bf16.mxu1 %v14684_v9  ;;  %v12594_v30 = vcombine.high %v106_v24, %v110_v25  ;;  %v114_v32 = vld [vmem:[%s19773_s1 + $0x2c0] sm:$0xff]  ;;  %v119_v35 = vld [vmem:[%s19773_s1 + $0x2e8] sm:$0xff]  ;;  %v12593_v36 = vcombine.low %v106_v24, %v110_v25 }
  0x19   :  { %v118_v33 = vld [vmem:[%s19773_s1 + $0x2e0] sm:$0xff]  ;;  %v12604_v39 = vcombine.high %v115_v34, %v119_v35  ;;  %v123_v42 = vld [vmem:[%s19773_s1 + $0x308] sm:$0xff]  ;;  %v12603_v46 = vcombine.low %v115_v34, %v119_v35 }
  0x1a   :  { %9680 = vmatpush1.bf16.msra.mxu0 %v12553_v56  ;;  %10213 = vmatpush1.bf16.msra.mxu1 %v12555_v57  ;;  %v12602_v38 = vcombine.high %v114_v32, %v118_v33  ;;  %v122_v40 = vld [vmem:[%s19773_s1 + $0x300] sm:$0xff]  ;;  %v127_v44 = vld [vmem:[%s19773_s1 + $0x328] sm:$0xff]  ;;  %v12601_v45 = vcombine.low %v114_v32, %v118_v33  ;;  %v14820_v33 = vcombine.high %v14684_v9, %v14684_v9 }
  0x1b   :  { %9681 = vmatprep.subr.bf16.mxu0 %v12562_v58  ;;  %10214 = vmatprep.subr.bf16.mxu1 %v12564_v60  ;;  %v126_v41 = vld [vmem:[%s19773_s1 + $0x320] sm:$0xff]  ;;  %v12612_v48 = vcombine.high %v123_v42, %v127_v44  ;;  %v131_v51 = vld [vmem:[%s19773_s1 + $0x348] sm:$0xff]  ;;  %v12611_v55 = vcombine.low %v123_v42, %v127_v44 }
  0x1c   :  { %v12610_v47 = vcombine.high %v122_v40, %v126_v41  ;;  %v130_v49 = vld [vmem:[%s19773_s1 + $0x340] sm:$0xff]  ;;  %v135_v52 = vld [vmem:[%s19773_s1 + $0x368] sm:$0xff]  ;;  %v12609_v54 = vcombine.low %v122_v40, %v126_v41 }
  0x1d   :  { %v134_v50 = vld [vmem:[%s19773_s1 + $0x360] sm:$0xff]  ;;  %v12620_v57 = vcombine.high %v131_v51, %v135_v52  ;;  %v139_v61 = vld [vmem:[%s19773_s1 + $0x388] sm:$0xff]  ;;  %v12619_v1 = vcombine.low %v131_v51, %v135_v52 }
  0x1e   :  { %9682 = vmatpush1.bf16.msra.mxu0 %v12561_v2  ;;  %10215 = vmatpush1.bf16.msra.mxu1 %v12563_v4  ;;  %v12618_v56 = vcombine.high %v130_v49, %v134_v50  ;;  %v138_v58 = vld [vmem:[%s19773_s1 + $0x380] sm:$0xff]  ;;  %v143_v62 = vld [vmem:[%s19773_s1 + $0x3a8] sm:$0xff]  ;;  %v12617_v0 = vcombine.low %v130_v49, %v134_v50 }
  0x1f   :  { %9683 = vmatprep.subr.bf16.mxu0 %v12570_v5  ;;  %10216 = vmatprep.subr.bf16.mxu1 %v12572_v6  ;;  %v142_v60 = vld [vmem:[%s19773_s1 + $0x3a0] sm:$0xff]  ;;  %v12628_v3 = vcombine.high %v139_v61, %v143_v62  ;;  %v147_v6 = vld [vmem:[%s19773_s1 + $0x3c8] sm:$0xff]  ;;  %v12627_v10 = vcombine.low %v139_v61, %v143_v62 }
  0x20   :  { %v12626_v2 = vcombine.high %v138_v58, %v142_v60  ;;  %v146_v4 = vld [vmem:[%s19773_s1 + $0x3c0] sm:$0xff]  ;;  %v151_v7 = vld [vmem:[%s19773_s1 + $0x3e8] sm:$0xff]  ;;  %v12625_v8 = vcombine.low %v138_v58, %v142_v60 }
  0x21   :  { %v150_v5 = vld [vmem:[%s19773_s1 + $0x3e0] sm:$0xff]  ;;  %v159_v16 = vld [vmem:[%s19773_s1 + $0x428] sm:$0xff]  ;;  %v12635_v18 = vcombine.low %v147_v6, %v151_v7 }
  0x22   :  { %9684 = vmatpush1.bf16.msra.mxu0 %v12569_v12  ;;  %10217 = vmatpush1.bf16.msra.mxu1 %v12571_v13  ;;  %v12634_v11 = vcombine.high %v146_v4, %v150_v5  ;;  %v12636_v12 = vcombine.high %v147_v6, %v151_v7  ;;  %v154_v13 = vld [vmem:[%s19773_s1 + $0x400] sm:$0xff]  ;;  %v12633_v17 = vcombine.low %v146_v4, %v150_v5  ;;  %v163_v24 = vld [vmem:[%s19773_s1 + $0x448] sm:$0xff] }
  0x23   :  { %9685 = vmatprep.subr.bf16.mxu0 %v12578_v14  ;;  %10218 = vmatprep.subr.bf16.mxu1 %v12580_v15  ;;  %v158_v14 = vld [vmem:[%s19773_s1 + $0x420] sm:$0xff]  ;;  %v155_v15 = vld [vmem:[%s19773_s1 + $0x408] sm:$0xff] }
  0x24   :  { %v12642_v19 = vcombine.high %v154_v13, %v158_v14  ;;  %v167_v25 = vld [vmem:[%s19773_s1 + $0x468] sm:$0xff]  ;;  %v12641_v26 = vcombine.low %v154_v13, %v158_v14  ;;  %v12643_v27 = vcombine.low %v155_v15, %v159_v16 }
  0x25   :  { %v175_v32 = vld [vmem:[%s19773_s1 + $0x4a8] sm:$0xff]  ;;  %v12651_v35 = vcombine.low %v163_v24, %v167_v25 }
  0x26   :  { %9686 = vmatpush1.bf16.msra.mxu0 %v12577_v20  ;;  %10219 = vmatpush1.bf16.msra.mxu1 %v12579_v21  ;;  %v12644_v20 = vcombine.high %v155_v15, %v159_v16  ;;  %v162_v21 = vld [vmem:[%s19773_s1 + $0x440] sm:$0xff]  ;;  %v183_v41 = vld [vmem:[%s19773_s1 + $0x4e8] sm:$0xff] }
  0x27   :  { %9687 = vmatprep.subr.bf16.mxu0 %v12586_v22  ;;  %10220 = vmatprep.subr.bf16.mxu1 %v12588_v23  ;;  %v166_v22 = vld [vmem:[%s19773_s1 + $0x460] sm:$0xff]  ;;  %v14798_v23 = vrot.slane %v14667_v63, %v14646_v53  ;;  %v191_v50 = vld [vmem:[%s19773_s1 + $0x528] sm:$0xff] }
  0x28   :  { %v174_v63 = vld [vmem:[%s19773_s1 + $0x4a0] sm:$0xff]  ;;  %v12649_v34 = vcombine.low %v162_v21, %v166_v22  ;;  %v199_v60 = vld [vmem:[%s19773_s1 + $0x568] sm:$0xff] }
  0x29   :  { %v207_v5 = vld [vmem:[%s19773_s1 + $0x5a8] sm:$0xff] }
  0x2a   :  { %9688 = vmatpush1.bf16.msra.mxu0 %v12585_v28  ;;  %10221 = vmatpush1.bf16.msra.mxu1 %v12587_v29  ;;  %v12650_v28 = vcombine.high %v162_v21, %v166_v22  ;;  %v170_v29 = vld [vmem:[%s19773_s1 + $0x480] sm:$0xff]  ;;  %v215_v14 = vld [vmem:[%s19773_s1 + $0x5e8] sm:$0xff] }
  0x2b   :  { %9689 = vmatprep.subr.bf16.mxu0 %v12594_v30  ;;  %10222 = vmatprep.subr.bf16.mxu1 %v12596_v31  ;;  %v171_v30 = vld [vmem:[%s19773_s1 + $0x488] sm:$0xff]  ;;  %v12652_v31 = vcombine.high %v163_v24, %v167_v25  ;;  %v12657_v42 = vcombine.low %v170_v29, %v174_v63 }
  0x2c   :  { %v12660_v40 = vcombine.high %v171_v30, %v175_v32  ;;  %v12659_v44 = vcombine.low %v171_v30, %v175_v32  ;;  %v223_v22 = vld [vmem:[%s19773_s1 + $0x628] sm:$0xff] }
  0x2d   :  { %v231_v30 = vld [vmem:[%s19773_s1 + $0x668] sm:$0xff] }
  0x2e   :  { %9690 = vmatpush1.bf16.msra.mxu0 %v12593_v36  ;;  %10223 = vmatpush1.bf16.msra.mxu1 %v12595_v37  ;;  %v12658_v36 = vcombine.high %v170_v29, %v174_v63  ;;  %v178_v37 = vld [vmem:[%s19773_s1 + $0x4c0] sm:$0xff]  ;;  %v227_v29 = vld [vmem:[%s19773_s1 + $0x648] sm:$0xff] }
  0x2f   :  { %9691 = vmatprep.subr.bf16.mxu0 %v12602_v38  ;;  %10224 = vmatprep.subr.bf16.mxu1 %v12604_v39  ;;  %v182_v38 = vld [vmem:[%s19773_s1 + $0x4e0] sm:$0xff]  ;;  %v179_v39 = vld [vmem:[%s19773_s1 + $0x4c8] sm:$0xff] }
  0x30   :  { %v12668_v49 = vcombine.high %v179_v39, %v183_v41  ;;  %v12665_v51 = vcombine.low %v178_v37, %v182_v38  ;;  %v12667_v52 = vcombine.low %v179_v39, %v183_v41  ;;  %v239_v39 = vld [vmem:[%s19773_s1 + $0x6a8] sm:$0xff]  ;;  %v12715_v41 = vcombine.low %v227_v29, %v231_v30 }
  0x32   :  { %9692 = vmatpush1.bf16.msra.mxu0 %v12601_v45  ;;  %10225 = vmatpush1.bf16.msra.mxu1 %v12603_v46  ;;  %v12666_v45 = vcombine.high %v178_v37, %v182_v38  ;;  %v186_v46 = vld [vmem:[%s19773_s1 + $0x500] sm:$0xff]  ;;  %v235_v37 = vld [vmem:[%s19773_s1 + $0x688] sm:$0xff]  ;;  %v12716_v38 = vcombine.high %v227_v29, %v231_v30 }
  0x33   :  { %9693 = vmatprep.subr.bf16.mxu0 %v12610_v47  ;;  %10226 = vmatprep.subr.bf16.mxu1 %v12612_v48  ;;  %v190_v47 = vld [vmem:[%s19773_s1 + $0x520] sm:$0xff]  ;;  %v187_v48 = vld [vmem:[%s19773_s1 + $0x508] sm:$0xff] }
  0x34   :  { %v12676_v58 = vcombine.high %v187_v48, %v191_v50  ;;  %v12673_v61 = vcombine.low %v186_v46, %v190_v47  ;;  %v12675_v62 = vcombine.low %v187_v48, %v191_v50  ;;  %v247_v48 = vld [vmem:[%s19773_s1 + $0x6e8] sm:$0xff]  ;;  %v12723_v50 = vcombine.low %v235_v37, %v239_v39 }
  0x35   :  { %v287_v29 = vld [vmem:[%s19773_s1 + $0x828] sm:$0xff] }
  0x36   :  { %9694 = vmatpush1.bf16.msra.mxu0 %v12609_v54  ;;  %10227 = vmatpush1.bf16.msra.mxu1 %v12611_v55  ;;  %v12674_v54 = vcombine.high %v186_v46, %v190_v47  ;;  %v194_v55 = vld [vmem:[%s19773_s1 + $0x540] sm:$0xff]  ;;  %v243_v46 = vld [vmem:[%s19773_s1 + $0x6c8] sm:$0xff]  ;;  %v12724_v47 = vcombine.high %v235_v37, %v239_v39 }
  0x37   :  { %9695 = vmatprep.subr.bf16.mxu0 %v12618_v56  ;;  %10228 = vmatprep.subr.bf16.mxu1 %v12620_v57  ;;  %v198_v56 = vld [vmem:[%s19773_s1 + $0x560] sm:$0xff]  ;;  %v195_v57 = vld [vmem:[%s19773_s1 + $0x548] sm:$0xff] }
  0x38   :  { %v12684_v4 = vcombine.high %v195_v57, %v199_v60  ;;  %v12681_v6 = vcombine.low %v194_v55, %v198_v56  ;;  %v12683_v7 = vcombine.low %v195_v57, %v199_v60  ;;  %v255_v57 = vld [vmem:[%s19773_s1 + $0x728] sm:$0xff]  ;;  %v12731_v60 = vcombine.low %v243_v46, %v247_v48 }
  0x3a   :  { %9696 = vmatpush1.bf16.msra.mxu0 %v12617_v0  ;;  %10229 = vmatpush1.bf16.msra.mxu1 %v12619_v1  ;;  %v12682_v0 = vcombine.high %v194_v55, %v198_v56  ;;  %v202_v1 = vld [vmem:[%s19773_s1 + $0x580] sm:$0xff]  ;;  %v251_v55 = vld [vmem:[%s19773_s1 + $0x708] sm:$0xff]  ;;  %v12732_v56 = vcombine.high %v243_v46, %v247_v48 }
  0x3b   :  { %9697 = vmatprep.subr.bf16.mxu0 %v12626_v2  ;;  %10230 = vmatprep.subr.bf16.mxu1 %v12628_v3  ;;  %v206_v2 = vld [vmem:[%s19773_s1 + $0x5a0] sm:$0xff]  ;;  %v203_v3 = vld [vmem:[%s19773_s1 + $0x588] sm:$0xff] }
  0x3c   :  { %v12692_v13 = vcombine.high %v203_v3, %v207_v5  ;;  %v12689_v15 = vcombine.low %v202_v1, %v206_v2  ;;  %v12691_v16 = vcombine.low %v203_v3, %v207_v5  ;;  %v263_v3 = vld [vmem:[%s19773_s1 + $0x768] sm:$0xff]  ;;  %v12739_v5 = vcombine.low %v251_v55, %v255_v57 }
  0x3e   :  { %9698 = vmatpush1.bf16.msra.mxu0 %v12625_v8  ;;  %10231 = vmatpush1.bf16.msra.mxu1 %v12627_v10  ;;  %v12690_v8 = vcombine.high %v202_v1, %v206_v2  ;;  %v210_v10 = vld [vmem:[%s19773_s1 + $0x5c0] sm:$0xff]  ;;  %v259_v1 = vld [vmem:[%s19773_s1 + $0x748] sm:$0xff]  ;;  %v12740_v2 = vcombine.high %v251_v55, %v255_v57 }
  0x3f   :  { %9699 = vmatprep.subr.bf16.mxu0 %v12634_v11  ;;  %10232 = vmatprep.subr.bf16.mxu1 %v12636_v12  ;;  %v214_v11 = vld [vmem:[%s19773_s1 + $0x5e0] sm:$0xff]  ;;  %v211_v12 = vld [vmem:[%s19773_s1 + $0x5c8] sm:$0xff] }
  0x40   :  { %v12700_v21 = vcombine.high %v211_v12, %v215_v14  ;;  %v12697_v24 = vcombine.low %v210_v10, %v214_v11  ;;  %v12699_v25 = vcombine.low %v211_v12, %v215_v14  ;;  %v271_v12 = vld [vmem:[%s19773_s1 + $0x7a8] sm:$0xff]  ;;  %v12747_v14 = vcombine.low %v259_v1, %v263_v3 }
  0x42   :  { %9700 = vmatpush1.bf16.msra.mxu0 %v12633_v17  ;;  %10233 = vmatpush1.bf16.msra.mxu1 %v12635_v18  ;;  %v12698_v17 = vcombine.high %v210_v10, %v214_v11  ;;  %v218_v18 = vld [vmem:[%s19773_s1 + $0x600] sm:$0xff]  ;;  %v267_v10 = vld [vmem:[%s19773_s1 + $0x788] sm:$0xff]  ;;  %v12748_v11 = vcombine.high %v259_v1, %v263_v3 }
  0x43   :  { %9710 = vmatprep.subr.bf16.mxu0 %v12642_v19  ;;  %10243 = vmatprep.subr.bf16.mxu1 %v12644_v20  ;;  %v222_v19 = vld [vmem:[%s19773_s1 + $0x620] sm:$0xff]  ;;  %v219_v20 = vld [vmem:[%s19773_s1 + $0x608] sm:$0xff] }
  0x44   :  { %v12708_v63 = vcombine.high %v219_v20, %v223_v22  ;;  %v12707_v32 = vcombine.low %v219_v20, %v223_v22  ;;  %v279_v20 = vld [vmem:[%s19773_s1 + $0x7e8] sm:$0xff] }
  0x45   :  { %9702 = vmatmul.mubr.bf16.vlgmr.msra.gmra.mrb[0].mxu0 %v14798_v23  ;;  %10235 = vmatmul.mubr.bf16.vlgmr.msra.gmra.mrb[0].mxu1 %v14798_v23 }
  0x46   :  { %9711 = vmatpush1.bf16.msra.mxu0 %v12641_v26  ;;  %10244 = vmatpush1.bf16.msra.mxu1 %v12643_v27  ;;  %v12706_v26 = vcombine.high %v218_v18, %v222_v19  ;;  %v226_v27 = vld [vmem:[%s19773_s1 + $0x640] sm:$0xff] }
  0x47   :  { %9712 = vmatprep.subr.bf16.mxu0 %v12650_v28  ;;  %10245 = vmatprep.subr.bf16.mxu1 %v12652_v31  ;;  %v230_v28 = vld [vmem:[%s19773_s1 + $0x660] sm:$0xff]  ;;  %v12705_v31 = vcombine.low %v218_v18, %v222_v19  ;;  %v275_v18 = vld [vmem:[%s19773_s1 + $0x7c8] sm:$0xff]  ;;  %v12756_v19 = vcombine.high %v267_v10, %v271_v12 }
  0x48   :  { %9742 = vmatprep.mubr.bf16.mxu0 %v14820_v33  ;;  %10275 = vmatprep.mubr.bf16.mxu1 %v14820_v33 }
  0x4a   :  { %9713 = vmatpush1.bf16.msra.mxu0 %v12649_v34  ;;  %10246 = vmatpush1.bf16.msra.mxu1 %v12651_v35  ;;  %v12714_v34 = vcombine.high %v226_v27, %v230_v28  ;;  %v234_v35 = vld [vmem:[%s19773_s1 + $0x680] sm:$0xff] }
  0x4b   :  { %9714 = vmatprep.subr.bf16.mxu0 %v12658_v36  ;;  %10247 = vmatprep.subr.bf16.mxu1 %v12660_v40  ;;  %v238_v36 = vld [vmem:[%s19773_s1 + $0x6a0] sm:$0xff]  ;;  %v12713_v40 = vcombine.low %v226_v27, %v230_v28  ;;  %v283_v28 = vld [vmem:[%s19773_s1 + $0x808] sm:$0xff] }
  0x4c   :  { %v286_v27 = vld [vmem:[%s19773_s1 + $0x820] sm:$0xff]  ;;  %v12772_v37 = vcombine.high %v283_v28, %v287_v29 }
  0x4e   :  { %9715 = vmatpush1.bf16.msra.mxu0 %v12657_v42  ;;  %10248 = vmatpush1.bf16.msra.mxu1 %v12659_v44  ;;  %v12722_v42 = vcombine.high %v234_v35, %v238_v36  ;;  %v242_v44 = vld [vmem:[%s19773_s1 + $0x6c0] sm:$0xff] }
  0x4f   :  { %9716 = vmatprep.subr.bf16.mxu0 %v12666_v45  ;;  %10249 = vmatprep.subr.bf16.mxu1 %v12668_v49  ;;  %v246_v45 = vld [vmem:[%s19773_s1 + $0x6e0] sm:$0xff]  ;;  %v12721_v49 = vcombine.low %v234_v35, %v238_v36  ;;  %v291_v36 = vld [vmem:[%s19773_s1 + $0x848] sm:$0xff] }
  0x50   :  { %v294_v35 = vld [vmem:[%s19773_s1 + $0x860] sm:$0xff] }
  0x52   :  { %9717 = vmatpush1.bf16.msra.mxu0 %v12665_v51  ;;  %10250 = vmatpush1.bf16.msra.mxu1 %v12667_v52  ;;  %v12730_v51 = vcombine.high %v242_v44, %v246_v45  ;;  %v250_v52 = vld [vmem:[%s19773_s1 + $0x700] sm:$0xff] }
  0x53   :  { %9718 = vmatprep.subr.bf16.mxu0 %v12674_v54  ;;  %10251 = vmatprep.subr.bf16.mxu1 %v12676_v58  ;;  %v254_v54 = vld [vmem:[%s19773_s1 + $0x720] sm:$0xff]  ;;  %v12729_v58 = vcombine.low %v242_v44, %v246_v45 }
  0x56   :  { %9719 = vmatpush1.bf16.msra.mxu0 %v12673_v61  ;;  %10252 = vmatpush1.bf16.msra.mxu1 %v12675_v62  ;;  %v12738_v61 = vcombine.high %v250_v52, %v254_v54  ;;  %v258_v62 = vld [vmem:[%s19773_s1 + $0x740] sm:$0xff] }
  0x57   :  { %9720 = vmatprep.subr.bf16.mxu0 %v12682_v0  ;;  %10253 = vmatprep.subr.bf16.mxu1 %v12684_v4  ;;  %v262_v0 = vld [vmem:[%s19773_s1 + $0x760] sm:$0xff]  ;;  %v12737_v4 = vcombine.low %v250_v52, %v254_v54 }
  0x5a   :  { %9721 = vmatpush1.bf16.msra.mxu0 %v12681_v6  ;;  %10254 = vmatpush1.bf16.msra.mxu1 %v12683_v7  ;;  %v12746_v6 = vcombine.high %v258_v62, %v262_v0  ;;  %v266_v7 = vld [vmem:[%s19773_s1 + $0x780] sm:$0xff] }
  0x5b   :  { %9722 = vmatprep.subr.bf16.mxu0 %v12690_v8  ;;  %10255 = vmatprep.subr.bf16.mxu1 %v12692_v13  ;;  %v270_v8 = vld [vmem:[%s19773_s1 + $0x7a0] sm:$0xff]  ;;  %v12745_v13 = vcombine.low %v258_v62, %v262_v0 }
  0x5c   :  { %v12753_v22 = vcombine.low %v266_v7, %v270_v8 }
  0x5e   :  { %9723 = vmatpush1.bf16.msra.mxu0 %v12689_v15  ;;  %10256 = vmatpush1.bf16.msra.mxu1 %v12691_v16  ;;  %v12754_v15 = vcombine.high %v266_v7, %v270_v8  ;;  %v274_v16 = vld [vmem:[%s19773_s1 + $0x7c0] sm:$0xff] }
  0x5f   :  { %9724 = vmatprep.subr.bf16.mxu0 %v12698_v17  ;;  %10257 = vmatprep.subr.bf16.mxu1 %v12700_v21  ;;  %v278_v17 = vld [vmem:[%s19773_s1 + $0x7e0] sm:$0xff]  ;;  %v1640_v21 = vcombine.high %v14657_v59, %v14657_v59  ;;  %v12764_v59 = vcombine.high %v275_v18, %v279_v20 }
  0x60   :  { %v12761_v30 = vcombine.low %v274_v16, %v278_v17 }
  0x62   :  { %9725 = vmatpush1.bf16.msra.mxu0 %v12697_v24  ;;  %10258 = vmatpush1.bf16.msra.mxu1 %v12699_v25  ;;  %v12755_v24 = vcombine.low %v267_v10, %v271_v12  ;;  %v12762_v25 = vcombine.high %v274_v16, %v278_v17 }
  0x63   :  { %9726 = vmatprep.subr.bf16.mxu0 %v12706_v26  ;;  %10259 = vmatprep.subr.bf16.mxu1 %v12708_v63  ;;  %v282_v26 = vld [vmem:[%s19773_s1 + $0x800] sm:$0xff]  ;;  %v14997_v63 = vrot.slane %v1640_v21, %v14646_v53 }
  0x65   :  { %v1656_v39 = vcombine.high %v14997_v63, %v14997_v63 }
  0x66   :  { %9727 = vmatpush1.bf16.msra.mxu0 %v12705_v31  ;;  %10260 = vmatpush1.bf16.msra.mxu1 %v12707_v32  ;;  %v12763_v31 = vcombine.low %v275_v18, %v279_v20  ;;  %v12770_v32 = vcombine.high %v282_v26, %v286_v27 }
  0x67   :  { %9728 = vmatprep.subr.bf16.mxu0 %v12714_v34  ;;  %10261 = vmatprep.subr.bf16.mxu1 %v12716_v38  ;;  %v290_v34 = vld [vmem:[%s19773_s1 + $0x840] sm:$0xff]  ;;  %v295_v38 = vld [vmem:[%s19773_s1 + $0x868] sm:$0xff] }
  0x6a   :  { %9729 = vmatpush1.bf16.msra.mxu0 %v12713_v40  ;;  %10262 = vmatpush1.bf16.msra.mxu1 %v12715_v41  ;;  %v15015_v40 = vcombine.high %v14798_v23, %v14798_v23  ;;  %v12769_v41 = vcombine.low %v282_v26, %v286_v27 }
  0x6b   :  { %9730 = vmatprep.subr.bf16.mxu0 %v12722_v42  ;;  %10263 = vmatprep.subr.bf16.mxu1 %v12724_v47 }
  0x6e   :  { %9731 = vmatpush1.bf16.msra.mxu0 %v12721_v49  ;;  %10264 = vmatpush1.bf16.msra.mxu1 %v12723_v50 }
  0x6f   :  { %9732 = vmatprep.subr.bf16.mxu0 %v12730_v51  ;;  %10265 = vmatprep.subr.bf16.mxu1 %v12732_v56 }
  0x72   :  { %9733 = vmatpush1.bf16.msra.mxu0 %v12729_v58  ;;  %10266 = vmatpush1.bf16.msra.mxu1 %v12731_v60 }
  0x73   :  { %9734 = vmatprep.subr.bf16.mxu0 %v12738_v61  ;;  %10267 = vmatprep.subr.bf16.mxu1 %v12740_v2 }
  0x76   :  { %9735 = vmatpush1.bf16.msra.mxu0 %v12737_v4  ;;  %10268 = vmatpush1.bf16.msra.mxu1 %v12739_v5 }
  0x77   :  { %9736 = vmatprep.subr.bf16.mxu0 %v12746_v6  ;;  %10269 = vmatprep.subr.bf16.mxu1 %v12748_v11 }
  0x7a   :  { %9737 = vmatpush1.bf16.msra.mxu0 %v12745_v13  ;;  %10270 = vmatpush1.bf16.msra.mxu1 %v12747_v14 }
  0x7b   :  { %9738 = vmatprep.subr.bf16.mxu0 %v12754_v15  ;;  %10271 = vmatprep.subr.bf16.mxu1 %v12756_v19 }
  0x7e   :  { %9739 = vmatpush1.bf16.msra.mxu0 %v12753_v22  ;;  %10272 = vmatpush1.bf16.msra.mxu1 %v12755_v24 }
  0x7f   :  { %9740 = vmatprep.subr.bf16.mxu0 %v12762_v25  ;;  %10273 = vmatprep.subr.bf16.mxu1 %v12764_v59 }
  0x82   :  { %9741 = vmatpush1.bf16.msra.mxu0 %v12761_v30 }
  0x83   :  { %10 = vsyncpa [#allocation3], 0  ;;  %10274 = vmatpush1.bf16.msra.mxu1 %v12763_v31  ;;  %9751 = vmatprep.subr.bf16.mxu0 %v12770_v32  ;;  %v12771_v42 = vcombine.low %v283_v28, %v287_v29  ;;  %v12778_v44 = vcombine.high %v290_v34, %v294_v35  ;;  %v12780_v45 = vcombine.high %v291_v36, %v295_v38  ;;  %v298_v46 = vld [vmem:[%s19773_s1 + $0x880] sm:$0xff]  ;;  %v299_v49 = vld [vmem:[%s19773_s1 + $0x888] sm:$0xff]  ;;  %vm9665_vm0 = vcmask 523264  }
  0x84   :  { %10284 = vmatprep.subr.bf16.mxu1 %v12772_v37  ;;  %v302_v47 = vld [vmem:[%s19773_s1 + $0x8a0] sm:$0xff]  ;;  %v15024_v48 = vrot.slane %v1656_v39, %v14646_v53  ;;  %v303_v50 = vld [vmem:[%s19773_s1 + $0x8a8] sm:$0xff]  ;;  %v12777_v51 = vcombine.low %v290_v34, %v294_v35  ;;  %v12779_v52 = vcombine.low %v291_v36, %v295_v38  ;;  %vm12496_vm1 = vcmask 41984  }
  0x85   :  { %9743 = vmatmul.mubr.bf16.vlgmr.msra.gmra.mrb[0].mxu0 %v15015_v40  ;;  %v12786_v54 = vcombine.high %v298_v46, %v302_v47  ;;  %v12788_v55 = vcombine.high %v299_v49, %v303_v50  ;;  %v306_v56 = vld [vmem:[%s19773_s1 + $0x8c0] sm:$0xff]  ;;  %v307_v58 = vld [vmem:[%s19773_s1 + $0x8c8] sm:$0xff]  ;;  %v12785_v61 = vcombine.low %v298_v46, %v302_v47  ;;  %v12787_v62 = vcombine.low %v299_v49, %v303_v50 }
  0x86   :  { %9752 = vmatpush1.bf16.msra.mxu0 %v12769_v41  ;;  %10276 = vmatmul.mubr.bf16.vlgmr.msra.gmra.mrb[0].mxu1 %v15015_v40  ;;  %v310_v57 = vld [vmem:[%s19773_s1 + $0x8e0] sm:$0xff]  ;;  %v311_v60 = vld [vmem:[%s19773_s1 + $0x8e8] sm:$0xff] }
  0x87   :  { %10285 = vmatpush1.bf16.msra.mxu1 %v12771_v42  ;;  %9753 = vmatprep.subr.bf16.mxu0 %v12778_v44  ;;  %v12794_v0 = vcombine.high %v306_v56, %v310_v57  ;;  %v12796_v1 = vcombine.high %v307_v58, %v311_v60  ;;  %v314_v2 = vld [vmem:[%s19773_s1 + $0x900] sm:$0xff]  ;;  %v315_v4 = vld [vmem:[%s19773_s1 + $0x908] sm:$0xff]  ;;  %v12793_v6 = vcombine.low %v306_v56, %v310_v57 }
  0x88   :  { %10286 = vmatprep.subr.bf16.mxu1 %v12780_v45  ;;  %9783 = vmatprep.mubr.bf16.mxu0 %v15024_v48  ;;  %v318_v3 = vld [vmem:[%s19773_s1 + $0x920] sm:$0xff]  ;;  %v319_v5 = vld [vmem:[%s19773_s1 + $0x928] sm:$0xff]  ;;  %v12795_v7 = vcombine.low %v307_v58, %v311_v60 }
  0x89   :  { %10316 = vmatprep.mubr.bf16.mxu1 %v15024_v48  ;;  %v12802_v8 = vcombine.high %v314_v2, %v318_v3  ;;  %v12804_v10 = vcombine.high %v315_v4, %v319_v5  ;;  %v322_v11 = vld [vmem:[%s19773_s1 + $0x940] sm:$0xff]  ;;  %v323_v13 = vld [vmem:[%s19773_s1 + $0x948] sm:$0xff]  ;;  %v12801_v15 = vcombine.low %v314_v2, %v318_v3  ;;  %v12803_v16 = vcombine.low %v315_v4, %v319_v5 }
  0x8a   :  { %9754 = vmatpush1.bf16.msra.mxu0 %v12777_v51  ;;  %v326_v12 = vld [vmem:[%s19773_s1 + $0x960] sm:$0xff]  ;;  %v327_v14 = vld [vmem:[%s19773_s1 + $0x968] sm:$0xff] }
  0x8b   :  { %10287 = vmatpush1.bf16.msra.mxu1 %v12779_v52  ;;  %9755 = vmatprep.subr.bf16.mxu0 %v12786_v54  ;;  %v12810_v17 = vcombine.high %v322_v11, %v326_v12  ;;  %v12812_v18 = vcombine.high %v323_v13, %v327_v14  ;;  %v330_v19 = vld [vmem:[%s19773_s1 + $0x980] sm:$0xff]  ;;  %v331_v21 = vld [vmem:[%s19773_s1 + $0x988] sm:$0xff]  ;;  %v12809_v24 = vcombine.low %v322_v11, %v326_v12 }
  0x8c   :  { %10288 = vmatprep.subr.bf16.mxu1 %v12788_v55  ;;  %v334_v20 = vld [vmem:[%s19773_s1 + $0x9a0] sm:$0xff]  ;;  %v335_v22 = vld [vmem:[%s19773_s1 + $0x9a8] sm:$0xff]  ;;  %v12811_v25 = vcombine.low %v323_v13, %v327_v14 }
  0x8d   :  { %v12818_v26 = vcombine.high %v330_v19, %v334_v20  ;;  %v12820_v27 = vcombine.high %v331_v21, %v335_v22  ;;  %v338_v28 = vld [vmem:[%s19773_s1 + $0x9c0] sm:$0xff]  ;;  %v339_v29 = vld [vmem:[%s19773_s1 + $0x9c8] sm:$0xff]  ;;  %v12817_v31 = vcombine.low %v330_v19, %v334_v20  ;;  %v12819_v32 = vcombine.low %v331_v21, %v335_v22 }
  0x8e   :  { %9756 = vmatpush1.bf16.msra.mxu0 %v12785_v61  ;;  %v342_v59 = vld [vmem:[%s19773_s1 + $0x9e0] sm:$0xff]  ;;  %v343_v30 = vld [vmem:[%s19773_s1 + $0x9e8] sm:$0xff] }
  0x8f   :  { %10289 = vmatpush1.bf16.msra.mxu1 %v12787_v62  ;;  %9757 = vmatprep.subr.bf16.mxu0 %v12794_v0  ;;  %v12826_v34 = vcombine.high %v338_v28, %v342_v59  ;;  %v12828_v35 = vcombine.high %v339_v29, %v343_v30  ;;  %v346_v36 = vld [vmem:[%s19773_s1 + $0xa00] sm:$0xff]  ;;  %v347_v38 = vld [vmem:[%s19773_s1 + $0xa08] sm:$0xff]  ;;  %v12825_v41 = vcombine.low %v338_v28, %v342_v59 }
  0x90   :  { %10290 = vmatprep.subr.bf16.mxu1 %v12796_v1  ;;  %v350_v37 = vld [vmem:[%s19773_s1 + $0xa20] sm:$0xff]  ;;  %v351_v39 = vld [vmem:[%s19773_s1 + $0xa28] sm:$0xff]  ;;  %v12827_v42 = vcombine.low %v339_v29, %v343_v30 }
  0x91   :  { %v12834_v44 = vcombine.high %v346_v36, %v350_v37  ;;  %v12836_v45 = vcombine.high %v347_v38, %v351_v39  ;;  %v354_v46 = vld [vmem:[%s19773_s1 + $0xa40] sm:$0xff]  ;;  %v355_v49 = vld [vmem:[%s19773_s1 + $0xa48] sm:$0xff]  ;;  %v12833_v51 = vcombine.low %v346_v36, %v350_v37  ;;  %v12835_v52 = vcombine.low %v347_v38, %v351_v39 }
  0x92   :  { %9758 = vmatpush1.bf16.msra.mxu0 %v12793_v6  ;;  %v358_v47 = vld [vmem:[%s19773_s1 + $0xa60] sm:$0xff]  ;;  %v359_v50 = vld [vmem:[%s19773_s1 + $0xa68] sm:$0xff] }
  0x93   :  { %10291 = vmatpush1.bf16.msra.mxu1 %v12795_v7  ;;  %9759 = vmatprep.subr.bf16.mxu0 %v12802_v8  ;;  %v12842_v54 = vcombine.high %v354_v46, %v358_v47  ;;  %v12844_v55 = vcombine.high %v355_v49, %v359_v50  ;;  %v362_v56 = vld [vmem:[%s19773_s1 + $0xa80] sm:$0xff]  ;;  %v363_v58 = vld [vmem:[%s19773_s1 + $0xa88] sm:$0xff]  ;;  %v12841_v61 = vcombine.low %v354_v46, %v358_v47 }
  0x94   :  { %10292 = vmatprep.subr.bf16.mxu1 %v12804_v10  ;;  %v366_v57 = vld [vmem:[%s19773_s1 + $0xaa0] sm:$0xff]  ;;  %v367_v60 = vld [vmem:[%s19773_s1 + $0xaa8] sm:$0xff]  ;;  %v12843_v62 = vcombine.low %v355_v49, %v359_v50 }
  0x95   :  { %v12850_v0 = vcombine.high %v362_v56, %v366_v57  ;;  %v12852_v1 = vcombine.high %v363_v58, %v367_v60  ;;  %v370_v2 = vld [vmem:[%s19773_s1 + $0xac0] sm:$0xff]  ;;  %v371_v4 = vld [vmem:[%s19773_s1 + $0xac8] sm:$0xff]  ;;  %v12849_v6 = vcombine.low %v362_v56, %v366_v57  ;;  %v12851_v7 = vcombine.low %v363_v58, %v367_v60 }
  0x96   :  { %9760 = vmatpush1.bf16.msra.mxu0 %v12801_v15  ;;  %v374_v3 = vld [vmem:[%s19773_s1 + $0xae0] sm:$0xff]  ;;  %v375_v5 = vld [vmem:[%s19773_s1 + $0xae8] sm:$0xff]  ;;  %v15212_v58 = vrot.slane %v14997_v63, %v14646_v53 }
  0x97   :  { %10293 = vmatpush1.bf16.msra.mxu1 %v12803_v16  ;;  %9761 = vmatprep.subr.bf16.mxu0 %v12810_v17  ;;  %v12858_v8 = vcombine.high %v370_v2, %v374_v3  ;;  %v12860_v10 = vcombine.high %v371_v4, %v375_v5  ;;  %v378_v11 = vld [vmem:[%s19773_s1 + $0xb00] sm:$0xff]  ;;  %v379_v13 = vld [vmem:[%s19773_s1 + $0xb08] sm:$0xff]  ;;  %v12857_v15 = vcombine.low %v370_v2, %v374_v3 }
  0x98   :  { %10294 = vmatprep.subr.bf16.mxu1 %v12812_v18  ;;  %v382_v12 = vld [vmem:[%s19773_s1 + $0xb20] sm:$0xff]  ;;  %v383_v14 = vld [vmem:[%s19773_s1 + $0xb28] sm:$0xff]  ;;  %v12859_v16 = vcombine.low %v371_v4, %v375_v5  ;;  %v15228_v4 = vcombine.high %v15024_v48, %v15024_v48 }
  0x99   :  { %v12866_v17 = vcombine.high %v378_v11, %v382_v12  ;;  %v12868_v18 = vcombine.high %v379_v13, %v383_v14  ;;  %v386_v19 = vld [vmem:[%s19773_s1 + $0xb40] sm:$0xff]  ;;  %v387_v21 = vld [vmem:[%s19773_s1 + $0xb48] sm:$0xff] }
  0x9a   :  { %9762 = vmatpush1.bf16.msra.mxu0 %v12809_v24  ;;  %v390_v20 = vld [vmem:[%s19773_s1 + $0xb60] sm:$0xff]  ;;  %v391_v22 = vld [vmem:[%s19773_s1 + $0xb68] sm:$0xff]  ;;  %v12865_v24 = vcombine.low %v378_v11, %v382_v12 }
  0x9b   :  { %10295 = vmatpush1.bf16.msra.mxu1 %v12811_v25  ;;  %9763 = vmatprep.subr.bf16.mxu0 %v12818_v26  ;;  %v12867_v25 = vcombine.low %v379_v13, %v383_v14  ;;  %v12874_v26 = vcombine.high %v386_v19, %v390_v20  ;;  %v394_v28 = vld [vmem:[%s19773_s1 + $0xb80] sm:$0xff]  ;;  %v395_v29 = vld [vmem:[%s19773_s1 + $0xb88] sm:$0xff] }
  0x9c   :  { %10296 = vmatprep.subr.bf16.mxu1 %v12820_v27  ;;  %v12876_v27 = vcombine.high %v387_v21, %v391_v22  ;;  %v398_v59 = vld [vmem:[%s19773_s1 + $0xba0] sm:$0xff]  ;;  %v399_v30 = vld [vmem:[%s19773_s1 + $0xba8] sm:$0xff] }
  0x9d   :  { %v402_v36 = vld [vmem:[%s19773_s1 + $0xbc0] sm:$0xff]  ;;  %v403_v38 = vld [vmem:[%s19773_s1 + $0xbc8] sm:$0xff] }
  0x9e   :  { %9764 = vmatpush1.bf16.msra.mxu0 %v12817_v31  ;;  %v12873_v31 = vcombine.low %v386_v19, %v390_v20  ;;  %v406_v37 = vld [vmem:[%s19773_s1 + $0xbe0] sm:$0xff]  ;;  %v407_v39 = vld [vmem:[%s19773_s1 + $0xbe8] sm:$0xff] }
  0x9f   :  { %10297 = vmatpush1.bf16.msra.mxu1 %v12819_v32  ;;  %9765 = vmatprep.subr.bf16.mxu0 %v12826_v34  ;;  %v12875_v32 = vcombine.low %v387_v21, %v391_v22  ;;  %v12882_v34 = vcombine.high %v394_v28, %v398_v59  ;;  %v410_v46 = vld [vmem:[%s19773_s1 + $0xc00] sm:$0xff]  ;;  %v411_v49 = vld [vmem:[%s19773_s1 + $0xc08] sm:$0xff] }
  0xa0   :  { %10298 = vmatprep.subr.bf16.mxu1 %v12828_v35  ;;  %v12884_v35 = vcombine.high %v395_v29, %v399_v30  ;;  %v414_v47 = vld [vmem:[%s19773_s1 + $0xc20] sm:$0xff]  ;;  %v415_v50 = vld [vmem:[%s19773_s1 + $0xc28] sm:$0xff] }
  0xa1   :  { %v418_v56 = vld [vmem:[%s19773_s1 + $0xc40] sm:$0xff]  ;;  %v419_v60 = vld [vmem:[%s19773_s1 + $0xc48] sm:$0xff] }
  0xa2   :  { %9766 = vmatpush1.bf16.msra.mxu0 %v12825_v41  ;;  %v12881_v41 = vcombine.low %v394_v28, %v398_v59  ;;  %v422_v57 = vld [vmem:[%s19773_s1 + $0xc60] sm:$0xff]  ;;  %v427_v5 = vld [vmem:[%s19773_s1 + $0xc88] sm:$0xff] }
  0xa3   :  { %10299 = vmatpush1.bf16.msra.mxu1 %v12827_v42  ;;  %9767 = vmatprep.subr.bf16.mxu0 %v12834_v44  ;;  %v12883_v42 = vcombine.low %v395_v29, %v399_v30  ;;  %v12890_v44 = vcombine.high %v402_v36, %v406_v37  ;;  %v426_v63 = vld [vmem:[%s19773_s1 + $0xc80] sm:$0xff]  ;;  %v435_v14 = vld [vmem:[%s19773_s1 + $0xcc8] sm:$0xff] }
  0xa4   :  { %10300 = vmatprep.subr.bf16.mxu1 %v12836_v45  ;;  %v12892_v45 = vcombine.high %v403_v38, %v407_v39  ;;  %v430_v3 = vld [vmem:[%s19773_s1 + $0xca0] sm:$0xff]  ;;  %v443_v22 = vld [vmem:[%s19773_s1 + $0xd08] sm:$0xff] }
  0xa5   :  { %v434_v12 = vld [vmem:[%s19773_s1 + $0xcc0] sm:$0xff]  ;;  %v451_v30 = vld [vmem:[%s19773_s1 + $0xd48] sm:$0xff] }
  0xa6   :  { %9768 = vmatpush1.bf16.msra.mxu0 %v12833_v51  ;;  %v12889_v51 = vcombine.low %v402_v36, %v406_v37  ;;  %v438_v13 = vld [vmem:[%s19773_s1 + $0xce0] sm:$0xff] }
  0xa7   :  { %10301 = vmatpush1.bf16.msra.mxu1 %v12835_v52  ;;  %9769 = vmatprep.subr.bf16.mxu0 %v12842_v54  ;;  %v12891_v52 = vcombine.low %v403_v38, %v407_v39  ;;  %v12898_v54 = vcombine.high %v410_v46, %v414_v47  ;;  %v442_v20 = vld [vmem:[%s19773_s1 + $0xd00] sm:$0xff]  ;;  %v459_v39 = vld [vmem:[%s19773_s1 + $0xd88] sm:$0xff] }
  0xa8   :  { %10302 = vmatprep.subr.bf16.mxu1 %v12844_v55  ;;  %v12900_v55 = vcombine.high %v411_v49, %v415_v50  ;;  %v446_v21 = vld [vmem:[%s19773_s1 + $0xd20] sm:$0xff] }
  0xa9   :  { %v450_v59 = vld [vmem:[%s19773_s1 + $0xd40] sm:$0xff] }
  0xaa   :  { %9770 = vmatpush1.bf16.msra.mxu0 %v12841_v61  ;;  %v423_v61 = vld [vmem:[%s19773_s1 + $0xc68] sm:$0xff]  ;;  %v454_v29 = vld [vmem:[%s19773_s1 + $0xd60] sm:$0xff] }
  0xab   :  { %10303 = vmatpush1.bf16.msra.mxu1 %v12843_v62  ;;  %9771 = vmatprep.subr.bf16.mxu0 %v12850_v0  ;;  %v12897_v62 = vcombine.low %v410_v46, %v414_v47  ;;  %v12899_v0 = vcombine.low %v411_v49, %v415_v50  ;;  %v12908_v2 = vcombine.high %v419_v60, %v423_v61  ;;  %v458_v37 = vld [vmem:[%s19773_s1 + $0xd80] sm:$0xff]  ;;  %v467_v50 = vld [vmem:[%s19773_s1 + $0xdc8] sm:$0xff] }
  0xac   :  { %10304 = vmatprep.subr.bf16.mxu1 %v12852_v1  ;;  %v12906_v1 = vcombine.high %v418_v56, %v422_v57  ;;  %v462_v38 = vld [vmem:[%s19773_s1 + $0xda0] sm:$0xff] }
  0xad   :  { %v466_v47 = vld [vmem:[%s19773_s1 + $0xdc0] sm:$0xff] }
  0xae   :  { %9772 = vmatpush1.bf16.msra.mxu0 %v12849_v6  ;;  %v431_v6 = vld [vmem:[%s19773_s1 + $0xca8] sm:$0xff]  ;;  %v470_v49 = vld [vmem:[%s19773_s1 + $0xde0] sm:$0xff] }
  0xaf   :  { %10305 = vmatpush1.bf16.msra.mxu1 %v12851_v7  ;;  %9773 = vmatprep.subr.bf16.mxu0 %v12858_v8  ;;  %v12905_v7 = vcombine.low %v418_v56, %v422_v57  ;;  %v12907_v8 = vcombine.low %v419_v60, %v423_v61  ;;  %v12916_v11 = vcombine.high %v427_v5, %v431_v6  ;;  %v474_v57 = vld [vmem:[%s19773_s1 + $0xe00] sm:$0xff]  ;;  %v475_v61 = vld [vmem:[%s19773_s1 + $0xe08] sm:$0xff] }
  0xb0   :  { %10306 = vmatprep.subr.bf16.mxu1 %v12860_v10  ;;  %v12914_v10 = vcombine.high %v426_v63, %v430_v3  ;;  %v478_v60 = vld [vmem:[%s19773_s1 + $0xe20] sm:$0xff] }
  0xb2   :  { %9774 = vmatpush1.bf16.msra.mxu0 %v12857_v15  ;;  %v439_v15 = vld [vmem:[%s19773_s1 + $0xce8] sm:$0xff] }
  0xb3   :  { %10307 = vmatpush1.bf16.msra.mxu1 %v12859_v16  ;;  %9775 = vmatprep.subr.bf16.mxu0 %v12866_v17  ;;  %v12913_v16 = vcombine.low %v426_v63, %v430_v3  ;;  %v12915_v17 = vcombine.low %v427_v5, %v431_v6  ;;  %v12924_v19 = vcombine.high %v435_v14, %v439_v15  ;;  %v482_v3 = vld [vmem:[%s19773_s1 + $0xe40] sm:$0xff]  ;;  %v483_v6 = vld [vmem:[%s19773_s1 + $0xe48] sm:$0xff] }
  0xb4   :  { %10308 = vmatprep.subr.bf16.mxu1 %v12868_v18  ;;  %v12922_v18 = vcombine.high %v434_v12, %v438_v13  ;;  %v486_v5 = vld [vmem:[%s19773_s1 + $0xe60] sm:$0xff] }
  0xb6   :  { %9776 = vmatpush1.bf16.msra.mxu0 %v12865_v24  ;;  %v447_v24 = vld [vmem:[%s19773_s1 + $0xd28] sm:$0xff] }
  0xb7   :  { %10309 = vmatpush1.bf16.msra.mxu1 %v12867_v25  ;;  %9777 = vmatprep.subr.bf16.mxu0 %v12874_v26  ;;  %v12921_v25 = vcombine.low %v434_v12, %v438_v13  ;;  %v12923_v26 = vcombine.low %v435_v14, %v439_v15  ;;  %v12932_v28 = vcombine.high %v443_v22, %v447_v24  ;;  %v490_v13 = vld [vmem:[%s19773_s1 + $0xe80] sm:$0xff]  ;;  %v491_v15 = vld [vmem:[%s19773_s1 + $0xe88] sm:$0xff] }
  0xb8   :  { %10310 = vmatprep.subr.bf16.mxu1 %v12876_v27  ;;  %v12930_v27 = vcombine.high %v442_v20, %v446_v21  ;;  %v494_v14 = vld [vmem:[%s19773_s1 + $0xea0] sm:$0xff] }
  0xba   :  { %9778 = vmatpush1.bf16.msra.mxu0 %v12873_v31  ;;  %v455_v31 = vld [vmem:[%s19773_s1 + $0xd68] sm:$0xff] }
  0xbb   :  { %10311 = vmatpush1.bf16.msra.mxu1 %v12875_v32  ;;  %9779 = vmatprep.subr.bf16.mxu0 %v12882_v34  ;;  %v12929_v32 = vcombine.low %v442_v20, %v446_v21  ;;  %v12931_v34 = vcombine.low %v443_v22, %v447_v24  ;;  %v12940_v36 = vcombine.high %v451_v30, %v455_v31  ;;  %v498_v21 = vld [vmem:[%s19773_s1 + $0xec0] sm:$0xff]  ;;  %v499_v24 = vld [vmem:[%s19773_s1 + $0xec8] sm:$0xff] }
  0xbc   :  { %10312 = vmatprep.subr.bf16.mxu1 %v12884_v35  ;;  %v12938_v35 = vcombine.high %v450_v59, %v454_v29  ;;  %v502_v22 = vld [vmem:[%s19773_s1 + $0xee0] sm:$0xff] }
  0xbe   :  { %9780 = vmatpush1.bf16.msra.mxu0 %v12881_v41  ;;  %v463_v41 = vld [vmem:[%s19773_s1 + $0xda8] sm:$0xff] }
  0xbf   :  { %10313 = vmatpush1.bf16.msra.mxu1 %v12883_v42  ;;  %9781 = vmatprep.subr.bf16.mxu0 %v12890_v44  ;;  %v12937_v42 = vcombine.low %v450_v59, %v454_v29  ;;  %v12939_v44 = vcombine.low %v451_v30, %v455_v31  ;;  %v12948_v46 = vcombine.high %v459_v39, %v463_v41  ;;  %v506_v29 = vld [vmem:[%s19773_s1 + $0xf00] sm:$0xff]  ;;  %v507_v31 = vld [vmem:[%s19773_s1 + $0xf08] sm:$0xff] }
  0xc0   :  { %10314 = vmatprep.subr.bf16.mxu1 %v12892_v45  ;;  %v12946_v45 = vcombine.high %v458_v37, %v462_v38  ;;  %v510_v30 = vld [vmem:[%s19773_s1 + $0xf20] sm:$0xff] }
  0xc2   :  { %9782 = vmatpush1.bf16.msra.mxu0 %v12889_v51  ;;  %v471_v51 = vld [vmem:[%s19773_s1 + $0xde8] sm:$0xff] }
  0xc3   :  { %10315 = vmatpush1.bf16.msra.mxu1 %v12891_v52  ;;  %9792 = vmatprep.subr.bf16.mxu0 %v12898_v54  ;;  %v12945_v52 = vcombine.low %v458_v37, %v462_v38  ;;  %v12947_v54 = vcombine.low %v459_v39, %v463_v41  ;;  %v12956_v56 = vcombine.high %v467_v50, %v471_v51  ;;  %v514_v38 = vld [vmem:[%s19773_s1 + $0xf40] sm:$0xff]  ;;  %v515_v41 = vld [vmem:[%s19773_s1 + $0xf48] sm:$0xff] }
  0xc4   :  { %10325 = vmatprep.subr.bf16.mxu1 %v12900_v55  ;;  %v12954_v55 = vcombine.high %v466_v47, %v470_v49  ;;  %v518_v39 = vld [vmem:[%s19773_s1 + $0xf60] sm:$0xff] }
  0xc5   :  { %9784 = vmatmul.mubr.bf16.vlgmr.msra.gmra.mrb[0].mxu0 %v15212_v58 }
  0xc6   :  { %9793 = vmatpush1.bf16.msra.mxu0 %v12897_v62  ;;  %10317 = vmatmul.mubr.bf16.vlgmr.msra.gmra.mrb[0].mxu1 %v15212_v58  ;;  %v479_v62 = vld [vmem:[%s19773_s1 + $0xe28] sm:$0xff] }
  0xc7   :  { %10326 = vmatpush1.bf16.msra.mxu1 %v12899_v0  ;;  %9794 = vmatprep.subr.bf16.mxu0 %v12906_v1  ;;  %v12953_v0 = vcombine.low %v466_v47, %v470_v49  ;;  %v12955_v1 = vcombine.low %v467_v50, %v471_v51  ;;  %v12964_v63 = vcombine.high %v475_v61, %v479_v62  ;;  %v522_v49 = vld [vmem:[%s19773_s1 + $0xf80] sm:$0xff]  ;;  %v523_v51 = vld [vmem:[%s19773_s1 + $0xf88] sm:$0xff] }
  0xc8   :  { %10327 = vmatprep.subr.bf16.mxu1 %v12908_v2  ;;  %9824 = vmatprep.mubr.bf16.mxu0 %v15228_v4  ;;  %v12962_v2 = vcombine.high %v474_v57, %v478_v60  ;;  %v526_v50 = vld [vmem:[%s19773_s1 + $0xfa0] sm:$0xff] }
  0xc9   :  { %10357 = vmatprep.mubr.bf16.mxu1 %v15228_v4 }
  0xca   :  { %9795 = vmatpush1.bf16.msra.mxu0 %v12905_v7  ;;  %v487_v7 = vld [vmem:[%s19773_s1 + $0xe68] sm:$0xff] }
  0xcb   :  { %10328 = vmatpush1.bf16.msra.mxu1 %v12907_v8  ;;  %9796 = vmatprep.subr.bf16.mxu0 %v12914_v10  ;;  %v12961_v8 = vcombine.low %v474_v57, %v478_v60  ;;  %v12963_v10 = vcombine.low %v475_v61, %v479_v62  ;;  %v12972_v12 = vcombine.high %v483_v6, %v487_v7  ;;  %v530_v60 = vld [vmem:[%s19773_s1 + $0xfc0] sm:$0xff]  ;;  %v531_v62 = vld [vmem:[%s19773_s1 + $0xfc8] sm:$0xff] }
  0xcc   :  { %10329 = vmatprep.subr.bf16.mxu1 %v12916_v11  ;;  %v12970_v11 = vcombine.high %v482_v3, %v486_v5  ;;  %v534_v61 = vld [vmem:[%s19773_s1 + $0xfe0] sm:$0xff] }
  0xce   :  { %9797 = vmatpush1.bf16.msra.mxu0 %v12913_v16  ;;  %v495_v16 = vld [vmem:[%s19773_s1 + $0xea8] sm:$0xff] }
  0xcf   :  { %10330 = vmatpush1.bf16.msra.mxu1 %v12915_v17  ;;  %9798 = vmatprep.subr.bf16.mxu0 %v12922_v18  ;;  %v12969_v17 = vcombine.low %v482_v3, %v486_v5  ;;  %v12971_v18 = vcombine.low %v483_v6, %v487_v7  ;;  %v12980_v20 = vcombine.high %v491_v15, %v495_v16  ;;  %v538_v6 = vld [vmem:[%s19773_s1 + $0x1000] sm:$0xff] }
  0xd0   :  { %10331 = vmatprep.subr.bf16.mxu1 %v12924_v19  ;;  %v12978_v19 = vcombine.high %v490_v13, %v494_v14  ;;  %v13018_v3 = vcombine.high %v530_v60, %v534_v61  ;;  %v542_v7 = vld [vmem:[%s19773_s1 + $0x1020] sm:$0xff] }
  0xd2   :  { %9799 = vmatpush1.bf16.msra.mxu0 %v12921_v25  ;;  %v503_v25 = vld [vmem:[%s19773_s1 + $0xee8] sm:$0xff] }
  0xd3   :  { %10332 = vmatpush1.bf16.msra.mxu1 %v12923_v26  ;;  %9800 = vmatprep.subr.bf16.mxu0 %v12930_v27  ;;  %v12977_v26 = vcombine.low %v490_v13, %v494_v14  ;;  %v12979_v27 = vcombine.low %v491_v15, %v495_v16  ;;  %v12988_v59 = vcombine.high %v499_v24, %v503_v25  ;;  %v546_v16 = vld [vmem:[%s19773_s1 + $0x1040] sm:$0xff] }
  0xd4   :  { %10333 = vmatprep.subr.bf16.mxu1 %v12932_v28  ;;  %v12986_v28 = vcombine.high %v498_v21, %v502_v22  ;;  %v13026_v14 = vcombine.high %v538_v6, %v542_v7 }
  0xd6   :  { %9801 = vmatpush1.bf16.msra.mxu0 %v12929_v32  ;;  %v511_v32 = vld [vmem:[%s19773_s1 + $0xf28] sm:$0xff] }
  0xd7   :  { %10334 = vmatpush1.bf16.msra.mxu1 %v12931_v34  ;;  %9802 = vmatprep.subr.bf16.mxu0 %v12938_v35  ;;  %v12985_v34 = vcombine.low %v498_v21, %v502_v22  ;;  %v12987_v35 = vcombine.low %v499_v24, %v503_v25  ;;  %v12996_v37 = vcombine.high %v507_v31, %v511_v32  ;;  %v551_v21 = vld [vmem:[%s19773_s1 + $0x1068] sm:$0xff] }
  0xd8   :  { %10335 = vmatprep.subr.bf16.mxu1 %v12940_v36  ;;  %v12994_v36 = vcombine.high %v506_v29, %v510_v30  ;;  %v13025_v22 = vcombine.low %v538_v6, %v542_v7  ;;  %v587_v6 = vld [vmem:[%s19773_s1 + $0x1188] sm:$0xff] }
  0xd9   :  { %v591_v7 = vld [vmem:[%s19773_s1 + $0x11a8] sm:$0xff] }
  0xda   :  { %9803 = vmatpush1.bf16.msra.mxu0 %v12937_v42  ;;  %v519_v42 = vld [vmem:[%s19773_s1 + $0xf68] sm:$0xff] }
  0xdb   :  { %10336 = vmatpush1.bf16.msra.mxu1 %v12939_v44  ;;  %9804 = vmatprep.subr.bf16.mxu0 %v12946_v45  ;;  %v12993_v44 = vcombine.low %v506_v29, %v510_v30  ;;  %v12995_v45 = vcombine.low %v507_v31, %v511_v32  ;;  %v13004_v47 = vcombine.high %v515_v41, %v519_v42  ;;  %v555_v29 = vld [vmem:[%s19773_s1 + $0x1088] sm:$0xff] }
  0xdc   :  { %10337 = vmatprep.subr.bf16.mxu1 %v12948_v46  ;;  %v13002_v46 = vcombine.high %v514_v38, %v518_v39  ;;  %v559_v30 = vld [vmem:[%s19773_s1 + $0x10a8] sm:$0xff] }
  0xde   :  { %9805 = vmatpush1.bf16.msra.mxu0 %v12945_v52  ;;  %v527_v52 = vld [vmem:[%s19773_s1 + $0xfa8] sm:$0xff] }
  0xdf   :  { %10338 = vmatpush1.bf16.msra.mxu1 %v12947_v54  ;;  %9806 = vmatprep.subr.bf16.mxu0 %v12954_v55  ;;  %v13001_v54 = vcombine.low %v514_v38, %v518_v39  ;;  %v13003_v55 = vcombine.low %v515_v41, %v519_v42  ;;  %v13012_v57 = vcombine.high %v523_v51, %v527_v52  ;;  %v563_v38 = vld [vmem:[%s19773_s1 + $0x10c8] sm:$0xff] }
  0xe0   :  { %10339 = vmatprep.subr.bf16.mxu1 %v12956_v56  ;;  %v13010_v56 = vcombine.high %v522_v49, %v526_v50  ;;  %v567_v39 = vld [vmem:[%s19773_s1 + $0x10e8] sm:$0xff]  ;;  %v13043_v42 = vcombine.low %v555_v29, %v559_v30 }
  0xe2   :  { %9807 = vmatpush1.bf16.msra.mxu0 %v12953_v0  ;;  %v535_v0 = vld [vmem:[%s19773_s1 + $0xfe8] sm:$0xff] }
  0xe3   :  { %10340 = vmatpush1.bf16.msra.mxu1 %v12955_v1  ;;  %9808 = vmatprep.subr.bf16.mxu0 %v12962_v2  ;;  %v15399_v1 = vld [vmem:[%s19772_s0 + $0x8] sm:$0xff]  ;;  %v13009_v2 = vcombine.low %v522_v49, %v526_v50  ;;  %v13020_v5 = vcombine.high %v531_v62, %v535_v0  ;;  %v13019_v13 = vcombine.low %v531_v62, %v535_v0 }
  0xe4   :  { %10341 = vmatprep.subr.bf16.mxu1 %v12964_v63  ;;  %v13011_v63 = vcombine.low %v523_v51, %v527_v52  ;;  %v571_v49 = vld [vmem:[%s19773_s1 + $0x1108] sm:$0xff]  ;;  %v13051_v52 = vcombine.low %v563_v38, %v567_v39 }
  0xe5   :  { %v575_v50 = vld [vmem:[%s19773_s1 + $0x1128] sm:$0xff] }
  0xe6   :  { %9809 = vmatpush1.bf16.msra.mxu0 %v12961_v8  ;;  %v15409_v8 = vrot.slane %v15399_v1, %v14646_v53  ;;  %v13059_v0 = vcombine.low %v571_v49, %v575_v50 }
  0xe7   :  { %10342 = vmatpush1.bf16.msra.mxu1 %v12963_v10  ;;  %9810 = vmatprep.subr.bf16.mxu0 %v12970_v11  ;;  %v539_v10 = vld [vmem:[%s19773_s1 + $0x1008] sm:$0xff] }
  0xe8   :  { %10343 = vmatprep.subr.bf16.mxu1 %v12972_v12  ;;  %v543_v11 = vld [vmem:[%s19773_s1 + $0x1028] sm:$0xff]  ;;  %v13017_v12 = vcombine.low %v530_v60, %v534_v61 }
  0xe9   :  { %v13028_v15 = vcombine.high %v539_v10, %v543_v11  ;;  %v13027_v24 = vcombine.low %v539_v10, %v543_v11  ;;  %v579_v60 = vld [vmem:[%s19773_s1 + $0x1148] sm:$0xff] }
  0xea   :  { %9811 = vmatpush1.bf16.msra.mxu0 %v12969_v17  ;;  %v550_v17 = vld [vmem:[%s19773_s1 + $0x1060] sm:$0xff]  ;;  %v583_v61 = vld [vmem:[%s19773_s1 + $0x1168] sm:$0xff] }
  0xeb   :  { %10344 = vmatpush1.bf16.msra.mxu1 %v12971_v18  ;;  %9812 = vmatprep.subr.bf16.mxu0 %v12978_v19  ;;  %v1704_v18 = vcombine.high %v15409_v8, %v15409_v8  ;;  %v15427_v19 = vcombine.high %v15212_v58, %v15212_v58  ;;  %v13034_v25 = vcombine.high %v546_v16, %v550_v17 }
  0xec   :  { %10345 = vmatprep.subr.bf16.mxu1 %v12980_v20  ;;  %v547_v20 = vld [vmem:[%s19773_s1 + $0x1048] sm:$0xff]  ;;  %v13033_v31 = vcombine.low %v546_v16, %v550_v17  ;;  %v13067_v11 = vcombine.low %v579_v60, %v583_v61 }
  0xed   :  { %v13035_v32 = vcombine.low %v547_v20, %v551_v21  ;;  %v595_v16 = vld [vmem:[%s19773_s1 + $0x11c8] sm:$0xff] }
  0xee   :  { %9813 = vmatpush1.bf16.msra.mxu0 %v12977_v26  ;;  %v13036_v26 = vcombine.high %v547_v20, %v551_v21  ;;  %v599_v17 = vld [vmem:[%s19773_s1 + $0x11e8] sm:$0xff]  ;;  %v13075_v20 = vcombine.low %v587_v6, %v591_v7 }
  0xef   :  { %10346 = vmatpush1.bf16.msra.mxu1 %v12979_v27  ;;  %9814 = vmatprep.subr.bf16.mxu0 %v12986_v28  ;;  %v554_v27 = vld [vmem:[%s19773_s1 + $0x1080] sm:$0xff] }
  0xf0   :  { %10347 = vmatprep.subr.bf16.mxu1 %v12988_v59  ;;  %v558_v28 = vld [vmem:[%s19773_s1 + $0x10a0] sm:$0xff]  ;;  %v15442_v59 = vrot.slane %v1704_v18, %v14646_v53 }
  0xf1   :  { %v13041_v41 = vcombine.low %v554_v27, %v558_v28 }
  0xf2   :  { %9815 = vmatpush1.bf16.msra.mxu0 %v12985_v34  ;;  %v13042_v34 = vcombine.high %v554_v27, %v558_v28  ;;  %v607_v27 = vld [vmem:[%s19773_s1 + $0x1228] sm:$0xff] }
  0xf3   :  { %10348 = vmatpush1.bf16.msra.mxu1 %v12987_v35  ;;  %9816 = vmatprep.subr.bf16.mxu0 %v12994_v36  ;;  %v13044_v35 = vcombine.high %v555_v29, %v559_v30  ;;  %v562_v36 = vld [vmem:[%s19773_s1 + $0x10c0] sm:$0xff]  ;;  %v13083_v29 = vcombine.low %v595_v16, %v599_v17 }
  0xf4   :  { %10349 = vmatprep.subr.bf16.mxu1 %v12996_v37  ;;  %v566_v37 = vld [vmem:[%s19773_s1 + $0x10e0] sm:$0xff] }
  0xf5   :  { %v13049_v51 = vcombine.low %v562_v36, %v566_v37 }
  0xf6   :  { %9817 = vmatpush1.bf16.msra.mxu0 %v12993_v44  ;;  %v13050_v44 = vcombine.high %v562_v36, %v566_v37  ;;  %v615_v36 = vld [vmem:[%s19773_s1 + $0x1268] sm:$0xff] }
  0xf7   :  { %10350 = vmatpush1.bf16.msra.mxu1 %v12995_v45  ;;  %9818 = vmatprep.subr.bf16.mxu0 %v13002_v46  ;;  %v13052_v45 = vcombine.high %v563_v38, %v567_v39  ;;  %v570_v46 = vld [vmem:[%s19773_s1 + $0x1100] sm:$0xff] }
  0xf8   :  { %10351 = vmatprep.subr.bf16.mxu1 %v13004_v47  ;;  %v574_v47 = vld [vmem:[%s19773_s1 + $0x1120] sm:$0xff] }
  0xf9   :  { %v13057_v62 = vcombine.low %v570_v46, %v574_v47 }
  0xfa   :  { %9819 = vmatpush1.bf16.msra.mxu0 %v13001_v54  ;;  %v13058_v54 = vcombine.high %v570_v46, %v574_v47  ;;  %v623_v46 = vld [vmem:[%s19773_s1 + $0x12a8] sm:$0xff] }
  0xfb   :  { %10352 = vmatpush1.bf16.msra.mxu1 %v13003_v55  ;;  %9820 = vmatprep.subr.bf16.mxu0 %v13010_v56  ;;  %v13060_v55 = vcombine.high %v571_v49, %v575_v50  ;;  %v578_v56 = vld [vmem:[%s19773_s1 + $0x1140] sm:$0xff] }
  0xfc   :  { %10353 = vmatprep.subr.bf16.mxu1 %v13012_v57  ;;  %v582_v57 = vld [vmem:[%s19773_s1 + $0x1160] sm:$0xff] }
  0xfd   :  { %v13065_v10 = vcombine.low %v578_v56, %v582_v57 }
  0xfe   :  { %9821 = vmatpush1.bf16.msra.mxu0 %v13009_v2  ;;  %v13066_v2 = vcombine.high %v578_v56, %v582_v57  ;;  %v631_v56 = vld [vmem:[%s19773_s1 + $0x12e8] sm:$0xff] }
  0xff   :  { %10354 = vmatpush1.bf16.msra.mxu1 %v13011_v63  ;;  %9822 = vmatprep.subr.bf16.mxu0 %v13018_v3  ;;  %v13068_v63 = vcombine.high %v579_v60, %v583_v61  ;;  %v586_v3 = vld [vmem:[%s19773_s1 + $0x1180] sm:$0xff] }
 0x100   :  { %10355 = vmatprep.subr.bf16.mxu1 %v13020_v5  ;;  %v590_v5 = vld [vmem:[%s19773_s1 + $0x11a0] sm:$0xff] }
 0x101   :  { %v13073_v18 = vcombine.low %v586_v3, %v590_v5 }
 0x102   :  { %9823 = vmatpush1.bf16.msra.mxu0 %v13017_v12  ;;  %v13074_v12 = vcombine.high %v586_v3, %v590_v5  ;;  %v639_v3 = vld [vmem:[%s19773_s1 + $0x1328] sm:$0xff] }
 0x103   :  { %10356 = vmatpush1.bf16.msra.mxu1 %v13019_v13  ;;  %9833 = vmatprep.subr.bf16.mxu0 %v13026_v14  ;;  %v13076_v13 = vcombine.high %v587_v6, %v591_v7  ;;  %v594_v14 = vld [vmem:[%s19773_s1 + $0x11c0] sm:$0xff] }
 0x104   :  { %10366 = vmatprep.subr.bf16.mxu1 %v13028_v15  ;;  %v598_v15 = vld [vmem:[%s19773_s1 + $0x11e0] sm:$0xff] }
 0x105   :  { %9825 = vmatmul.mubr.bf16.vlgmr.msra.gmra.mrb[0].mxu0 %v15427_v19  ;;  %v13082_v21 = vcombine.high %v594_v14, %v598_v15  ;;  %v13081_v28 = vcombine.low %v594_v14, %v598_v15  ;;  %v647_v14 = vld [vmem:[%s19773_s1 + $0x1368] sm:$0xff] }
 0x106   :  { %9834 = vmatpush1.bf16.msra.mxu0 %v13025_v22  ;;  %10358 = vmatmul.mubr.bf16.vlgmr.msra.gmra.mrb[0].mxu1 %v15427_v19  ;;  %v13084_v22 = vcombine.high %v595_v16, %v599_v17 }
 0x107   :  { %10367 = vmatpush1.bf16.msra.mxu1 %v13027_v24  ;;  %9835 = vmatprep.subr.bf16.mxu0 %v13034_v25  ;;  %v602_v24 = vld [vmem:[%s19773_s1 + $0x1200] sm:$0xff] }
 0x108   :  { %10368 = vmatprep.subr.bf16.mxu1 %v13036_v26  ;;  %9865 = vmatprep.mubr.bf16.mxu0 %v15442_v59  ;;  %v606_v25 = vld [vmem:[%s19773_s1 + $0x1220] sm:$0xff]  ;;  %v603_v26 = vld [vmem:[%s19773_s1 + $0x1208] sm:$0xff] }
 0x109   :  { %10398 = vmatprep.mubr.bf16.mxu1 %v15442_v59  ;;  %v13090_v30 = vcombine.high %v602_v24, %v606_v25  ;;  %v13089_v37 = vcombine.low %v602_v24, %v606_v25  ;;  %v13091_v38 = vcombine.low %v603_v26, %v607_v27  ;;  %v655_v24 = vld [vmem:[%s19773_s1 + $0x13a8] sm:$0xff] }
 0x10a   :  { %9836 = vmatpush1.bf16.msra.mxu0 %v13033_v31  ;;  %v13092_v31 = vcombine.high %v603_v26, %v607_v27 }
 0x10b   :  { %10369 = vmatpush1.bf16.msra.mxu1 %v13035_v32  ;;  %9837 = vmatprep.subr.bf16.mxu0 %v13042_v34  ;;  %v610_v32 = vld [vmem:[%s19773_s1 + $0x1240] sm:$0xff] }
 0x10c   :  { %10370 = vmatprep.subr.bf16.mxu1 %v13044_v35  ;;  %v614_v34 = vld [vmem:[%s19773_s1 + $0x1260] sm:$0xff]  ;;  %v611_v35 = vld [vmem:[%s19773_s1 + $0x1248] sm:$0xff] }
 0x10d   :  { %v13098_v39 = vcombine.high %v610_v32, %v614_v34  ;;  %v13097_v47 = vcombine.low %v610_v32, %v614_v34  ;;  %v13099_v49 = vcombine.low %v611_v35, %v615_v36  ;;  %v663_v32 = vld [vmem:[%s19773_s1 + $0x13e8] sm:$0xff] }
 0x10e   :  { %9838 = vmatpush1.bf16.msra.mxu0 %v13041_v41  ;;  %v13100_v41 = vcombine.high %v611_v35, %v615_v36 }
 0x10f   :  { %10371 = vmatpush1.bf16.msra.mxu1 %v13043_v42  ;;  %9839 = vmatprep.subr.bf16.mxu0 %v13050_v44  ;;  %v618_v42 = vld [vmem:[%s19773_s1 + $0x1280] sm:$0xff] }
 0x110   :  { %10372 = vmatprep.subr.bf16.mxu1 %v13052_v45  ;;  %v622_v44 = vld [vmem:[%s19773_s1 + $0x12a0] sm:$0xff]  ;;  %v619_v45 = vld [vmem:[%s19773_s1 + $0x1288] sm:$0xff] }
 0x111   :  { %v13106_v50 = vcombine.high %v618_v42, %v622_v44  ;;  %v13105_v57 = vcombine.low %v618_v42, %v622_v44  ;;  %v13107_v60 = vcombine.low %v619_v45, %v623_v46  ;;  %v671_v42 = vld [vmem:[%s19773_s1 + $0x1428] sm:$0xff] }
 0x112   :  { %9840 = vmatpush1.bf16.msra.mxu0 %v13049_v51  ;;  %v13108_v51 = vcombine.high %v619_v45, %v623_v46 }
 0x113   :  { %10373 = vmatpush1.bf16.msra.mxu1 %v13051_v52  ;;  %9841 = vmatprep.subr.bf16.mxu0 %v13058_v54  ;;  %v626_v52 = vld [vmem:[%s19773_s1 + $0x12c0] sm:$0xff] }
 0x114   :  { %10374 = vmatprep.subr.bf16.mxu1 %v13060_v55  ;;  %v630_v54 = vld [vmem:[%s19773_s1 + $0x12e0] sm:$0xff]  ;;  %v627_v55 = vld [vmem:[%s19773_s1 + $0x12c8] sm:$0xff] }
 0x115   :  { %v13114_v61 = vcombine.high %v626_v52, %v630_v54  ;;  %v13113_v5 = vcombine.low %v626_v52, %v630_v54  ;;  %v13115_v6 = vcombine.low %v627_v55, %v631_v56  ;;  %v675_v52 = vld [vmem:[%s19773_s1 + $0x1448] sm:$0xff] }
 0x116   :  { %9842 = vmatpush1.bf16.msra.mxu0 %v13057_v62  ;;  %v13116_v62 = vcombine.high %v627_v55, %v631_v56  ;;  %v679_v54 = vld [vmem:[%s19773_s1 + $0x1468] sm:$0xff] }
 0x117   :  { %10375 = vmatpush1.bf16.msra.mxu1 %v13059_v0  ;;  %9843 = vmatprep.subr.bf16.mxu0 %v13066_v2  ;;  %v634_v0 = vld [vmem:[%s19773_s1 + $0x1300] sm:$0xff] }
 0x118   :  { %10376 = vmatprep.subr.bf16.mxu1 %v13068_v63  ;;  %v638_v2 = vld [vmem:[%s19773_s1 + $0x1320] sm:$0xff]  ;;  %v635_v63 = vld [vmem:[%s19773_s1 + $0x1308] sm:$0xff] }
 0x119   :  { %v13122_v7 = vcombine.high %v634_v0, %v638_v2  ;;  %v13121_v15 = vcombine.low %v634_v0, %v638_v2  ;;  %v13123_v16 = vcombine.low %v635_v63, %v639_v3  ;;  %v683_v0 = vld [vmem:[%s19773_s1 + $0x1488] sm:$0xff] }
 0x11a   :  { %9844 = vmatpush1.bf16.msra.mxu0 %v13065_v10  ;;  %v13124_v10 = vcombine.high %v635_v63, %v639_v3  ;;  %v687_v2 = vld [vmem:[%s19773_s1 + $0x14a8] sm:$0xff]  ;;  %v13163_v3 = vcombine.low %v675_v52, %v679_v54 }
 0x11b   :  { %10377 = vmatpush1.bf16.msra.mxu1 %v13067_v11  ;;  %9845 = vmatprep.subr.bf16.mxu0 %v13074_v12  ;;  %v642_v11 = vld [vmem:[%s19773_s1 + $0x1340] sm:$0xff] }
 0x11c   :  { %10378 = vmatprep.subr.bf16.mxu1 %v13076_v13  ;;  %v646_v12 = vld [vmem:[%s19773_s1 + $0x1360] sm:$0xff]  ;;  %v643_v13 = vld [vmem:[%s19773_s1 + $0x1348] sm:$0xff] }
 0x11d   :  { %v13130_v17 = vcombine.high %v642_v11, %v646_v12  ;;  %v13129_v25 = vcombine.low %v642_v11, %v646_v12  ;;  %v13131_v26 = vcombine.low %v643_v13, %v647_v14  ;;  %v691_v11 = vld [vmem:[%s19773_s1 + $0x14c8] sm:$0xff] }
 0x11e   :  { %9846 = vmatpush1.bf16.msra.mxu0 %v13073_v18  ;;  %v13132_v18 = vcombine.high %v643_v13, %v647_v14  ;;  %v695_v12 = vld [vmem:[%s19773_s1 + $0x14e8] sm:$0xff]  ;;  %v13171_v14 = vcombine.low %v683_v0, %v687_v2 }
 0x11f   :  { %10379 = vmatpush1.bf16.msra.mxu1 %v13075_v20  ;;  %9847 = vmatprep.subr.bf16.mxu0 %v13082_v21  ;;  %v650_v20 = vld [vmem:[%s19773_s1 + $0x1380] sm:$0xff] }
 0x120   :  { %10380 = vmatprep.subr.bf16.mxu1 %v13084_v22  ;;  %v654_v21 = vld [vmem:[%s19773_s1 + $0x13a0] sm:$0xff]  ;;  %v651_v22 = vld [vmem:[%s19773_s1 + $0x1388] sm:$0xff] }
 0x121   :  { %v13138_v27 = vcombine.high %v650_v20, %v654_v21  ;;  %v13137_v34 = vcombine.low %v650_v20, %v654_v21  ;;  %v13139_v35 = vcombine.low %v651_v22, %v655_v24  ;;  %v699_v20 = vld [vmem:[%s19773_s1 + $0x1508] sm:$0xff] }
 0x122   :  { %9848 = vmatpush1.bf16.msra.mxu0 %v13081_v28  ;;  %v13140_v28 = vcombine.high %v651_v22, %v655_v24  ;;  %v703_v21 = vld [vmem:[%s19773_s1 + $0x1528] sm:$0xff]  ;;  %v13179_v24 = vcombine.low %v691_v11, %v695_v12 }
 0x123   :  { %10381 = vmatpush1.bf16.msra.mxu1 %v13083_v29  ;;  %9849 = vmatprep.subr.bf16.mxu0 %v13090_v30  ;;  %v658_v29 = vld [vmem:[%s19773_s1 + $0x13c0] sm:$0xff] }
 0x124   :  { %10382 = vmatprep.subr.bf16.mxu1 %v13092_v31  ;;  %v662_v30 = vld [vmem:[%s19773_s1 + $0x13e0] sm:$0xff]  ;;  %v659_v31 = vld [vmem:[%s19773_s1 + $0x13c8] sm:$0xff] }
 0x125   :  { %v13146_v36 = vcombine.high %v658_v29, %v662_v30  ;;  %v13145_v44 = vcombine.low %v658_v29, %v662_v30  ;;  %v13147_v45 = vcombine.low %v659_v31, %v663_v32  ;;  %v707_v29 = vld [vmem:[%s19773_s1 + $0x1548] sm:$0xff] }
 0x126   :  { %9850 = vmatpush1.bf16.msra.mxu0 %v13089_v37  ;;  %v13148_v37 = vcombine.high %v659_v31, %v663_v32  ;;  %v711_v30 = vld [vmem:[%s19773_s1 + $0x1568] sm:$0xff]  ;;  %v13187_v32 = vcombine.low %v699_v20, %v703_v21 }
 0x127   :  { %10383 = vmatpush1.bf16.msra.mxu1 %v13091_v38  ;;  %9851 = vmatprep.subr.bf16.mxu0 %v13098_v39  ;;  %v666_v38 = vld [vmem:[%s19773_s1 + $0x1400] sm:$0xff] }
 0x128   :  { %10384 = vmatprep.subr.bf16.mxu1 %v13100_v41  ;;  %v670_v39 = vld [vmem:[%s19773_s1 + $0x1420] sm:$0xff]  ;;  %v667_v41 = vld [vmem:[%s19773_s1 + $0x1408] sm:$0xff] }
 0x129   :  { %v13154_v46 = vcombine.high %v666_v38, %v670_v39  ;;  %v13153_v55 = vcombine.low %v666_v38, %v670_v39  ;;  %v13155_v56 = vcombine.low %v667_v41, %v671_v42  ;;  %v715_v38 = vld [vmem:[%s19773_s1 + $0x1588] sm:$0xff] }
 0x12a   :  { %9852 = vmatpush1.bf16.msra.mxu0 %v13097_v47  ;;  %v13156_v47 = vcombine.high %v667_v41, %v671_v42  ;;  %v719_v39 = vld [vmem:[%s19773_s1 + $0x15a8] sm:$0xff]  ;;  %v13195_v42 = vcombine.low %v707_v29, %v711_v30 }
 0x12b   :  { %10385 = vmatpush1.bf16.msra.mxu1 %v13099_v49  ;;  %9853 = vmatprep.subr.bf16.mxu0 %v13106_v50  ;;  %v674_v49 = vld [vmem:[%s19773_s1 + $0x1440] sm:$0xff] }
 0x12c   :  { %10386 = vmatprep.subr.bf16.mxu1 %v13108_v51  ;;  %v678_v50 = vld [vmem:[%s19773_s1 + $0x1460] sm:$0xff]  ;;  %v15630_v51 = vrot.slane %v15409_v8, %v14646_v53 }
 0x12d   :  { %v682_v8 = vld [vmem:[%s19773_s1 + $0x1480] sm:$0xff]  ;;  %v13161_v63 = vcombine.low %v674_v49, %v678_v50 }
 0x12e   :  { %9854 = vmatpush1.bf16.msra.mxu0 %v13105_v57  ;;  %v13162_v57 = vcombine.high %v674_v49, %v678_v50  ;;  %v723_v49 = vld [vmem:[%s19773_s1 + $0x15c8] sm:$0xff] }
 0x12f   :  { %10387 = vmatpush1.bf16.msra.mxu1 %v13107_v60  ;;  %9855 = vmatprep.subr.bf16.mxu0 %v13114_v61  ;;  %v13164_v60 = vcombine.high %v675_v52, %v679_v54  ;;  %v686_v61 = vld [vmem:[%s19773_s1 + $0x14a0] sm:$0xff]  ;;  %v727_v50 = vld [vmem:[%s19773_s1 + $0x15e8] sm:$0xff]  ;;  %v13203_v54 = vcombine.low %v715_v38, %v719_v39 }
 0x130   :  { %10388 = vmatprep.subr.bf16.mxu1 %v13116_v62  ;;  %v15646_v62 = vcombine.high %v15442_v59, %v15442_v59  ;;  %v13169_v13 = vcombine.low %v682_v8, %v686_v61 }
 0x132   :  { %9856 = vmatpush1.bf16.msra.mxu0 %v13113_v5  ;;  %v13170_v5 = vcombine.high %v682_v8, %v686_v61  ;;  %v731_v8 = vld [vmem:[%s19773_s1 + $0x1608] sm:$0xff] }
 0x133   :  { %10389 = vmatpush1.bf16.msra.mxu1 %v13115_v6  ;;  %9857 = vmatprep.subr.bf16.mxu0 %v13122_v7  ;;  %v13172_v6 = vcombine.high %v683_v0, %v687_v2  ;;  %v690_v7 = vld [vmem:[%s19773_s1 + $0x14c0] sm:$0xff]  ;;  %v735_v61 = vld [vmem:[%s19773_s1 + $0x1628] sm:$0xff]  ;;  %v13211_v2 = vcombine.low %v723_v49, %v727_v50 }
 0x134   :  { %10390 = vmatprep.subr.bf16.mxu1 %v13124_v10  ;;  %v694_v10 = vld [vmem:[%s19773_s1 + $0x14e0] sm:$0xff] }
 0x135   :  { %v13177_v22 = vcombine.low %v690_v7, %v694_v10 }
 0x136   :  { %9858 = vmatpush1.bf16.msra.mxu0 %v13121_v15  ;;  %v13178_v15 = vcombine.high %v690_v7, %v694_v10  ;;  %v739_v7 = vld [vmem:[%s19773_s1 + $0x1648] sm:$0xff] }
 0x137   :  { %10391 = vmatpush1.bf16.msra.mxu1 %v13123_v16  ;;  %9859 = vmatprep.subr.bf16.mxu0 %v13130_v17  ;;  %v13180_v16 = vcombine.high %v691_v11, %v695_v12  ;;  %v698_v17 = vld [vmem:[%s19773_s1 + $0x1500] sm:$0xff]  ;;  %v743_v10 = vld [vmem:[%s19773_s1 + $0x1668] sm:$0xff]  ;;  %v13219_v12 = vcombine.low %v731_v8, %v735_v61 }
 0x138   :  { %10392 = vmatprep.subr.bf16.mxu1 %v13132_v18  ;;  %v702_v18 = vld [vmem:[%s19773_s1 + $0x1520] sm:$0xff] }
 0x139   :  { %v13185_v31 = vcombine.low %v698_v17, %v702_v18 }
 0x13a   :  { %9860 = vmatpush1.bf16.msra.mxu0 %v13129_v25  ;;  %v13186_v25 = vcombine.high %v698_v17, %v702_v18  ;;  %v747_v17 = vld [vmem:[%s19773_s1 + $0x1688] sm:$0xff] }
 0x13b   :  { %10393 = vmatpush1.bf16.msra.mxu1 %v13131_v26  ;;  %9861 = vmatprep.subr.bf16.mxu0 %v13138_v27  ;;  %v13188_v26 = vcombine.high %v699_v20, %v703_v21  ;;  %v706_v27 = vld [vmem:[%s19773_s1 + $0x1540] sm:$0xff]  ;;  %v751_v18 = vld [vmem:[%s19773_s1 + $0x16a8] sm:$0xff]  ;;  %v13227_v21 = vcombine.low %v739_v7, %v743_v10 }
 0x13c   :  { %10394 = vmatprep.subr.bf16.mxu1 %v13140_v28  ;;  %v710_v28 = vld [vmem:[%s19773_s1 + $0x1560] sm:$0xff] }
 0x13d   :  { %v13193_v41 = vcombine.low %v706_v27, %v710_v28 }
 0x13e   :  { %9862 = vmatpush1.bf16.msra.mxu0 %v13137_v34  ;;  %v13194_v34 = vcombine.high %v706_v27, %v710_v28  ;;  %v755_v27 = vld [vmem:[%s19773_s1 + $0x16c8] sm:$0xff] }
 0x13f   :  { %10395 = vmatpush1.bf16.msra.mxu1 %v13139_v35  ;;  %9863 = vmatprep.subr.bf16.mxu0 %v13146_v36  ;;  %v13196_v35 = vcombine.high %v707_v29, %v711_v30  ;;  %v714_v36 = vld [vmem:[%s19773_s1 + $0x1580] sm:$0xff]  ;;  %v759_v28 = vld [vmem:[%s19773_s1 + $0x16e8] sm:$0xff]  ;;  %v13235_v30 = vcombine.low %v747_v17, %v751_v18 }
 0x140   :  { %10396 = vmatprep.subr.bf16.mxu1 %v13148_v37  ;;  %v718_v37 = vld [vmem:[%s19773_s1 + $0x15a0] sm:$0xff] }
 0x141   :  { %v13201_v52 = vcombine.low %v714_v36, %v718_v37 }
 0x142   :  { %9864 = vmatpush1.bf16.msra.mxu0 %v13145_v44  ;;  %v13202_v44 = vcombine.high %v714_v36, %v718_v37  ;;  %v763_v36 = vld [vmem:[%s19773_s1 + $0x1708] sm:$0xff] }
 0x143   :  { %10397 = vmatpush1.bf16.msra.mxu1 %v13147_v45  ;;  %9874 = vmatprep.subr.bf16.mxu0 %v13154_v46  ;;  %v13204_v45 = vcombine.high %v715_v38, %v719_v39  ;;  %v722_v46 = vld [vmem:[%s19773_s1 + $0x15c0] sm:$0xff]  ;;  %v767_v37 = vld [vmem:[%s19773_s1 + $0x1728] sm:$0xff]  ;;  %v13243_v39 = vcombine.low %v755_v27, %v759_v28 }
 0x144   :  { %10407 = vmatprep.subr.bf16.mxu1 %v13156_v47  ;;  %v726_v47 = vld [vmem:[%s19773_s1 + $0x15e0] sm:$0xff] }
 0x145   :  { %9866 = vmatmul.mubr.bf16.vlgmr.msra.gmra.mrb[0].mxu0 %v15630_v51  ;;  %v13209_v0 = vcombine.low %v722_v46, %v726_v47 }
 0x146   :  { %9875 = vmatpush1.bf16.msra.mxu0 %v13153_v55  ;;  %10399 = vmatmul.mubr.bf16.vlgmr.msra.gmra.mrb[0].mxu1 %v15630_v51  ;;  %v13210_v55 = vcombine.high %v722_v46, %v726_v47  ;;  %v771_v46 = vld [vmem:[%s19773_s1 + $0x1748] sm:$0xff] }
 0x147   :  { %10408 = vmatpush1.bf16.msra.mxu1 %v13155_v56  ;;  %9876 = vmatprep.subr.bf16.mxu0 %v13162_v57  ;;  %v13212_v56 = vcombine.high %v723_v49, %v727_v50  ;;  %v730_v57 = vld [vmem:[%s19773_s1 + $0x1600] sm:$0xff]  ;;  %v775_v47 = vld [vmem:[%s19773_s1 + $0x1768] sm:$0xff]  ;;  %v13251_v50 = vcombine.low %v763_v36, %v767_v37 }
 0x148   :  { %10409 = vmatprep.subr.bf16.mxu1 %v13164_v60  ;;  %9906 = vmatprep.mubr.bf16.mxu0 %v15646_v62  ;;  %v734_v60 = vld [vmem:[%s19773_s1 + $0x1620] sm:$0xff] }
 0x149   :  { %10439 = vmatprep.mubr.bf16.mxu1 %v15646_v62  ;;  %v13217_v11 = vcombine.low %v730_v57, %v734_v60 }
 0x14a   :  { %9877 = vmatpush1.bf16.msra.mxu0 %v13161_v63  ;;  %v13218_v63 = vcombine.high %v730_v57, %v734_v60  ;;  %v779_v57 = vld [vmem:[%s19773_s1 + $0x1788] sm:$0xff] }
 0x14b   :  { %10410 = vmatpush1.bf16.msra.mxu1 %v13163_v3  ;;  %9878 = vmatprep.subr.bf16.mxu0 %v13170_v5  ;;  %v13220_v3 = vcombine.high %v731_v8, %v735_v61  ;;  %v738_v5 = vld [vmem:[%s19773_s1 + $0x1640] sm:$0xff]  ;;  %v783_v60 = vld [vmem:[%s19773_s1 + $0x17a8] sm:$0xff]  ;;  %v13259_v61 = vcombine.low %v771_v46, %v775_v47 }
 0x14c   :  { %10411 = vmatprep.subr.bf16.mxu1 %v13172_v6  ;;  %v742_v6 = vld [vmem:[%s19773_s1 + $0x1660] sm:$0xff] }
 0x14d   :  { %v13225_v20 = vcombine.low %v738_v5, %v742_v6 }
 0x14e   :  { %9879 = vmatpush1.bf16.msra.mxu0 %v13169_v13  ;;  %v13226_v13 = vcombine.high %v738_v5, %v742_v6  ;;  %v1689_v5 = vcombine.high %v15399_v1, %v15399_v1  ;;  %v787_v6 = vld [vmem:[%s19773_s1 + $0x17c8] sm:$0xff]  ;;  %v794_v1 = vld [vmem:[%s19773_s1 + $0x1800] sm:$0xff] }
 0x14f   :  { %10412 = vmatpush1.bf16.msra.mxu1 %v13171_v14  ;;  %9880 = vmatprep.subr.bf16.mxu0 %v13178_v15  ;;  %v13228_v14 = vcombine.high %v739_v7, %v743_v10  ;;  %v746_v15 = vld [vmem:[%s19773_s1 + $0x1680] sm:$0xff]  ;;  %v791_v7 = vld [vmem:[%s19773_s1 + $0x17e8] sm:$0xff] }
 0x150   :  { %10413 = vmatprep.subr.bf16.mxu1 %v13180_v16  ;;  %v750_v16 = vld [vmem:[%s19773_s1 + $0x16a0] sm:$0xff] }
 0x151   :  { %v13233_v29 = vcombine.low %v746_v15, %v750_v16 }
 0x152   :  { %9881 = vmatpush1.bf16.msra.mxu0 %v13177_v22  ;;  %v13234_v22 = vcombine.high %v746_v15, %v750_v16  ;;  %v15823_v15 = vrot.slane %v1689_v5, %v14646_v53  ;;  %v795_v16 = vld [vmem:[%s19773_s1 + $0x1808] sm:$0xff]  ;;  %v834_v5 = vld [vmem:[%s19773_s1 + $0x1940] sm:$0xff] }
 0x153   :  { %10414 = vmatpush1.bf16.msra.mxu1 %v13179_v24  ;;  %9882 = vmatprep.subr.bf16.mxu0 %v13186_v25  ;;  %v13236_v24 = vcombine.high %v747_v17, %v751_v18  ;;  %v754_v25 = vld [vmem:[%s19773_s1 + $0x16c0] sm:$0xff]  ;;  %v799_v17 = vld [vmem:[%s19773_s1 + $0x1828] sm:$0xff] }
 0x154   :  { %10415 = vmatprep.subr.bf16.mxu1 %v13188_v26  ;;  %v758_v26 = vld [vmem:[%s19773_s1 + $0x16e0] sm:$0xff] }
 0x155   :  { %v13241_v38 = vcombine.low %v754_v25, %v758_v26 }
 0x156   :  { %9883 = vmatpush1.bf16.msra.mxu0 %v13185_v31  ;;  %v13242_v31 = vcombine.high %v754_v25, %v758_v26  ;;  %v806_v25 = vld [vmem:[%s19773_s1 + $0x1860] sm:$0xff]  ;;  %v1705_v26 = vcombine.high %v15823_v15, %v15823_v15 }
 0x157   :  { %10416 = vmatpush1.bf16.msra.mxu1 %v13187_v32  ;;  %9884 = vmatprep.subr.bf16.mxu0 %v13194_v34  ;;  %v13244_v32 = vcombine.high %v755_v27, %v759_v28  ;;  %v762_v34 = vld [vmem:[%s19773_s1 + $0x1700] sm:$0xff]  ;;  %v15841_v27 = vcombine.high %v15630_v51, %v15630_v51  ;;  %v803_v28 = vld [vmem:[%s19773_s1 + $0x1848] sm:$0xff] }
 0x158   :  { %10417 = vmatprep.subr.bf16.mxu1 %v13196_v35  ;;  %v766_v35 = vld [vmem:[%s19773_s1 + $0x1720] sm:$0xff] }
 0x159   :  { %v13249_v49 = vcombine.low %v762_v34, %v766_v35 }
 0x15a   :  { %9885 = vmatpush1.bf16.msra.mxu0 %v13193_v41  ;;  %v13250_v41 = vcombine.high %v762_v34, %v766_v35  ;;  %v810_v35 = vld [vmem:[%s19773_s1 + $0x1880] sm:$0xff] }
 0x15b   :  { %10418 = vmatpush1.bf16.msra.mxu1 %v13195_v42  ;;  %9886 = vmatprep.subr.bf16.mxu0 %v13202_v44  ;;  %v13252_v42 = vcombine.high %v763_v36, %v767_v37  ;;  %v770_v44 = vld [vmem:[%s19773_s1 + $0x1740] sm:$0xff]  ;;  %v15856_v37 = vrot.slane %v1705_v26, %v14646_v53 }
 0x15c   :  { %10419 = vmatprep.subr.bf16.mxu1 %v13204_v45  ;;  %v774_v45 = vld [vmem:[%s19773_s1 + $0x1760] sm:$0xff] }
 0x15d   :  { %v13257_v8 = vcombine.low %v770_v44, %v774_v45  ;;  %v814_v36 = vld [vmem:[%s19773_s1 + $0x18a0] sm:$0xff] }
 0x15e   :  { %9887 = vmatpush1.bf16.msra.mxu0 %v13201_v52  ;;  %v13258_v52 = vcombine.high %v770_v44, %v774_v45  ;;  %v13298_v44 = vcombine.high %v810_v35, %v814_v36  ;;  %v854_v26 = vld [vmem:[%s19773_s1 + $0x19e0] sm:$0xff] }
 0x15f   :  { %10420 = vmatpush1.bf16.msra.mxu1 %v13203_v54  ;;  %9888 = vmatprep.subr.bf16.mxu0 %v13210_v55  ;;  %v13260_v54 = vcombine.high %v771_v46, %v775_v47  ;;  %v778_v55 = vld [vmem:[%s19773_s1 + $0x1780] sm:$0xff] }
 0x160   :  { %10421 = vmatprep.subr.bf16.mxu1 %v13212_v56  ;;  %v782_v56 = vld [vmem:[%s19773_s1 + $0x17a0] sm:$0xff] }
 0x161   :  { %v13265_v10 = vcombine.low %v778_v55, %v782_v56  ;;  %v818_v46 = vld [vmem:[%s19773_s1 + $0x18c0] sm:$0xff] }
 0x162   :  { %9889 = vmatpush1.bf16.msra.mxu0 %v13209_v0  ;;  %v13266_v0 = vcombine.high %v778_v55, %v782_v56  ;;  %v822_v47 = vld [vmem:[%s19773_s1 + $0x18e0] sm:$0xff] }
 0x163   :  { %10422 = vmatpush1.bf16.msra.mxu1 %v13211_v2  ;;  %9890 = vmatprep.subr.bf16.mxu0 %v13218_v63  ;;  %v13268_v2 = vcombine.high %v779_v57, %v783_v60  ;;  %v786_v63 = vld [vmem:[%s19773_s1 + $0x17c0] sm:$0xff]  ;;  %v13306_v55 = vcombine.high %v818_v46, %v822_v47 }
 0x164   :  { %10423 = vmatprep.subr.bf16.mxu1 %v13220_v3  ;;  %v790_v3 = vld [vmem:[%s19773_s1 + $0x17e0] sm:$0xff] }
 0x165   :  { %v13273_v18 = vcombine.low %v786_v63, %v790_v3 }
 0x166   :  { %9891 = vmatpush1.bf16.msra.mxu0 %v13217_v11  ;;  %v13267_v11 = vcombine.low %v779_v57, %v783_v60  ;;  %v826_v57 = vld [vmem:[%s19773_s1 + $0x1900] sm:$0xff] }
 0x167   :  { %10424 = vmatpush1.bf16.msra.mxu1 %v13219_v12  ;;  %9892 = vmatprep.subr.bf16.mxu0 %v13226_v13  ;;  %v13274_v12 = vcombine.high %v786_v63, %v790_v3  ;;  %v13276_v13 = vcombine.high %v787_v6, %v791_v7  ;;  %v830_v60 = vld [vmem:[%s19773_s1 + $0x1920] sm:$0xff] }
 0x168   :  { %10425 = vmatprep.subr.bf16.mxu1 %v13228_v14  ;;  %v798_v14 = vld [vmem:[%s19773_s1 + $0x1820] sm:$0xff]  ;;  %v13314_v63 = vcombine.high %v826_v57, %v830_v60 }
 0x16a   :  { %9893 = vmatpush1.bf16.msra.mxu0 %v13225_v20  ;;  %v13275_v20 = vcombine.low %v787_v6, %v791_v7  ;;  %v838_v6 = vld [vmem:[%s19773_s1 + $0x1960] sm:$0xff]  ;;  %v835_v7 = vld [vmem:[%s19773_s1 + $0x1948] sm:$0xff] }
 0x16b   :  { %10426 = vmatpush1.bf16.msra.mxu1 %v13227_v21  ;;  %9894 = vmatprep.subr.bf16.mxu0 %v13234_v22  ;;  %v13282_v21 = vcombine.high %v794_v1, %v798_v14  ;;  %v13284_v22 = vcombine.high %v795_v16, %v799_v17 }
 0x16c   :  { %10427 = vmatprep.subr.bf16.mxu1 %v13236_v24  ;;  %v802_v24 = vld [vmem:[%s19773_s1 + $0x1840] sm:$0xff] }
 0x16e   :  { %9895 = vmatpush1.bf16.msra.mxu0 %v13233_v29  ;;  %v807_v29 = vld [vmem:[%s19773_s1 + $0x1868] sm:$0xff] }
 0x16f   :  { %10428 = vmatpush1.bf16.msra.mxu1 %v13235_v30  ;;  %9896 = vmatprep.subr.bf16.mxu0 %v13242_v31  ;;  %v13281_v30 = vcombine.low %v794_v1, %v798_v14  ;;  %v13283_v31 = vcombine.low %v795_v16, %v799_v17  ;;  %v13292_v34 = vcombine.high %v803_v28, %v807_v29  ;;  %v842_v14 = vld [vmem:[%s19773_s1 + $0x1980] sm:$0xff]  ;;  %v843_v17 = vld [vmem:[%s19773_s1 + $0x1988] sm:$0xff] }
 0x170   :  { %10429 = vmatprep.subr.bf16.mxu1 %v13244_v32  ;;  %v13290_v32 = vcombine.high %v802_v24, %v806_v25  ;;  %v846_v16 = vld [vmem:[%s19773_s1 + $0x19a0] sm:$0xff] }
 0x172   :  { %9897 = vmatpush1.bf16.msra.mxu0 %v13241_v38  ;;  %v811_v38 = vld [vmem:[%s19773_s1 + $0x1888] sm:$0xff] }
 0x173   :  { %10430 = vmatpush1.bf16.msra.mxu1 %v13243_v39  ;;  %9898 = vmatprep.subr.bf16.mxu0 %v13250_v41  ;;  %v815_v39 = vld [vmem:[%s19773_s1 + $0x18a8] sm:$0xff]  ;;  %v13289_v41 = vcombine.low %v802_v24, %v806_v25  ;;  %v850_v25 = vld [vmem:[%s19773_s1 + $0x19c0] sm:$0xff] }
 0x174   :  { %10431 = vmatprep.subr.bf16.mxu1 %v13252_v42  ;;  %v13291_v42 = vcombine.low %v803_v28, %v807_v29  ;;  %v13300_v45 = vcombine.high %v811_v38, %v815_v39  ;;  %v851_v28 = vld [vmem:[%s19773_s1 + $0x19c8] sm:$0xff] }
 0x175   :  { %v855_v29 = vld [vmem:[%s19773_s1 + $0x19e8] sm:$0xff] }
 0x176   :  { %9899 = vmatpush1.bf16.msra.mxu0 %v13249_v49  ;;  %v819_v49 = vld [vmem:[%s19773_s1 + $0x18c8] sm:$0xff] }
 0x177   :  { %10432 = vmatpush1.bf16.msra.mxu1 %v13251_v50  ;;  %9900 = vmatprep.subr.bf16.mxu0 %v13258_v52  ;;  %v823_v50 = vld [vmem:[%s19773_s1 + $0x18e8] sm:$0xff]  ;;  %v13297_v52 = vcombine.low %v810_v35, %v814_v36  ;;  %v858_v35 = vld [vmem:[%s19773_s1 + $0x1a00] sm:$0xff] }
 0x178   :  { %10433 = vmatprep.subr.bf16.mxu1 %v13260_v54  ;;  %v13299_v54 = vcombine.low %v811_v38, %v815_v39  ;;  %v13308_v56 = vcombine.high %v819_v49, %v823_v50  ;;  %v862_v36 = vld [vmem:[%s19773_s1 + $0x1a20] sm:$0xff]  ;;  %v859_v38 = vld [vmem:[%s19773_s1 + $0x1a08] sm:$0xff] }
 0x179   :  { %v863_v39 = vld [vmem:[%s19773_s1 + $0x1a28] sm:$0xff] }
 0x17a   :  { %9901 = vmatpush1.bf16.msra.mxu0 %v13257_v8  ;;  %v827_v8 = vld [vmem:[%s19773_s1 + $0x1908] sm:$0xff] }
 0x17b   :  { %10434 = vmatpush1.bf16.msra.mxu1 %v13259_v61  ;;  %9902 = vmatprep.subr.bf16.mxu0 %v13266_v0  ;;  %v831_v61 = vld [vmem:[%s19773_s1 + $0x1928] sm:$0xff]  ;;  %v13305_v0 = vcombine.low %v818_v46, %v822_v47  ;;  %v866_v46 = vld [vmem:[%s19773_s1 + $0x1a40] sm:$0xff] }
 0x17c   :  { %10435 = vmatprep.subr.bf16.mxu1 %v13268_v2  ;;  %v13307_v2 = vcombine.low %v819_v49, %v823_v50  ;;  %v13316_v3 = vcombine.high %v827_v8, %v831_v61  ;;  %v870_v47 = vld [vmem:[%s19773_s1 + $0x1a60] sm:$0xff]  ;;  %v867_v49 = vld [vmem:[%s19773_s1 + $0x1a48] sm:$0xff] }
 0x17d   :  { %v871_v50 = vld [vmem:[%s19773_s1 + $0x1a68] sm:$0xff] }
 0x17e   :  { %9903 = vmatpush1.bf16.msra.mxu0 %v13265_v10  ;;  %v839_v10 = vld [vmem:[%s19773_s1 + $0x1968] sm:$0xff] }
 0x17f   :  { %10436 = vmatpush1.bf16.msra.mxu1 %v13267_v11  ;;  %9904 = vmatprep.subr.bf16.mxu0 %v13274_v12  ;;  %v13313_v11 = vcombine.low %v826_v57, %v830_v60  ;;  %v13315_v12 = vcombine.low %v827_v8, %v831_v61  ;;  %v13324_v1 = vcombine.high %v835_v7, %v839_v10  ;;  %v874_v57 = vld [vmem:[%s19773_s1 + $0x1a80] sm:$0xff]  ;;  %v875_v8 = vld [vmem:[%s19773_s1 + $0x1a88] sm:$0xff] }
 0x180   :  { %10437 = vmatprep.subr.bf16.mxu1 %v13276_v13  ;;  %v13322_v13 = vcombine.high %v834_v5, %v838_v6  ;;  %v878_v60 = vld [vmem:[%s19773_s1 + $0x1aa0] sm:$0xff]  ;;  %v879_v61 = vld [vmem:[%s19773_s1 + $0x1aa8] sm:$0xff] }
 0x182   :  { %9905 = vmatpush1.bf16.msra.mxu0 %v13273_v18  ;;  %v847_v18 = vld [vmem:[%s19773_s1 + $0x19a8] sm:$0xff] }
 0x183   :  { %10438 = vmatpush1.bf16.msra.mxu1 %v13275_v20  ;;  %9915 = vmatprep.subr.bf16.mxu0 %v13282_v21  ;;  %v13321_v20 = vcombine.low %v834_v5, %v838_v6  ;;  %v13323_v21 = vcombine.low %v835_v7, %v839_v10  ;;  %v13332_v24 = vcombine.high %v843_v17, %v847_v18  ;;  %v882_v5 = vld [vmem:[%s19773_s1 + $0x1ac0] sm:$0xff]  ;;  %v883_v7 = vld [vmem:[%s19773_s1 + $0x1ac8] sm:$0xff] }
 0x184   :  { %10448 = vmatprep.subr.bf16.mxu1 %v13284_v22  ;;  %v13330_v22 = vcombine.high %v842_v14, %v846_v16  ;;  %v886_v6 = vld [vmem:[%s19773_s1 + $0x1ae0] sm:$0xff]  ;;  %v887_v10 = vld [vmem:[%s19773_s1 + $0x1ae8] sm:$0xff] }
 0x185   :  { %9907 = vmatmul.mubr.bf16.vlgmr.msra.gmra.mrb[0].mxu0 %v15841_v27 }
 0x186   :  { %9916 = vmatpush1.bf16.msra.mxu0 %v13281_v30  ;;  %10440 = vmatmul.mubr.bf16.vlgmr.msra.gmra.mrb[0].mxu1 %v15841_v27  ;;  %v13329_v30 = vcombine.low %v842_v14, %v846_v16  ;;  %v890_v14 = vld [vmem:[%s19773_s1 + $0x1b00] sm:$0xff] }
 0x187   :  { %10449 = vmatpush1.bf16.msra.mxu1 %v13283_v31  ;;  %9917 = vmatprep.subr.bf16.mxu0 %v13290_v32  ;;  %v13331_v31 = vcombine.low %v843_v17, %v847_v18  ;;  %v13338_v32 = vcombine.high %v850_v25, %v854_v26  ;;  %v894_v16 = vld [vmem:[%s19773_s1 + $0x1b20] sm:$0xff]  ;;  %v891_v17 = vld [vmem:[%s19773_s1 + $0x1b08] sm:$0xff] }
 0x188   :  { %10450 = vmatprep.subr.bf16.mxu1 %v13292_v34  ;;  %9947 = vmatprep.mubr.bf16.mxu0 %v15856_v37  ;;  %v13340_v34 = vcombine.high %v851_v28, %v855_v29  ;;  %v895_v18 = vld [vmem:[%s19773_s1 + $0x1b28] sm:$0xff] }
 0x189   :  { %10480 = vmatprep.mubr.bf16.mxu1 %v15856_v37 }
 0x18a   :  { %9918 = vmatpush1.bf16.msra.mxu0 %v13289_v41  ;;  %v13337_v41 = vcombine.low %v850_v25, %v854_v26  ;;  %v898_v25 = vld [vmem:[%s19773_s1 + $0x1b40] sm:$0xff] }
 0x18b   :  { %10451 = vmatpush1.bf16.msra.mxu1 %v13291_v42  ;;  %9919 = vmatprep.subr.bf16.mxu0 %v13298_v44  ;;  %v13339_v42 = vcombine.low %v851_v28, %v855_v29  ;;  %v13346_v44 = vcombine.high %v858_v35, %v862_v36  ;;  %v902_v26 = vld [vmem:[%s19773_s1 + $0x1b60] sm:$0xff]  ;;  %v899_v28 = vld [vmem:[%s19773_s1 + $0x1b48] sm:$0xff] }
 0x18c   :  { %10452 = vmatprep.subr.bf16.mxu1 %v13300_v45  ;;  %v13348_v45 = vcombine.high %v859_v38, %v863_v39  ;;  %v903_v29 = vld [vmem:[%s19773_s1 + $0x1b68] sm:$0xff] }
 0x18e   :  { %9920 = vmatpush1.bf16.msra.mxu0 %v13297_v52  ;;  %v13345_v52 = vcombine.low %v858_v35, %v862_v36  ;;  %v906_v35 = vld [vmem:[%s19773_s1 + $0x1b80] sm:$0xff] }
 0x18f   :  { %10453 = vmatpush1.bf16.msra.mxu1 %v13299_v54  ;;  %9921 = vmatprep.subr.bf16.mxu0 %v13306_v55  ;;  %v13347_v54 = vcombine.low %v859_v38, %v863_v39  ;;  %v13354_v55 = vcombine.high %v866_v46, %v870_v47  ;;  %v910_v36 = vld [vmem:[%s19773_s1 + $0x1ba0] sm:$0xff]  ;;  %v907_v38 = vld [vmem:[%s19773_s1 + $0x1b88] sm:$0xff] }
 0x190   :  { %10454 = vmatprep.subr.bf16.mxu1 %v13308_v56  ;;  %v13356_v56 = vcombine.high %v867_v49, %v871_v50  ;;  %v911_v39 = vld [vmem:[%s19773_s1 + $0x1ba8] sm:$0xff] }
 0x192   :  { %9922 = vmatpush1.bf16.msra.mxu0 %v13305_v0  ;;  %v13353_v0 = vcombine.low %v866_v46, %v870_v47  ;;  %v914_v46 = vld [vmem:[%s19773_s1 + $0x1bc0] sm:$0xff] }
 0x193   :  { %10455 = vmatpush1.bf16.msra.mxu1 %v13307_v2  ;;  %9923 = vmatprep.subr.bf16.mxu0 %v13314_v63  ;;  %v13355_v2 = vcombine.low %v867_v49, %v871_v50  ;;  %v13362_v63 = vcombine.high %v874_v57, %v878_v60  ;;  %v918_v47 = vld [vmem:[%s19773_s1 + $0x1be0] sm:$0xff]  ;;  %v915_v49 = vld [vmem:[%s19773_s1 + $0x1bc8] sm:$0xff] }
 0x194   :  { %10456 = vmatprep.subr.bf16.mxu1 %v13316_v3  ;;  %v13364_v3 = vcombine.high %v875_v8, %v879_v61  ;;  %v919_v50 = vld [vmem:[%s19773_s1 + $0x1be8] sm:$0xff] }
 0x196   :  { %9924 = vmatpush1.bf16.msra.mxu0 %v13313_v11  ;;  %v13361_v11 = vcombine.low %v874_v57, %v878_v60  ;;  %v922_v57 = vld [vmem:[%s19773_s1 + $0x1c00] sm:$0xff] }
 0x197   :  { %10457 = vmatpush1.bf16.msra.mxu1 %v13315_v12  ;;  %9925 = vmatprep.subr.bf16.mxu0 %v13322_v13  ;;  %v13363_v12 = vcombine.low %v875_v8, %v879_v61  ;;  %v13370_v13 = vcombine.high %v882_v5, %v886_v6  ;;  %v926_v60 = vld [vmem:[%s19773_s1 + $0x1c20] sm:$0xff]  ;;  %v923_v8 = vld [vmem:[%s19773_s1 + $0x1c08] sm:$0xff] }
 0x198   :  { %10458 = vmatprep.subr.bf16.mxu1 %v13324_v1  ;;  %v13372_v1 = vcombine.high %v883_v7, %v887_v10  ;;  %v927_v61 = vld [vmem:[%s19773_s1 + $0x1c28] sm:$0xff] }
 0x19a   :  { %9926 = vmatpush1.bf16.msra.mxu0 %v13321_v20  ;;  %v13369_v20 = vcombine.low %v882_v5, %v886_v6  ;;  %v930_v5 = vld [vmem:[%s19773_s1 + $0x1c40] sm:$0xff] }
 0x19b   :  { %10459 = vmatpush1.bf16.msra.mxu1 %v13323_v21  ;;  %9927 = vmatprep.subr.bf16.mxu0 %v13330_v22  ;;  %v13371_v21 = vcombine.low %v883_v7, %v887_v10  ;;  %v13378_v22 = vcombine.high %v890_v14, %v894_v16  ;;  %v934_v6 = vld [vmem:[%s19773_s1 + $0x1c60] sm:$0xff]  ;;  %v16044_v7 = vrot.slane %v15823_v15, %v14646_v53  ;;  %v931_v10 = vld [vmem:[%s19773_s1 + $0x1c48] sm:$0xff] }
 0x19c   :  { %10460 = vmatprep.subr.bf16.mxu1 %v13332_v24  ;;  %v13380_v24 = vcombine.high %v891_v17, %v895_v18  ;;  %v938_v15 = vld [vmem:[%s19773_s1 + $0x1c80] sm:$0xff] }
 0x19e   :  { %9928 = vmatpush1.bf16.msra.mxu0 %v13329_v30  ;;  %v13377_v30 = vcombine.low %v890_v14, %v894_v16  ;;  %v942_v16 = vld [vmem:[%s19773_s1 + $0x1ca0] sm:$0xff] }
 0x19f   :  { %10461 = vmatpush1.bf16.msra.mxu1 %v13331_v31  ;;  %9929 = vmatprep.subr.bf16.mxu0 %v13338_v32  ;;  %v13379_v31 = vcombine.low %v891_v17, %v895_v18  ;;  %v13386_v32 = vcombine.high %v898_v25, %v902_v26  ;;  %v16060_v17 = vcombine.high %v15856_v37, %v15856_v37  ;;  %v939_v18 = vld [vmem:[%s19773_s1 + $0x1c88] sm:$0xff] }
 0x1a0   :  { %10462 = vmatprep.subr.bf16.mxu1 %v13340_v34  ;;  %v13388_v34 = vcombine.high %v899_v28, %v903_v29 }
 0x1a2   :  { %9930 = vmatpush1.bf16.msra.mxu0 %v13337_v41  ;;  %v13385_v41 = vcombine.low %v898_v25, %v902_v26  ;;  %v946_v26 = vld [vmem:[%s19773_s1 + $0x1cc0] sm:$0xff] }
 0x1a3   :  { %10463 = vmatpush1.bf16.msra.mxu1 %v13339_v42  ;;  %9931 = vmatprep.subr.bf16.mxu0 %v13346_v44  ;;  %v13387_v42 = vcombine.low %v899_v28, %v903_v29  ;;  %v13394_v44 = vcombine.high %v906_v35, %v910_v36  ;;  %v950_v28 = vld [vmem:[%s19773_s1 + $0x1ce0] sm:$0xff]  ;;  %v947_v29 = vld [vmem:[%s19773_s1 + $0x1cc8] sm:$0xff] }
 0x1a4   :  { %10464 = vmatprep.subr.bf16.mxu1 %v13348_v45  ;;  %v13396_v45 = vcombine.high %v907_v38, %v911_v39 }
 0x1a6   :  { %9932 = vmatpush1.bf16.msra.mxu0 %v13345_v52  ;;  %v13393_v52 = vcombine.low %v906_v35, %v910_v36  ;;  %v954_v36 = vld [vmem:[%s19773_s1 + $0x1d00] sm:$0xff] }
 0x1a7   :  { %10465 = vmatpush1.bf16.msra.mxu1 %v13347_v54  ;;  %9933 = vmatprep.subr.bf16.mxu0 %v13354_v55  ;;  %v13395_v54 = vcombine.low %v907_v38, %v911_v39  ;;  %v13402_v55 = vcombine.high %v914_v46, %v918_v47  ;;  %v958_v38 = vld [vmem:[%s19773_s1 + $0x1d20] sm:$0xff]  ;;  %v955_v39 = vld [vmem:[%s19773_s1 + $0x1d08] sm:$0xff] }
 0x1a8   :  { %10466 = vmatprep.subr.bf16.mxu1 %v13356_v56  ;;  %v13404_v56 = vcombine.high %v915_v49, %v919_v50 }
 0x1aa   :  { %9934 = vmatpush1.bf16.msra.mxu0 %v13353_v0  ;;  %v13401_v0 = vcombine.low %v914_v46, %v918_v47  ;;  %v962_v47 = vld [vmem:[%s19773_s1 + $0x1d40] sm:$0xff] }
 0x1ab   :  { %10467 = vmatpush1.bf16.msra.mxu1 %v13355_v2  ;;  %9935 = vmatprep.subr.bf16.mxu0 %v13362_v63  ;;  %v13403_v2 = vcombine.low %v915_v49, %v919_v50  ;;  %v13410_v63 = vcombine.high %v922_v57, %v926_v60  ;;  %v966_v49 = vld [vmem:[%s19773_s1 + $0x1d60] sm:$0xff]  ;;  %v963_v50 = vld [vmem:[%s19773_s1 + $0x1d48] sm:$0xff] }
 0x1ac   :  { %10468 = vmatprep.subr.bf16.mxu1 %v13364_v3  ;;  %v13412_v3 = vcombine.high %v923_v8, %v927_v61 }
 0x1ae   :  { %9936 = vmatpush1.bf16.msra.mxu0 %v13361_v11  ;;  %v935_v11 = vld [vmem:[%s19773_s1 + $0x1c68] sm:$0xff] }
 0x1af   :  { %10469 = vmatpush1.bf16.msra.mxu1 %v13363_v12  ;;  %9937 = vmatprep.subr.bf16.mxu0 %v13370_v13  ;;  %v13409_v12 = vcombine.low %v922_v57, %v926_v60  ;;  %v13411_v13 = vcombine.low %v923_v8, %v927_v61  ;;  %v13420_v14 = vcombine.high %v931_v10, %v935_v11  ;;  %v970_v60 = vld [vmem:[%s19773_s1 + $0x1d80] sm:$0xff]  ;;  %v971_v61 = vld [vmem:[%s19773_s1 + $0x1d88] sm:$0xff] }
 0x1b0   :  { %10470 = vmatprep.subr.bf16.mxu1 %v13372_v1  ;;  %v13418_v1 = vcombine.high %v930_v5, %v934_v6  ;;  %v974_v8 = vld [vmem:[%s19773_s1 + $0x1da0] sm:$0xff] }
 0x1b2   :  { %9938 = vmatpush1.bf16.msra.mxu0 %v13369_v20  ;;  %v943_v20 = vld [vmem:[%s19773_s1 + $0x1ca8] sm:$0xff] }
 0x1b3   :  { %10471 = vmatpush1.bf16.msra.mxu1 %v13371_v21  ;;  %9939 = vmatprep.subr.bf16.mxu0 %v13378_v22  ;;  %v13417_v21 = vcombine.low %v930_v5, %v934_v6  ;;  %v13419_v22 = vcombine.low %v931_v10, %v935_v11  ;;  %v13428_v25 = vcombine.high %v939_v18, %v943_v20  ;;  %v978_v6 = vld [vmem:[%s19773_s1 + $0x1dc0] sm:$0xff]  ;;  %v979_v11 = vld [vmem:[%s19773_s1 + $0x1dc8] sm:$0xff] }
 0x1b4   :  { %10472 = vmatprep.subr.bf16.mxu1 %v13380_v24  ;;  %v13426_v24 = vcombine.high %v938_v15, %v942_v16  ;;  %v982_v10 = vld [vmem:[%s19773_s1 + $0x1de0] sm:$0xff] }
 0x1b6   :  { %9940 = vmatpush1.bf16.msra.mxu0 %v13377_v30  ;;  %v951_v30 = vld [vmem:[%s19773_s1 + $0x1ce8] sm:$0xff] }
 0x1b7   :  { %10473 = vmatpush1.bf16.msra.mxu1 %v13379_v31  ;;  %9941 = vmatprep.subr.bf16.mxu0 %v13386_v32  ;;  %v13425_v31 = vcombine.low %v938_v15, %v942_v16  ;;  %v13427_v32 = vcombine.low %v939_v18, %v943_v20  ;;  %v13436_v35 = vcombine.high %v947_v29, %v951_v30  ;;  %v986_v16 = vld [vmem:[%s19773_s1 + $0x1e00] sm:$0xff]  ;;  %v987_v20 = vld [vmem:[%s19773_s1 + $0x1e08] sm:$0xff] }
 0x1b8   :  { %10474 = vmatprep.subr.bf16.mxu1 %v13388_v34  ;;  %v13434_v34 = vcombine.high %v946_v26, %v950_v28  ;;  %v990_v18 = vld [vmem:[%s19773_s1 + $0x1e20] sm:$0xff] }
 0x1ba   :  { %9942 = vmatpush1.bf16.msra.mxu0 %v13385_v41  ;;  %v959_v41 = vld [vmem:[%s19773_s1 + $0x1d28] sm:$0xff] }
 0x1bb   :  { %10475 = vmatpush1.bf16.msra.mxu1 %v13387_v42  ;;  %9943 = vmatprep.subr.bf16.mxu0 %v13394_v44  ;;  %v13433_v42 = vcombine.low %v946_v26, %v950_v28  ;;  %v13435_v44 = vcombine.low %v947_v29, %v951_v30  ;;  %v13444_v46 = vcombine.high %v955_v39, %v959_v41  ;;  %v994_v28 = vld [vmem:[%s19773_s1 + $0x1e40] sm:$0xff]  ;;  %v995_v30 = vld [vmem:[%s19773_s1 + $0x1e48] sm:$0xff] }
 0x1bc   :  { %10476 = vmatprep.subr.bf16.mxu1 %v13396_v45  ;;  %v13442_v45 = vcombine.high %v954_v36, %v958_v38  ;;  %v998_v29 = vld [vmem:[%s19773_s1 + $0x1e60] sm:$0xff] }
 0x1be   :  { %9944 = vmatpush1.bf16.msra.mxu0 %v13393_v52  ;;  %v967_v52 = vld [vmem:[%s19773_s1 + $0x1d68] sm:$0xff] }
 0x1bf   :  { %10477 = vmatpush1.bf16.msra.mxu1 %v13395_v54  ;;  %9945 = vmatprep.subr.bf16.mxu0 %v13402_v55  ;;  %v13441_v54 = vcombine.low %v954_v36, %v958_v38  ;;  %v13443_v55 = vcombine.low %v955_v39, %v959_v41  ;;  %v13452_v57 = vcombine.high %v963_v50, %v967_v52  ;;  %v1002_v38 = vld [vmem:[%s19773_s1 + $0x1e80] sm:$0xff]  ;;  %v1003_v41 = vld [vmem:[%s19773_s1 + $0x1e88] sm:$0xff] }
 0x1c0   :  { %10478 = vmatprep.subr.bf16.mxu1 %v13404_v56  ;;  %v13450_v56 = vcombine.high %v962_v47, %v966_v49  ;;  %v1006_v39 = vld [vmem:[%s19773_s1 + $0x1ea0] sm:$0xff] }
 0x1c2   :  { %9946 = vmatpush1.bf16.msra.mxu0 %v13401_v0  ;;  %v975_v0 = vld [vmem:[%s19773_s1 + $0x1da8] sm:$0xff] }
 0x1c3   :  { %10479 = vmatpush1.bf16.msra.mxu1 %v13403_v2  ;;  %9956 = vmatprep.subr.bf16.mxu0 %v13410_v63  ;;  %v13449_v2 = vcombine.low %v962_v47, %v966_v49  ;;  %v13451_v63 = vcombine.low %v963_v50, %v967_v52  ;;  %v13460_v5 = vcombine.high %v971_v61, %v975_v0  ;;  %v1010_v49 = vld [vmem:[%s19773_s1 + $0x1ec0] sm:$0xff]  ;;  %v1011_v52 = vld [vmem:[%s19773_s1 + $0x1ec8] sm:$0xff] }
 0x1c4   :  { %10489 = vmatprep.subr.bf16.mxu1 %v13412_v3  ;;  %v13458_v3 = vcombine.high %v970_v60, %v974_v8  ;;  %v1014_v50 = vld [vmem:[%s19773_s1 + $0x1ee0] sm:$0xff] }
 0x1c5   :  { %9948 = vmatmul.mubr.bf16.vlgmr.msra.gmra.mrb[0].mxu0 %v16044_v7 }
 0x1c6   :  { %9957 = vmatpush1.bf16.msra.mxu0 %v13409_v12  ;;  %10481 = vmatmul.mubr.bf16.vlgmr.msra.gmra.mrb[0].mxu1 %v16044_v7  ;;  %v983_v12 = vld [vmem:[%s19773_s1 + $0x1de8] sm:$0xff] }
 0x1c7   :  { %10490 = vmatpush1.bf16.msra.mxu1 %v13411_v13  ;;  %9958 = vmatprep.subr.bf16.mxu0 %v13418_v1  ;;  %v13457_v13 = vcombine.low %v970_v60, %v974_v8  ;;  %v13459_v1 = vcombine.low %v971_v61, %v975_v0  ;;  %v13468_v15 = vcombine.high %v979_v11, %v983_v12  ;;  %v1018_v8 = vld [vmem:[%s19773_s1 + $0x1f00] sm:$0xff]  ;;  %v1019_v0 = vld [vmem:[%s19773_s1 + $0x1f08] sm:$0xff] }
 0x1c8   :  { %10491 = vmatprep.subr.bf16.mxu1 %v13420_v14  ;;  %9988 = vmatprep.mubr.bf16.mxu0 %v16060_v17  ;;  %v13466_v14 = vcombine.high %v978_v6, %v982_v10  ;;  %v1022_v61 = vld [vmem:[%s19773_s1 + $0x1f20] sm:$0xff] }
 0x1c9   :  { %10521 = vmatprep.mubr.bf16.mxu1 %v16060_v17 }
 0x1ca   :  { %9959 = vmatpush1.bf16.msra.mxu0 %v13417_v21  ;;  %v991_v21 = vld [vmem:[%s19773_s1 + $0x1e28] sm:$0xff] }
 0x1cb   :  { %10492 = vmatpush1.bf16.msra.mxu1 %v13419_v22  ;;  %9960 = vmatprep.subr.bf16.mxu0 %v13426_v24  ;;  %v13465_v22 = vcombine.low %v978_v6, %v982_v10  ;;  %v13467_v24 = vcombine.low %v979_v11, %v983_v12  ;;  %v13476_v26 = vcombine.high %v987_v20, %v991_v21  ;;  %v1026_v10 = vld [vmem:[%s19773_s1 + $0x1f40] sm:$0xff]  ;;  %v1027_v12 = vld [vmem:[%s19773_s1 + $0x1f48] sm:$0xff] }
 0x1cc   :  { %10493 = vmatprep.subr.bf16.mxu1 %v13428_v25  ;;  %v13474_v25 = vcombine.high %v986_v16, %v990_v18  ;;  %v1030_v11 = vld [vmem:[%s19773_s1 + $0x1f60] sm:$0xff] }
 0x1ce   :  { %9961 = vmatpush1.bf16.msra.mxu0 %v13425_v31  ;;  %v999_v31 = vld [vmem:[%s19773_s1 + $0x1e68] sm:$0xff] }
 0x1cf   :  { %10494 = vmatpush1.bf16.msra.mxu1 %v13427_v32  ;;  %9962 = vmatprep.subr.bf16.mxu0 %v13434_v34  ;;  %v13473_v32 = vcombine.low %v986_v16, %v990_v18  ;;  %v13475_v34 = vcombine.low %v987_v20, %v991_v21  ;;  %v13484_v36 = vcombine.high %v995_v30, %v999_v31  ;;  %v1034_v18 = vld [vmem:[%s19773_s1 + $0x1f80] sm:$0xff]  ;;  %v1035_v21 = vld [vmem:[%s19773_s1 + $0x1f88] sm:$0xff] }
 0x1d0   :  { %10495 = vmatprep.subr.bf16.mxu1 %v13436_v35  ;;  %v13482_v35 = vcombine.high %v994_v28, %v998_v29  ;;  %v1038_v20 = vld [vmem:[%s19773_s1 + $0x1fa0] sm:$0xff] }
 0x1d2   :  { %9963 = vmatpush1.bf16.msra.mxu0 %v13433_v42  ;;  %v1007_v42 = vld [vmem:[%s19773_s1 + $0x1ea8] sm:$0xff] }
 0x1d3   :  { %10496 = vmatpush1.bf16.msra.mxu1 %v13435_v44  ;;  %9964 = vmatprep.subr.bf16.mxu0 %v13442_v45  ;;  %v13481_v44 = vcombine.low %v994_v28, %v998_v29  ;;  %v13483_v45 = vcombine.low %v995_v30, %v999_v31  ;;  %v13492_v47 = vcombine.high %v1003_v41, %v1007_v42  ;;  %v1042_v29 = vld [vmem:[%s19773_s1 + $0x1fc0] sm:$0xff]  ;;  %v1043_v31 = vld [vmem:[%s19773_s1 + $0x1fc8] sm:$0xff] }
 0x1d4   :  { %10497 = vmatprep.subr.bf16.mxu1 %v13444_v46  ;;  %v13490_v46 = vcombine.high %v1002_v38, %v1006_v39  ;;  %v1046_v30 = vld [vmem:[%s19773_s1 + $0x1fe0] sm:$0xff] }
 0x1d6   :  { %9965 = vmatpush1.bf16.msra.mxu0 %v13441_v54  ;;  %v1015_v54 = vld [vmem:[%s19773_s1 + $0x1ee8] sm:$0xff] }
 0x1d7   :  { %10498 = vmatpush1.bf16.msra.mxu1 %v13443_v55  ;;  %9966 = vmatprep.subr.bf16.mxu0 %v13450_v56  ;;  %v13489_v55 = vcombine.low %v1002_v38, %v1006_v39  ;;  %v13491_v56 = vcombine.low %v1003_v41, %v1007_v42  ;;  %v13500_v60 = vcombine.high %v1011_v52, %v1015_v54  ;;  %v1050_v41 = vld [vmem:[%s19773_s1 + $0x2000] sm:$0xff] }
 0x1d8   :  { %10499 = vmatprep.subr.bf16.mxu1 %v13452_v57  ;;  %v13498_v57 = vcombine.high %v1010_v49, %v1014_v50  ;;  %v13530_v38 = vcombine.high %v1042_v29, %v1046_v30  ;;  %v1054_v42 = vld [vmem:[%s19773_s1 + $0x2020] sm:$0xff] }
 0x1da   :  { %9967 = vmatpush1.bf16.msra.mxu0 %v13449_v2  ;;  %v1023_v2 = vld [vmem:[%s19773_s1 + $0x1f28] sm:$0xff] }
 0x1db   :  { %10500 = vmatpush1.bf16.msra.mxu1 %v13451_v63  ;;  %9968 = vmatprep.subr.bf16.mxu0 %v13458_v3  ;;  %v13497_v63 = vcombine.low %v1010_v49, %v1014_v50  ;;  %v13499_v3 = vcombine.low %v1011_v52, %v1015_v54  ;;  %v13508_v6 = vcombine.high %v1019_v0, %v1023_v2  ;;  %v1058_v54 = vld [vmem:[%s19773_s1 + $0x2040] sm:$0xff] }
 0x1dc   :  { %10501 = vmatprep.subr.bf16.mxu1 %v13460_v5  ;;  %v13506_v5 = vcombine.high %v1018_v8, %v1022_v61  ;;  %v13538_v50 = vcombine.high %v1050_v41, %v1054_v42 }
 0x1de   :  { %9969 = vmatpush1.bf16.msra.mxu0 %v13457_v13  ;;  %v1031_v13 = vld [vmem:[%s19773_s1 + $0x1f68] sm:$0xff] }
 0x1df   :  { %10502 = vmatpush1.bf16.msra.mxu1 %v13459_v1  ;;  %9970 = vmatprep.subr.bf16.mxu0 %v13466_v14  ;;  %v13505_v1 = vcombine.low %v1018_v8, %v1022_v61  ;;  %v13507_v14 = vcombine.low %v1019_v0, %v1023_v2  ;;  %v13516_v16 = vcombine.high %v1027_v12, %v1031_v13  ;;  %v1063_v8 = vld [vmem:[%s19773_s1 + $0x2068] sm:$0xff] }
 0x1e0   :  { %10503 = vmatprep.subr.bf16.mxu1 %v13468_v15  ;;  %v13514_v15 = vcombine.high %v1026_v10, %v1030_v11  ;;  %v13537_v61 = vcombine.low %v1050_v41, %v1054_v42  ;;  %v1091_v41 = vld [vmem:[%s19773_s1 + $0x2148] sm:$0xff] }
 0x1e1   :  { %v1095_v42 = vld [vmem:[%s19773_s1 + $0x2168] sm:$0xff] }
 0x1e2   :  { %9971 = vmatpush1.bf16.msra.mxu0 %v13465_v22  ;;  %v1039_v22 = vld [vmem:[%s19773_s1 + $0x1fa8] sm:$0xff] }
 0x1e3   :  { %10504 = vmatpush1.bf16.msra.mxu1 %v13467_v24  ;;  %9972 = vmatprep.subr.bf16.mxu0 %v13474_v25  ;;  %v13513_v24 = vcombine.low %v1026_v10, %v1030_v11  ;;  %v13515_v25 = vcombine.low %v1027_v12, %v1031_v13  ;;  %v13524_v28 = vcombine.high %v1035_v21, %v1039_v22  ;;  %v1067_v10 = vld [vmem:[%s19773_s1 + $0x2088] sm:$0xff] }
 0x1e4   :  { %10505 = vmatprep.subr.bf16.mxu1 %v13476_v26  ;;  %v13522_v26 = vcombine.high %v1034_v18, %v1038_v20  ;;  %v1071_v11 = vld [vmem:[%s19773_s1 + $0x20a8] sm:$0xff] }
 0x1e6   :  { %9973 = vmatpush1.bf16.msra.mxu0 %v13473_v32  ;;  %v1047_v32 = vld [vmem:[%s19773_s1 + $0x1fe8] sm:$0xff] }
 0x1e7   :  { %10506 = vmatpush1.bf16.msra.mxu1 %v13475_v34  ;;  %9974 = vmatprep.subr.bf16.mxu0 %v13482_v35  ;;  %v16231_v34 = vld [vmem:[%s19772_s0 + $0x10] sm:$0xff]  ;;  %v13521_v35 = vcombine.low %v1034_v18, %v1038_v20  ;;  %v13532_v39 = vcombine.high %v1043_v31, %v1047_v32  ;;  %v13531_v49 = vcombine.low %v1043_v31, %v1047_v32  ;;  %v1075_v18 = vld [vmem:[%s19773_s1 + $0x20c8] sm:$0xff] }
 0x1e8   :  { %10507 = vmatprep.subr.bf16.mxu1 %v13484_v36  ;;  %v13523_v36 = vcombine.low %v1035_v21, %v1039_v22  ;;  %v1079_v20 = vld [vmem:[%s19773_s1 + $0x20e8] sm:$0xff]  ;;  %v13555_v22 = vcombine.low %v1067_v10, %v1071_v11 }
 0x1e9   :  { %v13563_v32 = vcombine.low %v1075_v18, %v1079_v20 }
 0x1ea   :  { %9975 = vmatpush1.bf16.msra.mxu0 %v13481_v44  ;;  %v16241_v44 = vrot.slane %v16231_v34, %v14646_v53 }
 0x1eb   :  { %10508 = vmatpush1.bf16.msra.mxu1 %v13483_v45  ;;  %9976 = vmatprep.subr.bf16.mxu0 %v13490_v46  ;;  %v1051_v45 = vld [vmem:[%s19773_s1 + $0x2008] sm:$0xff] }
 0x1ec   :  { %10509 = vmatprep.subr.bf16.mxu1 %v13492_v47  ;;  %v1055_v46 = vld [vmem:[%s19773_s1 + $0x2028] sm:$0xff]  ;;  %v13529_v47 = vcombine.low %v1042_v29, %v1046_v30 }
 0x1ed   :  { %v13540_v52 = vcombine.high %v1051_v45, %v1055_v46  ;;  %v13539_v0 = vcombine.low %v1051_v45, %v1055_v46  ;;  %v1083_v29 = vld [vmem:[%s19773_s1 + $0x2108] sm:$0xff] }
 0x1ee   :  { %9977 = vmatpush1.bf16.msra.mxu0 %v13489_v55  ;;  %v1062_v55 = vld [vmem:[%s19773_s1 + $0x2060] sm:$0xff]  ;;  %v1087_v30 = vld [vmem:[%s19773_s1 + $0x2128] sm:$0xff] }
 0x1ef   :  { %10510 = vmatpush1.bf16.msra.mxu1 %v13491_v56  ;;  %9978 = vmatprep.subr.bf16.mxu0 %v13498_v57  ;;  %v1753_v56 = vcombine.high %v16241_v44, %v16241_v44  ;;  %v16259_v57 = vcombine.high %v16044_v7, %v16044_v7  ;;  %v13546_v2 = vcombine.high %v1058_v54, %v1062_v55 }
 0x1f0   :  { %10511 = vmatprep.subr.bf16.mxu1 %v13500_v60  ;;  %v1059_v60 = vld [vmem:[%s19773_s1 + $0x2048] sm:$0xff]  ;;  %v13545_v12 = vcombine.low %v1058_v54, %v1062_v55  ;;  %v13571_v46 = vcombine.low %v1083_v29, %v1087_v30 }
 0x1f1   :  { %v13547_v13 = vcombine.low %v1059_v60, %v1063_v8  ;;  %v1099_v54 = vld [vmem:[%s19773_s1 + $0x2188] sm:$0xff] }
 0x1f2   :  { %9979 = vmatpush1.bf16.msra.mxu0 %v13497_v63  ;;  %v13548_v63 = vcombine.high %v1059_v60, %v1063_v8  ;;  %v1103_v55 = vld [vmem:[%s19773_s1 + $0x21a8] sm:$0xff]  ;;  %v13579_v60 = vcombine.low %v1091_v41, %v1095_v42 }
 0x1f3   :  { %10512 = vmatpush1.bf16.msra.mxu1 %v13499_v3  ;;  %9980 = vmatprep.subr.bf16.mxu0 %v13506_v5  ;;  %v1066_v3 = vld [vmem:[%s19773_s1 + $0x2080] sm:$0xff] }
 0x1f4   :  { %10513 = vmatprep.subr.bf16.mxu1 %v13508_v6  ;;  %v1070_v5 = vld [vmem:[%s19773_s1 + $0x20a0] sm:$0xff]  ;;  %v16274_v6 = vrot.slane %v1753_v56, %v14646_v53 }
 0x1f5   :  { %v13553_v21 = vcombine.low %v1066_v3, %v1070_v5 }
 0x1f6   :  { %9981 = vmatpush1.bf16.msra.mxu0 %v13505_v1  ;;  %v13554_v1 = vcombine.high %v1066_v3, %v1070_v5  ;;  %v1111_v3 = vld [vmem:[%s19773_s1 + $0x21e8] sm:$0xff] }
 0x1f7   :  { %10514 = vmatpush1.bf16.msra.mxu1 %v13507_v14  ;;  %9982 = vmatprep.subr.bf16.mxu0 %v13514_v15  ;;  %v13556_v14 = vcombine.high %v1067_v10, %v1071_v11  ;;  %v1074_v15 = vld [vmem:[%s19773_s1 + $0x20c0] sm:$0xff]  ;;  %v13587_v10 = vcombine.low %v1099_v54, %v1103_v55 }
 0x1f8   :  { %10515 = vmatprep.subr.bf16.mxu1 %v13516_v16  ;;  %v1078_v16 = vld [vmem:[%s19773_s1 + $0x20e0] sm:$0xff] }
 0x1f9   :  { %v13561_v31 = vcombine.low %v1074_v15, %v1078_v16 }
 0x1fa   :  { %9983 = vmatpush1.bf16.msra.mxu0 %v13513_v24  ;;  %v13562_v24 = vcombine.high %v1074_v15, %v1078_v16  ;;  %v1119_v15 = vld [vmem:[%s19773_s1 + $0x2228] sm:$0xff] }
 0x1fb   :  { %10516 = vmatpush1.bf16.msra.mxu1 %v13515_v25  ;;  %9984 = vmatprep.subr.bf16.mxu0 %v13522_v26  ;;  %v13564_v25 = vcombine.high %v1075_v18, %v1079_v20  ;;  %v1082_v26 = vld [vmem:[%s19773_s1 + $0x2100] sm:$0xff] }
 0x1fc   :  { %10517 = vmatprep.subr.bf16.mxu1 %v13524_v28  ;;  %v1086_v28 = vld [vmem:[%s19773_s1 + $0x2120] sm:$0xff] }
 0x1fd   :  { %v13569_v45 = vcombine.low %v1082_v26, %v1086_v28 }
 0x1fe   :  { %9985 = vmatpush1.bf16.msra.mxu0 %v13521_v35  ;;  %v13570_v35 = vcombine.high %v1082_v26, %v1086_v28  ;;  %v1127_v26 = vld [vmem:[%s19773_s1 + $0x2268] sm:$0xff] }
 0x1ff   :  { %10518 = vmatpush1.bf16.msra.mxu1 %v13523_v36  ;;  %9986 = vmatprep.subr.bf16.mxu0 %v13530_v38  ;;  %v13572_v36 = vcombine.high %v1083_v29, %v1087_v30  ;;  %v1090_v38 = vld [vmem:[%s19773_s1 + $0x2140] sm:$0xff] }
 0x200   :  { %10519 = vmatprep.subr.bf16.mxu1 %v13532_v39  ;;  %v1094_v39 = vld [vmem:[%s19773_s1 + $0x2160] sm:$0xff] }
 0x201   :  { %v13577_v56 = vcombine.low %v1090_v38, %v1094_v39 }
 0x202   :  { %9987 = vmatpush1.bf16.msra.mxu0 %v13529_v47  ;;  %v13578_v47 = vcombine.high %v1090_v38, %v1094_v39  ;;  %v1135_v38 = vld [vmem:[%s19773_s1 + $0x22a8] sm:$0xff] }
 0x203   :  { %10520 = vmatpush1.bf16.msra.mxu1 %v13531_v49  ;;  %9997 = vmatprep.subr.bf16.mxu0 %v13538_v50  ;;  %v13580_v49 = vcombine.high %v1091_v41, %v1095_v42  ;;  %v1098_v50 = vld [vmem:[%s19773_s1 + $0x2180] sm:$0xff] }
 0x204   :  { %10530 = vmatprep.subr.bf16.mxu1 %v13540_v52  ;;  %v1102_v52 = vld [vmem:[%s19773_s1 + $0x21a0] sm:$0xff] }
 0x205   :  { %9989 = vmatmul.mubr.bf16.vlgmr.msra.gmra.mrb[0].mxu0 %v16259_v57  ;;  %v13586_v8 = vcombine.high %v1098_v50, %v1102_v52  ;;  %v13585_v5 = vcombine.low %v1098_v50, %v1102_v52  ;;  %v1143_v50 = vld [vmem:[%s19773_s1 + $0x22e8] sm:$0xff] }
 0x206   :  { %9998 = vmatpush1.bf16.msra.mxu0 %v13537_v61  ;;  %10522 = vmatmul.mubr.bf16.vlgmr.msra.gmra.mrb[0].mxu1 %v16259_v57  ;;  %v13588_v61 = vcombine.high %v1099_v54, %v1103_v55 }
 0x207   :  { %10531 = vmatpush1.bf16.msra.mxu1 %v13539_v0  ;;  %9999 = vmatprep.subr.bf16.mxu0 %v13546_v2  ;;  %v1106_v0 = vld [vmem:[%s19773_s1 + $0x21c0] sm:$0xff] }
 0x208   :  { %10532 = vmatprep.subr.bf16.mxu1 %v13548_v63  ;;  %10029 = vmatprep.mubr.bf16.mxu0 %v16274_v6  ;;  %v1110_v2 = vld [vmem:[%s19773_s1 + $0x21e0] sm:$0xff]  ;;  %v1107_v63 = vld [vmem:[%s19773_s1 + $0x21c8] sm:$0xff] }
 0x209   :  { %10562 = vmatprep.mubr.bf16.mxu1 %v16274_v6  ;;  %v13594_v11 = vcombine.high %v1106_v0, %v1110_v2  ;;  %v13593_v16 = vcombine.low %v1106_v0, %v1110_v2  ;;  %v13595_v18 = vcombine.low %v1107_v63, %v1111_v3  ;;  %v1151_v0 = vld [vmem:[%s19773_s1 + $0x2328] sm:$0xff] }
 0x20a   :  { %10000 = vmatpush1.bf16.msra.mxu0 %v13545_v12  ;;  %v13596_v12 = vcombine.high %v1107_v63, %v1111_v3 }
 0x20b   :  { %10533 = vmatpush1.bf16.msra.mxu1 %v13547_v13  ;;  %10001 = vmatprep.subr.bf16.mxu0 %v13554_v1  ;;  %v1114_v13 = vld [vmem:[%s19773_s1 + $0x2200] sm:$0xff] }
 0x20c   :  { %10534 = vmatprep.subr.bf16.mxu1 %v13556_v14  ;;  %v1118_v1 = vld [vmem:[%s19773_s1 + $0x2220] sm:$0xff]  ;;  %v1115_v14 = vld [vmem:[%s19773_s1 + $0x2208] sm:$0xff] }
 0x20d   :  { %v13602_v20 = vcombine.high %v1114_v13, %v1118_v1  ;;  %v13601_v28 = vcombine.low %v1114_v13, %v1118_v1  ;;  %v13603_v29 = vcombine.low %v1115_v14, %v1119_v15  ;;  %v1159_v13 = vld [vmem:[%s19773_s1 + $0x2368] sm:$0xff] }
 0x20e   :  { %10002 = vmatpush1.bf16.msra.mxu0 %v13553_v21  ;;  %v13604_v21 = vcombine.high %v1115_v14, %v1119_v15 }
 0x20f   :  { %10535 = vmatpush1.bf16.msra.mxu1 %v13555_v22  ;;  %10003 = vmatprep.subr.bf16.mxu0 %v13562_v24  ;;  %v1122_v22 = vld [vmem:[%s19773_s1 + $0x2240] sm:$0xff] }
 0x210   :  { %10536 = vmatprep.subr.bf16.mxu1 %v13564_v25  ;;  %v1126_v24 = vld [vmem:[%s19773_s1 + $0x2260] sm:$0xff]  ;;  %v1123_v25 = vld [vmem:[%s19773_s1 + $0x2248] sm:$0xff] }
 0x211   :  { %v13610_v30 = vcombine.high %v1122_v22, %v1126_v24  ;;  %v13609_v39 = vcombine.low %v1122_v22, %v1126_v24  ;;  %v13611_v41 = vcombine.low %v1123_v25, %v1127_v26  ;;  %v1167_v22 = vld [vmem:[%s19773_s1 + $0x23a8] sm:$0xff] }
 0x212   :  { %10004 = vmatpush1.bf16.msra.mxu0 %v13561_v31  ;;  %v13612_v31 = vcombine.high %v1123_v25, %v1127_v26 }
 0x213   :  { %10537 = vmatpush1.bf16.msra.mxu1 %v13563_v32  ;;  %10005 = vmatprep.subr.bf16.mxu0 %v13570_v35  ;;  %v1130_v32 = vld [vmem:[%s19773_s1 + $0x2280] sm:$0xff] }
 0x214   :  { %10538 = vmatprep.subr.bf16.mxu1 %v13572_v36  ;;  %v1134_v35 = vld [vmem:[%s19773_s1 + $0x22a0] sm:$0xff]  ;;  %v1131_v36 = vld [vmem:[%s19773_s1 + $0x2288] sm:$0xff] }
 0x215   :  { %v13618_v42 = vcombine.high %v1130_v32, %v1134_v35  ;;  %v13617_v52 = vcombine.low %v1130_v32, %v1134_v35  ;;  %v13619_v54 = vcombine.low %v1131_v36, %v1135_v38  ;;  %v1175_v32 = vld [vmem:[%s19773_s1 + $0x23e8] sm:$0xff] }
 0x216   :  { %10006 = vmatpush1.bf16.msra.mxu0 %v13569_v45  ;;  %v13620_v45 = vcombine.high %v1131_v36, %v1135_v38 }
 0x217   :  { %10539 = vmatpush1.bf16.msra.mxu1 %v13571_v46  ;;  %10007 = vmatprep.subr.bf16.mxu0 %v13578_v47  ;;  %v1138_v46 = vld [vmem:[%s19773_s1 + $0x22c0] sm:$0xff] }
 0x218   :  { %10540 = vmatprep.subr.bf16.mxu1 %v13580_v49  ;;  %v1142_v47 = vld [vmem:[%s19773_s1 + $0x22e0] sm:$0xff]  ;;  %v1139_v49 = vld [vmem:[%s19773_s1 + $0x22c8] sm:$0xff] }
 0x219   :  { %v13626_v55 = vcombine.high %v1138_v46, %v1142_v47  ;;  %v13625_v2 = vcombine.low %v1138_v46, %v1142_v47  ;;  %v13627_v63 = vcombine.low %v1139_v49, %v1143_v50  ;;  %v1183_v46 = vld [vmem:[%s19773_s1 + $0x2428] sm:$0xff] }
 0x21a   :  { %10008 = vmatpush1.bf16.msra.mxu0 %v13577_v56  ;;  %v13628_v56 = vcombine.high %v1139_v49, %v1143_v50 }
 0x21b   :  { %10541 = vmatpush1.bf16.msra.mxu1 %v13579_v60  ;;  %10009 = vmatprep.subr.bf16.mxu0 %v13586_v8  ;;  %v1146_v60 = vld [vmem:[%s19773_s1 + $0x2300] sm:$0xff] }
 0x21c   :  { %10542 = vmatprep.subr.bf16.mxu1 %v13588_v61  ;;  %v1150_v8 = vld [vmem:[%s19773_s1 + $0x2320] sm:$0xff]  ;;  %v1147_v61 = vld [vmem:[%s19773_s1 + $0x2308] sm:$0xff] }
 0x21d   :  { %v13634_v3 = vcombine.high %v1146_v60, %v1150_v8  ;;  %v13633_v1 = vcombine.low %v1146_v60, %v1150_v8  ;;  %v13635_v14 = vcombine.low %v1147_v61, %v1151_v0  ;;  %v1187_v60 = vld [vmem:[%s19773_s1 + $0x2448] sm:$0xff] }
 0x21e   :  { %10010 = vmatpush1.bf16.msra.mxu0 %v13585_v5  ;;  %v13636_v5 = vcombine.high %v1147_v61, %v1151_v0  ;;  %v1191_v8 = vld [vmem:[%s19773_s1 + $0x2468] sm:$0xff] }
 0x21f   :  { %10543 = vmatpush1.bf16.msra.mxu1 %v13587_v10  ;;  %10011 = vmatprep.subr.bf16.mxu0 %v13594_v11  ;;  %v1154_v10 = vld [vmem:[%s19773_s1 + $0x2340] sm:$0xff] }
 0x220   :  { %10544 = vmatprep.subr.bf16.mxu1 %v13596_v12  ;;  %v1158_v11 = vld [vmem:[%s19773_s1 + $0x2360] sm:$0xff]  ;;  %v1155_v12 = vld [vmem:[%s19773_s1 + $0x2348] sm:$0xff] }
 0x221   :  { %v13642_v15 = vcombine.high %v1154_v10, %v1158_v11  ;;  %v13641_v24 = vcombine.low %v1154_v10, %v1158_v11  ;;  %v13643_v25 = vcombine.low %v1155_v12, %v1159_v13  ;;  %v1195_v10 = vld [vmem:[%s19773_s1 + $0x2488] sm:$0xff] }
 0x222   :  { %10012 = vmatpush1.bf16.msra.mxu0 %v13593_v16  ;;  %v13644_v16 = vcombine.high %v1155_v12, %v1159_v13  ;;  %v1199_v11 = vld [vmem:[%s19773_s1 + $0x24a8] sm:$0xff]  ;;  %v13675_v13 = vcombine.low %v1187_v60, %v1191_v8 }
 0x223   :  { %10545 = vmatpush1.bf16.msra.mxu1 %v13595_v18  ;;  %10013 = vmatprep.subr.bf16.mxu0 %v13602_v20  ;;  %v1162_v18 = vld [vmem:[%s19773_s1 + $0x2380] sm:$0xff] }
 0x224   :  { %10546 = vmatprep.subr.bf16.mxu1 %v13604_v21  ;;  %v1166_v20 = vld [vmem:[%s19773_s1 + $0x23a0] sm:$0xff]  ;;  %v1163_v21 = vld [vmem:[%s19773_s1 + $0x2388] sm:$0xff] }
 0x225   :  { %v13650_v26 = vcombine.high %v1162_v18, %v1166_v20  ;;  %v13649_v35 = vcombine.low %v1162_v18, %v1166_v20  ;;  %v13651_v36 = vcombine.low %v1163_v21, %v1167_v22  ;;  %v1203_v18 = vld [vmem:[%s19773_s1 + $0x24c8] sm:$0xff] }
 0x226   :  { %10014 = vmatpush1.bf16.msra.mxu0 %v13601_v28  ;;  %v13652_v28 = vcombine.high %v1163_v21, %v1167_v22  ;;  %v1207_v20 = vld [vmem:[%s19773_s1 + $0x24e8] sm:$0xff]  ;;  %v13683_v22 = vcombine.low %v1195_v10, %v1199_v11 }
 0x227   :  { %10547 = vmatpush1.bf16.msra.mxu1 %v13603_v29  ;;  %10015 = vmatprep.subr.bf16.mxu0 %v13610_v30  ;;  %v1170_v29 = vld [vmem:[%s19773_s1 + $0x23c0] sm:$0xff] }
 0x228   :  { %10548 = vmatprep.subr.bf16.mxu1 %v13612_v31  ;;  %v1174_v30 = vld [vmem:[%s19773_s1 + $0x23e0] sm:$0xff]  ;;  %v1171_v31 = vld [vmem:[%s19773_s1 + $0x23c8] sm:$0xff] }
 0x229   :  { %v13658_v38 = vcombine.high %v1170_v29, %v1174_v30  ;;  %v13657_v47 = vcombine.low %v1170_v29, %v1174_v30  ;;  %v13659_v49 = vcombine.low %v1171_v31, %v1175_v32  ;;  %v1211_v29 = vld [vmem:[%s19773_s1 + $0x2508] sm:$0xff] }
 0x22a   :  { %10016 = vmatpush1.bf16.msra.mxu0 %v13609_v39  ;;  %v13660_v39 = vcombine.high %v1171_v31, %v1175_v32  ;;  %v1215_v30 = vld [vmem:[%s19773_s1 + $0x2528] sm:$0xff]  ;;  %v13691_v32 = vcombine.low %v1203_v18, %v1207_v20 }
 0x22b   :  { %10549 = vmatpush1.bf16.msra.mxu1 %v13611_v41  ;;  %10017 = vmatprep.subr.bf16.mxu0 %v13618_v42  ;;  %v1178_v41 = vld [vmem:[%s19773_s1 + $0x2400] sm:$0xff] }
 0x22c   :  { %10550 = vmatprep.subr.bf16.mxu1 %v13620_v45  ;;  %v1182_v42 = vld [vmem:[%s19773_s1 + $0x2420] sm:$0xff]  ;;  %v1179_v45 = vld [vmem:[%s19773_s1 + $0x2408] sm:$0xff] }
 0x22d   :  { %v13666_v50 = vcombine.high %v1178_v41, %v1182_v42  ;;  %v13665_v61 = vcombine.low %v1178_v41, %v1182_v42  ;;  %v13667_v0 = vcombine.low %v1179_v45, %v1183_v46  ;;  %v1219_v41 = vld [vmem:[%s19773_s1 + $0x2548] sm:$0xff] }
 0x22e   :  { %10018 = vmatpush1.bf16.msra.mxu0 %v13617_v52  ;;  %v13668_v52 = vcombine.high %v1179_v45, %v1183_v46  ;;  %v1223_v42 = vld [vmem:[%s19773_s1 + $0x2568] sm:$0xff]  ;;  %v13699_v46 = vcombine.low %v1211_v29, %v1215_v30 }
 0x22f   :  { %10551 = vmatpush1.bf16.msra.mxu1 %v13619_v54  ;;  %10019 = vmatprep.subr.bf16.mxu0 %v13626_v55  ;;  %v1186_v54 = vld [vmem:[%s19773_s1 + $0x2440] sm:$0xff] }
 0x230   :  { %10552 = vmatprep.subr.bf16.mxu1 %v13628_v56  ;;  %v1190_v55 = vld [vmem:[%s19773_s1 + $0x2460] sm:$0xff]  ;;  %v16462_v56 = vrot.slane %v16241_v44, %v14646_v53 }
 0x231   :  { %v1194_v44 = vld [vmem:[%s19773_s1 + $0x2480] sm:$0xff]  ;;  %v13673_v12 = vcombine.low %v1186_v54, %v1190_v55 }
 0x232   :  { %10020 = vmatpush1.bf16.msra.mxu0 %v13625_v2  ;;  %v13674_v2 = vcombine.high %v1186_v54, %v1190_v55  ;;  %v1227_v54 = vld [vmem:[%s19773_s1 + $0x2588] sm:$0xff] }
 0x233   :  { %10553 = vmatpush1.bf16.msra.mxu1 %v13627_v63  ;;  %10021 = vmatprep.subr.bf16.mxu0 %v13634_v3  ;;  %v13676_v63 = vcombine.high %v1187_v60, %v1191_v8  ;;  %v1198_v3 = vld [vmem:[%s19773_s1 + $0x24a0] sm:$0xff]  ;;  %v1231_v55 = vld [vmem:[%s19773_s1 + $0x25a8] sm:$0xff]  ;;  %v13707_v8 = vcombine.low %v1219_v41, %v1223_v42 }
 0x234   :  { %10554 = vmatprep.subr.bf16.mxu1 %v13636_v5  ;;  %v16478_v5 = vcombine.high %v16274_v6, %v16274_v6  ;;  %v13681_v21 = vcombine.low %v1194_v44, %v1198_v3 }
 0x236   :  { %10022 = vmatpush1.bf16.msra.mxu0 %v13633_v1  ;;  %v13682_v1 = vcombine.high %v1194_v44, %v1198_v3  ;;  %v1235_v44 = vld [vmem:[%s19773_s1 + $0x25c8] sm:$0xff] }
 0x237   :  { %10555 = vmatpush1.bf16.msra.mxu1 %v13635_v14  ;;  %10023 = vmatprep.subr.bf16.mxu0 %v13642_v15  ;;  %v13684_v14 = vcombine.high %v1195_v10, %v1199_v11  ;;  %v1202_v15 = vld [vmem:[%s19773_s1 + $0x24c0] sm:$0xff]  ;;  %v1239_v3 = vld [vmem:[%s19773_s1 + $0x25e8] sm:$0xff]  ;;  %v13715_v11 = vcombine.low %v1227_v54, %v1231_v55 }
 0x238   :  { %10556 = vmatprep.subr.bf16.mxu1 %v13644_v16  ;;  %v1206_v16 = vld [vmem:[%s19773_s1 + $0x24e0] sm:$0xff] }
 0x239   :  { %v13689_v31 = vcombine.low %v1202_v15, %v1206_v16 }
 0x23a   :  { %10024 = vmatpush1.bf16.msra.mxu0 %v13641_v24  ;;  %v13690_v24 = vcombine.high %v1202_v15, %v1206_v16  ;;  %v1243_v15 = vld [vmem:[%s19773_s1 + $0x2608] sm:$0xff] }
 0x23b   :  { %10557 = vmatpush1.bf16.msra.mxu1 %v13643_v25  ;;  %10025 = vmatprep.subr.bf16.mxu0 %v13650_v26  ;;  %v13692_v25 = vcombine.high %v1203_v18, %v1207_v20  ;;  %v1210_v26 = vld [vmem:[%s19773_s1 + $0x2500] sm:$0xff]  ;;  %v1247_v16 = vld [vmem:[%s19773_s1 + $0x2628] sm:$0xff]  ;;  %v13723_v20 = vcombine.low %v1235_v44, %v1239_v3 }
 0x23c   :  { %10558 = vmatprep.subr.bf16.mxu1 %v13652_v28  ;;  %v1214_v28 = vld [vmem:[%s19773_s1 + $0x2520] sm:$0xff] }
 0x23d   :  { %v13697_v45 = vcombine.low %v1210_v26, %v1214_v28 }
 0x23e   :  { %10026 = vmatpush1.bf16.msra.mxu0 %v13649_v35  ;;  %v13698_v35 = vcombine.high %v1210_v26, %v1214_v28  ;;  %v1251_v26 = vld [vmem:[%s19773_s1 + $0x2648] sm:$0xff] }
 0x23f   :  { %10559 = vmatpush1.bf16.msra.mxu1 %v13651_v36  ;;  %10027 = vmatprep.subr.bf16.mxu0 %v13658_v38  ;;  %v13700_v36 = vcombine.high %v1211_v29, %v1215_v30  ;;  %v1218_v38 = vld [vmem:[%s19773_s1 + $0x2540] sm:$0xff]  ;;  %v1255_v28 = vld [vmem:[%s19773_s1 + $0x2668] sm:$0xff]  ;;  %v13731_v30 = vcombine.low %v1243_v15, %v1247_v16 }
 0x240   :  { %10560 = vmatprep.subr.bf16.mxu1 %v13660_v39  ;;  %v1222_v39 = vld [vmem:[%s19773_s1 + $0x2560] sm:$0xff] }
 0x241   :  { %v13705_v60 = vcombine.low %v1218_v38, %v1222_v39 }
 0x242   :  { %10028 = vmatpush1.bf16.msra.mxu0 %v13657_v47  ;;  %v13706_v47 = vcombine.high %v1218_v38, %v1222_v39  ;;  %v1259_v38 = vld [vmem:[%s19773_s1 + $0x2688] sm:$0xff] }
 0x243   :  { %10561 = vmatpush1.bf16.msra.mxu1 %v13659_v49  ;;  %10038 = vmatprep.subr.bf16.mxu0 %v13666_v50  ;;  %v13708_v49 = vcombine.high %v1219_v41, %v1223_v42  ;;  %v1226_v50 = vld [vmem:[%s19773_s1 + $0x2580] sm:$0xff]  ;;  %v1263_v39 = vld [vmem:[%s19773_s1 + $0x26a8] sm:$0xff]  ;;  %v13739_v42 = vcombine.low %v1251_v26, %v1255_v28 }
 0x244   :  { %10571 = vmatprep.subr.bf16.mxu1 %v13668_v52  ;;  %v1230_v52 = vld [vmem:[%s19773_s1 + $0x25a0] sm:$0xff] }
 0x245   :  { %10030 = vmatmul.mubr.bf16.vlgmr.msra.gmra.mrb[0].mxu0 %v16462_v56  ;;  %v13713_v10 = vcombine.low %v1226_v50, %v1230_v52 }
 0x246   :  { %10039 = vmatpush1.bf16.msra.mxu0 %v13665_v61  ;;  %10563 = vmatmul.mubr.bf16.vlgmr.msra.gmra.mrb[0].mxu1 %v16462_v56  ;;  %v13714_v61 = vcombine.high %v1226_v50, %v1230_v52  ;;  %v1267_v50 = vld [vmem:[%s19773_s1 + $0x26c8] sm:$0xff] }
 0x247   :  { %10572 = vmatpush1.bf16.msra.mxu1 %v13667_v0  ;;  %10040 = vmatprep.subr.bf16.mxu0 %v13674_v2  ;;  %v13716_v0 = vcombine.high %v1227_v54, %v1231_v55  ;;  %v1234_v2 = vld [vmem:[%s19773_s1 + $0x25c0] sm:$0xff]  ;;  %v1271_v52 = vld [vmem:[%s19773_s1 + $0x26e8] sm:$0xff]  ;;  %v13747_v55 = vcombine.low %v1259_v38, %v1263_v39 }
 0x248   :  { %10573 = vmatprep.subr.bf16.mxu1 %v13676_v63  ;;  %10070 = vmatprep.mubr.bf16.mxu0 %v16478_v5  ;;  %v1238_v63 = vld [vmem:[%s19773_s1 + $0x25e0] sm:$0xff] }
 0x249   :  { %10603 = vmatprep.mubr.bf16.mxu1 %v16478_v5  ;;  %v13721_v18 = vcombine.low %v1234_v2, %v1238_v63 }
 0x24a   :  { %10041 = vmatpush1.bf16.msra.mxu0 %v13673_v12  ;;  %v13722_v12 = vcombine.high %v1234_v2, %v1238_v63  ;;  %v1275_v2 = vld [vmem:[%s19773_s1 + $0x2708] sm:$0xff] }
 0x24b   :  { %10574 = vmatpush1.bf16.msra.mxu1 %v13675_v13  ;;  %10042 = vmatprep.subr.bf16.mxu0 %v13682_v1  ;;  %v13724_v13 = vcombine.high %v1235_v44, %v1239_v3  ;;  %v1242_v1 = vld [vmem:[%s19773_s1 + $0x2600] sm:$0xff]  ;;  %v1279_v63 = vld [vmem:[%s19773_s1 + $0x2728] sm:$0xff]  ;;  %v13755_v3 = vcombine.low %v1267_v50, %v1271_v52 }
 0x24c   :  { %10575 = vmatprep.subr.bf16.mxu1 %v13684_v14  ;;  %v1246_v14 = vld [vmem:[%s19773_s1 + $0x2620] sm:$0xff] }
 0x24d   :  { %v13729_v29 = vcombine.low %v1242_v1, %v1246_v14 }
 0x24e   :  { %10043 = vmatpush1.bf16.msra.mxu0 %v13681_v21  ;;  %v13730_v21 = vcombine.high %v1242_v1, %v1246_v14  ;;  %v1283_v1 = vld [vmem:[%s19773_s1 + $0x2748] sm:$0xff] }
 0x24f   :  { %10576 = vmatpush1.bf16.msra.mxu1 %v13683_v22  ;;  %10044 = vmatprep.subr.bf16.mxu0 %v13690_v24  ;;  %v13732_v22 = vcombine.high %v1243_v15, %v1247_v16  ;;  %v1250_v24 = vld [vmem:[%s19773_s1 + $0x2640] sm:$0xff]  ;;  %v1287_v14 = vld [vmem:[%s19773_s1 + $0x2768] sm:$0xff]  ;;  %v13763_v16 = vcombine.low %v1275_v2, %v1279_v63 }
 0x250   :  { %10577 = vmatprep.subr.bf16.mxu1 %v13692_v25  ;;  %v1254_v25 = vld [vmem:[%s19773_s1 + $0x2660] sm:$0xff] }
 0x251   :  { %v13737_v41 = vcombine.low %v1250_v24, %v1254_v25 }
 0x252   :  { %10045 = vmatpush1.bf16.msra.mxu0 %v13689_v31  ;;  %v13738_v31 = vcombine.high %v1250_v24, %v1254_v25  ;;  %v1291_v24 = vld [vmem:[%s19773_s1 + $0x2788] sm:$0xff] }
 0x253   :  { %10578 = vmatpush1.bf16.msra.mxu1 %v13691_v32  ;;  %10046 = vmatprep.subr.bf16.mxu0 %v13698_v35  ;;  %v13740_v32 = vcombine.high %v1251_v26, %v1255_v28  ;;  %v1258_v35 = vld [vmem:[%s19773_s1 + $0x2680] sm:$0xff]  ;;  %v1295_v25 = vld [vmem:[%s19773_s1 + $0x27a8] sm:$0xff]  ;;  %v13771_v28 = vcombine.low %v1283_v1, %v1287_v14 }
 0x254   :  { %10579 = vmatprep.subr.bf16.mxu1 %v13700_v36  ;;  %v1262_v36 = vld [vmem:[%s19773_s1 + $0x26a0] sm:$0xff] }
 0x255   :  { %v13745_v54 = vcombine.low %v1258_v35, %v1262_v36 }
 0x256   :  { %10047 = vmatpush1.bf16.msra.mxu0 %v13697_v45  ;;  %v13746_v45 = vcombine.high %v1258_v35, %v1262_v36  ;;  %v1738_v35 = vcombine.high %v16231_v34, %v16231_v34  ;;  %v1299_v36 = vld [vmem:[%s19773_s1 + $0x27c8] sm:$0xff]  ;;  %v1306_v34 = vld [vmem:[%s19773_s1 + $0x2800] sm:$0xff] }
 0x257   :  { %10580 = vmatpush1.bf16.msra.mxu1 %v13699_v46  ;;  %10048 = vmatprep.subr.bf16.mxu0 %v13706_v47  ;;  %v13748_v46 = vcombine.high %v1259_v38, %v1263_v39  ;;  %v1266_v47 = vld [vmem:[%s19773_s1 + $0x26c0] sm:$0xff]  ;;  %v1303_v38 = vld [vmem:[%s19773_s1 + $0x27e8] sm:$0xff] }
 0x258   :  { %10581 = vmatprep.subr.bf16.mxu1 %v13708_v49  ;;  %v1270_v49 = vld [vmem:[%s19773_s1 + $0x26e0] sm:$0xff] }
 0x259   :  { %v13753_v44 = vcombine.low %v1266_v47, %v1270_v49 }
 0x25a   :  { %10049 = vmatpush1.bf16.msra.mxu0 %v13705_v60  ;;  %v13754_v60 = vcombine.high %v1266_v47, %v1270_v49  ;;  %v16655_v47 = vrot.slane %v1738_v35, %v14646_v53  ;;  %v1307_v49 = vld [vmem:[%s19773_s1 + $0x2808] sm:$0xff]  ;;  %v1338_v35 = vld [vmem:[%s19773_s1 + $0x2900] sm:$0xff] }
 0x25b   :  { %10582 = vmatpush1.bf16.msra.mxu1 %v13707_v8  ;;  %10050 = vmatprep.subr.bf16.mxu0 %v13714_v61  ;;  %v13756_v8 = vcombine.high %v1267_v50, %v1271_v52  ;;  %v1274_v61 = vld [vmem:[%s19773_s1 + $0x2700] sm:$0xff]  ;;  %v1311_v50 = vld [vmem:[%s19773_s1 + $0x2828] sm:$0xff] }
 0x25c   :  { %10583 = vmatprep.subr.bf16.mxu1 %v13716_v0  ;;  %v1278_v0 = vld [vmem:[%s19773_s1 + $0x2720] sm:$0xff] }
 0x25d   :  { %v13761_v15 = vcombine.low %v1274_v61, %v1278_v0 }
 0x25e   :  { %10051 = vmatpush1.bf16.msra.mxu0 %v13713_v10  ;;  %v13762_v10 = vcombine.high %v1274_v61, %v1278_v0  ;;  %v1318_v61 = vld [vmem:[%s19773_s1 + $0x2860] sm:$0xff]  ;;  %v1754_v0 = vcombine.high %v16655_v47, %v16655_v47 }
 0x25f   :  { %10584 = vmatpush1.bf16.msra.mxu1 %v13715_v11  ;;  %10052 = vmatprep.subr.bf16.mxu0 %v13722_v12  ;;  %v13764_v11 = vcombine.high %v1275_v2, %v1279_v63  ;;  %v1282_v12 = vld [vmem:[%s19773_s1 + $0x2740] sm:$0xff]  ;;  %v16673_v2 = vcombine.high %v16462_v56, %v16462_v56  ;;  %v1315_v63 = vld [vmem:[%s19773_s1 + $0x2848] sm:$0xff] }
 0x260   :  { %10585 = vmatprep.subr.bf16.mxu1 %v13724_v13  ;;  %v1286_v13 = vld [vmem:[%s19773_s1 + $0x2760] sm:$0xff] }
 0x261   :  { %v13769_v26 = vcombine.low %v1282_v12, %v1286_v13 }
 0x262   :  { %10053 = vmatpush1.bf16.msra.mxu0 %v13721_v18  ;;  %v13770_v18 = vcombine.high %v1282_v12, %v1286_v13  ;;  %v1322_v13 = vld [vmem:[%s19773_s1 + $0x2880] sm:$0xff] }
 0x263   :  { %10586 = vmatpush1.bf16.msra.mxu1 %v13723_v20  ;;  %10054 = vmatprep.subr.bf16.mxu0 %v13730_v21  ;;  %v13772_v20 = vcombine.high %v1283_v1, %v1287_v14  ;;  %v1290_v21 = vld [vmem:[%s19773_s1 + $0x2780] sm:$0xff]  ;;  %v16688_v14 = vrot.slane %v1754_v0, %v14646_v53 }
 0x264   :  { %10587 = vmatprep.subr.bf16.mxu1 %v13732_v22  ;;  %v1294_v22 = vld [vmem:[%s19773_s1 + $0x27a0] sm:$0xff] }
 0x265   :  { %v13777_v39 = vcombine.low %v1290_v21, %v1294_v22  ;;  %v1326_v1 = vld [vmem:[%s19773_s1 + $0x28a0] sm:$0xff] }
 0x266   :  { %10055 = vmatpush1.bf16.msra.mxu0 %v13729_v29  ;;  %v13778_v29 = vcombine.high %v1290_v21, %v1294_v22  ;;  %v13810_v21 = vcombine.high %v1322_v13, %v1326_v1  ;;  %v1358_v0 = vld [vmem:[%s19773_s1 + $0x29a0] sm:$0xff] }
 0x267   :  { %10588 = vmatpush1.bf16.msra.mxu1 %v13731_v30  ;;  %10056 = vmatprep.subr.bf16.mxu0 %v13738_v31  ;;  %v13780_v30 = vcombine.high %v1291_v24, %v1295_v25  ;;  %v1298_v31 = vld [vmem:[%s19773_s1 + $0x27c0] sm:$0xff] }
 0x268   :  { %10589 = vmatprep.subr.bf16.mxu1 %v13740_v32  ;;  %v1302_v32 = vld [vmem:[%s19773_s1 + $0x27e0] sm:$0xff] }
 0x269   :  { %v13785_v52 = vcombine.low %v1298_v31, %v1302_v32 }
 0x26a   :  { %10057 = vmatpush1.bf16.msra.mxu0 %v13737_v41  ;;  %v13779_v41 = vcombine.low %v1291_v24, %v1295_v25  ;;  %v1330_v24 = vld [vmem:[%s19773_s1 + $0x28c0] sm:$0xff] }
 0x26b   :  { %10590 = vmatpush1.bf16.msra.mxu1 %v13739_v42  ;;  %10058 = vmatprep.subr.bf16.mxu0 %v13746_v45  ;;  %v13786_v42 = vcombine.high %v1298_v31, %v1302_v32  ;;  %v13788_v45 = vcombine.high %v1299_v36, %v1303_v38  ;;  %v1334_v25 = vld [vmem:[%s19773_s1 + $0x28e0] sm:$0xff] }
 0x26c   :  { %10591 = vmatprep.subr.bf16.mxu1 %v13748_v46  ;;  %v1310_v46 = vld [vmem:[%s19773_s1 + $0x2820] sm:$0xff]  ;;  %v13818_v31 = vcombine.high %v1330_v24, %v1334_v25 }
 0x26e   :  { %10059 = vmatpush1.bf16.msra.mxu0 %v13745_v54  ;;  %v13787_v54 = vcombine.low %v1299_v36, %v1303_v38  ;;  %v1342_v36 = vld [vmem:[%s19773_s1 + $0x2920] sm:$0xff]  ;;  %v1339_v38 = vld [vmem:[%s19773_s1 + $0x2908] sm:$0xff] }
 0x26f   :  { %10592 = vmatpush1.bf16.msra.mxu1 %v13747_v55  ;;  %10060 = vmatprep.subr.bf16.mxu0 %v13754_v60  ;;  %v13794_v55 = vcombine.high %v1306_v34, %v1310_v46  ;;  %v13796_v60 = vcombine.high %v1307_v49, %v1311_v50 }
 0x270   :  { %10593 = vmatprep.subr.bf16.mxu1 %v13756_v8  ;;  %v1314_v8 = vld [vmem:[%s19773_s1 + $0x2840] sm:$0xff] }
 0x272   :  { %10061 = vmatpush1.bf16.msra.mxu0 %v13753_v44  ;;  %v1319_v44 = vld [vmem:[%s19773_s1 + $0x2868] sm:$0xff] }
 0x273   :  { %10594 = vmatpush1.bf16.msra.mxu1 %v13755_v3  ;;  %10062 = vmatprep.subr.bf16.mxu0 %v13762_v10  ;;  %v13793_v3 = vcombine.low %v1306_v34, %v1310_v46  ;;  %v13795_v10 = vcombine.low %v1307_v49, %v1311_v50  ;;  %v13804_v12 = vcombine.high %v1315_v63, %v1319_v44  ;;  %v1346_v46 = vld [vmem:[%s19773_s1 + $0x2940] sm:$0xff]  ;;  %v1347_v50 = vld [vmem:[%s19773_s1 + $0x2948] sm:$0xff] }
 0x274   :  { %10595 = vmatprep.subr.bf16.mxu1 %v13764_v11  ;;  %v13802_v11 = vcombine.high %v1314_v8, %v1318_v61  ;;  %v1350_v49 = vld [vmem:[%s19773_s1 + $0x2960] sm:$0xff] }
 0x276   :  { %10063 = vmatpush1.bf16.msra.mxu0 %v13761_v15  ;;  %v1323_v15 = vld [vmem:[%s19773_s1 + $0x2888] sm:$0xff] }
 0x277   :  { %10596 = vmatpush1.bf16.msra.mxu1 %v13763_v16  ;;  %10064 = vmatprep.subr.bf16.mxu0 %v13770_v18  ;;  %v1327_v16 = vld [vmem:[%s19773_s1 + $0x28a8] sm:$0xff]  ;;  %v13801_v18 = vcombine.low %v1314_v8, %v1318_v61  ;;  %v1354_v61 = vld [vmem:[%s19773_s1 + $0x2980] sm:$0xff] }
 0x278   :  { %10597 = vmatprep.subr.bf16.mxu1 %v13772_v20  ;;  %v13803_v20 = vcombine.low %v1315_v63, %v1319_v44  ;;  %v13812_v22 = vcombine.high %v1323_v15, %v1327_v16  ;;  %v1355_v63 = vld [vmem:[%s19773_s1 + $0x2988] sm:$0xff] }
 0x279   :  { %v1359_v44 = vld [vmem:[%s19773_s1 + $0x29a8] sm:$0xff] }
 0x27a   :  { %10065 = vmatpush1.bf16.msra.mxu0 %v13769_v26  ;;  %v1331_v26 = vld [vmem:[%s19773_s1 + $0x28c8] sm:$0xff] }
 0x27b   :  { %10598 = vmatpush1.bf16.msra.mxu1 %v13771_v28  ;;  %10066 = vmatprep.subr.bf16.mxu0 %v13778_v29  ;;  %v1335_v28 = vld [vmem:[%s19773_s1 + $0x28e8] sm:$0xff]  ;;  %v13809_v29 = vcombine.low %v1322_v13, %v1326_v1  ;;  %v1362_v13 = vld [vmem:[%s19773_s1 + $0x29c0] sm:$0xff] }
 0x27c   :  { %10599 = vmatprep.subr.bf16.mxu1 %v13780_v30  ;;  %v13811_v30 = vcombine.low %v1323_v15, %v1327_v16  ;;  %v13820_v32 = vcombine.high %v1331_v26, %v1335_v28  ;;  %v1366_v1 = vld [vmem:[%s19773_s1 + $0x29e0] sm:$0xff]  ;;  %v1363_v15 = vld [vmem:[%s19773_s1 + $0x29c8] sm:$0xff] }
 0x27d   :  { %v1367_v16 = vld [vmem:[%s19773_s1 + $0x29e8] sm:$0xff] }
 0x27e   :  { %10067 = vmatpush1.bf16.msra.mxu0 %v13777_v39  ;;  %v1343_v39 = vld [vmem:[%s19773_s1 + $0x2928] sm:$0xff] }
 0x27f   :  { %10600 = vmatpush1.bf16.msra.mxu1 %v13779_v41  ;;  %10068 = vmatprep.subr.bf16.mxu0 %v13786_v42  ;;  %v13817_v41 = vcombine.low %v1330_v24, %v1334_v25  ;;  %v13819_v42 = vcombine.low %v1331_v26, %v1335_v28  ;;  %v13828_v34 = vcombine.high %v1339_v38, %v1343_v39  ;;  %v1370_v24 = vld [vmem:[%s19773_s1 + $0x2a00] sm:$0xff]  ;;  %v1371_v26 = vld [vmem:[%s19773_s1 + $0x2a08] sm:$0xff] }
 0x280   :  { %10601 = vmatprep.subr.bf16.mxu1 %v13788_v45  ;;  %v13826_v45 = vcombine.high %v1338_v35, %v1342_v36  ;;  %v1374_v25 = vld [vmem:[%s19773_s1 + $0x2a20] sm:$0xff]  ;;  %v1375_v28 = vld [vmem:[%s19773_s1 + $0x2a28] sm:$0xff] }
 0x282   :  { %10069 = vmatpush1.bf16.msra.mxu0 %v13785_v52  ;;  %v1351_v52 = vld [vmem:[%s19773_s1 + $0x2968] sm:$0xff] }
 0x283   :  { %10602 = vmatpush1.bf16.msra.mxu1 %v13787_v54  ;;  %10079 = vmatprep.subr.bf16.mxu0 %v13794_v55  ;;  %v13825_v54 = vcombine.low %v1338_v35, %v1342_v36  ;;  %v13827_v55 = vcombine.low %v1339_v38, %v1343_v39  ;;  %v13836_v8 = vcombine.high %v1347_v50, %v1351_v52  ;;  %v1378_v35 = vld [vmem:[%s19773_s1 + $0x2a40] sm:$0xff]  ;;  %v1379_v38 = vld [vmem:[%s19773_s1 + $0x2a48] sm:$0xff] }
 0x284   :  { %10612 = vmatprep.subr.bf16.mxu1 %v13796_v60  ;;  %v13834_v60 = vcombine.high %v1346_v46, %v1350_v49  ;;  %v1382_v36 = vld [vmem:[%s19773_s1 + $0x2a60] sm:$0xff]  ;;  %v1383_v39 = vld [vmem:[%s19773_s1 + $0x2a68] sm:$0xff] }
 0x285   :  { %10071 = vmatmul.mubr.bf16.vlgmr.msra.gmra.mrb[0].mxu0 %v16673_v2 }
 0x286   :  { %10080 = vmatpush1.bf16.msra.mxu0 %v13793_v3  ;;  %10604 = vmatmul.mubr.bf16.vlgmr.msra.gmra.mrb[0].mxu1 %v16673_v2  ;;  %v13833_v3 = vcombine.low %v1346_v46, %v1350_v49  ;;  %v1386_v46 = vld [vmem:[%s19773_s1 + $0x2a80] sm:$0xff] }
 0x287   :  { %10613 = vmatpush1.bf16.msra.mxu1 %v13795_v10  ;;  %10081 = vmatprep.subr.bf16.mxu0 %v13802_v11  ;;  %v13835_v10 = vcombine.low %v1347_v50, %v1351_v52  ;;  %v13842_v11 = vcombine.high %v1354_v61, %v1358_v0  ;;  %v1390_v49 = vld [vmem:[%s19773_s1 + $0x2aa0] sm:$0xff]  ;;  %v1387_v50 = vld [vmem:[%s19773_s1 + $0x2a88] sm:$0xff] }
 0x288   :  { %10614 = vmatprep.subr.bf16.mxu1 %v13804_v12  ;;  %10111 = vmatprep.mubr.bf16.mxu0 %v16688_v14  ;;  %v13844_v12 = vcombine.high %v1355_v63, %v1359_v44  ;;  %v1391_v52 = vld [vmem:[%s19773_s1 + $0x2aa8] sm:$0xff] }
 0x289   :  { %10644 = vmatprep.mubr.bf16.mxu1 %v16688_v14 }
 0x28a   :  { %10082 = vmatpush1.bf16.msra.mxu0 %v13801_v18  ;;  %v13841_v18 = vcombine.low %v1354_v61, %v1358_v0  ;;  %v1394_v61 = vld [vmem:[%s19773_s1 + $0x2ac0] sm:$0xff] }
 0x28b   :  { %10615 = vmatpush1.bf16.msra.mxu1 %v13803_v20  ;;  %10083 = vmatprep.subr.bf16.mxu0 %v13810_v21  ;;  %v13843_v20 = vcombine.low %v1355_v63, %v1359_v44  ;;  %v13850_v21 = vcombine.high %v1362_v13, %v1366_v1  ;;  %v1398_v0 = vld [vmem:[%s19773_s1 + $0x2ae0] sm:$0xff]  ;;  %v1395_v63 = vld [vmem:[%s19773_s1 + $0x2ac8] sm:$0xff] }
 0x28c   :  { %10616 = vmatprep.subr.bf16.mxu1 %v13812_v22  ;;  %v13852_v22 = vcombine.high %v1363_v15, %v1367_v16  ;;  %v1399_v44 = vld [vmem:[%s19773_s1 + $0x2ae8] sm:$0xff] }
 0x28e   :  { %10084 = vmatpush1.bf16.msra.mxu0 %v13809_v29  ;;  %v13849_v29 = vcombine.low %v1362_v13, %v1366_v1  ;;  %v1402_v13 = vld [vmem:[%s19773_s1 + $0x2b00] sm:$0xff] }
 0x28f   :  { %10617 = vmatpush1.bf16.msra.mxu1 %v13811_v30  ;;  %10085 = vmatprep.subr.bf16.mxu0 %v13818_v31  ;;  %v13851_v30 = vcombine.low %v1363_v15, %v1367_v16  ;;  %v13858_v31 = vcombine.high %v1370_v24, %v1374_v25  ;;  %v1406_v1 = vld [vmem:[%s19773_s1 + $0x2b20] sm:$0xff]  ;;  %v1403_v15 = vld [vmem:[%s19773_s1 + $0x2b08] sm:$0xff] }
 0x290   :  { %10618 = vmatprep.subr.bf16.mxu1 %v13820_v32  ;;  %v13860_v32 = vcombine.high %v1371_v26, %v1375_v28  ;;  %v1407_v16 = vld [vmem:[%s19773_s1 + $0x2b28] sm:$0xff] }
 0x292   :  { %10086 = vmatpush1.bf16.msra.mxu0 %v13817_v41  ;;  %v13857_v41 = vcombine.low %v1370_v24, %v1374_v25  ;;  %v1410_v24 = vld [vmem:[%s19773_s1 + $0x2b40] sm:$0xff] }
 0x293   :  { %10619 = vmatpush1.bf16.msra.mxu1 %v13819_v42  ;;  %10087 = vmatprep.subr.bf16.mxu0 %v13826_v45  ;;  %v13859_v42 = vcombine.low %v1371_v26, %v1375_v28  ;;  %v13866_v45 = vcombine.high %v1378_v35, %v1382_v36  ;;  %v1414_v25 = vld [vmem:[%s19773_s1 + $0x2b60] sm:$0xff]  ;;  %v1411_v26 = vld [vmem:[%s19773_s1 + $0x2b48] sm:$0xff] }
 0x294   :  { %10620 = vmatprep.subr.bf16.mxu1 %v13828_v34  ;;  %v13868_v34 = vcombine.high %v1379_v38, %v1383_v39  ;;  %v1415_v28 = vld [vmem:[%s19773_s1 + $0x2b68] sm:$0xff] }
 0x296   :  { %10088 = vmatpush1.bf16.msra.mxu0 %v13825_v54  ;;  %v13865_v54 = vcombine.low %v1378_v35, %v1382_v36  ;;  %v1418_v35 = vld [vmem:[%s19773_s1 + $0x2b80] sm:$0xff] }
 0x297   :  { %10621 = vmatpush1.bf16.msra.mxu1 %v13827_v55  ;;  %10089 = vmatprep.subr.bf16.mxu0 %v13834_v60  ;;  %v13867_v55 = vcombine.low %v1379_v38, %v1383_v39  ;;  %v13874_v60 = vcombine.high %v1386_v46, %v1390_v49  ;;  %v1422_v36 = vld [vmem:[%s19773_s1 + $0x2ba0] sm:$0xff]  ;;  %v1419_v38 = vld [vmem:[%s19773_s1 + $0x2b88] sm:$0xff] }
 0x298   :  { %10622 = vmatprep.subr.bf16.mxu1 %v13836_v8  ;;  %v13876_v8 = vcombine.high %v1387_v50, %v1391_v52  ;;  %v1423_v39 = vld [vmem:[%s19773_s1 + $0x2ba8] sm:$0xff] }
 0x29a   :  { %10090 = vmatpush1.bf16.msra.mxu0 %v13833_v3  ;;  %v13873_v3 = vcombine.low %v1386_v46, %v1390_v49  ;;  %v1426_v46 = vld [vmem:[%s19773_s1 + $0x2bc0] sm:$0xff] }
 0x29b   :  { %10623 = vmatpush1.bf16.msra.mxu1 %v13835_v10  ;;  %10091 = vmatprep.subr.bf16.mxu0 %v13842_v11  ;;  %v13875_v10 = vcombine.low %v1387_v50, %v1391_v52  ;;  %v13882_v11 = vcombine.high %v1394_v61, %v1398_v0  ;;  %v1430_v49 = vld [vmem:[%s19773_s1 + $0x2be0] sm:$0xff]  ;;  %v1427_v50 = vld [vmem:[%s19773_s1 + $0x2bc8] sm:$0xff] }
 0x29c   :  { %10624 = vmatprep.subr.bf16.mxu1 %v13844_v12  ;;  %v13884_v12 = vcombine.high %v1395_v63, %v1399_v44  ;;  %v1431_v52 = vld [vmem:[%s19773_s1 + $0x2be8] sm:$0xff] }
 0x29e   :  { %10092 = vmatpush1.bf16.msra.mxu0 %v13841_v18  ;;  %v13881_v18 = vcombine.low %v1394_v61, %v1398_v0  ;;  %v1434_v61 = vld [vmem:[%s19773_s1 + $0x2c00] sm:$0xff] }
 0x29f   :  { %10625 = vmatpush1.bf16.msra.mxu1 %v13843_v20  ;;  %10093 = vmatprep.subr.bf16.mxu0 %v13850_v21  ;;  %v13883_v20 = vcombine.low %v1395_v63, %v1399_v44  ;;  %v13890_v21 = vcombine.high %v1402_v13, %v1406_v1  ;;  %v1438_v0 = vld [vmem:[%s19773_s1 + $0x2c20] sm:$0xff]  ;;  %v1435_v63 = vld [vmem:[%s19773_s1 + $0x2c08] sm:$0xff] }
 0x2a0   :  { %10626 = vmatprep.subr.bf16.mxu1 %v13852_v22  ;;  %v13892_v22 = vcombine.high %v1403_v15, %v1407_v16  ;;  %v1439_v44 = vld [vmem:[%s19773_s1 + $0x2c28] sm:$0xff] }
 0x2a2   :  { %10094 = vmatpush1.bf16.msra.mxu0 %v13849_v29  ;;  %v13889_v29 = vcombine.low %v1402_v13, %v1406_v1  ;;  %v1442_v13 = vld [vmem:[%s19773_s1 + $0x2c40] sm:$0xff] }
 0x2a3   :  { %10627 = vmatpush1.bf16.msra.mxu1 %v13851_v30  ;;  %10095 = vmatprep.subr.bf16.mxu0 %v13858_v31  ;;  %v13891_v30 = vcombine.low %v1403_v15, %v1407_v16  ;;  %v13898_v31 = vcombine.high %v1410_v24, %v1414_v25  ;;  %v1446_v1 = vld [vmem:[%s19773_s1 + $0x2c60] sm:$0xff]  ;;  %v16876_v15 = vrot.slane %v16655_v47, %v14646_v53  ;;  %v1443_v16 = vld [vmem:[%s19773_s1 + $0x2c48] sm:$0xff] }
 0x2a4   :  { %10628 = vmatprep.subr.bf16.mxu1 %v13860_v32  ;;  %v13900_v32 = vcombine.high %v1411_v26, %v1415_v28  ;;  %v1450_v47 = vld [vmem:[%s19773_s1 + $0x2c80] sm:$0xff] }
 0x2a6   :  { %10096 = vmatpush1.bf16.msra.mxu0 %v13857_v41  ;;  %v13897_v41 = vcombine.low %v1410_v24, %v1414_v25  ;;  %v1454_v25 = vld [vmem:[%s19773_s1 + $0x2ca0] sm:$0xff] }
 0x2a7   :  { %10629 = vmatpush1.bf16.msra.mxu1 %v13859_v42  ;;  %10097 = vmatprep.subr.bf16.mxu0 %v13866_v45  ;;  %v13899_v42 = vcombine.low %v1411_v26, %v1415_v28  ;;  %v13906_v45 = vcombine.high %v1418_v35, %v1422_v36  ;;  %v16892_v26 = vcombine.high %v16688_v14, %v16688_v14  ;;  %v1451_v28 = vld [vmem:[%s19773_s1 + $0x2c88] sm:$0xff] }
 0x2a8   :  { %10630 = vmatprep.subr.bf16.mxu1 %v13868_v34  ;;  %v13908_v34 = vcombine.high %v1419_v38, %v1423_v39 }
 0x2aa   :  { %10098 = vmatpush1.bf16.msra.mxu0 %v13865_v54  ;;  %v13905_v54 = vcombine.low %v1418_v35, %v1422_v36  ;;  %v1458_v36 = vld [vmem:[%s19773_s1 + $0x2cc0] sm:$0xff] }
 0x2ab   :  { %10631 = vmatpush1.bf16.msra.mxu1 %v13867_v55  ;;  %10099 = vmatprep.subr.bf16.mxu0 %v13874_v60  ;;  %v13907_v55 = vcombine.low %v1419_v38, %v1423_v39  ;;  %v13914_v60 = vcombine.high %v1426_v46, %v1430_v49  ;;  %v1462_v38 = vld [vmem:[%s19773_s1 + $0x2ce0] sm:$0xff]  ;;  %v1459_v39 = vld [vmem:[%s19773_s1 + $0x2cc8] sm:$0xff] }
 0x2ac   :  { %10632 = vmatprep.subr.bf16.mxu1 %v13876_v8  ;;  %v13916_v8 = vcombine.high %v1427_v50, %v1431_v52 }
 0x2ae   :  { %10100 = vmatpush1.bf16.msra.mxu0 %v13873_v3  ;;  %v13913_v3 = vcombine.low %v1426_v46, %v1430_v49  ;;  %v1466_v49 = vld [vmem:[%s19773_s1 + $0x2d00] sm:$0xff] }
 0x2af   :  { %10633 = vmatpush1.bf16.msra.mxu1 %v13875_v10  ;;  %10101 = vmatprep.subr.bf16.mxu0 %v13882_v11  ;;  %v13915_v10 = vcombine.low %v1427_v50, %v1431_v52  ;;  %v13922_v11 = vcombine.high %v1434_v61, %v1438_v0  ;;  %v1470_v50 = vld [vmem:[%s19773_s1 + $0x2d20] sm:$0xff]  ;;  %v1467_v52 = vld [vmem:[%s19773_s1 + $0x2d08] sm:$0xff] }
 0x2b0   :  { %10634 = vmatprep.subr.bf16.mxu1 %v13884_v12  ;;  %v13924_v12 = vcombine.high %v1435_v63, %v1439_v44 }
 0x2b2   :  { %10102 = vmatpush1.bf16.msra.mxu0 %v13881_v18  ;;  %v1447_v18 = vld [vmem:[%s19773_s1 + $0x2c68] sm:$0xff] }
 0x2b3   :  { %10635 = vmatpush1.bf16.msra.mxu1 %v13883_v20  ;;  %10103 = vmatprep.subr.bf16.mxu0 %v13890_v21  ;;  %v13921_v20 = vcombine.low %v1434_v61, %v1438_v0  ;;  %v13923_v21 = vcombine.low %v1435_v63, %v1439_v44  ;;  %v13932_v24 = vcombine.high %v1443_v16, %v1447_v18  ;;  %v1474_v0 = vld [vmem:[%s19773_s1 + $0x2d40] sm:$0xff]  ;;  %v1475_v44 = vld [vmem:[%s19773_s1 + $0x2d48] sm:$0xff] }
 0x2b4   :  { %10636 = vmatprep.subr.bf16.mxu1 %v13892_v22  ;;  %v13930_v22 = vcombine.high %v1442_v13, %v1446_v1  ;;  %v1478_v63 = vld [vmem:[%s19773_s1 + $0x2d60] sm:$0xff] }
 0x2b6   :  { %10104 = vmatpush1.bf16.msra.mxu0 %v13889_v29  ;;  %v1455_v29 = vld [vmem:[%s19773_s1 + $0x2ca8] sm:$0xff] }
 0x2b7   :  { %10637 = vmatpush1.bf16.msra.mxu1 %v13891_v30  ;;  %10105 = vmatprep.subr.bf16.mxu0 %v13898_v31  ;;  %v13929_v30 = vcombine.low %v1442_v13, %v1446_v1  ;;  %v13931_v31 = vcombine.low %v1443_v16, %v1447_v18  ;;  %v13940_v35 = vcombine.high %v1451_v28, %v1455_v29  ;;  %v1482_v1 = vld [vmem:[%s19773_s1 + $0x2d80] sm:$0xff]  ;;  %v1483_v18 = vld [vmem:[%s19773_s1 + $0x2d88] sm:$0xff] }
 0x2b8   :  { %10638 = vmatprep.subr.bf16.mxu1 %v13900_v32  ;;  %v13938_v32 = vcombine.high %v1450_v47, %v1454_v25  ;;  %v1486_v16 = vld [vmem:[%s19773_s1 + $0x2da0] sm:$0xff] }
 0x2ba   :  { %10106 = vmatpush1.bf16.msra.mxu0 %v13897_v41  ;;  %v1463_v41 = vld [vmem:[%s19773_s1 + $0x2ce8] sm:$0xff] }
 0x2bb   :  { %10639 = vmatpush1.bf16.msra.mxu1 %v13899_v42  ;;  %10107 = vmatprep.subr.bf16.mxu0 %v13906_v45  ;;  %v13937_v42 = vcombine.low %v1450_v47, %v1454_v25  ;;  %v13939_v45 = vcombine.low %v1451_v28, %v1455_v29  ;;  %v13948_v46 = vcombine.high %v1459_v39, %v1463_v41  ;;  %v1490_v25 = vld [vmem:[%s19773_s1 + $0x2dc0] sm:$0xff]  ;;  %v1491_v29 = vld [vmem:[%s19773_s1 + $0x2dc8] sm:$0xff] }
 0x2bc   :  { %10640 = vmatprep.subr.bf16.mxu1 %v13908_v34  ;;  %v13946_v34 = vcombine.high %v1458_v36, %v1462_v38  ;;  %v1494_v28 = vld [vmem:[%s19773_s1 + $0x2de0] sm:$0xff] }
 0x2be   :  { %10108 = vmatpush1.bf16.msra.mxu0 %v13905_v54  ;;  %v1471_v54 = vld [vmem:[%s19773_s1 + $0x2d28] sm:$0xff] }
 0x2bf   :  { %10641 = vmatpush1.bf16.msra.mxu1 %v13907_v55  ;;  %10109 = vmatprep.subr.bf16.mxu0 %v13914_v60  ;;  %v13945_v55 = vcombine.low %v1458_v36, %v1462_v38  ;;  %v13947_v60 = vcombine.low %v1459_v39, %v1463_v41  ;;  %v13956_v61 = vcombine.high %v1467_v52, %v1471_v54  ;;  %v1498_v38 = vld [vmem:[%s19773_s1 + $0x2e00] sm:$0xff]  ;;  %v1499_v41 = vld [vmem:[%s19773_s1 + $0x2e08] sm:$0xff] }
 0x2c0   :  { %10642 = vmatprep.subr.bf16.mxu1 %v13916_v8  ;;  %v13954_v8 = vcombine.high %v1466_v49, %v1470_v50  ;;  %v1502_v39 = vld [vmem:[%s19773_s1 + $0x2e20] sm:$0xff] }
 0x2c2   :  { %10110 = vmatpush1.bf16.msra.mxu0 %v13913_v3  ;;  %v1479_v3 = vld [vmem:[%s19773_s1 + $0x2d68] sm:$0xff] }
 0x2c3   :  { %10643 = vmatpush1.bf16.msra.mxu1 %v13915_v10  ;;  %10120 = vmatprep.subr.bf16.mxu0 %v13922_v11  ;;  %v13953_v10 = vcombine.low %v1466_v49, %v1470_v50  ;;  %v13955_v11 = vcombine.low %v1467_v52, %v1471_v54  ;;  %v13964_v13 = vcombine.high %v1475_v44, %v1479_v3  ;;  %v1506_v50 = vld [vmem:[%s19773_s1 + $0x2e40] sm:$0xff]  ;;  %v1507_v54 = vld [vmem:[%s19773_s1 + $0x2e48] sm:$0xff] }
 0x2c4   :  { %10653 = vmatprep.subr.bf16.mxu1 %v13924_v12  ;;  %v13962_v12 = vcombine.high %v1474_v0, %v1478_v63  ;;  %v1510_v52 = vld [vmem:[%s19773_s1 + $0x2e60] sm:$0xff] }
 0x2c5   :  { %10112 = vmatmul.mubr.bf16.vlgmr.msra.gmra.mrb[0].mxu0 %v16876_v15 }
 0x2c6   :  { %10121 = vmatpush1.bf16.msra.mxu0 %v13921_v20  ;;  %10645 = vmatmul.mubr.bf16.vlgmr.msra.gmra.mrb[0].mxu1 %v16876_v15  ;;  %v1487_v20 = vld [vmem:[%s19773_s1 + $0x2da8] sm:$0xff] }
 0x2c7   :  { %10654 = vmatpush1.bf16.msra.mxu1 %v13923_v21  ;;  %10122 = vmatprep.subr.bf16.mxu0 %v13930_v22  ;;  %v13961_v21 = vcombine.low %v1474_v0, %v1478_v63  ;;  %v13963_v22 = vcombine.low %v1475_v44, %v1479_v3  ;;  %v13972_v47 = vcombine.high %v1483_v18, %v1487_v20  ;;  %v1514_v63 = vld [vmem:[%s19773_s1 + $0x2e80] sm:$0xff]  ;;  %v1515_v3 = vld [vmem:[%s19773_s1 + $0x2e88] sm:$0xff] }
 0x2c8   :  { %10655 = vmatprep.subr.bf16.mxu1 %v13932_v24  ;;  %10152 = vmatprep.mubr.bf16.mxu0 %v16892_v26  ;;  %v13970_v24 = vcombine.high %v1482_v1, %v1486_v16  ;;  %v1518_v44 = vld [vmem:[%s19773_s1 + $0x2ea0] sm:$0xff] }
 0x2c9   :  { %10685 = vmatprep.mubr.bf16.mxu1 %v16892_v26 }
 0x2ca   :  { %10123 = vmatpush1.bf16.msra.mxu0 %v13929_v30  ;;  %v1495_v30 = vld [vmem:[%s19773_s1 + $0x2de8] sm:$0xff] }
 0x2cb   :  { %10656 = vmatpush1.bf16.msra.mxu1 %v13931_v31  ;;  %10124 = vmatprep.subr.bf16.mxu0 %v13938_v32  ;;  %v13969_v31 = vcombine.low %v1482_v1, %v1486_v16  ;;  %v13971_v32 = vcombine.low %v1483_v18, %v1487_v20  ;;  %v13980_v36 = vcombine.high %v1491_v29, %v1495_v30  ;;  %v1522_v16 = vld [vmem:[%s19773_s1 + $0x2ec0] sm:$0xff]  ;;  %v1523_v20 = vld [vmem:[%s19773_s1 + $0x2ec8] sm:$0xff] }
 0x2cc   :  { %10657 = vmatprep.subr.bf16.mxu1 %v13940_v35  ;;  %v13978_v35 = vcombine.high %v1490_v25, %v1494_v28  ;;  %v1526_v18 = vld [vmem:[%s19773_s1 + $0x2ee0] sm:$0xff] }
 0x2ce   :  { %10125 = vmatpush1.bf16.msra.mxu0 %v13937_v42  ;;  %v1503_v42 = vld [vmem:[%s19773_s1 + $0x2e28] sm:$0xff] }
 0x2cf   :  { %10658 = vmatpush1.bf16.msra.mxu1 %v13939_v45  ;;  %10126 = vmatprep.subr.bf16.mxu0 %v13946_v34  ;;  %v13977_v45 = vcombine.low %v1490_v25, %v1494_v28  ;;  %v13979_v34 = vcombine.low %v1491_v29, %v1495_v30  ;;  %v13988_v49 = vcombine.high %v1499_v41, %v1503_v42  ;;  %v1530_v28 = vld [vmem:[%s19773_s1 + $0x2f00] sm:$0xff]  ;;  %v1531_v30 = vld [vmem:[%s19773_s1 + $0x2f08] sm:$0xff] }
 0x2d0   :  { %10659 = vmatprep.subr.bf16.mxu1 %v13948_v46  ;;  %v13986_v46 = vcombine.high %v1498_v38, %v1502_v39  ;;  %v1534_v29 = vld [vmem:[%s19773_s1 + $0x2f20] sm:$0xff] }
 0x2d2   :  { %10127 = vmatpush1.bf16.msra.mxu0 %v13945_v55  ;;  %v1511_v55 = vld [vmem:[%s19773_s1 + $0x2e68] sm:$0xff] }
 0x2d3   :  { %10660 = vmatpush1.bf16.msra.mxu1 %v13947_v60  ;;  %10128 = vmatprep.subr.bf16.mxu0 %v13954_v8  ;;  %v13985_v60 = vcombine.low %v1498_v38, %v1502_v39  ;;  %v13987_v8 = vcombine.low %v1499_v41, %v1503_v42  ;;  %v13996_v0 = vcombine.high %v1507_v54, %v1511_v55  ;;  %v1538_v39 = vld [vmem:[%s19773_s1 + $0x2f40] sm:$0xff]  ;;  %v1539_v42 = vld [vmem:[%s19773_s1 + $0x2f48] sm:$0xff] }
 0x2d4   :  { %10661 = vmatprep.subr.bf16.mxu1 %v13956_v61  ;;  %v13994_v61 = vcombine.high %v1506_v50, %v1510_v52  ;;  %v1542_v41 = vld [vmem:[%s19773_s1 + $0x2f60] sm:$0xff] }
 0x2d6   :  { %10129 = vmatpush1.bf16.msra.mxu0 %v13953_v10  ;;  %v1519_v10 = vld [vmem:[%s19773_s1 + $0x2ea8] sm:$0xff] }
 0x2d7   :  { %10662 = vmatpush1.bf16.msra.mxu1 %v13955_v11  ;;  %10130 = vmatprep.subr.bf16.mxu0 %v13962_v12  ;;  %v13993_v11 = vcombine.low %v1506_v50, %v1510_v52  ;;  %v13995_v12 = vcombine.low %v1507_v54, %v1511_v55  ;;  %v14004_v1 = vcombine.high %v1515_v3, %v1519_v10  ;;  %v1546_v52 = vld [vmem:[%s19773_s1 + $0x2f80] sm:$0xff]  ;;  %v1547_v55 = vld [vmem:[%s19773_s1 + $0x2f88] sm:$0xff] }
 0x2d8   :  { %10663 = vmatprep.subr.bf16.mxu1 %v13964_v13  ;;  %v14002_v13 = vcombine.high %v1514_v63, %v1518_v44  ;;  %v1550_v54 = vld [vmem:[%s19773_s1 + $0x2fa0] sm:$0xff] }
 0x2da   :  { %10131 = vmatpush1.bf16.msra.mxu0 %v13961_v21  ;;  %v1527_v21 = vld [vmem:[%s19773_s1 + $0x2ee8] sm:$0xff] }
 0x2db   :  { %10664 = vmatpush1.bf16.msra.mxu1 %v13963_v22  ;;  %10132 = vmatprep.subr.bf16.mxu0 %v13970_v24  ;;  %v14001_v22 = vcombine.low %v1514_v63, %v1518_v44  ;;  %v14003_v24 = vcombine.low %v1515_v3, %v1519_v10  ;;  %v14012_v25 = vcombine.high %v1523_v20, %v1527_v21  ;;  %v1554_v44 = vld [vmem:[%s19773_s1 + $0x2fc0] sm:$0xff]  ;;  %v1555_v10 = vld [vmem:[%s19773_s1 + $0x2fc8] sm:$0xff] }
 0x2dc   :  { %10665 = vmatprep.subr.bf16.mxu1 %v13972_v47  ;;  %v14010_v47 = vcombine.high %v1522_v16, %v1526_v18  ;;  %v1558_v3 = vld [vmem:[%s19773_s1 + $0x2fe0] sm:$0xff] }
 0x2de   :  { %10133 = vmatpush1.bf16.msra.mxu0 %v13969_v31  ;;  %v1535_v31 = vld [vmem:[%s19773_s1 + $0x2f28] sm:$0xff] }
 0x2df   :  { %10666 = vmatpush1.bf16.msra.mxu1 %v13971_v32  ;;  %10134 = vmatprep.subr.bf16.mxu0 %v13978_v35  ;;  %v14009_v32 = vcombine.low %v1522_v16, %v1526_v18  ;;  %v14011_v35 = vcombine.low %v1523_v20, %v1527_v21  ;;  %v14020_v38 = vcombine.high %v1531_v30, %v1535_v31  ;;  %v1562_v18 = vld [vmem:[%s19773_s1 + $0x3000] sm:$0xff]  ;;  %v1563_v21 = vld [vmem:[%s19773_s1 + $0x3008] sm:$0xff] }
 0x2e0   :  { %10667 = vmatprep.subr.bf16.mxu1 %v13980_v36  ;;  %v14018_v36 = vcombine.high %v1530_v28, %v1534_v29  ;;  %v1566_v20 = vld [vmem:[%s19773_s1 + $0x3020] sm:$0xff] }
 0x2e2   :  { %10135 = vmatpush1.bf16.msra.mxu0 %v13977_v45  ;;  %v1543_v45 = vld [vmem:[%s19773_s1 + $0x2f68] sm:$0xff] }
 0x2e3   :  { %10668 = vmatpush1.bf16.msra.mxu1 %v13979_v34  ;;  %10136 = vmatprep.subr.bf16.mxu0 %v13986_v46  ;;  %v14017_v34 = vcombine.low %v1530_v28, %v1534_v29  ;;  %v14019_v46 = vcombine.low %v1531_v30, %v1535_v31  ;;  %v14028_v50 = vcombine.high %v1539_v42, %v1543_v45  ;;  %v1570_v29 = vld [vmem:[%s19773_s1 + $0x3040] sm:$0xff] }
 0x2e4   :  { %10669 = vmatprep.subr.bf16.mxu1 %v13988_v49  ;;  %v14026_v49 = vcombine.high %v1538_v39, %v1542_v41  ;;  %v1574_v30 = vld [vmem:[%s19773_s1 + $0x3060] sm:$0xff]  ;;  %v17080_v31 = vcombine.high %v16876_v15, %v16876_v15 }
 0x2e6   :  { %10137 = vmatpush1.bf16.msra.mxu0 %v13985_v60  ;;  %v1551_v60 = vld [vmem:[%s19773_s1 + $0x2fa8] sm:$0xff] }
 0x2e7   :  { %10670 = vmatpush1.bf16.msra.mxu1 %v13987_v8  ;;  %10138 = vmatprep.subr.bf16.mxu0 %v13994_v61  ;;  %v14025_v8 = vcombine.low %v1538_v39, %v1542_v41  ;;  %v14027_v61 = vcombine.low %v1539_v42, %v1543_v45  ;;  %v14036_v63 = vcombine.high %v1547_v55, %v1551_v60  ;;  %v1578_v42 = vld [vmem:[%s19773_s1 + $0x3080] sm:$0xff] }
 0x2e8   :  { %10671 = vmatprep.subr.bf16.mxu1 %v13996_v0  ;;  %v14034_v0 = vcombine.high %v1546_v52, %v1550_v54  ;;  %v14058_v39 = vcombine.high %v1570_v29, %v1574_v30  ;;  %v1582_v45 = vld [vmem:[%s19773_s1 + $0x30a0] sm:$0xff] }
 0x2ea   :  { %10139 = vmatpush1.bf16.msra.mxu0 %v13993_v11  ;;  %v1559_v11 = vld [vmem:[%s19773_s1 + $0x2fe8] sm:$0xff] }
 0x2eb   :  { %10672 = vmatpush1.bf16.msra.mxu1 %v13995_v12  ;;  %10140 = vmatprep.subr.bf16.mxu0 %v14002_v13  ;;  %v14033_v12 = vcombine.low %v1546_v52, %v1550_v54  ;;  %v14035_v13 = vcombine.low %v1547_v55, %v1551_v60  ;;  %v14044_v16 = vcombine.high %v1555_v10, %v1559_v11  ;;  %v1586_v55 = vld [vmem:[%s19773_s1 + $0x30c0] sm:$0xff] }
 0x2ec   :  { %10673 = vmatprep.subr.bf16.mxu1 %v14004_v1  ;;  %v14042_v1 = vcombine.high %v1554_v44, %v1558_v3  ;;  %v14066_v52 = vcombine.high %v1578_v42, %v1582_v45  ;;  %v1590_v60 = vld [vmem:[%s19773_s1 + $0x30e0] sm:$0xff] }
 0x2ee   :  { %10141 = vmatpush1.bf16.msra.mxu0 %v14001_v22  ;;  %v1567_v22 = vld [vmem:[%s19773_s1 + $0x3028] sm:$0xff] }
 0x2ef   :  { %10674 = vmatpush1.bf16.msra.mxu1 %v14003_v24  ;;  %10142 = vmatprep.subr.bf16.mxu0 %v14010_v47  ;;  %v14041_v24 = vcombine.low %v1554_v44, %v1558_v3  ;;  %v14043_v47 = vcombine.low %v1555_v10, %v1559_v11  ;;  %v14052_v28 = vcombine.high %v1563_v21, %v1567_v22  ;;  %v28_v11 = vld [vmem:[%s19773_s1 + $0x10] sm:$0xff] }
 0x2f0   :  { %10675 = vmatprep.subr.bf16.mxu1 %v14012_v25  ;;  %v14050_v25 = vcombine.high %v1562_v18, %v1566_v20  ;;  %v14074_v3 = vcombine.high %v1586_v55, %v1590_v60 }
 0x2f2   :  { %10143 = vmatpush1.bf16.msra.mxu0 %v14009_v32  ;;  %v1571_v32 = vld [vmem:[%s19773_s1 + $0x3048] sm:$0xff] }
 0x2f3   :  { %10676 = vmatpush1.bf16.msra.mxu1 %v14011_v35  ;;  %10144 = vmatprep.subr.bf16.mxu0 %v14018_v36  ;;  %v1575_v35 = vld [vmem:[%s19773_s1 + $0x3068] sm:$0xff]  ;;  %v14049_v36 = vcombine.low %v1562_v18, %v1566_v20  ;;  %v12512_v18 = vld.sshfl [vmem:[%s19772_s0 + $0x18] sm:$0x1 pattern:$0x75316420] }
 0x2f4   :  { %10677 = vmatprep.subr.bf16.mxu1 %v14020_v38  ;;  %v14051_v38 = vcombine.low %v1563_v21, %v1567_v22  ;;  %v14060_v41 = vcombine.high %v1571_v32, %v1575_v35 }
 0x2f6   :  { %10145 = vmatpush1.bf16.msra.mxu0 %v14017_v34  ;;  %v1579_v34 = vld [vmem:[%s19773_s1 + $0x3088] sm:$0xff] }
 0x2f7   :  { %10678 = vmatpush1.bf16.msra.mxu1 %v14019_v46  ;;  %10146 = vmatprep.subr.bf16.mxu0 %v14026_v49  ;;  %v1583_v46 = vld [vmem:[%s19773_s1 + $0x30a8] sm:$0xff]  ;;  %v14057_v49 = vcombine.low %v1570_v29, %v1574_v30  ;;  %v41_v29 = vld [vmem:[%s19773_s1 + $0x78] sm:$0xff] }
 0x2f8   :  { %10679 = vmatprep.subr.bf16.mxu1 %v14028_v50  ;;  %v14059_v50 = vcombine.low %v1571_v32, %v1575_v35  ;;  %v14068_v54 = vcombine.high %v1579_v34, %v1583_v46  ;;  %v14067_v44 = vcombine.low %v1579_v34, %v1583_v46 }
 0x2fa   :  { %10147 = vmatpush1.bf16.msra.mxu0 %v14025_v8  ;;  %v14533_v8 = vmov 0  }
 0x2fb   :  { %10680 = vmatpush1.bf16.msra.mxu1 %v14027_v61  ;;  %10148 = vmatprep.subr.bf16.mxu0 %v14034_v0  ;;  %v1587_v61 = vld [vmem:[%s19773_s1 + $0x30c8] sm:$0xff] }
 0x2fc   :  { %10681 = vmatprep.subr.bf16.mxu1 %v14036_v63  ;;  %v1591_v0 = vld [vmem:[%s19773_s1 + $0x30e8] sm:$0xff]  ;;  %v14065_v63 = vcombine.low %v1578_v42, %v1582_v45 }
 0x2fd   :  { %v14076_v10 = vcombine.high %v1587_v61, %v1591_v0  ;;  %v14075_v20 = vcombine.low %v1587_v61, %v1591_v0 }
 0x2fe   :  { %10149 = vmatpush1.bf16.msra.mxu0 %v14033_v12  ;;  %v32_v12 = vld [vmem:[%s19773_s1 + $0x30] sm:$0xff] }
 0x2ff   :  { %10682 = vmatpush1.bf16.msra.mxu1 %v14035_v13  ;;  %10150 = vmatprep.subr.bf16.mxu0 %v14042_v1  ;;  %v29_v13 = vld [vmem:[%s19773_s1 + $0x18] sm:$0xff]  ;;  %v12518_v21 = vcombine.high %v28_v11, %v32_v12  ;;  %v12517_v30 = vcombine.low %v28_v11, %v32_v12 }
 0x300   :  { %10683 = vmatprep.subr.bf16.mxu1 %v14044_v16  ;;  %v33_v1 = vld [vmem:[%s19773_s1 + $0x38] sm:$0xff]  ;;  %v14073_v16 = vcombine.low %v1586_v55, %v1590_v60 }
 0x301   :  { %v12520_v22 = vcombine.high %v29_v13, %v33_v1  ;;  %v12519_v32 = vcombine.low %v29_v13, %v33_v1  ;;  %v68_v1 = vld [vmem:[%s19773_s1 + $0x150] sm:$0xff] }
 0x302   :  { %10151 = vmatpush1.bf16.msra.mxu0 %v14041_v24  ;;  %v36_v24 = vld [vmem:[%s19773_s1 + $0x50] sm:$0xff] }
 0x303   :  { %10684 = vmatpush1.bf16.msra.mxu1 %v14043_v47  ;;  %10161 = vmatprep.subr.bf16.mxu0 %v14050_v25  ;;  %v40_v47 = vld [vmem:[%s19773_s1 + $0x70] sm:$0xff]  ;;  %v17138_v25 = vrot.slane %v12512_v18, %v14646_v53  ;;  %v69_v18 = vld [vmem:[%s19773_s1 + $0x158] sm:$0xff] }
 0x304   :  { %10694 = vmatprep.subr.bf16.mxu1 %v14052_v28  ;;  %v37_v28 = vld [vmem:[%s19773_s1 + $0x58] sm:$0xff]  ;;  %v12526_v35 = vcombine.high %v36_v24, %v40_v47  ;;  %v44_v53 = vld [vmem:[%s19773_s1 + $0x90] sm:$0xff]  ;;  %v12525_v42 = vcombine.low %v36_v24, %v40_v47 }
 0x305   :  { %10153 = vmatmul.mubr.bf16.vlgmr.msra.gmra.mrb[0].mxu0 %v17080_v31  ;;  %v12527_v45 = vcombine.low %v37_v28, %v41_v29 }
 0x306   :  { %10162 = vmatpush1.bf16.msra.mxu0 %v14049_v36  ;;  %10686 = vmatmul.mubr.bf16.vlgmr.msra.gmra.mrb[0].mxu1 %v17080_v31  ;;  %v12528_v36 = vcombine.high %v37_v28, %v41_v29  ;;  %v76_v28 = vld [vmem:[%s19773_s1 + $0x190] sm:$0xff] }
 0x307   :  { %10695 = vmatpush1.bf16.msra.mxu1 %v14051_v38  ;;  %10163 = vmatprep.subr.bf16.mxu0 %v14058_v39  ;;  %v48_v38 = vld [vmem:[%s19773_s1 + $0xb0] sm:$0xff]  ;;  %v45_v39 = vld [vmem:[%s19773_s1 + $0x98] sm:$0xff] }
 0x308   :  { %10696 = vmatprep.subr.bf16.mxu1 %v14060_v41  ;;  %10193 = vmatprep.mubr.bf16.mxu0 %v14533_v8  ;;  %v49_v41 = vld [vmem:[%s19773_s1 + $0xb8] sm:$0xff]  ;;  %v12534_v34 = vcombine.high %v44_v53, %v48_v38  ;;  %v12533_v55 = vcombine.low %v44_v53, %v48_v38  ;;  %v80_v29 = vld [vmem:[%s19773_s1 + $0x1b0] sm:$0xff] }
 0x309   :  { %10726 = vmatprep.mubr.bf16.mxu1 %v14533_v8  ;;  %v12536_v46 = vcombine.high %v45_v39, %v49_v41  ;;  %v12535_v60 = vcombine.low %v45_v39, %v49_v41  ;;  %v12566_v53 = vcombine.high %v76_v28, %v80_v29  ;;  %v84_v39 = vld [vmem:[%s19773_s1 + $0x1d0] sm:$0xff] }
 0x30a   :  { %10164 = vmatpush1.bf16.msra.mxu0 %v14057_v49  ;;  %v52_v49 = vld [vmem:[%s19773_s1 + $0xd0] sm:$0xff] }
 0x30b   :  { %10697 = vmatpush1.bf16.msra.mxu1 %v14059_v50  ;;  %10165 = vmatprep.subr.bf16.mxu0 %v14066_v52  ;;  %v56_v50 = vld [vmem:[%s19773_s1 + $0xf0] sm:$0xff]  ;;  %v53_v52 = vld [vmem:[%s19773_s1 + $0xd8] sm:$0xff] }
 0x30c   :  { %10698 = vmatprep.subr.bf16.mxu1 %v14068_v54  ;;  %v57_v54 = vld [vmem:[%s19773_s1 + $0xf8] sm:$0xff]  ;;  %v12542_v61 = vcombine.high %v52_v49, %v56_v50  ;;  %v88_v41 = vld [vmem:[%s19773_s1 + $0x1f0] sm:$0xff] }
 0x30d   :  { %v12544_v0 = vcombine.high %v53_v52, %v57_v54  ;;  %v12543_v11 = vcombine.low %v53_v52, %v57_v54  ;;  %v92_v52 = vld [vmem:[%s19773_s1 + $0x210] sm:$0xff] }
 0x30e   :  { %10166 = vmatpush1.bf16.msra.mxu0 %v14065_v63  ;;  %v60_v63 = vld [vmem:[%s19773_s1 + $0x110] sm:$0xff] }
 0x30f   :  { %10699 = vmatpush1.bf16.msra.mxu1 %v14067_v44  ;;  %10167 = vmatprep.subr.bf16.mxu0 %v14074_v3  ;;  %v64_v44 = vld [vmem:[%s19773_s1 + $0x130] sm:$0xff]  ;;  %v65_v3 = vld [vmem:[%s19773_s1 + $0x138] sm:$0xff] }
 0x310   :  { %10700 = vmatprep.subr.bf16.mxu1 %v14076_v10  ;;  %v12541_v10 = vcombine.low %v52_v49, %v56_v50  ;;  %v12550_v12 = vcombine.high %v60_v63, %v64_v44  ;;  %v12574_v49 = vcombine.high %v84_v39, %v88_v41  ;;  %v96_v54 = vld [vmem:[%s19773_s1 + $0x230] sm:$0xff] }
 0x312   :  { %10168 = vmatpush1.bf16.msra.mxu0 %v14073_v16  ;;  %v72_v16 = vld [vmem:[%s19773_s1 + $0x170] sm:$0xff] }
 0x313   :  { %10701 = vmatpush1.bf16.msra.mxu1 %v14075_v20  ;;  %10735 = vmatprep.subr.bf16.mxu0 %v12518_v21  ;;  %v73_v20 = vld [vmem:[%s19773_s1 + $0x178] sm:$0xff]  ;;  %v12549_v21 = vcombine.low %v60_v63, %v64_v44  ;;  %v12558_v24 = vcombine.high %v68_v1, %v72_v16  ;;  %v12582_v63 = vcombine.high %v92_v52, %v96_v54 }
 0x314   :  { %11268 = vmatprep.subr.bf16.mxu1 %v12520_v22  ;;  %v12560_v47 = vcombine.high %v69_v18, %v73_v20 }
 0x315   :  { %14081 = vmatmul.mubr.msk.bf16.vlgmr.msra.gmra.mrb[0].mxu0 %vm9665_vm0, %v17138_v25 }
 0x316   :  { %14082 = vmatmul.mubr.msk.bf16.vlgmr.msra.gmra.mrb[0].mxu1 %vm9665_vm0, %v17138_v25  ;;  %10736 = vmatpush1.bf16.msra.mxu0 %v12517_v30  ;;  %v77_v30 = vld [vmem:[%s19773_s1 + $0x198] sm:$0xff] }
 0x317   :  { %11269 = vmatpush1.bf16.msra.mxu1 %v12519_v32  ;;  %10737 = vmatprep.subr.bf16.mxu0 %v12526_v35  ;;  %v81_v32 = vld [vmem:[%s19773_s1 + $0x1b8] sm:$0xff]  ;;  %v12557_v35 = vcombine.low %v68_v1, %v72_v16 }
 0x318   :  { %11270 = vmatprep.subr.bf16.mxu1 %v12528_v36  ;;  %10767 = vmatprep.mubr.bf16.mxu0 %v14684_v9  ;;  %v12559_v36 = vcombine.low %v69_v18, %v73_v20  ;;  %v12568_v38 = vcombine.high %v77_v30, %v81_v32  ;;  %v108_v18 = vld [vmem:[%s19773_s1 + $0x290] sm:$0xff] }
 0x319   :  { %11300 = vmatprep.mubr.bf16.mxu1 %v14684_v9  ;;  %v61_v9 = vld [vmem:[%s19773_s1 + $0x118] sm:$0xff]  ;;  %v112_v20 = vld [vmem:[%s19773_s1 + $0x2b0] sm:$0xff] }
 0x31a   :  { %10738 = vmatpush1.bf16.msra.mxu0 %v12525_v42  ;;  %v12552_v13 = vcombine.high %v61_v9, %v65_v3  ;;  %v12551_v22 = vcombine.low %v61_v9, %v65_v3  ;;  %v85_v42 = vld [vmem:[%s19773_s1 + $0x1d8] sm:$0xff]  ;;  %v100_v9 = vld [vmem:[%s19773_s1 + $0x250] sm:$0xff] }
 0x31b   :  { %11271 = vmatpush1.bf16.msra.mxu1 %v12527_v45  ;;  %10739 = vmatprep.subr.bf16.mxu0 %v12534_v34  ;;  %v89_v45 = vld [vmem:[%s19773_s1 + $0x1f8] sm:$0xff]  ;;  %v12565_v34 = vcombine.low %v76_v28, %v80_v29  ;;  %v104_v3 = vld [vmem:[%s19773_s1 + $0x270] sm:$0xff]  ;;  %v12598_v28 = vcombine.high %v108_v18, %v112_v20 }
 0x31c   :  { %11272 = vmatprep.subr.bf16.mxu1 %v12536_v46  ;;  %v12567_v46 = vcombine.low %v77_v30, %v81_v32  ;;  %v12576_v50 = vcombine.high %v85_v42, %v89_v45  ;;  %v12590_v1 = vcombine.high %v100_v9, %v104_v3  ;;  %v116_v30 = vld [vmem:[%s19773_s1 + $0x2d0] sm:$0xff] }
 0x31d   :  { %v120_v32 = vld [vmem:[%s19773_s1 + $0x2f0] sm:$0xff] }
 0x31e   :  { %10740 = vmatpush1.bf16.msra.mxu0 %v12533_v55  ;;  %v93_v55 = vld [vmem:[%s19773_s1 + $0x218] sm:$0xff] }
 0x31f   :  { %11273 = vmatpush1.bf16.msra.mxu1 %v12535_v60  ;;  %10741 = vmatprep.subr.bf16.mxu0 %v12542_v61  ;;  %v97_v60 = vld [vmem:[%s19773_s1 + $0x238] sm:$0xff]  ;;  %v12573_v61 = vcombine.low %v84_v39, %v88_v41  ;;  %v12606_v39 = vcombine.high %v116_v30, %v120_v32 }
 0x320   :  { %11274 = vmatprep.subr.bf16.mxu1 %v12544_v0  ;;  %v12575_v0 = vcombine.low %v85_v42, %v89_v45  ;;  %v12584_v44 = vcombine.high %v93_v55, %v97_v60  ;;  %v124_v42 = vld [vmem:[%s19773_s1 + $0x310] sm:$0xff] }
 0x321   :  { %v128_v45 = vld [vmem:[%s19773_s1 + $0x330] sm:$0xff] }
 0x322   :  { %10742 = vmatpush1.bf16.msra.mxu0 %v12541_v10  ;;  %v101_v10 = vld [vmem:[%s19773_s1 + $0x258] sm:$0xff] }
 0x323   :  { %11275 = vmatpush1.bf16.msra.mxu1 %v12543_v11  ;;  %10743 = vmatprep.subr.bf16.mxu0 %v12550_v12  ;;  %v105_v11 = vld [vmem:[%s19773_s1 + $0x278] sm:$0xff]  ;;  %v12581_v12 = vcombine.low %v92_v52, %v96_v54  ;;  %v12614_v52 = vcombine.high %v124_v42, %v128_v45 }
 0x324   :  { %11276 = vmatprep.subr.bf16.mxu1 %v12552_v13  ;;  %v12583_v13 = vcombine.low %v93_v55, %v97_v60  ;;  %v12592_v16 = vcombine.high %v101_v10, %v105_v11  ;;  %v132_v55 = vld [vmem:[%s19773_s1 + $0x350] sm:$0xff] }
 0x325   :  { %v136_v60 = vld [vmem:[%s19773_s1 + $0x370] sm:$0xff] }
 0x326   :  { %10744 = vmatpush1.bf16.msra.mxu0 %v12549_v21  ;;  %v109_v21 = vld [vmem:[%s19773_s1 + $0x298] sm:$0xff] }
 0x327   :  { %11277 = vmatpush1.bf16.msra.mxu1 %v12551_v22  ;;  %10745 = vmatprep.subr.bf16.mxu0 %v12558_v24  ;;  %v113_v22 = vld [vmem:[%s19773_s1 + $0x2b8] sm:$0xff]  ;;  %v12589_v24 = vcombine.low %v100_v9, %v104_v3  ;;  %v12622_v9 = vcombine.high %v132_v55, %v136_v60 }
 0x328   :  { %11278 = vmatprep.subr.bf16.mxu1 %v12560_v47  ;;  %v12591_v47 = vcombine.low %v101_v10, %v105_v11  ;;  %v12600_v29 = vcombine.high %v109_v21, %v113_v22  ;;  %v140_v10 = vld [vmem:[%s19773_s1 + $0x390] sm:$0xff] }
 0x329   :  { %v144_v11 = vld [vmem:[%s19773_s1 + $0x3b0] sm:$0xff] }
 0x32a   :  { %10746 = vmatpush1.bf16.msra.mxu0 %v12557_v35  ;;  %v117_v35 = vld [vmem:[%s19773_s1 + $0x2d8] sm:$0xff] }
 0x32b   :  { %11279 = vmatpush1.bf16.msra.mxu1 %v12559_v36  ;;  %10747 = vmatprep.subr.bf16.mxu0 %v12566_v53  ;;  %v121_v36 = vld [vmem:[%s19773_s1 + $0x2f8] sm:$0xff]  ;;  %v12597_v53 = vcombine.low %v108_v18, %v112_v20  ;;  %v12630_v18 = vcombine.high %v140_v10, %v144_v11 }
 0x32c   :  { %11280 = vmatprep.subr.bf16.mxu1 %v12568_v38  ;;  %v12599_v38 = vcombine.low %v109_v21, %v113_v22  ;;  %v12608_v41 = vcombine.high %v117_v35, %v121_v36  ;;  %v148_v21 = vld [vmem:[%s19773_s1 + $0x3d0] sm:$0xff] }
 0x32d   :  { %v152_v22 = vld [vmem:[%s19773_s1 + $0x3f0] sm:$0xff] }
 0x32e   :  { %10748 = vmatpush1.bf16.msra.mxu0 %v12565_v34  ;;  %v125_v34 = vld [vmem:[%s19773_s1 + $0x318] sm:$0xff] }
 0x32f   :  { %11281 = vmatpush1.bf16.msra.mxu1 %v12567_v46  ;;  %10749 = vmatprep.subr.bf16.mxu0 %v12574_v49  ;;  %v129_v46 = vld [vmem:[%s19773_s1 + $0x338] sm:$0xff]  ;;  %v12605_v49 = vcombine.low %v116_v30, %v120_v32  ;;  %v12638_v30 = vcombine.high %v148_v21, %v152_v22 }
 0x330   :  { %11282 = vmatprep.subr.bf16.mxu1 %v12576_v50  ;;  %v12607_v50 = vcombine.low %v117_v35, %v121_v36  ;;  %v12616_v54 = vcombine.high %v125_v34, %v129_v46  ;;  %v156_v35 = vld [vmem:[%s19773_s1 + $0x410] sm:$0xff] }
 0x331   :  { %v160_v36 = vld [vmem:[%s19773_s1 + $0x430] sm:$0xff] }
 0x332   :  { %10750 = vmatpush1.bf16.msra.mxu0 %v12573_v61  ;;  %v133_v61 = vld [vmem:[%s19773_s1 + $0x358] sm:$0xff] }
 0x333   :  { %11283 = vmatpush1.bf16.msra.mxu1 %v12575_v0  ;;  %10751 = vmatprep.subr.bf16.mxu0 %v12582_v63  ;;  %v137_v0 = vld [vmem:[%s19773_s1 + $0x378] sm:$0xff]  ;;  %v12613_v63 = vcombine.low %v124_v42, %v128_v45  ;;  %v12646_v42 = vcombine.high %v156_v35, %v160_v36 }
 0x334   :  { %11284 = vmatprep.subr.bf16.mxu1 %v12584_v44  ;;  %v12615_v44 = vcombine.low %v125_v34, %v129_v46  ;;  %v12624_v3 = vcombine.high %v133_v61, %v137_v0  ;;  %v164_v34 = vld [vmem:[%s19773_s1 + $0x450] sm:$0xff] }
 0x335   :  { %v168_v46 = vld [vmem:[%s19773_s1 + $0x470] sm:$0xff] }
 0x336   :  { %10752 = vmatpush1.bf16.msra.mxu0 %v12581_v12  ;;  %v141_v12 = vld [vmem:[%s19773_s1 + $0x398] sm:$0xff] }
 0x337   :  { %11285 = vmatpush1.bf16.msra.mxu1 %v12583_v13  ;;  %10753 = vmatprep.subr.bf16.mxu0 %v12590_v1  ;;  %v145_v13 = vld [vmem:[%s19773_s1 + $0x3b8] sm:$0xff]  ;;  %v12621_v1 = vcombine.low %v132_v55, %v136_v60  ;;  %v12654_v55 = vcombine.high %v164_v34, %v168_v46 }
 0x338   :  { %11286 = vmatprep.subr.bf16.mxu1 %v12592_v16  ;;  %v12623_v16 = vcombine.low %v133_v61, %v137_v0  ;;  %v12632_v20 = vcombine.high %v141_v12, %v145_v13  ;;  %v172_v61 = vld [vmem:[%s19773_s1 + $0x490] sm:$0xff] }
 0x339   :  { %v176_v0 = vld [vmem:[%s19773_s1 + $0x4b0] sm:$0xff] }
 0x33a   :  { %10754 = vmatpush1.bf16.msra.mxu0 %v12589_v24  ;;  %v149_v24 = vld [vmem:[%s19773_s1 + $0x3d8] sm:$0xff] }
 0x33b   :  { %11287 = vmatpush1.bf16.msra.mxu1 %v12591_v47  ;;  %10755 = vmatprep.subr.bf16.mxu0 %v12598_v28  ;;  %v153_v47 = vld [vmem:[%s19773_s1 + $0x3f8] sm:$0xff]  ;;  %v12629_v28 = vcombine.low %v140_v10, %v144_v11  ;;  %v12662_v10 = vcombine.high %v172_v61, %v176_v0 }
 0x33c   :  { %11288 = vmatprep.subr.bf16.mxu1 %v12600_v29  ;;  %v12631_v29 = vcombine.low %v141_v12, %v145_v13  ;;  %v12640_v32 = vcombine.high %v149_v24, %v153_v47  ;;  %v180_v12 = vld [vmem:[%s19773_s1 + $0x4d0] sm:$0xff] }
 0x33d   :  { %v184_v13 = vld [vmem:[%s19773_s1 + $0x4f0] sm:$0xff] }
 0x33e   :  { %10756 = vmatpush1.bf16.msra.mxu0 %v12597_v53  ;;  %v157_v53 = vld [vmem:[%s19773_s1 + $0x418] sm:$0xff] }
 0x33f   :  { %11289 = vmatpush1.bf16.msra.mxu1 %v12599_v38  ;;  %10757 = vmatprep.subr.bf16.mxu0 %v12606_v39  ;;  %v161_v38 = vld [vmem:[%s19773_s1 + $0x438] sm:$0xff]  ;;  %v12637_v39 = vcombine.low %v148_v21, %v152_v22  ;;  %v188_v22 = vld [vmem:[%s19773_s1 + $0x510] sm:$0xff] }
 0x340   :  { %11290 = vmatprep.subr.bf16.mxu1 %v12608_v41  ;;  %v12639_v41 = vcombine.low %v149_v24, %v153_v47  ;;  %v12648_v45 = vcombine.high %v157_v53, %v161_v38  ;;  %v192_v24 = vld [vmem:[%s19773_s1 + $0x530] sm:$0xff]  ;;  %v193_v47 = vld [vmem:[%s19773_s1 + $0x538] sm:$0xff] }
 0x342   :  { %10758 = vmatpush1.bf16.msra.mxu0 %v12605_v49  ;;  %v165_v49 = vld [vmem:[%s19773_s1 + $0x458] sm:$0xff] }
 0x343   :  { %11291 = vmatpush1.bf16.msra.mxu1 %v12607_v50  ;;  %10759 = vmatprep.subr.bf16.mxu0 %v12614_v52  ;;  %v169_v50 = vld [vmem:[%s19773_s1 + $0x478] sm:$0xff]  ;;  %v12645_v52 = vcombine.low %v156_v35, %v160_v36  ;;  %v196_v35 = vld [vmem:[%s19773_s1 + $0x550] sm:$0xff] }
 0x344   :  { %11292 = vmatprep.subr.bf16.mxu1 %v12616_v54  ;;  %v12647_v54 = vcombine.low %v157_v53, %v161_v38  ;;  %v12656_v60 = vcombine.high %v165_v49, %v169_v50  ;;  %v200_v36 = vld [vmem:[%s19773_s1 + $0x570] sm:$0xff]  ;;  %v197_v53 = vld [vmem:[%s19773_s1 + $0x558] sm:$0xff] }
 0x345   :  { %v201_v38 = vld [vmem:[%s19773_s1 + $0x578] sm:$0xff] }
 0x346   :  { %10760 = vmatpush1.bf16.msra.mxu0 %v12613_v63  ;;  %v173_v63 = vld [vmem:[%s19773_s1 + $0x498] sm:$0xff] }
 0x347   :  { %11293 = vmatpush1.bf16.msra.mxu1 %v12615_v44  ;;  %10761 = vmatprep.subr.bf16.mxu0 %v12622_v9  ;;  %v177_v44 = vld [vmem:[%s19773_s1 + $0x4b8] sm:$0xff]  ;;  %v12653_v9 = vcombine.low %v164_v34, %v168_v46  ;;  %v204_v34 = vld [vmem:[%s19773_s1 + $0x590] sm:$0xff] }
 0x348   :  { %11294 = vmatprep.subr.bf16.mxu1 %v12624_v3  ;;  %v12655_v3 = vcombine.low %v165_v49, %v169_v50  ;;  %v12664_v11 = vcombine.high %v173_v63, %v177_v44  ;;  %v208_v46 = vld [vmem:[%s19773_s1 + $0x5b0] sm:$0xff]  ;;  %v205_v49 = vld [vmem:[%s19773_s1 + $0x598] sm:$0xff] }
 0x349   :  { %v209_v50 = vld [vmem:[%s19773_s1 + $0x5b8] sm:$0xff] }
 0x34a   :  { %10762 = vmatpush1.bf16.msra.mxu0 %v12621_v1  ;;  %v185_v1 = vld [vmem:[%s19773_s1 + $0x4f8] sm:$0xff] }
 0x34b   :  { %11295 = vmatpush1.bf16.msra.mxu1 %v12623_v16  ;;  %10763 = vmatprep.subr.bf16.mxu0 %v12630_v18  ;;  %v12661_v16 = vcombine.low %v172_v61, %v176_v0  ;;  %v12663_v18 = vcombine.low %v173_v63, %v177_v44  ;;  %v212_v61 = vld [vmem:[%s19773_s1 + $0x5d0] sm:$0xff]  ;;  %v213_v63 = vld [vmem:[%s19773_s1 + $0x5d8] sm:$0xff] }
 0x34c   :  { %11296 = vmatprep.subr.bf16.mxu1 %v12632_v20  ;;  %v12670_v20 = vcombine.high %v180_v12, %v184_v13  ;;  %v216_v0 = vld [vmem:[%s19773_s1 + $0x5f0] sm:$0xff]  ;;  %v217_v44 = vld [vmem:[%s19773_s1 + $0x5f8] sm:$0xff] }
 0x34e   :  { %10764 = vmatpush1.bf16.msra.mxu0 %v12629_v28  ;;  %v12669_v28 = vcombine.low %v180_v12, %v184_v13  ;;  %v220_v12 = vld [vmem:[%s19773_s1 + $0x610] sm:$0xff] }
 0x34f   :  { %11297 = vmatpush1.bf16.msra.mxu1 %v12631_v29  ;;  %10765 = vmatprep.subr.bf16.mxu0 %v12638_v30  ;;  %v12678_v30 = vcombine.high %v188_v22, %v192_v24  ;;  %v224_v13 = vld [vmem:[%s19773_s1 + $0x630] sm:$0xff] }
 0x350   :  { %11298 = vmatprep.subr.bf16.mxu1 %v12640_v32 }
 0x352   :  { %10766 = vmatpush1.bf16.msra.mxu0 %v12637_v39  ;;  %v12677_v39 = vcombine.low %v188_v22, %v192_v24  ;;  %v228_v22 = vld [vmem:[%s19773_s1 + $0x650] sm:$0xff] }
 0x353   :  { %11299 = vmatpush1.bf16.msra.mxu1 %v12639_v41  ;;  %10776 = vmatprep.subr.bf16.mxu0 %v12646_v42  ;;  %v12686_v42 = vcombine.high %v196_v35, %v200_v36  ;;  %v232_v24 = vld [vmem:[%s19773_s1 + $0x670] sm:$0xff] }
 0x354   :  { %11309 = vmatprep.subr.bf16.mxu1 %v12648_v45  ;;  %v12688_v45 = vcombine.high %v197_v53, %v201_v38 }
 0x355   :  { %10768 = vmatmul.mubr.bf16.vlgmr.msra.gmra.mrb[4].mxu0 %v14798_v23 }
 0x356   :  { %10777 = vmatpush1.bf16.msra.mxu0 %v12645_v52  ;;  %11301 = vmatmul.mubr.bf16.vlgmr.msra.gmra.mrb[4].mxu1 %v14798_v23  ;;  %v181_v23 = vld [vmem:[%s19773_s1 + $0x4d8] sm:$0xff]  ;;  %v12685_v52 = vcombine.low %v196_v35, %v200_v36  ;;  %v236_v35 = vld [vmem:[%s19773_s1 + $0x690] sm:$0xff] }
 0x357   :  { %11310 = vmatpush1.bf16.msra.mxu1 %v12647_v54  ;;  %10778 = vmatprep.subr.bf16.mxu0 %v12654_v55  ;;  %v12672_v21 = vcombine.high %v181_v23, %v185_v1  ;;  %v12671_v29 = vcombine.low %v181_v23, %v185_v1  ;;  %v12687_v54 = vcombine.low %v197_v53, %v201_v38  ;;  %v221_v23 = vld [vmem:[%s19773_s1 + $0x618] sm:$0xff]  ;;  %v240_v36 = vld [vmem:[%s19773_s1 + $0x6b0] sm:$0xff] }
 0x358   :  { %11311 = vmatprep.subr.bf16.mxu1 %v12656_v60  ;;  %10808 = vmatprep.mubr.bf16.mxu0 %v14820_v33  ;;  %v12694_v55 = vcombine.high %v204_v34, %v208_v46  ;;  %v12696_v60 = vcombine.high %v205_v49, %v209_v50  ;;  %v225_v1 = vld [vmem:[%s19773_s1 + $0x638] sm:$0xff] }
 0x359   :  { %11341 = vmatprep.mubr.bf16.mxu1 %v14820_v33  ;;  %v189_v33 = vld [vmem:[%s19773_s1 + $0x518] sm:$0xff] }
 0x35a   :  { %10779 = vmatpush1.bf16.msra.mxu0 %v12653_v9  ;;  %v12680_v32 = vcombine.high %v189_v33, %v193_v47  ;;  %v12679_v41 = vcombine.low %v189_v33, %v193_v47  ;;  %v12693_v9 = vcombine.low %v204_v34, %v208_v46  ;;  %v229_v33 = vld [vmem:[%s19773_s1 + $0x658] sm:$0xff]  ;;  %v244_v34 = vld [vmem:[%s19773_s1 + $0x6d0] sm:$0xff] }
 0x35b   :  { %11312 = vmatpush1.bf16.msra.mxu1 %v12655_v3  ;;  %10780 = vmatprep.subr.bf16.mxu0 %v12662_v10  ;;  %v12695_v3 = vcombine.low %v205_v49, %v209_v50  ;;  %v12702_v10 = vcombine.high %v212_v61, %v216_v0  ;;  %v233_v47 = vld [vmem:[%s19773_s1 + $0x678] sm:$0xff]  ;;  %v248_v46 = vld [vmem:[%s19773_s1 + $0x6f0] sm:$0xff] }
 0x35c   :  { %11313 = vmatprep.subr.bf16.mxu1 %v12664_v11  ;;  %v12704_v11 = vcombine.high %v213_v63, %v217_v44  ;;  %v237_v53 = vld [vmem:[%s19773_s1 + $0x698] sm:$0xff] }
 0x35d   :  { %v241_v38 = vld [vmem:[%s19773_s1 + $0x6b8] sm:$0xff] }
 0x35e   :  { %10781 = vmatpush1.bf16.msra.mxu0 %v12661_v16  ;;  %v12701_v16 = vcombine.low %v212_v61, %v216_v0  ;;  %v245_v49 = vld [vmem:[%s19773_s1 + $0x6d8] sm:$0xff]  ;;  %v252_v61 = vld [vmem:[%s19773_s1 + $0x710] sm:$0xff] }
 0x35f   :  { %11314 = vmatpush1.bf16.msra.mxu1 %v12663_v18  ;;  %10782 = vmatprep.subr.bf16.mxu0 %v12670_v20  ;;  %v12703_v18 = vcombine.low %v213_v63, %v217_v44  ;;  %v12710_v20 = vcombine.high %v220_v12, %v224_v13  ;;  %v249_v50 = vld [vmem:[%s19773_s1 + $0x6f8] sm:$0xff]  ;;  %v256_v0 = vld [vmem:[%s19773_s1 + $0x730] sm:$0xff] }
 0x360   :  { %11315 = vmatprep.subr.bf16.mxu1 %v12672_v21  ;;  %v12712_v21 = vcombine.high %v221_v23, %v225_v1  ;;  %v253_v63 = vld [vmem:[%s19773_s1 + $0x718] sm:$0xff] }
 0x361   :  { %v257_v44 = vld [vmem:[%s19773_s1 + $0x738] sm:$0xff] }
 0x362   :  { %10783 = vmatpush1.bf16.msra.mxu0 %v12669_v28  ;;  %v12709_v28 = vcombine.low %v220_v12, %v224_v13  ;;  %v260_v12 = vld [vmem:[%s19773_s1 + $0x750] sm:$0xff] }
 0x363   :  { %11316 = vmatpush1.bf16.msra.mxu1 %v12671_v29  ;;  %10784 = vmatprep.subr.bf16.mxu0 %v12678_v30  ;;  %v12711_v29 = vcombine.low %v221_v23, %v225_v1  ;;  %v12718_v30 = vcombine.high %v228_v22, %v232_v24  ;;  %v264_v13 = vld [vmem:[%s19773_s1 + $0x770] sm:$0xff]  ;;  %v261_v23 = vld [vmem:[%s19773_s1 + $0x758] sm:$0xff] }
 0x364   :  { %11317 = vmatprep.subr.bf16.mxu1 %v12680_v32  ;;  %v12720_v32 = vcombine.high %v229_v33, %v233_v47  ;;  %v265_v1 = vld [vmem:[%s19773_s1 + $0x778] sm:$0xff] }
 0x366   :  { %10785 = vmatpush1.bf16.msra.mxu0 %v12677_v39  ;;  %v12717_v39 = vcombine.low %v228_v22, %v232_v24  ;;  %v268_v22 = vld [vmem:[%s19773_s1 + $0x790] sm:$0xff] }
 0x367   :  { %11318 = vmatpush1.bf16.msra.mxu1 %v12679_v41  ;;  %10786 = vmatprep.subr.bf16.mxu0 %v12686_v42  ;;  %v12719_v41 = vcombine.low %v229_v33, %v233_v47  ;;  %v12726_v42 = vcombine.high %v236_v35, %v240_v36  ;;  %v272_v24 = vld [vmem:[%s19773_s1 + $0x7b0] sm:$0xff]  ;;  %v269_v33 = vld [vmem:[%s19773_s1 + $0x798] sm:$0xff] }
 0x368   :  { %11319 = vmatprep.subr.bf16.mxu1 %v12688_v45  ;;  %v12728_v45 = vcombine.high %v237_v53, %v241_v38  ;;  %v273_v47 = vld [vmem:[%s19773_s1 + $0x7b8] sm:$0xff] }
 0x36a   :  { %10787 = vmatpush1.bf16.msra.mxu0 %v12685_v52  ;;  %v12725_v52 = vcombine.low %v236_v35, %v240_v36  ;;  %v276_v35 = vld [vmem:[%s19773_s1 + $0x7d0] sm:$0xff] }
 0x36b   :  { %11320 = vmatpush1.bf16.msra.mxu1 %v12687_v54  ;;  %10788 = vmatprep.subr.bf16.mxu0 %v12694_v55  ;;  %v12727_v54 = vcombine.low %v237_v53, %v241_v38  ;;  %v12734_v55 = vcombine.high %v244_v34, %v248_v46  ;;  %v280_v36 = vld [vmem:[%s19773_s1 + $0x7f0] sm:$0xff]  ;;  %v277_v53 = vld [vmem:[%s19773_s1 + $0x7d8] sm:$0xff] }
 0x36c   :  { %11321 = vmatprep.subr.bf16.mxu1 %v12696_v60  ;;  %v12736_v60 = vcombine.high %v245_v49, %v249_v50  ;;  %v281_v38 = vld [vmem:[%s19773_s1 + $0x7f8] sm:$0xff] }
 0x36e   :  { %10789 = vmatpush1.bf16.msra.mxu0 %v12693_v9  ;;  %v12733_v9 = vcombine.low %v244_v34, %v248_v46  ;;  %v284_v34 = vld [vmem:[%s19773_s1 + $0x810] sm:$0xff] }
 0x36f   :  { %11322 = vmatpush1.bf16.msra.mxu1 %v12695_v3  ;;  %10790 = vmatprep.subr.bf16.mxu0 %v12702_v10  ;;  %v12735_v3 = vcombine.low %v245_v49, %v249_v50  ;;  %v12742_v10 = vcombine.high %v252_v61, %v256_v0  ;;  %v288_v46 = vld [vmem:[%s19773_s1 + $0x830] sm:$0xff]  ;;  %v285_v49 = vld [vmem:[%s19773_s1 + $0x818] sm:$0xff] }
 0x370   :  { %11323 = vmatprep.subr.bf16.mxu1 %v12704_v11  ;;  %v12744_v11 = vcombine.high %v253_v63, %v257_v44  ;;  %v289_v50 = vld [vmem:[%s19773_s1 + $0x838] sm:$0xff] }
 0x372   :  { %10791 = vmatpush1.bf16.msra.mxu0 %v12701_v16  ;;  %v12741_v16 = vcombine.low %v252_v61, %v256_v0  ;;  %v292_v61 = vld [vmem:[%s19773_s1 + $0x850] sm:$0xff] }
 0x373   :  { %11324 = vmatpush1.bf16.msra.mxu1 %v12703_v18  ;;  %10792 = vmatprep.subr.bf16.mxu0 %v12710_v20  ;;  %v12743_v18 = vcombine.low %v253_v63, %v257_v44  ;;  %v12750_v20 = vcombine.high %v260_v12, %v264_v13  ;;  %v296_v0 = vld [vmem:[%s19773_s1 + $0x870] sm:$0xff]  ;;  %v293_v63 = vld [vmem:[%s19773_s1 + $0x858] sm:$0xff] }
 0x374   :  { %11325 = vmatprep.subr.bf16.mxu1 %v12712_v21  ;;  %v12752_v21 = vcombine.high %v261_v23, %v265_v1  ;;  %v297_v44 = vld [vmem:[%s19773_s1 + $0x878] sm:$0xff] }
 0x376   :  { %10793 = vmatpush1.bf16.msra.mxu0 %v12709_v28  ;;  %v12749_v28 = vcombine.low %v260_v12, %v264_v13  ;;  %v300_v12 = vld [vmem:[%s19773_s1 + $0x890] sm:$0xff] }
 0x377   :  { %11326 = vmatpush1.bf16.msra.mxu1 %v12711_v29  ;;  %10794 = vmatprep.subr.bf16.mxu0 %v12718_v30  ;;  %v12751_v29 = vcombine.low %v261_v23, %v265_v1  ;;  %v12758_v30 = vcombine.high %v268_v22, %v272_v24  ;;  %v304_v13 = vld [vmem:[%s19773_s1 + $0x8b0] sm:$0xff]  ;;  %v301_v23 = vld [vmem:[%s19773_s1 + $0x898] sm:$0xff] }
 0x378   :  { %11327 = vmatprep.subr.bf16.mxu1 %v12720_v32  ;;  %v12760_v32 = vcombine.high %v269_v33, %v273_v47  ;;  %v305_v1 = vld [vmem:[%s19773_s1 + $0x8b8] sm:$0xff] }
 0x37a   :  { %10795 = vmatpush1.bf16.msra.mxu0 %v12717_v39  ;;  %v12757_v39 = vcombine.low %v268_v22, %v272_v24  ;;  %v308_v22 = vld [vmem:[%s19773_s1 + $0x8d0] sm:$0xff] }
 0x37b   :  { %11328 = vmatpush1.bf16.msra.mxu1 %v12719_v41  ;;  %10796 = vmatprep.subr.bf16.mxu0 %v12726_v42  ;;  %v12759_v41 = vcombine.low %v269_v33, %v273_v47  ;;  %v12766_v42 = vcombine.high %v276_v35, %v280_v36  ;;  %v312_v24 = vld [vmem:[%s19773_s1 + $0x8f0] sm:$0xff]  ;;  %v313_v33 = vld [vmem:[%s19773_s1 + $0x8f8] sm:$0xff]  ;;  %v12789_v47 = vcombine.low %v300_v12, %v304_v13 }
 0x37c   :  { %11329 = vmatprep.subr.bf16.mxu1 %v12728_v45  ;;  %v12768_v45 = vcombine.high %v277_v53, %v281_v38 }
 0x37e   :  { %10797 = vmatpush1.bf16.msra.mxu0 %v12725_v52  ;;  %v12765_v52 = vcombine.low %v276_v35, %v280_v36  ;;  %v320_v35 = vld [vmem:[%s19773_s1 + $0x930] sm:$0xff]  ;;  %v321_v36 = vld [vmem:[%s19773_s1 + $0x938] sm:$0xff] }
 0x37f   :  { %11330 = vmatpush1.bf16.msra.mxu1 %v12727_v54  ;;  %10798 = vmatprep.subr.bf16.mxu0 %v12734_v55  ;;  %v12767_v54 = vcombine.low %v277_v53, %v281_v38  ;;  %v12774_v55 = vcombine.high %v284_v34, %v288_v46  ;;  %v12797_v53 = vcombine.low %v308_v22, %v312_v24 }
 0x380   :  { %11331 = vmatprep.subr.bf16.mxu1 %v12736_v60  ;;  %v12776_v60 = vcombine.high %v285_v49, %v289_v50 }
 0x382   :  { %10799 = vmatpush1.bf16.msra.mxu0 %v12733_v9  ;;  %v12773_v9 = vcombine.low %v284_v34, %v288_v46  ;;  %v325_v34 = vld [vmem:[%s19773_s1 + $0x958] sm:$0xff] }
 0x383   :  { %11332 = vmatpush1.bf16.msra.mxu1 %v12735_v3  ;;  %10800 = vmatprep.subr.bf16.mxu0 %v12742_v10  ;;  %v12775_v3 = vcombine.low %v285_v49, %v289_v50  ;;  %v12782_v10 = vcombine.high %v292_v61, %v296_v0  ;;  %v329_v46 = vld [vmem:[%s19773_s1 + $0x978] sm:$0xff] }
 0x384   :  { %11333 = vmatprep.subr.bf16.mxu1 %v12744_v11  ;;  %v12784_v11 = vcombine.high %v293_v63, %v297_v44 }
 0x386   :  { %10801 = vmatpush1.bf16.msra.mxu0 %v12741_v16  ;;  %v12781_v16 = vcombine.low %v292_v61, %v296_v0  ;;  %v333_v61 = vld [vmem:[%s19773_s1 + $0x998] sm:$0xff] }
 0x387   :  { %11334 = vmatpush1.bf16.msra.mxu1 %v12743_v18  ;;  %10802 = vmatprep.subr.bf16.mxu0 %v12750_v20  ;;  %v12783_v18 = vcombine.low %v293_v63, %v297_v44  ;;  %v12790_v20 = vcombine.high %v300_v12, %v304_v13  ;;  %v337_v0 = vld [vmem:[%s19773_s1 + $0x9b8] sm:$0xff]  ;;  %v12815_v44 = vcombine.low %v325_v34, %v329_v46 }
 0x388   :  { %11335 = vmatprep.subr.bf16.mxu1 %v12752_v21  ;;  %v12792_v21 = vcombine.high %v301_v23, %v305_v1  ;;  %v341_v12 = vld [vmem:[%s19773_s1 + $0x9d8] sm:$0xff] }
 0x389   :  { %v345_v13 = vld [vmem:[%s19773_s1 + $0x9f8] sm:$0xff] }
 0x38a   :  { %10803 = vmatpush1.bf16.msra.mxu0 %v12749_v28  ;;  %v12791_v28 = vcombine.low %v301_v23, %v305_v1  ;;  %v12823_v1 = vcombine.low %v333_v61, %v337_v0 }
 0x38b   :  { %11336 = vmatpush1.bf16.msra.mxu1 %v12751_v29  ;;  %10804 = vmatprep.subr.bf16.mxu0 %v12758_v30  ;;  %v12798_v29 = vcombine.high %v308_v22, %v312_v24  ;;  %v349_v22 = vld [vmem:[%s19773_s1 + $0xa18] sm:$0xff] }
 0x38c   :  { %11337 = vmatprep.subr.bf16.mxu1 %v12760_v32  ;;  %v316_v32 = vld [vmem:[%s19773_s1 + $0x910] sm:$0xff]  ;;  %v353_v24 = vld [vmem:[%s19773_s1 + $0xa38] sm:$0xff] }
 0x38d   :  { %v12805_v49 = vcombine.low %v316_v32, %v320_v35 }
 0x38e   :  { %10805 = vmatpush1.bf16.msra.mxu0 %v12757_v39  ;;  %v12806_v39 = vcombine.high %v316_v32, %v320_v35  ;;  %v357_v32 = vld [vmem:[%s19773_s1 + $0xa58] sm:$0xff] }
 0x38f   :  { %11338 = vmatpush1.bf16.msra.mxu1 %v12759_v41  ;;  %10806 = vmatprep.subr.bf16.mxu0 %v12766_v42  ;;  %v324_v42 = vld [vmem:[%s19773_s1 + $0x950] sm:$0xff]  ;;  %v361_v35 = vld [vmem:[%s19773_s1 + $0xa78] sm:$0xff] }
 0x390   :  { %11339 = vmatprep.subr.bf16.mxu1 %v12768_v45  ;;  %v328_v45 = vld [vmem:[%s19773_s1 + $0x970] sm:$0xff] }
 0x391   :  { %v12813_v63 = vcombine.low %v324_v42, %v328_v45 }
 0x392   :  { %10807 = vmatpush1.bf16.msra.mxu0 %v12765_v52  ;;  %v12814_v52 = vcombine.high %v324_v42, %v328_v45  ;;  %v365_v42 = vld [vmem:[%s19773_s1 + $0xa98] sm:$0xff] }
 0x393   :  { %11340 = vmatpush1.bf16.msra.mxu1 %v12767_v54  ;;  %10817 = vmatprep.subr.bf16.mxu0 %v12774_v55  ;;  %v12816_v54 = vcombine.high %v325_v34, %v329_v46  ;;  %v332_v55 = vld [vmem:[%s19773_s1 + $0x990] sm:$0xff]  ;;  %v369_v45 = vld [vmem:[%s19773_s1 + $0xab8] sm:$0xff]  ;;  %v12847_v46 = vcombine.low %v357_v32, %v361_v35 }
 0x394   :  { %11350 = vmatprep.subr.bf16.mxu1 %v12776_v60  ;;  %v336_v60 = vld [vmem:[%s19773_s1 + $0x9b0] sm:$0xff] }
 0x395   :  { %10809 = vmatmul.mubr.bf16.vlgmr.msra.gmra.mrb[4].mxu0 %v15015_v40  ;;  %v12821_v23 = vcombine.low %v332_v55, %v336_v60 }
 0x396   :  { %10818 = vmatpush1.bf16.msra.mxu0 %v12773_v9  ;;  %11342 = vmatmul.mubr.bf16.vlgmr.msra.gmra.mrb[4].mxu1 %v15015_v40  ;;  %v309_v40 = vld [vmem:[%s19773_s1 + $0x8d8] sm:$0xff]  ;;  %v12822_v9 = vcombine.high %v332_v55, %v336_v60 }
 0x397   :  { %11351 = vmatpush1.bf16.msra.mxu1 %v12775_v3  ;;  %10819 = vmatprep.subr.bf16.mxu0 %v12782_v10  ;;  %v12800_v30 = vcombine.high %v309_v40, %v313_v33  ;;  %v12799_v38 = vcombine.low %v309_v40, %v313_v33  ;;  %v12824_v3 = vcombine.high %v333_v61, %v337_v0  ;;  %v340_v10 = vld [vmem:[%s19773_s1 + $0x9d0] sm:$0xff]  ;;  %v373_v55 = vld [vmem:[%s19773_s1 + $0xad8] sm:$0xff] }
 0x398   :  { %11352 = vmatprep.subr.bf16.mxu1 %v12784_v11  ;;  %10849 = vmatprep.mubr.bf16.mxu0 %v15024_v48  ;;  %v344_v11 = vld [vmem:[%s19773_s1 + $0x9f0] sm:$0xff]  ;;  %v12831_v33 = vcombine.low %v341_v12, %v345_v13  ;;  %v377_v60 = vld [vmem:[%s19773_s1 + $0xaf8] sm:$0xff]  ;;  %v12855_v0 = vcombine.low %v365_v42, %v369_v45 }
 0x399   :  { %11382 = vmatprep.mubr.bf16.mxu1 %v15024_v48  ;;  %v317_v48 = vld [vmem:[%s19773_s1 + $0x918] sm:$0xff]  ;;  %v12829_v40 = vcombine.low %v340_v10, %v344_v11 }
 0x39a   :  { %10820 = vmatpush1.bf16.msra.mxu0 %v12781_v16  ;;  %v12808_v41 = vcombine.high %v317_v48, %v321_v36  ;;  %v12807_v50 = vcombine.low %v317_v48, %v321_v36  ;;  %v12830_v16 = vcombine.high %v340_v10, %v344_v11  ;;  %v12839_v36 = vcombine.low %v349_v22, %v353_v24  ;;  %v381_v10 = vld [vmem:[%s19773_s1 + $0xb18] sm:$0xff] }
 0x39b   :  { %11353 = vmatpush1.bf16.msra.mxu1 %v12783_v18  ;;  %10821 = vmatprep.subr.bf16.mxu0 %v12790_v20  ;;  %v12832_v18 = vcombine.high %v341_v12, %v345_v13  ;;  %v348_v20 = vld [vmem:[%s19773_s1 + $0xa10] sm:$0xff]  ;;  %v385_v11 = vld [vmem:[%s19773_s1 + $0xb38] sm:$0xff]  ;;  %v12863_v13 = vcombine.low %v373_v55, %v377_v60 }
 0x39c   :  { %11354 = vmatprep.subr.bf16.mxu1 %v12792_v21  ;;  %v352_v21 = vld [vmem:[%s19773_s1 + $0xa30] sm:$0xff] }
 0x39d   :  { %v12837_v48 = vcombine.low %v348_v20, %v352_v21 }
 0x39e   :  { %10822 = vmatpush1.bf16.msra.mxu0 %v12789_v47  ;;  %v12838_v47 = vcombine.high %v348_v20, %v352_v21  ;;  %v389_v20 = vld [vmem:[%s19773_s1 + $0xb58] sm:$0xff] }
 0x39f   :  { %11355 = vmatpush1.bf16.msra.mxu1 %v12791_v28  ;;  %10823 = vmatprep.subr.bf16.mxu0 %v12798_v29  ;;  %v12840_v28 = vcombine.high %v349_v22, %v353_v24  ;;  %v356_v29 = vld [vmem:[%s19773_s1 + $0xa50] sm:$0xff]  ;;  %v393_v21 = vld [vmem:[%s19773_s1 + $0xb78] sm:$0xff]  ;;  %v12871_v24 = vcombine.low %v381_v10, %v385_v11 }
 0x3a0   :  { %11356 = vmatprep.subr.bf16.mxu1 %v12800_v30  ;;  %v360_v30 = vld [vmem:[%s19773_s1 + $0xa70] sm:$0xff] }
 0x3a1   :  { %v12845_v34 = vcombine.low %v356_v29, %v360_v30 }
 0x3a2   :  { %10824 = vmatpush1.bf16.msra.mxu0 %v12797_v53  ;;  %v12846_v53 = vcombine.high %v356_v29, %v360_v30  ;;  %v397_v29 = vld [vmem:[%s19773_s1 + $0xb98] sm:$0xff] }
 0x3a3   :  { %11357 = vmatpush1.bf16.msra.mxu1 %v12799_v38  ;;  %10825 = vmatprep.subr.bf16.mxu0 %v12806_v39  ;;  %v12848_v38 = vcombine.high %v357_v32, %v361_v35  ;;  %v364_v39 = vld [vmem:[%s19773_s1 + $0xa90] sm:$0xff]  ;;  %v401_v30 = vld [vmem:[%s19773_s1 + $0xbb8] sm:$0xff]  ;;  %v12879_v35 = vcombine.low %v389_v20, %v393_v21 }
 0x3a4   :  { %11358 = vmatprep.subr.bf16.mxu1 %v12808_v41  ;;  %v368_v41 = vld [vmem:[%s19773_s1 + $0xab0] sm:$0xff] }
 0x3a5   :  { %v12853_v61 = vcombine.low %v364_v39, %v368_v41 }
 0x3a6   :  { %10826 = vmatpush1.bf16.msra.mxu0 %v12805_v49  ;;  %v12854_v49 = vcombine.high %v364_v39, %v368_v41  ;;  %v405_v39 = vld [vmem:[%s19773_s1 + $0xbd8] sm:$0xff] }
 0x3a7   :  { %11359 = vmatpush1.bf16.msra.mxu1 %v12807_v50  ;;  %10827 = vmatprep.subr.bf16.mxu0 %v12814_v52  ;;  %v12856_v50 = vcombine.high %v365_v42, %v369_v45  ;;  %v372_v52 = vld [vmem:[%s19773_s1 + $0xad0] sm:$0xff]  ;;  %v409_v41 = vld [vmem:[%s19773_s1 + $0xbf8] sm:$0xff]  ;;  %v12887_v45 = vcombine.low %v397_v29, %v401_v30 }
 0x3a8   :  { %11360 = vmatprep.subr.bf16.mxu1 %v12816_v54  ;;  %v376_v54 = vld [vmem:[%s19773_s1 + $0xaf0] sm:$0xff] }
 0x3a9   :  { %v12861_v12 = vcombine.low %v372_v52, %v376_v54 }
 0x3aa   :  { %10828 = vmatpush1.bf16.msra.mxu0 %v12813_v63  ;;  %v12862_v63 = vcombine.high %v372_v52, %v376_v54  ;;  %v413_v52 = vld [vmem:[%s19773_s1 + $0xc18] sm:$0xff] }
 0x3ab   :  { %11361 = vmatpush1.bf16.msra.mxu1 %v12815_v44  ;;  %10829 = vmatprep.subr.bf16.mxu0 %v12822_v9  ;;  %v12864_v44 = vcombine.high %v373_v55, %v377_v60  ;;  %v380_v9 = vld [vmem:[%s19773_s1 + $0xb10] sm:$0xff]  ;;  %v417_v54 = vld [vmem:[%s19773_s1 + $0xc38] sm:$0xff]  ;;  %v12895_v60 = vcombine.low %v405_v39, %v409_v41 }
 0x3ac   :  { %11362 = vmatprep.subr.bf16.mxu1 %v12824_v3  ;;  %v384_v3 = vld [vmem:[%s19773_s1 + $0xb30] sm:$0xff] }
 0x3ad   :  { %v12869_v22 = vcombine.low %v380_v9, %v384_v3 }
 0x3ae   :  { %10830 = vmatpush1.bf16.msra.mxu0 %v12821_v23  ;;  %v12870_v23 = vcombine.high %v380_v9, %v384_v3  ;;  %v421_v9 = vld [vmem:[%s19773_s1 + $0xc58] sm:$0xff] }
 0x3af   :  { %11363 = vmatpush1.bf16.msra.mxu1 %v12823_v1  ;;  %10831 = vmatprep.subr.bf16.mxu0 %v12830_v16  ;;  %v12872_v1 = vcombine.high %v381_v10, %v385_v11  ;;  %v388_v16 = vld [vmem:[%s19773_s1 + $0xb50] sm:$0xff]  ;;  %v425_v3 = vld [vmem:[%s19773_s1 + $0xc78] sm:$0xff]  ;;  %v12903_v11 = vcombine.low %v413_v52, %v417_v54 }
 0x3b0   :  { %11364 = vmatprep.subr.bf16.mxu1 %v12832_v18  ;;  %v392_v18 = vld [vmem:[%s19773_s1 + $0xb70] sm:$0xff] }
 0x3b1   :  { %v12877_v32 = vcombine.low %v388_v16, %v392_v18 }
 0x3b2   :  { %10832 = vmatpush1.bf16.msra.mxu0 %v12829_v40  ;;  %v12878_v40 = vcombine.high %v388_v16, %v392_v18  ;;  %v429_v16 = vld [vmem:[%s19773_s1 + $0xc98] sm:$0xff] }
 0x3b3   :  { %11365 = vmatpush1.bf16.msra.mxu1 %v12831_v33  ;;  %10833 = vmatprep.subr.bf16.mxu0 %v12838_v47  ;;  %v12880_v33 = vcombine.high %v389_v20, %v393_v21  ;;  %v396_v47 = vld [vmem:[%s19773_s1 + $0xb90] sm:$0xff]  ;;  %v433_v18 = vld [vmem:[%s19773_s1 + $0xcb8] sm:$0xff]  ;;  %v12911_v21 = vcombine.low %v421_v9, %v425_v3 }
 0x3b4   :  { %11366 = vmatprep.subr.bf16.mxu1 %v12840_v28  ;;  %v400_v28 = vld [vmem:[%s19773_s1 + $0xbb0] sm:$0xff] }
 0x3b5   :  { %v12885_v42 = vcombine.low %v396_v47, %v400_v28 }
 0x3b6   :  { %10834 = vmatpush1.bf16.msra.mxu0 %v12837_v48  ;;  %v12886_v48 = vcombine.high %v396_v47, %v400_v28  ;;  %v441_v47 = vld [vmem:[%s19773_s1 + $0xcf8] sm:$0xff] }
 0x3b7   :  { %11367 = vmatpush1.bf16.msra.mxu1 %v12839_v36  ;;  %10835 = vmatprep.subr.bf16.mxu0 %v12846_v53  ;;  %v12888_v36 = vcombine.high %v397_v29, %v401_v30  ;;  %v404_v53 = vld [vmem:[%s19773_s1 + $0xbd0] sm:$0xff]  ;;  %v12919_v29 = vcombine.low %v429_v16, %v433_v18 }
 0x3b8   :  { %11368 = vmatprep.subr.bf16.mxu1 %v12848_v38  ;;  %v408_v38 = vld [vmem:[%s19773_s1 + $0xbf0] sm:$0xff] }
 0x3b9   :  { %v12893_v55 = vcombine.low %v404_v53, %v408_v38 }
 0x3ba   :  { %10836 = vmatpush1.bf16.msra.mxu0 %v12845_v34  ;;  %v12894_v34 = vcombine.high %v404_v53, %v408_v38 }
 0x3bb   :  { %11369 = vmatpush1.bf16.msra.mxu1 %v12847_v46  ;;  %10837 = vmatprep.subr.bf16.mxu0 %v12854_v49  ;;  %v12896_v46 = vcombine.high %v405_v39, %v409_v41  ;;  %v412_v49 = vld [vmem:[%s19773_s1 + $0xc10] sm:$0xff] }
 0x3bc   :  { %11370 = vmatprep.subr.bf16.mxu1 %v12856_v50  ;;  %v416_v50 = vld [vmem:[%s19773_s1 + $0xc30] sm:$0xff] }
 0x3bd   :  { %v12901_v10 = vcombine.low %v412_v49, %v416_v50 }
 0x3be   :  { %10838 = vmatpush1.bf16.msra.mxu0 %v12853_v61  ;;  %v12902_v61 = vcombine.high %v412_v49, %v416_v50 }
 0x3bf   :  { %11371 = vmatpush1.bf16.msra.mxu1 %v12855_v0  ;;  %10839 = vmatprep.subr.bf16.mxu0 %v12862_v63  ;;  %v12904_v0 = vcombine.high %v413_v52, %v417_v54  ;;  %v420_v63 = vld [vmem:[%s19773_s1 + $0xc50] sm:$0xff] }
 0x3c0   :  { %11372 = vmatprep.subr.bf16.mxu1 %v12864_v44  ;;  %v424_v44 = vld [vmem:[%s19773_s1 + $0xc70] sm:$0xff] }
 0x3c1   :  { %v12909_v20 = vcombine.low %v420_v63, %v424_v44 }
 0x3c2   :  { %10840 = vmatpush1.bf16.msra.mxu0 %v12861_v12  ;;  %v12910_v12 = vcombine.high %v420_v63, %v424_v44 }
 0x3c3   :  { %11373 = vmatpush1.bf16.msra.mxu1 %v12863_v13  ;;  %10841 = vmatprep.subr.bf16.mxu0 %v12870_v23  ;;  %v12912_v13 = vcombine.high %v421_v9, %v425_v3  ;;  %v428_v23 = vld [vmem:[%s19773_s1 + $0xc90] sm:$0xff] }
 0x3c4   :  { %11374 = vmatprep.subr.bf16.mxu1 %v12872_v1  ;;  %v432_v1 = vld [vmem:[%s19773_s1 + $0xcb0] sm:$0xff] }
 0x3c5   :  { %v12917_v28 = vcombine.low %v428_v23, %v432_v1 }
 0x3c6   :  { %10842 = vmatpush1.bf16.msra.mxu0 %v12869_v22  ;;  %v12918_v22 = vcombine.high %v428_v23, %v432_v1  ;;  %v469_v1 = vld [vmem:[%s19773_s1 + $0xdd8] sm:$0xff] }
 0x3c7   :  { %11375 = vmatpush1.bf16.msra.mxu1 %v12871_v24  ;;  %10843 = vmatprep.subr.bf16.mxu0 %v12878_v40  ;;  %v12920_v24 = vcombine.high %v429_v16, %v433_v18  ;;  %v436_v40 = vld [vmem:[%s19773_s1 + $0xcd0] sm:$0xff]  ;;  %v473_v16 = vld [vmem:[%s19773_s1 + $0xdf8] sm:$0xff] }
 0x3c8   :  { %11376 = vmatprep.subr.bf16.mxu1 %v12880_v33  ;;  %v440_v33 = vld [vmem:[%s19773_s1 + $0xcf0] sm:$0xff] }
 0x3c9   :  { %v12926_v30 = vcombine.high %v436_v40, %v440_v33  ;;  %v12925_v53 = vcombine.low %v436_v40, %v440_v33 }
 0x3ca   :  { %10844 = vmatpush1.bf16.msra.mxu0 %v12877_v32 }
 0x3cb   :  { %11377 = vmatpush1.bf16.msra.mxu1 %v12879_v35  ;;  %10845 = vmatprep.subr.bf16.mxu0 %v12886_v48  ;;  %v444_v35 = vld [vmem:[%s19773_s1 + $0xd10] sm:$0xff] }
 0x3cc   :  { %11378 = vmatprep.subr.bf16.mxu1 %v12888_v36  ;;  %v448_v48 = vld [vmem:[%s19773_s1 + $0xd30] sm:$0xff]  ;;  %v449_v36 = vld [vmem:[%s19773_s1 + $0xd38] sm:$0xff] }
 0x3cd   :  { %v12934_v39 = vcombine.high %v444_v35, %v448_v48  ;;  %v12933_v49 = vcombine.low %v444_v35, %v448_v48  ;;  %v12959_v48 = vcombine.low %v469_v1, %v473_v16 }
 0x3ce   :  { %10846 = vmatpush1.bf16.msra.mxu0 %v12885_v42  ;;  %v452_v42 = vld [vmem:[%s19773_s1 + $0xd50] sm:$0xff] }
 0x3cf   :  { %11379 = vmatpush1.bf16.msra.mxu1 %v12887_v45  ;;  %10847 = vmatprep.subr.bf16.mxu0 %v12894_v34  ;;  %v456_v45 = vld [vmem:[%s19773_s1 + $0xd70] sm:$0xff]  ;;  %v453_v34 = vld [vmem:[%s19773_s1 + $0xd58] sm:$0xff] }
 0x3d0   :  { %11380 = vmatprep.subr.bf16.mxu1 %v12896_v46  ;;  %v457_v46 = vld [vmem:[%s19773_s1 + $0xd78] sm:$0xff]  ;;  %v12942_v52 = vcombine.high %v452_v42, %v456_v45  ;;  %v12941_v63 = vcombine.low %v452_v42, %v456_v45 }
 0x3d1   :  { %v12944_v54 = vcombine.high %v453_v34, %v457_v46  ;;  %v12943_v44 = vcombine.low %v453_v34, %v457_v46 }
 0x3d2   :  { %10848 = vmatpush1.bf16.msra.mxu0 %v12893_v55  ;;  %v460_v55 = vld [vmem:[%s19773_s1 + $0xd90] sm:$0xff] }
 0x3d3   :  { %11381 = vmatpush1.bf16.msra.mxu1 %v12895_v60  ;;  %10858 = vmatprep.subr.bf16.mxu0 %v12902_v61  ;;  %v464_v60 = vld [vmem:[%s19773_s1 + $0xdb0] sm:$0xff]  ;;  %v461_v61 = vld [vmem:[%s19773_s1 + $0xd98] sm:$0xff] }
 0x3d4   :  { %11391 = vmatprep.subr.bf16.mxu1 %v12904_v0  ;;  %v465_v0 = vld [vmem:[%s19773_s1 + $0xdb8] sm:$0xff]  ;;  %v12950_v9 = vcombine.high %v460_v55, %v464_v60 }
 0x3d5   :  { %10850 = vmatmul.mubr.bf16.vlgmr.msra.gmra.mrb[4].mxu0 %v15212_v58  ;;  %v12951_v40 = vcombine.low %v461_v61, %v465_v0 }
 0x3d6   :  { %10859 = vmatpush1.bf16.msra.mxu0 %v12901_v10  ;;  %11383 = vmatmul.mubr.bf16.vlgmr.msra.gmra.mrb[4].mxu1 %v15212_v58  ;;  %v437_v58 = vld [vmem:[%s19773_s1 + $0xcd8] sm:$0xff]  ;;  %v12952_v10 = vcombine.high %v461_v61, %v465_v0 }
 0x3d7   :  { %11392 = vmatpush1.bf16.msra.mxu1 %v12903_v11  ;;  %10860 = vmatprep.subr.bf16.mxu0 %v12910_v12  ;;  %v12928_v32 = vcombine.high %v437_v58, %v441_v47  ;;  %v12927_v38 = vcombine.low %v437_v58, %v441_v47  ;;  %v468_v11 = vld [vmem:[%s19773_s1 + $0xdd0] sm:$0xff]  ;;  %v12960_v47 = vcombine.high %v469_v1, %v473_v16 }
 0x3d8   :  { %11393 = vmatprep.subr.bf16.mxu1 %v12912_v13  ;;  %10890 = vmatprep.mubr.bf16.mxu0 %v15228_v4  ;;  %v472_v12 = vld [vmem:[%s19773_s1 + $0xdf0] sm:$0xff] }
 0x3d9   :  { %11423 = vmatprep.mubr.bf16.mxu1 %v15228_v4  ;;  %v445_v4 = vld [vmem:[%s19773_s1 + $0xd18] sm:$0xff]  ;;  %v12958_v33 = vcombine.high %v468_v11, %v472_v12  ;;  %v12957_v35 = vcombine.low %v468_v11, %v472_v12 }
 0x3da   :  { %10861 = vmatpush1.bf16.msra.mxu0 %v12909_v20  ;;  %v12936_v41 = vcombine.high %v445_v4, %v449_v36  ;;  %v12935_v50 = vcombine.low %v445_v4, %v449_v36 }
 0x3db   :  { %11394 = vmatpush1.bf16.msra.mxu1 %v12911_v21  ;;  %10862 = vmatprep.subr.bf16.mxu0 %v12918_v22  ;;  %v12949_v21 = vcombine.low %v460_v55, %v464_v60 }
 0x3dc   :  { %11395 = vmatprep.subr.bf16.mxu1 %v12920_v24 }
 0x3de   :  { %10863 = vmatpush1.bf16.msra.mxu0 %v12917_v28  ;;  %v476_v28 = vld [vmem:[%s19773_s1 + $0xe10] sm:$0xff] }
 0x3df   :  { %11396 = vmatpush1.bf16.msra.mxu1 %v12919_v29  ;;  %10864 = vmatprep.subr.bf16.mxu0 %v12926_v30  ;;  %v480_v29 = vld [vmem:[%s19773_s1 + $0xe30] sm:$0xff]  ;;  %v477_v30 = vld [vmem:[%s19773_s1 + $0xe18] sm:$0xff] }
 0x3e0   :  { %11397 = vmatprep.subr.bf16.mxu1 %v12928_v32  ;;  %v481_v32 = vld [vmem:[%s19773_s1 + $0xe38] sm:$0xff]  ;;  %v12966_v4 = vcombine.high %v476_v28, %v480_v29  ;;  %v12965_v42 = vcombine.low %v476_v28, %v480_v29  ;;  %v516_v28 = vld [vmem:[%s19773_s1 + $0xf50] sm:$0xff] }
 0x3e1   :  { %v12968_v36 = vcombine.high %v477_v30, %v481_v32  ;;  %v12967_v45 = vcombine.low %v477_v30, %v481_v32  ;;  %v520_v29 = vld [vmem:[%s19773_s1 + $0xf70] sm:$0xff]  ;;  %v517_v30 = vld [vmem:[%s19773_s1 + $0xf58] sm:$0xff] }
 0x3e2   :  { %10865 = vmatpush1.bf16.msra.mxu0 %v12925_v53  ;;  %v484_v53 = vld [vmem:[%s19773_s1 + $0xe50] sm:$0xff]  ;;  %v521_v32 = vld [vmem:[%s19773_s1 + $0xf78] sm:$0xff] }
 0x3e3   :  { %11398 = vmatpush1.bf16.msra.mxu1 %v12927_v38  ;;  %10866 = vmatprep.subr.bf16.mxu0 %v12934_v39  ;;  %v488_v38 = vld [vmem:[%s19773_s1 + $0xe70] sm:$0xff]  ;;  %v485_v39 = vld [vmem:[%s19773_s1 + $0xe58] sm:$0xff] }
 0x3e4   :  { %11399 = vmatprep.subr.bf16.mxu1 %v12936_v41  ;;  %v489_v41 = vld [vmem:[%s19773_s1 + $0xe78] sm:$0xff]  ;;  %v12974_v34 = vcombine.high %v484_v53, %v488_v38  ;;  %v12973_v55 = vcombine.low %v484_v53, %v488_v38  ;;  %v524_v53 = vld [vmem:[%s19773_s1 + $0xf90] sm:$0xff] }
 0x3e5   :  { %v12976_v46 = vcombine.high %v485_v39, %v489_v41  ;;  %v12975_v60 = vcombine.low %v485_v39, %v489_v41  ;;  %v528_v38 = vld [vmem:[%s19773_s1 + $0xfb0] sm:$0xff]  ;;  %v525_v39 = vld [vmem:[%s19773_s1 + $0xf98] sm:$0xff] }
 0x3e6   :  { %10867 = vmatpush1.bf16.msra.mxu0 %v12933_v49  ;;  %v492_v49 = vld [vmem:[%s19773_s1 + $0xe90] sm:$0xff]  ;;  %v529_v41 = vld [vmem:[%s19773_s1 + $0xfb8] sm:$0xff] }
 0x3e7   :  { %11400 = vmatpush1.bf16.msra.mxu1 %v12935_v50  ;;  %10868 = vmatprep.subr.bf16.mxu0 %v12942_v52  ;;  %v496_v50 = vld [vmem:[%s19773_s1 + $0xeb0] sm:$0xff]  ;;  %v493_v52 = vld [vmem:[%s19773_s1 + $0xe98] sm:$0xff] }
 0x3e8   :  { %v17800_v3 = vpop.f32.mrb[0].mxu0  ;;  %11401 = vmatprep.subr.bf16.mxu1 %v12944_v54  ;;  %v497_v54 = vld [vmem:[%s19773_s1 + $0xeb8] sm:$0xff]  ;;  %v12982_v61 = vcombine.high %v492_v49, %v496_v50  ;;  %v12981_v11 = vcombine.low %v492_v49, %v496_v50  ;;  %v532_v49 = vld [vmem:[%s19773_s1 + $0xfd0] sm:$0xff] }
 0x3e9   :  { %v17808_v13 = vpop.f32.mrb[0].mxu1  ;;  %v17810_v23 = vpop.f32.mrb[1].mxu0  ;;  %v12984_v0 = vcombine.high %v493_v52, %v497_v54  ;;  %v12983_v12 = vcombine.low %v493_v52, %v497_v54  ;;  %v536_v50 = vld [vmem:[%s19773_s1 + $0xff0] sm:$0xff]  ;;  %v533_v52 = vld [vmem:[%s19773_s1 + $0xfd8] sm:$0xff] }
 0x3ea   :  { %v17818_v18 = vpop.f32.mrb[1].mxu1  ;;  %v10199_v20 = vpop.f32.mrb[2].mxu0  ;;  %10869 = vmatpush1.bf16.msra.mxu0 %v12941_v63  ;;  %v500_v63 = vld [vmem:[%s19773_s1 + $0xed0] sm:$0xff]  ;;  %v537_v54 = vld [vmem:[%s19773_s1 + $0xff8] sm:$0xff] }
 0x3eb   :  { %v10732_v22 = vpop.f32.mrb[2].mxu1  ;;  %11402 = vmatpush1.bf16.msra.mxu1 %v12943_v44  ;;  %v10200_v24 = vpop.f32.mrb[3].mxu0  ;;  %10870 = vmatprep.subr.bf16.mxu0 %v12950_v9  ;;  %v504_v44 = vld [vmem:[%s19773_s1 + $0xef0] sm:$0xff]  ;;  %v501_v9 = vld [vmem:[%s19773_s1 + $0xed8] sm:$0xff] }
 0x3ec   :  { %v10733_v58 = vpop.f32.mrb[3].mxu1  ;;  %11403 = vmatprep.subr.bf16.mxu1 %v12952_v10  ;;  %v505_v10 = vld [vmem:[%s19773_s1 + $0xef8] sm:$0xff]  ;;  %v12990_v1 = vcombine.high %v500_v63, %v504_v44  ;;  %v508_v20 = vld [vmem:[%s19773_s1 + $0xf10] sm:$0xff] }
 0x3ed   :  { %v12992_v16 = vcombine.high %v501_v9, %v505_v10  ;;  %v509_v22 = vld [vmem:[%s19773_s1 + $0xf18] sm:$0xff] }
 0x3ee   :  { %10871 = vmatpush1.bf16.msra.mxu0 %v12949_v21  ;;  %v512_v21 = vld [vmem:[%s19773_s1 + $0xf30] sm:$0xff]  ;;  %v513_v24 = vld [vmem:[%s19773_s1 + $0xf38] sm:$0xff] }
 0x3ef   :  { %11404 = vmatpush1.bf16.msra.mxu1 %v12951_v40  ;;  %10872 = vmatprep.subr.bf16.mxu0 %v12958_v33  ;;  %v12989_v40 = vcombine.low %v500_v63, %v504_v44  ;;  %v12991_v33 = vcombine.low %v501_v9, %v505_v10  ;;  %v12998_v58 = vcombine.high %v508_v20, %v512_v21  ;;  %v540_v63 = vld [vmem:[%s19773_s1 + $0x1010] sm:$0xff]  ;;  %v541_v9 = vld [vmem:[%s19773_s1 + $0x1018] sm:$0xff] }
 0x3f0   :  { %11405 = vmatprep.subr.bf16.mxu1 %v12960_v47  ;;  %v13000_v47 = vcombine.high %v509_v22, %v513_v24  ;;  %v544_v44 = vld [vmem:[%s19773_s1 + $0x1030] sm:$0xff]  ;;  %v545_v10 = vld [vmem:[%s19773_s1 + $0x1038] sm:$0xff] }
 0x3f2   :  { %10873 = vmatpush1.bf16.msra.mxu0 %v12957_v35  ;;  %v12997_v35 = vcombine.low %v508_v20, %v512_v21  ;;  %v548_v20 = vld [vmem:[%s19773_s1 + $0x1050] sm:$0xff] }
 0x3f3   :  { %11406 = vmatpush1.bf16.msra.mxu1 %v12959_v48  ;;  %10874 = vmatprep.subr.bf16.mxu0 %v12966_v4  ;;  %v12999_v48 = vcombine.low %v509_v22, %v513_v24  ;;  %v13006_v4 = vcombine.high %v516_v28, %v520_v29  ;;  %v552_v21 = vld [vmem:[%s19773_s1 + $0x1070] sm:$0xff]  ;;  %v549_v22 = vld [vmem:[%s19773_s1 + $0x1058] sm:$0xff] }
 0x3f4   :  { %11407 = vmatprep.subr.bf16.mxu1 %v12968_v36  ;;  %v13008_v36 = vcombine.high %v517_v30, %v521_v32  ;;  %v553_v24 = vld [vmem:[%s19773_s1 + $0x1078] sm:$0xff] }
 0x3f6   :  { %10875 = vmatpush1.bf16.msra.mxu0 %v12965_v42  ;;  %v13005_v42 = vcombine.low %v516_v28, %v520_v29  ;;  %v556_v28 = vld [vmem:[%s19773_s1 + $0x1090] sm:$0xff] }
 0x3f7   :  { %11408 = vmatpush1.bf16.msra.mxu1 %v12967_v45  ;;  %10876 = vmatprep.subr.bf16.mxu0 %v12974_v34  ;;  %v13007_v45 = vcombine.low %v517_v30, %v521_v32  ;;  %v13014_v34 = vcombine.high %v524_v53, %v528_v38  ;;  %v560_v29 = vld [vmem:[%s19773_s1 + $0x10b0] sm:$0xff]  ;;  %v557_v30 = vld [vmem:[%s19773_s1 + $0x1098] sm:$0xff] }
 0x3f8   :  { %11409 = vmatprep.subr.bf16.mxu1 %v12976_v46  ;;  %v13016_v46 = vcombine.high %v525_v39, %v529_v41  ;;  %v561_v32 = vld [vmem:[%s19773_s1 + $0x10b8] sm:$0xff] }
 0x3fa   :  { %10877 = vmatpush1.bf16.msra.mxu0 %v12973_v55  ;;  %v13013_v55 = vcombine.low %v524_v53, %v528_v38  ;;  %v564_v53 = vld [vmem:[%s19773_s1 + $0x10d0] sm:$0xff] }
 0x3fb   :  { %11410 = vmatpush1.bf16.msra.mxu1 %v12975_v60  ;;  %10878 = vmatprep.subr.bf16.mxu0 %v12982_v61  ;;  %v13015_v60 = vcombine.low %v525_v39, %v529_v41  ;;  %v13022_v61 = vcombine.high %v532_v49, %v536_v50  ;;  %v568_v38 = vld [vmem:[%s19773_s1 + $0x10f0] sm:$0xff]  ;;  %v569_v39 = vld [vmem:[%s19773_s1 + $0x10f8] sm:$0xff]  ;;  %v13045_v41 = vcombine.low %v556_v28, %v560_v29 }
 0x3fc   :  { %11411 = vmatprep.subr.bf16.mxu1 %v12984_v0  ;;  %v13024_v0 = vcombine.high %v533_v52, %v537_v54 }
 0x3fe   :  { %10879 = vmatpush1.bf16.msra.mxu0 %v12981_v11  ;;  %v13021_v11 = vcombine.low %v532_v49, %v536_v50  ;;  %v576_v49 = vld [vmem:[%s19773_s1 + $0x1130] sm:$0xff]  ;;  %v577_v50 = vld [vmem:[%s19773_s1 + $0x1138] sm:$0xff] }
 0x3ff   :  { %11412 = vmatpush1.bf16.msra.mxu1 %v12983_v12  ;;  %10880 = vmatprep.subr.bf16.mxu0 %v12990_v1  ;;  %v13023_v12 = vcombine.low %v533_v52, %v537_v54  ;;  %v13030_v1 = vcombine.high %v540_v63, %v544_v44  ;;  %v13053_v52 = vcombine.low %v564_v53, %v568_v38 }
 0x400   :  { %11413 = vmatprep.subr.bf16.mxu1 %v12992_v16  ;;  %v13032_v16 = vcombine.high %v541_v9, %v545_v10 }
 0x402   :  { %10881 = vmatpush1.bf16.msra.mxu0 %v12989_v40  ;;  %v13029_v40 = vcombine.low %v540_v63, %v544_v44  ;;  %v581_v63 = vld [vmem:[%s19773_s1 + $0x1158] sm:$0xff] }
 0x403   :  { %11414 = vmatpush1.bf16.msra.mxu1 %v12991_v33  ;;  %10882 = vmatprep.subr.bf16.mxu0 %v12998_v58  ;;  %v13031_v33 = vcombine.low %v541_v9, %v545_v10  ;;  %v13038_v58 = vcombine.high %v548_v20, %v552_v21  ;;  %v585_v44 = vld [vmem:[%s19773_s1 + $0x1178] sm:$0xff] }
 0x404   :  { %11415 = vmatprep.subr.bf16.mxu1 %v13000_v47  ;;  %v13040_v47 = vcombine.high %v549_v22, %v553_v24 }
 0x406   :  { %10883 = vmatpush1.bf16.msra.mxu0 %v12997_v35  ;;  %v13037_v35 = vcombine.low %v548_v20, %v552_v21  ;;  %v589_v20 = vld [vmem:[%s19773_s1 + $0x1198] sm:$0xff] }
 0x407   :  { %11416 = vmatpush1.bf16.msra.mxu1 %v12999_v48  ;;  %10884 = vmatprep.subr.bf16.mxu0 %v13006_v4  ;;  %v13039_v48 = vcombine.low %v549_v22, %v553_v24  ;;  %v13046_v4 = vcombine.high %v556_v28, %v560_v29  ;;  %v593_v21 = vld [vmem:[%s19773_s1 + $0x11b8] sm:$0xff]  ;;  %v13071_v24 = vcombine.low %v581_v63, %v585_v44 }
 0x408   :  { %11417 = vmatprep.subr.bf16.mxu1 %v13008_v36  ;;  %v13048_v36 = vcombine.high %v557_v30, %v561_v32  ;;  %v597_v28 = vld [vmem:[%s19773_s1 + $0x11d8] sm:$0xff] }
 0x409   :  { %v601_v29 = vld [vmem:[%s19773_s1 + $0x11f8] sm:$0xff] }
 0x40a   :  { %10885 = vmatpush1.bf16.msra.mxu0 %v13005_v42  ;;  %v13047_v42 = vcombine.low %v557_v30, %v561_v32  ;;  %v13079_v32 = vcombine.low %v589_v20, %v593_v21 }
 0x40b   :  { %11418 = vmatpush1.bf16.msra.mxu1 %v13007_v45  ;;  %10886 = vmatprep.subr.bf16.mxu0 %v13014_v34  ;;  %v13054_v45 = vcombine.high %v564_v53, %v568_v38  ;;  %v605_v53 = vld [vmem:[%s19773_s1 + $0x1218] sm:$0xff] }
 0x40c   :  { %11419 = vmatprep.subr.bf16.mxu1 %v13016_v46  ;;  %v572_v46 = vld [vmem:[%s19773_s1 + $0x1110] sm:$0xff]  ;;  %v609_v38 = vld [vmem:[%s19773_s1 + $0x1238] sm:$0xff] }
 0x40d   :  { %v13061_v9 = vcombine.low %v572_v46, %v576_v49 }
 0x40e   :  { %10887 = vmatpush1.bf16.msra.mxu0 %v13013_v55  ;;  %v13062_v55 = vcombine.high %v572_v46, %v576_v49  ;;  %v613_v46 = vld [vmem:[%s19773_s1 + $0x1258] sm:$0xff] }
 0x40f   :  { %11420 = vmatpush1.bf16.msra.mxu1 %v13015_v60  ;;  %10888 = vmatprep.subr.bf16.mxu0 %v13022_v61  ;;  %v580_v61 = vld [vmem:[%s19773_s1 + $0x1150] sm:$0xff]  ;;  %v617_v49 = vld [vmem:[%s19773_s1 + $0x1278] sm:$0xff] }
 0x410   :  { %11421 = vmatprep.subr.bf16.mxu1 %v13024_v0  ;;  %v584_v0 = vld [vmem:[%s19773_s1 + $0x1170] sm:$0xff] }
 0x411   :  { %v13069_v22 = vcombine.low %v580_v61, %v584_v0 }
 0x412   :  { %10889 = vmatpush1.bf16.msra.mxu0 %v13021_v11  ;;  %v13070_v11 = vcombine.high %v580_v61, %v584_v0  ;;  %v621_v61 = vld [vmem:[%s19773_s1 + $0x1298] sm:$0xff] }
 0x413   :  { %11422 = vmatpush1.bf16.msra.mxu1 %v13023_v12  ;;  %10899 = vmatprep.subr.bf16.mxu0 %v13030_v1  ;;  %v13072_v12 = vcombine.high %v581_v63, %v585_v44  ;;  %v588_v1 = vld [vmem:[%s19773_s1 + $0x1190] sm:$0xff]  ;;  %v625_v0 = vld [vmem:[%s19773_s1 + $0x12b8] sm:$0xff]  ;;  %v13103_v44 = vcombine.low %v613_v46, %v617_v49 }
 0x414   :  { %11432 = vmatprep.subr.bf16.mxu1 %v13032_v16  ;;  %v592_v16 = vld [vmem:[%s19773_s1 + $0x11b0] sm:$0xff] }
 0x415   :  { %10891 = vmatmul.mubr.bf16.vlgmr.msra.gmra.mrb[4].mxu0 %v15427_v19  ;;  %v13077_v30 = vcombine.low %v588_v1, %v592_v16 }
 0x416   :  { %10900 = vmatpush1.bf16.msra.mxu0 %v13029_v40  ;;  %11424 = vmatmul.mubr.bf16.vlgmr.msra.gmra.mrb[4].mxu1 %v15427_v19  ;;  %v565_v19 = vld [vmem:[%s19773_s1 + $0x10d8] sm:$0xff]  ;;  %v13078_v40 = vcombine.high %v588_v1, %v592_v16 }
 0x417   :  { %11433 = vmatpush1.bf16.msra.mxu1 %v13031_v33  ;;  %10901 = vmatprep.subr.bf16.mxu0 %v13038_v58  ;;  %v13056_v34 = vcombine.high %v565_v19, %v569_v39  ;;  %v13055_v54 = vcombine.low %v565_v19, %v569_v39  ;;  %v13080_v33 = vcombine.high %v589_v20, %v593_v21  ;;  %v596_v58 = vld [vmem:[%s19773_s1 + $0x11d0] sm:$0xff]  ;;  %v629_v1 = vld [vmem:[%s19773_s1 + $0x12d8] sm:$0xff] }
 0x418   :  { %11434 = vmatprep.subr.bf16.mxu1 %v13040_v47  ;;  %10931 = vmatprep.mubr.bf16.mxu0 %v15442_v59  ;;  %v600_v47 = vld [vmem:[%s19773_s1 + $0x11f0] sm:$0xff]  ;;  %v13087_v39 = vcombine.low %v597_v28, %v601_v29  ;;  %v633_v16 = vld [vmem:[%s19773_s1 + $0x12f8] sm:$0xff]  ;;  %v13111_v21 = vcombine.low %v621_v61, %v625_v0 }
 0x419   :  { %11464 = vmatprep.mubr.bf16.mxu1 %v15442_v59  ;;  %v573_v59 = vld [vmem:[%s19773_s1 + $0x1118] sm:$0xff]  ;;  %v13085_v19 = vcombine.low %v596_v58, %v600_v47 }
 0x41a   :  { %10902 = vmatpush1.bf16.msra.mxu0 %v13037_v35  ;;  %v13064_v60 = vcombine.high %v573_v59, %v577_v50  ;;  %v13063_v10 = vcombine.low %v573_v59, %v577_v50  ;;  %v13086_v35 = vcombine.high %v596_v58, %v600_v47  ;;  %v13095_v50 = vcombine.low %v605_v53, %v609_v38  ;;  %v637_v58 = vld [vmem:[%s19773_s1 + $0x1318] sm:$0xff] }
 0x41b   :  { %11435 = vmatpush1.bf16.msra.mxu1 %v13039_v48  ;;  %10903 = vmatprep.subr.bf16.mxu0 %v13046_v4  ;;  %v13088_v48 = vcombine.high %v597_v28, %v601_v29  ;;  %v604_v4 = vld [vmem:[%s19773_s1 + $0x1210] sm:$0xff]  ;;  %v641_v47 = vld [vmem:[%s19773_s1 + $0x1338] sm:$0xff]  ;;  %v13119_v29 = vcombine.low %v629_v1, %v633_v16 }
 0x41c   :  { %11436 = vmatprep.subr.bf16.mxu1 %v13048_v36  ;;  %v608_v36 = vld [vmem:[%s19773_s1 + $0x1230] sm:$0xff] }
 0x41d   :  { %v13093_v59 = vcombine.low %v604_v4, %v608_v36 }
 0x41e   :  { %10904 = vmatpush1.bf16.msra.mxu0 %v13045_v41  ;;  %v13094_v41 = vcombine.high %v604_v4, %v608_v36  ;;  %v645_v4 = vld [vmem:[%s19773_s1 + $0x1358] sm:$0xff] }
 0x41f   :  { %11437 = vmatpush1.bf16.msra.mxu1 %v13047_v42  ;;  %10905 = vmatprep.subr.bf16.mxu0 %v13054_v45  ;;  %v13096_v42 = vcombine.high %v605_v53, %v609_v38  ;;  %v612_v45 = vld [vmem:[%s19773_s1 + $0x1250] sm:$0xff]  ;;  %v649_v36 = vld [vmem:[%s19773_s1 + $0x1378] sm:$0xff]  ;;  %v13127_v38 = vcombine.low %v637_v58, %v641_v47 }
 0x420   :  { %11438 = vmatprep.subr.bf16.mxu1 %v13056_v34  ;;  %v616_v34 = vld [vmem:[%s19773_s1 + $0x1270] sm:$0xff] }
 0x421   :  { %v13101_v63 = vcombine.low %v612_v45, %v616_v34 }
 0x422   :  { %10906 = vmatpush1.bf16.msra.mxu0 %v13053_v52  ;;  %v13102_v52 = vcombine.high %v612_v45, %v616_v34  ;;  %v653_v45 = vld [vmem:[%s19773_s1 + $0x1398] sm:$0xff] }
 0x423   :  { %11439 = vmatpush1.bf16.msra.mxu1 %v13055_v54  ;;  %10907 = vmatprep.subr.bf16.mxu0 %v13062_v55  ;;  %v13104_v54 = vcombine.high %v613_v46, %v617_v49  ;;  %v620_v55 = vld [vmem:[%s19773_s1 + $0x1290] sm:$0xff]  ;;  %v657_v34 = vld [vmem:[%s19773_s1 + $0x13b8] sm:$0xff]  ;;  %v13135_v49 = vcombine.low %v645_v4, %v649_v36 }
 0x424   :  { %11440 = vmatprep.subr.bf16.mxu1 %v13064_v60  ;;  %v624_v60 = vld [vmem:[%s19773_s1 + $0x12b0] sm:$0xff] }
 0x425   :  { %v13109_v20 = vcombine.low %v620_v55, %v624_v60 }
 0x426   :  { %10908 = vmatpush1.bf16.msra.mxu0 %v13061_v9  ;;  %v13110_v9 = vcombine.high %v620_v55, %v624_v60  ;;  %v661_v55 = vld [vmem:[%s19773_s1 + $0x13d8] sm:$0xff] }
 0x427   :  { %11441 = vmatpush1.bf16.msra.mxu1 %v13063_v10  ;;  %10909 = vmatprep.subr.bf16.mxu0 %v13070_v11  ;;  %v13112_v10 = vcombine.high %v621_v61, %v625_v0  ;;  %v628_v11 = vld [vmem:[%s19773_s1 + $0x12d0] sm:$0xff]  ;;  %v665_v60 = vld [vmem:[%s19773_s1 + $0x13f8] sm:$0xff]  ;;  %v13143_v0 = vcombine.low %v653_v45, %v657_v34 }
 0x428   :  { %11442 = vmatprep.subr.bf16.mxu1 %v13072_v12  ;;  %v632_v12 = vld [vmem:[%s19773_s1 + $0x12f0] sm:$0xff] }
 0x429   :  { %v13117_v28 = vcombine.low %v628_v11, %v632_v12 }
 0x42a   :  { %10910 = vmatpush1.bf16.msra.mxu0 %v13069_v22  ;;  %v13118_v22 = vcombine.high %v628_v11, %v632_v12  ;;  %v669_v11 = vld [vmem:[%s19773_s1 + $0x1418] sm:$0xff] }
 0x42b   :  { %11443 = vmatpush1.bf16.msra.mxu1 %v13071_v24  ;;  %10911 = vmatprep.subr.bf16.mxu0 %v13078_v40  ;;  %v13120_v24 = vcombine.high %v629_v1, %v633_v16  ;;  %v636_v40 = vld [vmem:[%s19773_s1 + $0x1310] sm:$0xff]  ;;  %v673_v12 = vld [vmem:[%s19773_s1 + $0x1438] sm:$0xff]  ;;  %v13151_v16 = vcombine.low %v661_v55, %v665_v60 }
 0x42c   :  { %11444 = vmatprep.subr.bf16.mxu1 %v13080_v33  ;;  %v640_v33 = vld [vmem:[%s19773_s1 + $0x1330] sm:$0xff] }
 0x42d   :  { %v13125_v53 = vcombine.low %v636_v40, %v640_v33 }
 0x42e   :  { %10912 = vmatpush1.bf16.msra.mxu0 %v13077_v30  ;;  %v13126_v30 = vcombine.high %v636_v40, %v640_v33  ;;  %v677_v40 = vld [vmem:[%s19773_s1 + $0x1458] sm:$0xff] }
 0x42f   :  { %11445 = vmatpush1.bf16.msra.mxu1 %v13079_v32  ;;  %10913 = vmatprep.subr.bf16.mxu0 %v13086_v35  ;;  %v13128_v32 = vcombine.high %v637_v58, %v641_v47  ;;  %v644_v35 = vld [vmem:[%s19773_s1 + $0x1350] sm:$0xff]  ;;  %v681_v33 = vld [vmem:[%s19773_s1 + $0x1478] sm:$0xff]  ;;  %v13159_v47 = vcombine.low %v669_v11, %v673_v12 }
 0x430   :  { %11446 = vmatprep.subr.bf16.mxu1 %v13088_v48  ;;  %v648_v48 = vld [vmem:[%s19773_s1 + $0x1370] sm:$0xff] }
 0x431   :  { %v13133_v46 = vcombine.low %v644_v35, %v648_v48 }
 0x432   :  { %10914 = vmatpush1.bf16.msra.mxu0 %v13085_v19  ;;  %v13134_v19 = vcombine.high %v644_v35, %v648_v48  ;;  %v685_v35 = vld [vmem:[%s19773_s1 + $0x1498] sm:$0xff] }
 0x433   :  { %11447 = vmatpush1.bf16.msra.mxu1 %v13087_v39  ;;  %10915 = vmatprep.subr.bf16.mxu0 %v13094_v41  ;;  %v13136_v39 = vcombine.high %v645_v4, %v649_v36  ;;  %v652_v41 = vld [vmem:[%s19773_s1 + $0x1390] sm:$0xff]  ;;  %v689_v48 = vld [vmem:[%s19773_s1 + $0x14b8] sm:$0xff]  ;;  %v13167_v36 = vcombine.low %v677_v40, %v681_v33 }
 0x434   :  { %11448 = vmatprep.subr.bf16.mxu1 %v13096_v42  ;;  %v656_v42 = vld [vmem:[%s19773_s1 + $0x13b0] sm:$0xff] }
 0x435   :  { %v13141_v61 = vcombine.low %v652_v41, %v656_v42 }
 0x436   :  { %10916 = vmatpush1.bf16.msra.mxu0 %v13093_v59  ;;  %v13142_v59 = vcombine.high %v652_v41, %v656_v42  ;;  %v697_v41 = vld [vmem:[%s19773_s1 + $0x14f8] sm:$0xff] }
 0x437   :  { %11449 = vmatpush1.bf16.msra.mxu1 %v13095_v50  ;;  %10917 = vmatprep.subr.bf16.mxu0 %v13102_v52  ;;  %v13144_v50 = vcombine.high %v653_v45, %v657_v34  ;;  %v660_v52 = vld [vmem:[%s19773_s1 + $0x13d0] sm:$0xff]  ;;  %v13175_v45 = vcombine.low %v685_v35, %v689_v48 }
 0x438   :  { %11450 = vmatprep.subr.bf16.mxu1 %v13104_v54  ;;  %v664_v54 = vld [vmem:[%s19773_s1 + $0x13f0] sm:$0xff] }
 0x439   :  { %v13149_v1 = vcombine.low %v660_v52, %v664_v54 }
 0x43a   :  { %10918 = vmatpush1.bf16.msra.mxu0 %v13101_v63  ;;  %v13150_v63 = vcombine.high %v660_v52, %v664_v54 }
 0x43b   :  { %11451 = vmatpush1.bf16.msra.mxu1 %v13103_v44  ;;  %10919 = vmatprep.subr.bf16.mxu0 %v13110_v9  ;;  %v13152_v44 = vcombine.high %v661_v55, %v665_v60  ;;  %v668_v9 = vld [vmem:[%s19773_s1 + $0x1410] sm:$0xff] }
 0x43c   :  { %11452 = vmatprep.subr.bf16.mxu1 %v13112_v10  ;;  %v672_v10 = vld [vmem:[%s19773_s1 + $0x1430] sm:$0xff] }
 0x43d   :  { %v13157_v58 = vcombine.low %v668_v9, %v672_v10 }
 0x43e   :  { %10920 = vmatpush1.bf16.msra.mxu0 %v13109_v20  ;;  %v13158_v20 = vcombine.high %v668_v9, %v672_v10 }
 0x43f   :  { %11453 = vmatpush1.bf16.msra.mxu1 %v13111_v21  ;;  %10921 = vmatprep.subr.bf16.mxu0 %v13118_v22  ;;  %v13160_v21 = vcombine.high %v669_v11, %v673_v12  ;;  %v676_v22 = vld [vmem:[%s19773_s1 + $0x1450] sm:$0xff] }
 0x440   :  { %11454 = vmatprep.subr.bf16.mxu1 %v13120_v24  ;;  %v680_v24 = vld [vmem:[%s19773_s1 + $0x1470] sm:$0xff] }
 0x441   :  { %v13165_v4 = vcombine.low %v676_v22, %v680_v24 }
 0x442   :  { %10922 = vmatpush1.bf16.msra.mxu0 %v13117_v28  ;;  %v13166_v28 = vcombine.high %v676_v22, %v680_v24 }
 0x443   :  { %11455 = vmatpush1.bf16.msra.mxu1 %v13119_v29  ;;  %10923 = vmatprep.subr.bf16.mxu0 %v13126_v30  ;;  %v13168_v29 = vcombine.high %v677_v40, %v681_v33  ;;  %v684_v30 = vld [vmem:[%s19773_s1 + $0x1490] sm:$0xff] }
 0x444   :  { %11456 = vmatprep.subr.bf16.mxu1 %v13128_v32  ;;  %v688_v32 = vld [vmem:[%s19773_s1 + $0x14b0] sm:$0xff] }
 0x445   :  { %v13173_v42 = vcombine.low %v684_v30, %v688_v32 }
 0x446   :  { %10924 = vmatpush1.bf16.msra.mxu0 %v13125_v53  ;;  %v13174_v53 = vcombine.high %v684_v30, %v688_v32 }
 0x447   :  { %11457 = vmatpush1.bf16.msra.mxu1 %v13127_v38  ;;  %10925 = vmatprep.subr.bf16.mxu0 %v13134_v19  ;;  %v13176_v38 = vcombine.high %v685_v35, %v689_v48  ;;  %v692_v19 = vld [vmem:[%s19773_s1 + $0x14d0] sm:$0xff] }
 0x448   :  { %11458 = vmatprep.subr.bf16.mxu1 %v13136_v39  ;;  %v696_v39 = vld [vmem:[%s19773_s1 + $0x14f0] sm:$0xff] }
 0x449   :  { %v13182_v34 = vcombine.high %v692_v19, %v696_v39  ;;  %v13181_v52 = vcombine.low %v692_v19, %v696_v39 }
 0x44a   :  { %10926 = vmatpush1.bf16.msra.mxu0 %v13133_v46 }
 0x44b   :  { %11459 = vmatpush1.bf16.msra.mxu1 %v13135_v49  ;;  %10927 = vmatprep.subr.bf16.mxu0 %v13142_v59  ;;  %v700_v49 = vld [vmem:[%s19773_s1 + $0x1510] sm:$0xff] }
 0x44c   :  { %11460 = vmatprep.subr.bf16.mxu1 %v13144_v50  ;;  %v704_v59 = vld [vmem:[%s19773_s1 + $0x1530] sm:$0xff]  ;;  %v705_v50 = vld [vmem:[%s19773_s1 + $0x1538] sm:$0xff] }
 0x44d   :  { %v13190_v55 = vcombine.high %v700_v49, %v704_v59  ;;  %v13189_v9 = vcombine.low %v700_v49, %v704_v59 }
 0x44e   :  { %10928 = vmatpush1.bf16.msra.mxu0 %v13141_v61  ;;  %v708_v61 = vld [vmem:[%s19773_s1 + $0x1550] sm:$0xff] }
 0x44f   :  { %11461 = vmatpush1.bf16.msra.mxu1 %v13143_v0  ;;  %10929 = vmatprep.subr.bf16.mxu0 %v13150_v63  ;;  %v712_v0 = vld [vmem:[%s19773_s1 + $0x1570] sm:$0xff]  ;;  %v709_v63 = vld [vmem:[%s19773_s1 + $0x1558] sm:$0xff] }
 0x450   :  { %11462 = vmatprep.subr.bf16.mxu1 %v13152_v44  ;;  %v713_v44 = vld [vmem:[%s19773_s1 + $0x1578] sm:$0xff]  ;;  %v13198_v11 = vcombine.high %v708_v61, %v712_v0  ;;  %v13197_v22 = vcombine.low %v708_v61, %v712_v0 }
 0x451   :  { %v13200_v12 = vcombine.high %v709_v63, %v713_v44  ;;  %v13199_v24 = vcombine.low %v709_v63, %v713_v44 }
 0x452   :  { %10930 = vmatpush1.bf16.msra.mxu0 %v13149_v1  ;;  %v716_v1 = vld [vmem:[%s19773_s1 + $0x1590] sm:$0xff] }
 0x453   :  { %11463 = vmatpush1.bf16.msra.mxu1 %v13151_v16  ;;  %10940 = vmatprep.subr.bf16.mxu0 %v13158_v20  ;;  %v720_v16 = vld [vmem:[%s19773_s1 + $0x15b0] sm:$0xff]  ;;  %v717_v20 = vld [vmem:[%s19773_s1 + $0x1598] sm:$0xff] }
 0x454   :  { %11473 = vmatprep.subr.bf16.mxu1 %v13160_v21  ;;  %v721_v21 = vld [vmem:[%s19773_s1 + $0x15b8] sm:$0xff]  ;;  %v13206_v40 = vcombine.high %v716_v1, %v720_v16  ;;  %v13205_v30 = vcombine.low %v716_v1, %v720_v16 }
 0x455   :  { %10932 = vmatmul.mubr.bf16.vlgmr.msra.gmra.mrb[4].mxu0 %v15630_v51  ;;  %v13208_v33 = vcombine.high %v717_v20, %v721_v21  ;;  %v13207_v32 = vcombine.low %v717_v20, %v721_v21 }
 0x456   :  { %10941 = vmatpush1.bf16.msra.mxu0 %v13157_v58  ;;  %11465 = vmatmul.mubr.bf16.vlgmr.msra.gmra.mrb[4].mxu1 %v15630_v51  ;;  %v693_v51 = vld [vmem:[%s19773_s1 + $0x14d8] sm:$0xff]  ;;  %v724_v58 = vld [vmem:[%s19773_s1 + $0x15d0] sm:$0xff] }
 0x457   :  { %11474 = vmatpush1.bf16.msra.mxu1 %v13159_v47  ;;  %10942 = vmatprep.subr.bf16.mxu0 %v13166_v28  ;;  %v13184_v46 = vcombine.high %v693_v51, %v697_v41  ;;  %v13183_v54 = vcombine.low %v693_v51, %v697_v41  ;;  %v728_v47 = vld [vmem:[%s19773_s1 + $0x15f0] sm:$0xff]  ;;  %v725_v28 = vld [vmem:[%s19773_s1 + $0x15d8] sm:$0xff] }
 0x458   :  { %11475 = vmatprep.subr.bf16.mxu1 %v13168_v29  ;;  %10972 = vmatprep.mubr.bf16.mxu0 %v15646_v62  ;;  %v729_v29 = vld [vmem:[%s19773_s1 + $0x15f8] sm:$0xff]  ;;  %v13214_v35 = vcombine.high %v724_v58, %v728_v47  ;;  %v13213_v19 = vcombine.low %v724_v58, %v728_v47 }
 0x459   :  { %11505 = vmatprep.mubr.bf16.mxu1 %v15646_v62  ;;  %v701_v62 = vld [vmem:[%s19773_s1 + $0x1518] sm:$0xff]  ;;  %v13216_v48 = vcombine.high %v725_v28, %v729_v29  ;;  %v13215_v39 = vcombine.low %v725_v28, %v729_v29 }
 0x45a   :  { %10943 = vmatpush1.bf16.msra.mxu0 %v13165_v4  ;;  %v13192_v60 = vcombine.high %v701_v62, %v705_v50  ;;  %v13191_v10 = vcombine.low %v701_v62, %v705_v50  ;;  %v732_v4 = vld [vmem:[%s19773_s1 + $0x1610] sm:$0xff] }
 0x45b   :  { %11476 = vmatpush1.bf16.msra.mxu1 %v13167_v36  ;;  %10944 = vmatprep.subr.bf16.mxu0 %v13174_v53  ;;  %v736_v36 = vld [vmem:[%s19773_s1 + $0x1630] sm:$0xff]  ;;  %v733_v53 = vld [vmem:[%s19773_s1 + $0x1618] sm:$0xff] }
 0x45c   :  { %11477 = vmatprep.subr.bf16.mxu1 %v13176_v38  ;;  %v737_v38 = vld [vmem:[%s19773_s1 + $0x1638] sm:$0xff]  ;;  %v13222_v51 = vcombine.high %v732_v4, %v736_v36  ;;  %v13221_v49 = vcombine.low %v732_v4, %v736_v36 }
 0x45d   :  { %v13224_v41 = vcombine.high %v733_v53, %v737_v38  ;;  %v13223_v59 = vcombine.low %v733_v53, %v737_v38 }
 0x45e   :  { %10945 = vmatpush1.bf16.msra.mxu0 %v13173_v42  ;;  %v740_v42 = vld [vmem:[%s19773_s1 + $0x1650] sm:$0xff] }
 0x45f   :  { %11478 = vmatpush1.bf16.msra.mxu1 %v13175_v45  ;;  %10946 = vmatprep.subr.bf16.mxu0 %v13182_v34  ;;  %v744_v45 = vld [vmem:[%s19773_s1 + $0x1670] sm:$0xff]  ;;  %v741_v34 = vld [vmem:[%s19773_s1 + $0x1658] sm:$0xff] }
 0x460   :  { %11479 = vmatprep.subr.bf16.mxu1 %v13184_v46  ;;  %v745_v46 = vld [vmem:[%s19773_s1 + $0x1678] sm:$0xff]  ;;  %v13230_v62 = vcombine.high %v740_v42, %v744_v45  ;;  %v13229_v61 = vcombine.low %v740_v42, %v744_v45 }
 0x461   :  { %v13232_v50 = vcombine.high %v741_v34, %v745_v46  ;;  %v13231_v0 = vcombine.low %v741_v34, %v745_v46 }
 0x462   :  { %10947 = vmatpush1.bf16.msra.mxu0 %v13181_v52  ;;  %v748_v52 = vld [vmem:[%s19773_s1 + $0x1690] sm:$0xff] }
 0x463   :  { %11480 = vmatpush1.bf16.msra.mxu1 %v13183_v54  ;;  %10948 = vmatprep.subr.bf16.mxu0 %v13190_v55  ;;  %v752_v54 = vld [vmem:[%s19773_s1 + $0x16b0] sm:$0xff]  ;;  %v749_v55 = vld [vmem:[%s19773_s1 + $0x1698] sm:$0xff] }
 0x464   :  { %11481 = vmatprep.subr.bf16.mxu1 %v13192_v60  ;;  %v753_v60 = vld [vmem:[%s19773_s1 + $0x16b8] sm:$0xff]  ;;  %v13238_v63 = vcombine.high %v748_v52, %v752_v54  ;;  %v13237_v1 = vcombine.low %v748_v52, %v752_v54 }
 0x465   :  { %v13240_v44 = vcombine.high %v749_v55, %v753_v60  ;;  %v13239_v16 = vcombine.low %v749_v55, %v753_v60 }
 0x466   :  { %10949 = vmatpush1.bf16.msra.mxu0 %v13189_v9  ;;  %v756_v9 = vld [vmem:[%s19773_s1 + $0x16d0] sm:$0xff] }
 0x467   :  { %11482 = vmatpush1.bf16.msra.mxu1 %v13191_v10  ;;  %10950 = vmatprep.subr.bf16.mxu0 %v13198_v11  ;;  %v760_v10 = vld [vmem:[%s19773_s1 + $0x16f0] sm:$0xff]  ;;  %v757_v11 = vld [vmem:[%s19773_s1 + $0x16d8] sm:$0xff] }
 0x468   :  { %11483 = vmatprep.subr.bf16.mxu1 %v13200_v12  ;;  %v761_v12 = vld [vmem:[%s19773_s1 + $0x16f8] sm:$0xff]  ;;  %v13246_v20 = vcombine.high %v756_v9, %v760_v10  ;;  %v13245_v58 = vcombine.low %v756_v9, %v760_v10 }
 0x469   :  { %v13248_v21 = vcombine.high %v757_v11, %v761_v12  ;;  %v13247_v47 = vcombine.low %v757_v11, %v761_v12 }
 0x46a   :  { %10951 = vmatpush1.bf16.msra.mxu0 %v13197_v22  ;;  %v764_v22 = vld [vmem:[%s19773_s1 + $0x1710] sm:$0xff] }
 0x46b   :  { %11484 = vmatpush1.bf16.msra.mxu1 %v13199_v24  ;;  %10952 = vmatprep.subr.bf16.mxu0 %v13206_v40  ;;  %v768_v24 = vld [vmem:[%s19773_s1 + $0x1730] sm:$0xff]  ;;  %v765_v40 = vld [vmem:[%s19773_s1 + $0x1718] sm:$0xff] }
 0x46c   :  { %11485 = vmatprep.subr.bf16.mxu1 %v13208_v33  ;;  %v769_v33 = vld [vmem:[%s19773_s1 + $0x1738] sm:$0xff]  ;;  %v13254_v28 = vcombine.high %v764_v22, %v768_v24  ;;  %v13253_v4 = vcombine.low %v764_v22, %v768_v24 }
 0x46d   :  { %v13256_v29 = vcombine.high %v765_v40, %v769_v33  ;;  %v13255_v36 = vcombine.low %v765_v40, %v769_v33 }
 0x46e   :  { %10953 = vmatpush1.bf16.msra.mxu0 %v13205_v30  ;;  %v772_v30 = vld [vmem:[%s19773_s1 + $0x1750] sm:$0xff] }
 0x46f   :  { %11486 = vmatpush1.bf16.msra.mxu1 %v13207_v32  ;;  %10954 = vmatprep.subr.bf16.mxu0 %v13214_v35  ;;  %v776_v32 = vld [vmem:[%s19773_s1 + $0x1770] sm:$0xff]  ;;  %v773_v35 = vld [vmem:[%s19773_s1 + $0x1758] sm:$0xff] }
 0x470   :  { %11487 = vmatprep.subr.bf16.mxu1 %v13216_v48  ;;  %v777_v48 = vld [vmem:[%s19773_s1 + $0x1778] sm:$0xff]  ;;  %v13262_v53 = vcombine.high %v772_v30, %v776_v32  ;;  %v13261_v42 = vcombine.low %v772_v30, %v776_v32 }
 0x471   :  { %v13264_v38 = vcombine.high %v773_v35, %v777_v48  ;;  %v13263_v45 = vcombine.low %v773_v35, %v777_v48 }
 0x472   :  { %10955 = vmatpush1.bf16.msra.mxu0 %v13213_v19  ;;  %v780_v19 = vld [vmem:[%s19773_s1 + $0x1790] sm:$0xff] }
 0x473   :  { %11488 = vmatpush1.bf16.msra.mxu1 %v13215_v39  ;;  %10956 = vmatprep.subr.bf16.mxu0 %v13222_v51  ;;  %v784_v39 = vld [vmem:[%s19773_s1 + $0x17b0] sm:$0xff]  ;;  %v781_v51 = vld [vmem:[%s19773_s1 + $0x1798] sm:$0xff] }
 0x474   :  { %11489 = vmatprep.subr.bf16.mxu1 %v13224_v41  ;;  %v785_v41 = vld [vmem:[%s19773_s1 + $0x17b8] sm:$0xff]  ;;  %v13270_v34 = vcombine.high %v780_v19, %v784_v39  ;;  %v13269_v52 = vcombine.low %v780_v19, %v784_v39 }
 0x475   :  { %v13272_v46 = vcombine.high %v781_v51, %v785_v41  ;;  %v13271_v54 = vcombine.low %v781_v51, %v785_v41  ;;  %v828_v41 = vld [vmem:[%s19773_s1 + $0x1910] sm:$0xff] }
 0x476   :  { %10957 = vmatpush1.bf16.msra.mxu0 %v13221_v49  ;;  %v788_v49 = vld [vmem:[%s19773_s1 + $0x17d0] sm:$0xff] }
 0x477   :  { %11490 = vmatpush1.bf16.msra.mxu1 %v13223_v59  ;;  %10958 = vmatprep.subr.bf16.mxu0 %v13230_v62  ;;  %v792_v59 = vld [vmem:[%s19773_s1 + $0x17f0] sm:$0xff]  ;;  %v789_v62 = vld [vmem:[%s19773_s1 + $0x17d8] sm:$0xff] }
 0x478   :  { %11491 = vmatprep.subr.bf16.mxu1 %v13232_v50  ;;  %v793_v50 = vld [vmem:[%s19773_s1 + $0x17f8] sm:$0xff]  ;;  %v13278_v55 = vcombine.high %v788_v49, %v792_v59  ;;  %v13277_v9 = vcombine.low %v788_v49, %v792_v59 }
 0x479   :  { %v13280_v60 = vcombine.high %v789_v62, %v793_v50  ;;  %v13279_v10 = vcombine.low %v789_v62, %v793_v50  ;;  %v836_v62 = vld [vmem:[%s19773_s1 + $0x1950] sm:$0xff] }
 0x47a   :  { %10959 = vmatpush1.bf16.msra.mxu0 %v13229_v61  ;;  %v796_v61 = vld [vmem:[%s19773_s1 + $0x1810] sm:$0xff] }
 0x47b   :  { %11492 = vmatpush1.bf16.msra.mxu1 %v13231_v0  ;;  %10960 = vmatprep.subr.bf16.mxu0 %v13238_v63  ;;  %v800_v0 = vld [vmem:[%s19773_s1 + $0x1830] sm:$0xff]  ;;  %v797_v63 = vld [vmem:[%s19773_s1 + $0x1818] sm:$0xff] }
 0x47c   :  { %11493 = vmatprep.subr.bf16.mxu1 %v13240_v44  ;;  %v801_v44 = vld [vmem:[%s19773_s1 + $0x1838] sm:$0xff]  ;;  %v13286_v11 = vcombine.high %v796_v61, %v800_v0  ;;  %v13285_v22 = vcombine.low %v796_v61, %v800_v0  ;;  %v840_v50 = vld [vmem:[%s19773_s1 + $0x1970] sm:$0xff] }
 0x47d   :  { %v13288_v12 = vcombine.high %v797_v63, %v801_v44  ;;  %v13287_v24 = vcombine.low %v797_v63, %v801_v44  ;;  %v13326_v61 = vcombine.high %v836_v62, %v840_v50  ;;  %v844_v63 = vld [vmem:[%s19773_s1 + $0x1990] sm:$0xff] }
 0x47e   :  { %10961 = vmatpush1.bf16.msra.mxu0 %v13237_v1  ;;  %v804_v1 = vld [vmem:[%s19773_s1 + $0x1850] sm:$0xff] }
 0x47f   :  { %11494 = vmatpush1.bf16.msra.mxu1 %v13239_v16  ;;  %10962 = vmatprep.subr.bf16.mxu0 %v13246_v20  ;;  %v808_v16 = vld [vmem:[%s19773_s1 + $0x1870] sm:$0xff]  ;;  %v805_v20 = vld [vmem:[%s19773_s1 + $0x1858] sm:$0xff] }
 0x480   :  { %11495 = vmatprep.subr.bf16.mxu1 %v13248_v21  ;;  %v809_v21 = vld [vmem:[%s19773_s1 + $0x1878] sm:$0xff]  ;;  %v13294_v40 = vcombine.high %v804_v1, %v808_v16  ;;  %v13293_v30 = vcombine.low %v804_v1, %v808_v16  ;;  %v848_v44 = vld [vmem:[%s19773_s1 + $0x19b0] sm:$0xff] }
 0x481   :  { %v13296_v33 = vcombine.high %v805_v20, %v809_v21  ;;  %v13295_v32 = vcombine.low %v805_v20, %v809_v21  ;;  %v13334_v1 = vcombine.high %v844_v63, %v848_v44  ;;  %v852_v20 = vld [vmem:[%s19773_s1 + $0x19d0] sm:$0xff] }
 0x482   :  { %10963 = vmatpush1.bf16.msra.mxu0 %v13245_v58  ;;  %v812_v58 = vld [vmem:[%s19773_s1 + $0x1890] sm:$0xff] }
 0x483   :  { %11496 = vmatpush1.bf16.msra.mxu1 %v13247_v47  ;;  %10964 = vmatprep.subr.bf16.mxu0 %v13254_v28  ;;  %v816_v47 = vld [vmem:[%s19773_s1 + $0x18b0] sm:$0xff]  ;;  %v813_v28 = vld [vmem:[%s19773_s1 + $0x1898] sm:$0xff] }
 0x484   :  { %11497 = vmatprep.subr.bf16.mxu1 %v13256_v29  ;;  %v817_v29 = vld [vmem:[%s19773_s1 + $0x18b8] sm:$0xff]  ;;  %v13302_v35 = vcombine.high %v812_v58, %v816_v47  ;;  %v856_v21 = vld [vmem:[%s19773_s1 + $0x19f0] sm:$0xff] }
 0x485   :  { %v13304_v48 = vcombine.high %v813_v28, %v817_v29  ;;  %v13303_v19 = vcombine.low %v813_v28, %v817_v29  ;;  %v860_v28 = vld [vmem:[%s19773_s1 + $0x1a10] sm:$0xff] }
 0x486   :  { %10965 = vmatpush1.bf16.msra.mxu0 %v13253_v4  ;;  %v820_v4 = vld [vmem:[%s19773_s1 + $0x18d0] sm:$0xff] }
 0x487   :  { %11498 = vmatpush1.bf16.msra.mxu1 %v13255_v36  ;;  %10966 = vmatprep.subr.bf16.mxu0 %v13262_v53  ;;  %v824_v36 = vld [vmem:[%s19773_s1 + $0x18f0] sm:$0xff]  ;;  %v825_v53 = vld [vmem:[%s19773_s1 + $0x18f8] sm:$0xff] }
 0x488   :  { %11499 = vmatprep.subr.bf16.mxu1 %v13264_v38  ;;  %v13301_v38 = vcombine.low %v812_v58, %v816_v47  ;;  %v13310_v39 = vcombine.high %v820_v4, %v824_v36  ;;  %v13342_v58 = vcombine.high %v852_v20, %v856_v21  ;;  %v864_v29 = vld [vmem:[%s19773_s1 + $0x1a30] sm:$0xff] }
 0x48a   :  { %10967 = vmatpush1.bf16.msra.mxu0 %v13261_v42  ;;  %v832_v42 = vld [vmem:[%s19773_s1 + $0x1930] sm:$0xff] }
 0x48b   :  { %11500 = vmatpush1.bf16.msra.mxu1 %v13263_v45  ;;  %10968 = vmatprep.subr.bf16.mxu0 %v13270_v34  ;;  %v833_v45 = vld [vmem:[%s19773_s1 + $0x1938] sm:$0xff]  ;;  %v13309_v34 = vcombine.low %v820_v4, %v824_v36  ;;  %v13318_v49 = vcombine.high %v828_v41, %v832_v42  ;;  %v13350_v4 = vcombine.high %v860_v28, %v864_v29 }
 0x48c   :  { %11501 = vmatprep.subr.bf16.mxu1 %v13272_v46 }
 0x48e   :  { %10969 = vmatpush1.bf16.msra.mxu0 %v13269_v52  ;;  %v837_v52 = vld [vmem:[%s19773_s1 + $0x1958] sm:$0xff] }
 0x48f   :  { %11502 = vmatpush1.bf16.msra.mxu1 %v13271_v54  ;;  %10970 = vmatprep.subr.bf16.mxu0 %v13278_v55  ;;  %v841_v54 = vld [vmem:[%s19773_s1 + $0x1978] sm:$0xff]  ;;  %v13317_v55 = vcombine.low %v828_v41, %v832_v42 }
 0x490   :  { %11503 = vmatprep.subr.bf16.mxu1 %v13280_v60  ;;  %v13328_v0 = vcombine.high %v837_v52, %v841_v54 }
 0x492   :  { %10971 = vmatpush1.bf16.msra.mxu0 %v13277_v9  ;;  %v845_v9 = vld [vmem:[%s19773_s1 + $0x1998] sm:$0xff] }
 0x493   :  { %11504 = vmatpush1.bf16.msra.mxu1 %v13279_v10  ;;  %10981 = vmatprep.subr.bf16.mxu0 %v13286_v11  ;;  %v849_v10 = vld [vmem:[%s19773_s1 + $0x19b8] sm:$0xff]  ;;  %v13325_v11 = vcombine.low %v836_v62, %v840_v50 }
 0x494   :  { %11514 = vmatprep.subr.bf16.mxu1 %v13288_v12  ;;  %v13327_v12 = vcombine.low %v837_v52, %v841_v54  ;;  %v13336_v16 = vcombine.high %v845_v9, %v849_v10  ;;  %v884_v52 = vld [vmem:[%s19773_s1 + $0x1ad0] sm:$0xff] }
 0x495   :  { %10973 = vmatmul.mubr.bf16.vlgmr.msra.gmra.mrb[4].mxu0 %v15841_v27  ;;  %v888_v54 = vld [vmem:[%s19773_s1 + $0x1af0] sm:$0xff] }
 0x496   :  { %10982 = vmatpush1.bf16.msra.mxu0 %v13285_v22  ;;  %11506 = vmatmul.mubr.bf16.vlgmr.msra.gmra.mrb[4].mxu1 %v15841_v27  ;;  %v821_v27 = vld [vmem:[%s19773_s1 + $0x18d8] sm:$0xff] }
 0x497   :  { %11515 = vmatpush1.bf16.msra.mxu1 %v13287_v24  ;;  %10983 = vmatprep.subr.bf16.mxu0 %v13294_v40  ;;  %v13312_v51 = vcombine.high %v821_v27, %v825_v53  ;;  %v13311_v46 = vcombine.low %v821_v27, %v825_v53  ;;  %v853_v22 = vld [vmem:[%s19773_s1 + $0x19d8] sm:$0xff]  ;;  %v13333_v40 = vcombine.low %v844_v63, %v848_v44  ;;  %v868_v27 = vld [vmem:[%s19773_s1 + $0x1a50] sm:$0xff] }
 0x498   :  { %11516 = vmatprep.subr.bf16.mxu1 %v13296_v33  ;;  %11013 = vmatprep.mubr.bf16.mxu0 %v15856_v37  ;;  %v857_v24 = vld [vmem:[%s19773_s1 + $0x19f8] sm:$0xff]  ;;  %v13335_v33 = vcombine.low %v845_v9, %v849_v10  ;;  %v872_v53 = vld [vmem:[%s19773_s1 + $0x1a70] sm:$0xff]  ;;  %v13374_v63 = vcombine.high %v884_v52, %v888_v54 }
 0x499   :  { %11546 = vmatprep.mubr.bf16.mxu1 %v15856_v37  ;;  %v829_v37 = vld [vmem:[%s19773_s1 + $0x1918] sm:$0xff]  ;;  %v13344_v47 = vcombine.high %v853_v22, %v857_v24  ;;  %v13358_v41 = vcombine.high %v868_v27, %v872_v53  ;;  %v892_v9 = vld [vmem:[%s19773_s1 + $0x1b10] sm:$0xff] }
 0x49a   :  { %10984 = vmatpush1.bf16.msra.mxu0 %v13293_v30  ;;  %v13320_v59 = vcombine.high %v829_v37, %v833_v45  ;;  %v13319_v60 = vcombine.low %v829_v37, %v833_v45  ;;  %v861_v30 = vld [vmem:[%s19773_s1 + $0x1a18] sm:$0xff]  ;;  %v876_v37 = vld [vmem:[%s19773_s1 + $0x1a90] sm:$0xff] }
 0x49b   :  { %11517 = vmatpush1.bf16.msra.mxu1 %v13295_v32  ;;  %10985 = vmatprep.subr.bf16.mxu0 %v13302_v35  ;;  %v865_v32 = vld [vmem:[%s19773_s1 + $0x1a38] sm:$0xff]  ;;  %v13341_v35 = vcombine.low %v852_v20, %v856_v21  ;;  %v880_v45 = vld [vmem:[%s19773_s1 + $0x1ab0] sm:$0xff] }
 0x49c   :  { %11518 = vmatprep.subr.bf16.mxu1 %v13304_v48  ;;  %v13343_v48 = vcombine.low %v853_v22, %v857_v24  ;;  %v13352_v36 = vcombine.high %v861_v30, %v865_v32  ;;  %v13366_v62 = vcombine.high %v876_v37, %v880_v45  ;;  %v896_v10 = vld [vmem:[%s19773_s1 + $0x1b30] sm:$0xff] }
 0x49d   :  { %v13382_v20 = vcombine.high %v892_v9, %v896_v10  ;;  %v900_v22 = vld [vmem:[%s19773_s1 + $0x1b50] sm:$0xff] }
 0x49e   :  { %10986 = vmatpush1.bf16.msra.mxu0 %v13301_v38  ;;  %v869_v38 = vld [vmem:[%s19773_s1 + $0x1a58] sm:$0xff]  ;;  %v904_v24 = vld [vmem:[%s19773_s1 + $0x1b70] sm:$0xff] }
 0x49f   :  { %11519 = vmatpush1.bf16.msra.mxu1 %v13303_v19  ;;  %10987 = vmatprep.subr.bf16.mxu0 %v13310_v39  ;;  %v873_v19 = vld [vmem:[%s19773_s1 + $0x1a78] sm:$0xff]  ;;  %v13349_v39 = vcombine.low %v860_v28, %v864_v29  ;;  %v13390_v28 = vcombine.high %v900_v22, %v904_v24 }
 0x4a0   :  { %11520 = vmatprep.subr.bf16.mxu1 %v13312_v51  ;;  %v13351_v51 = vcombine.low %v861_v30, %v865_v32  ;;  %v13360_v42 = vcombine.high %v869_v38, %v873_v19  ;;  %v908_v30 = vld [vmem:[%s19773_s1 + $0x1b90] sm:$0xff] }
 0x4a1   :  { %v912_v32 = vld [vmem:[%s19773_s1 + $0x1bb0] sm:$0xff] }
 0x4a2   :  { %10988 = vmatpush1.bf16.msra.mxu0 %v13309_v34  ;;  %v877_v34 = vld [vmem:[%s19773_s1 + $0x1a98] sm:$0xff] }
 0x4a3   :  { %11521 = vmatpush1.bf16.msra.mxu1 %v13311_v46  ;;  %10989 = vmatprep.subr.bf16.mxu0 %v13318_v49  ;;  %v881_v46 = vld [vmem:[%s19773_s1 + $0x1ab8] sm:$0xff]  ;;  %v13357_v49 = vcombine.low %v868_v27, %v872_v53  ;;  %v13398_v27 = vcombine.high %v908_v30, %v912_v32 }
 0x4a4   :  { %11522 = vmatprep.subr.bf16.mxu1 %v13320_v59  ;;  %v13359_v59 = vcombine.low %v869_v38, %v873_v19  ;;  %v13368_v50 = vcombine.high %v877_v34, %v881_v46  ;;  %v916_v38 = vld [vmem:[%s19773_s1 + $0x1bd0] sm:$0xff] }
 0x4a5   :  { %v920_v19 = vld [vmem:[%s19773_s1 + $0x1bf0] sm:$0xff] }
 0x4a6   :  { %10990 = vmatpush1.bf16.msra.mxu0 %v13317_v55  ;;  %v885_v55 = vld [vmem:[%s19773_s1 + $0x1ad8] sm:$0xff] }
 0x4a7   :  { %11523 = vmatpush1.bf16.msra.mxu1 %v13319_v60  ;;  %10991 = vmatprep.subr.bf16.mxu0 %v13326_v61  ;;  %v889_v60 = vld [vmem:[%s19773_s1 + $0x1af8] sm:$0xff]  ;;  %v13365_v61 = vcombine.low %v876_v37, %v880_v45  ;;  %v13406_v37 = vcombine.high %v916_v38, %v920_v19 }
 0x4a8   :  { %11524 = vmatprep.subr.bf16.mxu1 %v13328_v0  ;;  %v13367_v0 = vcombine.low %v877_v34, %v881_v46  ;;  %v13376_v44 = vcombine.high %v885_v55, %v889_v60  ;;  %v924_v34 = vld [vmem:[%s19773_s1 + $0x1c10] sm:$0xff] }
 0x4a9   :  { %v928_v46 = vld [vmem:[%s19773_s1 + $0x1c30] sm:$0xff] }
 0x4aa   :  { %10992 = vmatpush1.bf16.msra.mxu0 %v13325_v11  ;;  %v893_v11 = vld [vmem:[%s19773_s1 + $0x1b18] sm:$0xff] }
 0x4ab   :  { %11525 = vmatpush1.bf16.msra.mxu1 %v13327_v12  ;;  %10993 = vmatprep.subr.bf16.mxu0 %v13334_v1  ;;  %v897_v12 = vld [vmem:[%s19773_s1 + $0x1b38] sm:$0xff]  ;;  %v13373_v1 = vcombine.low %v884_v52, %v888_v54  ;;  %v13414_v52 = vcombine.high %v924_v34, %v928_v46 }
 0x4ac   :  { %11526 = vmatprep.subr.bf16.mxu1 %v13336_v16  ;;  %v13375_v16 = vcombine.low %v885_v55, %v889_v60  ;;  %v13384_v21 = vcombine.high %v893_v11, %v897_v12  ;;  %v932_v55 = vld [vmem:[%s19773_s1 + $0x1c50] sm:$0xff] }
 0x4ad   :  { %v936_v60 = vld [vmem:[%s19773_s1 + $0x1c70] sm:$0xff] }
 0x4ae   :  { %10994 = vmatpush1.bf16.msra.mxu0 %v13333_v40  ;;  %v901_v40 = vld [vmem:[%s19773_s1 + $0x1b58] sm:$0xff] }
 0x4af   :  { %11527 = vmatpush1.bf16.msra.mxu1 %v13335_v33  ;;  %10995 = vmatprep.subr.bf16.mxu0 %v13342_v58  ;;  %v905_v33 = vld [vmem:[%s19773_s1 + $0x1b78] sm:$0xff]  ;;  %v13381_v58 = vcombine.low %v892_v9, %v896_v10  ;;  %v13422_v9 = vcombine.high %v932_v55, %v936_v60 }
 0x4b0   :  { %11528 = vmatprep.subr.bf16.mxu1 %v13344_v47  ;;  %v13383_v47 = vcombine.low %v893_v11, %v897_v12  ;;  %v13392_v29 = vcombine.high %v901_v40, %v905_v33  ;;  %v940_v11 = vld [vmem:[%s19773_s1 + $0x1c90] sm:$0xff] }
 0x4b1   :  { %v944_v12 = vld [vmem:[%s19773_s1 + $0x1cb0] sm:$0xff] }
 0x4b2   :  { %10996 = vmatpush1.bf16.msra.mxu0 %v13341_v35  ;;  %v909_v35 = vld [vmem:[%s19773_s1 + $0x1b98] sm:$0xff] }
 0x4b3   :  { %11529 = vmatpush1.bf16.msra.mxu1 %v13343_v48  ;;  %10997 = vmatprep.subr.bf16.mxu0 %v13350_v4  ;;  %v913_v48 = vld [vmem:[%s19773_s1 + $0x1bb8] sm:$0xff]  ;;  %v13389_v4 = vcombine.low %v900_v22, %v904_v24  ;;  %v13430_v22 = vcombine.high %v940_v11, %v944_v12 }
 0x4b4   :  { %11530 = vmatprep.subr.bf16.mxu1 %v13352_v36  ;;  %v13391_v36 = vcombine.low %v901_v40, %v905_v33  ;;  %v13400_v53 = vcombine.high %v909_v35, %v913_v48  ;;  %v948_v40 = vld [vmem:[%s19773_s1 + $0x1cd0] sm:$0xff] }
 0x4b5   :  { %v952_v33 = vld [vmem:[%s19773_s1 + $0x1cf0] sm:$0xff] }
 0x4b6   :  { %10998 = vmatpush1.bf16.msra.mxu0 %v13349_v39  ;;  %v917_v39 = vld [vmem:[%s19773_s1 + $0x1bd8] sm:$0xff] }
 0x4b7   :  { %11531 = vmatpush1.bf16.msra.mxu1 %v13351_v51  ;;  %10999 = vmatprep.subr.bf16.mxu0 %v13358_v41  ;;  %v921_v51 = vld [vmem:[%s19773_s1 + $0x1bf8] sm:$0xff]  ;;  %v13397_v41 = vcombine.low %v908_v30, %v912_v32  ;;  %v956_v32 = vld [vmem:[%s19773_s1 + $0x1d10] sm:$0xff] }
 0x4b8   :  { %11532 = vmatprep.subr.bf16.mxu1 %v13360_v42  ;;  %v13399_v42 = vcombine.low %v909_v35, %v913_v48  ;;  %v13408_v45 = vcombine.high %v917_v39, %v921_v51  ;;  %v960_v35 = vld [vmem:[%s19773_s1 + $0x1d30] sm:$0xff]  ;;  %v961_v48 = vld [vmem:[%s19773_s1 + $0x1d38] sm:$0xff] }
 0x4ba   :  { %11000 = vmatpush1.bf16.msra.mxu0 %v13357_v49  ;;  %v925_v49 = vld [vmem:[%s19773_s1 + $0x1c18] sm:$0xff] }
 0x4bb   :  { %11533 = vmatpush1.bf16.msra.mxu1 %v13359_v59  ;;  %11001 = vmatprep.subr.bf16.mxu0 %v13366_v62  ;;  %v929_v59 = vld [vmem:[%s19773_s1 + $0x1c38] sm:$0xff]  ;;  %v13405_v62 = vcombine.low %v916_v38, %v920_v19  ;;  %v964_v38 = vld [vmem:[%s19773_s1 + $0x1d50] sm:$0xff] }
 0x4bc   :  { %11534 = vmatprep.subr.bf16.mxu1 %v13368_v50  ;;  %v13407_v50 = vcombine.low %v917_v39, %v921_v51  ;;  %v13416_v54 = vcombine.high %v925_v49, %v929_v59  ;;  %v968_v19 = vld [vmem:[%s19773_s1 + $0x1d70] sm:$0xff]  ;;  %v965_v39 = vld [vmem:[%s19773_s1 + $0x1d58] sm:$0xff] }
 0x4bd   :  { %v969_v51 = vld [vmem:[%s19773_s1 + $0x1d78] sm:$0xff] }
 0x4be   :  { %11002 = vmatpush1.bf16.msra.mxu0 %v13365_v61  ;;  %v933_v61 = vld [vmem:[%s19773_s1 + $0x1c58] sm:$0xff] }
 0x4bf   :  { %11535 = vmatpush1.bf16.msra.mxu1 %v13367_v0  ;;  %11003 = vmatprep.subr.bf16.mxu0 %v13374_v63  ;;  %v937_v0 = vld [vmem:[%s19773_s1 + $0x1c78] sm:$0xff]  ;;  %v13413_v63 = vcombine.low %v924_v34, %v928_v46  ;;  %v972_v34 = vld [vmem:[%s19773_s1 + $0x1d90] sm:$0xff] }
 0x4c0   :  { %11536 = vmatprep.subr.bf16.mxu1 %v13376_v44  ;;  %v13415_v44 = vcombine.low %v925_v49, %v929_v59  ;;  %v13424_v10 = vcombine.high %v933_v61, %v937_v0  ;;  %v976_v46 = vld [vmem:[%s19773_s1 + $0x1db0] sm:$0xff]  ;;  %v973_v49 = vld [vmem:[%s19773_s1 + $0x1d98] sm:$0xff] }
 0x4c1   :  { %v977_v59 = vld [vmem:[%s19773_s1 + $0x1db8] sm:$0xff] }
 0x4c2   :  { %11004 = vmatpush1.bf16.msra.mxu0 %v13373_v1  ;;  %v941_v1 = vld [vmem:[%s19773_s1 + $0x1c98] sm:$0xff] }
 0x4c3   :  { %11537 = vmatpush1.bf16.msra.mxu1 %v13375_v16  ;;  %11005 = vmatprep.subr.bf16.mxu0 %v13382_v20  ;;  %v945_v16 = vld [vmem:[%s19773_s1 + $0x1cb8] sm:$0xff]  ;;  %v13421_v20 = vcombine.low %v932_v55, %v936_v60  ;;  %v980_v55 = vld [vmem:[%s19773_s1 + $0x1dd0] sm:$0xff] }
 0x4c4   :  { %11538 = vmatprep.subr.bf16.mxu1 %v13384_v21  ;;  %v13423_v21 = vcombine.low %v933_v61, %v937_v0  ;;  %v13432_v24 = vcombine.high %v941_v1, %v945_v16  ;;  %v984_v60 = vld [vmem:[%s19773_s1 + $0x1df0] sm:$0xff]  ;;  %v981_v61 = vld [vmem:[%s19773_s1 + $0x1dd8] sm:$0xff] }
 0x4c5   :  { %v985_v0 = vld [vmem:[%s19773_s1 + $0x1df8] sm:$0xff] }
 0x4c6   :  { %11006 = vmatpush1.bf16.msra.mxu0 %v13381_v58  ;;  %v953_v58 = vld [vmem:[%s19773_s1 + $0x1cf8] sm:$0xff] }
 0x4c7   :  { %11539 = vmatpush1.bf16.msra.mxu1 %v13383_v47  ;;  %11007 = vmatprep.subr.bf16.mxu0 %v13390_v28  ;;  %v13429_v47 = vcombine.low %v940_v11, %v944_v12  ;;  %v13431_v28 = vcombine.low %v941_v1, %v945_v16  ;;  %v988_v11 = vld [vmem:[%s19773_s1 + $0x1e10] sm:$0xff]  ;;  %v989_v1 = vld [vmem:[%s19773_s1 + $0x1e18] sm:$0xff] }
 0x4c8   :  { %11540 = vmatprep.subr.bf16.mxu1 %v13392_v29  ;;  %v13438_v29 = vcombine.high %v948_v40, %v952_v33  ;;  %v992_v12 = vld [vmem:[%s19773_s1 + $0x1e30] sm:$0xff]  ;;  %v993_v16 = vld [vmem:[%s19773_s1 + $0x1e38] sm:$0xff] }
 0x4ca   :  { %11008 = vmatpush1.bf16.msra.mxu0 %v13389_v4  ;;  %v13437_v4 = vcombine.low %v948_v40, %v952_v33  ;;  %v996_v40 = vld [vmem:[%s19773_s1 + $0x1e50] sm:$0xff] }
 0x4cb   :  { %11541 = vmatpush1.bf16.msra.mxu1 %v13391_v36  ;;  %11009 = vmatprep.subr.bf16.mxu0 %v13398_v27  ;;  %v13446_v27 = vcombine.high %v956_v32, %v960_v35  ;;  %v1000_v33 = vld [vmem:[%s19773_s1 + $0x1e70] sm:$0xff] }
 0x4cc   :  { %11542 = vmatprep.subr.bf16.mxu1 %v13400_v53 }
 0x4ce   :  { %11010 = vmatpush1.bf16.msra.mxu0 %v13397_v41  ;;  %v13445_v41 = vcombine.low %v956_v32, %v960_v35  ;;  %v1004_v32 = vld [vmem:[%s19773_s1 + $0x1e90] sm:$0xff] }
 0x4cf   :  { %11543 = vmatpush1.bf16.msra.mxu1 %v13399_v42  ;;  %11011 = vmatprep.subr.bf16.mxu0 %v13406_v37  ;;  %v13454_v37 = vcombine.high %v964_v38, %v968_v19  ;;  %v1008_v35 = vld [vmem:[%s19773_s1 + $0x1eb0] sm:$0xff] }
 0x4d0   :  { %11544 = vmatprep.subr.bf16.mxu1 %v13408_v45  ;;  %v13456_v45 = vcombine.high %v965_v39, %v969_v51 }
 0x4d2   :  { %11012 = vmatpush1.bf16.msra.mxu0 %v13405_v62  ;;  %v13453_v62 = vcombine.low %v964_v38, %v968_v19  ;;  %v1012_v38 = vld [vmem:[%s19773_s1 + $0x1ed0] sm:$0xff] }
 0x4d3   :  { %11545 = vmatpush1.bf16.msra.mxu1 %v13407_v50  ;;  %11022 = vmatprep.subr.bf16.mxu0 %v13414_v52  ;;  %v13455_v50 = vcombine.low %v965_v39, %v969_v51  ;;  %v13462_v52 = vcombine.high %v972_v34, %v976_v46  ;;  %v1016_v19 = vld [vmem:[%s19773_s1 + $0x1ef0] sm:$0xff]  ;;  %v1013_v39 = vld [vmem:[%s19773_s1 + $0x1ed8] sm:$0xff] }
 0x4d4   :  { %11555 = vmatprep.subr.bf16.mxu1 %v13416_v54  ;;  %v13464_v54 = vcombine.high %v973_v49, %v977_v59  ;;  %v1017_v51 = vld [vmem:[%s19773_s1 + $0x1ef8] sm:$0xff] }
 0x4d5   :  { %11014 = vmatmul.mubr.bf16.vlgmr.msra.gmra.mrb[4].mxu0 %v16044_v7 }
 0x4d6   :  { %11023 = vmatpush1.bf16.msra.mxu0 %v13413_v63  ;;  %11547 = vmatmul.mubr.bf16.vlgmr.msra.gmra.mrb[4].mxu1 %v16044_v7  ;;  %v949_v7 = vld [vmem:[%s19773_s1 + $0x1cd8] sm:$0xff]  ;;  %v13461_v63 = vcombine.low %v972_v34, %v976_v46  ;;  %v1020_v34 = vld [vmem:[%s19773_s1 + $0x1f10] sm:$0xff] }
 0x4d7   :  { %11556 = vmatpush1.bf16.msra.mxu1 %v13415_v44  ;;  %11024 = vmatprep.subr.bf16.mxu0 %v13422_v9  ;;  %v13440_v30 = vcombine.high %v949_v7, %v953_v58  ;;  %v13439_v36 = vcombine.low %v949_v7, %v953_v58  ;;  %v13463_v44 = vcombine.low %v973_v49, %v977_v59  ;;  %v997_v7 = vld [vmem:[%s19773_s1 + $0x1e58] sm:$0xff]  ;;  %v1024_v46 = vld [vmem:[%s19773_s1 + $0x1f30] sm:$0xff] }
 0x4d8   :  { %11557 = vmatprep.subr.bf16.mxu1 %v13424_v10  ;;  %11054 = vmatprep.mubr.bf16.mxu0 %v16060_v17  ;;  %v13470_v9 = vcombine.high %v980_v55, %v984_v60  ;;  %v13472_v10 = vcombine.high %v981_v61, %v985_v0  ;;  %v1001_v58 = vld [vmem:[%s19773_s1 + $0x1e78] sm:$0xff] }
 0x4d9   :  { %11587 = vmatprep.mubr.bf16.mxu1 %v16060_v17  ;;  %v957_v17 = vld [vmem:[%s19773_s1 + $0x1d18] sm:$0xff] }
 0x4da   :  { %11025 = vmatpush1.bf16.msra.mxu0 %v13421_v20  ;;  %v13448_v53 = vcombine.high %v957_v17, %v961_v48  ;;  %v13447_v42 = vcombine.low %v957_v17, %v961_v48  ;;  %v13469_v20 = vcombine.low %v980_v55, %v984_v60  ;;  %v1005_v17 = vld [vmem:[%s19773_s1 + $0x1e98] sm:$0xff]  ;;  %v1028_v55 = vld [vmem:[%s19773_s1 + $0x1f50] sm:$0xff] }
 0x4db   :  { %11558 = vmatpush1.bf16.msra.mxu1 %v13423_v21  ;;  %11026 = vmatprep.subr.bf16.mxu0 %v13430_v22  ;;  %v13471_v21 = vcombine.low %v981_v61, %v985_v0  ;;  %v13478_v22 = vcombine.high %v988_v11, %v992_v12  ;;  %v1009_v48 = vld [vmem:[%s19773_s1 + $0x1eb8] sm:$0xff]  ;;  %v1032_v60 = vld [vmem:[%s19773_s1 + $0x1f70] sm:$0xff] }
 0x4dc   :  { %11559 = vmatprep.subr.bf16.mxu1 %v13432_v24  ;;  %v13480_v24 = vcombine.high %v989_v1, %v993_v16  ;;  %v1021_v49 = vld [vmem:[%s19773_s1 + $0x1f18] sm:$0xff] }
 0x4dd   :  { %v1025_v59 = vld [vmem:[%s19773_s1 + $0x1f38] sm:$0xff] }
 0x4de   :  { %11027 = vmatpush1.bf16.msra.mxu0 %v13429_v47  ;;  %v13477_v47 = vcombine.low %v988_v11, %v992_v12  ;;  %v1029_v61 = vld [vmem:[%s19773_s1 + $0x1f58] sm:$0xff]  ;;  %v1036_v11 = vld [vmem:[%s19773_s1 + $0x1f90] sm:$0xff] }
 0x4df   :  { %11560 = vmatpush1.bf16.msra.mxu1 %v13431_v28  ;;  %11028 = vmatprep.subr.bf16.mxu0 %v13438_v29  ;;  %v13479_v28 = vcombine.low %v989_v1, %v993_v16  ;;  %v13486_v29 = vcombine.high %v996_v40, %v1000_v33  ;;  %v1033_v0 = vld [vmem:[%s19773_s1 + $0x1f78] sm:$0xff]  ;;  %v1040_v12 = vld [vmem:[%s19773_s1 + $0x1fb0] sm:$0xff] }
 0x4e0   :  { %11561 = vmatprep.subr.bf16.mxu1 %v13440_v30  ;;  %v13488_v30 = vcombine.high %v997_v7, %v1001_v58  ;;  %v1037_v1 = vld [vmem:[%s19773_s1 + $0x1f98] sm:$0xff] }
 0x4e1   :  { %v1041_v16 = vld [vmem:[%s19773_s1 + $0x1fb8] sm:$0xff] }
 0x4e2   :  { %11029 = vmatpush1.bf16.msra.mxu0 %v13437_v4  ;;  %v13485_v4 = vcombine.low %v996_v40, %v1000_v33  ;;  %v1044_v40 = vld [vmem:[%s19773_s1 + $0x1fd0] sm:$0xff] }
 0x4e3   :  { %11562 = vmatpush1.bf16.msra.mxu1 %v13439_v36  ;;  %11030 = vmatprep.subr.bf16.mxu0 %v13446_v27  ;;  %v13487_v36 = vcombine.low %v997_v7, %v1001_v58  ;;  %v13494_v27 = vcombine.high %v1004_v32, %v1008_v35  ;;  %v1048_v33 = vld [vmem:[%s19773_s1 + $0x1ff0] sm:$0xff]  ;;  %v1045_v7 = vld [vmem:[%s19773_s1 + $0x1fd8] sm:$0xff] }
 0x4e4   :  { %11563 = vmatprep.subr.bf16.mxu1 %v13448_v53  ;;  %v13496_v53 = vcombine.high %v1005_v17, %v1009_v48  ;;  %v1049_v58 = vld [vmem:[%s19773_s1 + $0x1ff8] sm:$0xff] }
 0x4e6   :  { %11031 = vmatpush1.bf16.msra.mxu0 %v13445_v41  ;;  %v13493_v41 = vcombine.low %v1004_v32, %v1008_v35  ;;  %v1052_v32 = vld [vmem:[%s19773_s1 + $0x2010] sm:$0xff] }
 0x4e7   :  { %11564 = vmatpush1.bf16.msra.mxu1 %v13447_v42  ;;  %11032 = vmatprep.subr.bf16.mxu0 %v13454_v37  ;;  %v13495_v42 = vcombine.low %v1005_v17, %v1009_v48  ;;  %v13502_v37 = vcombine.high %v1012_v38, %v1016_v19  ;;  %v1056_v35 = vld [vmem:[%s19773_s1 + $0x2030] sm:$0xff]  ;;  %v1053_v17 = vld [vmem:[%s19773_s1 + $0x2018] sm:$0xff] }
 0x4e8   :  { %11565 = vmatprep.subr.bf16.mxu1 %v13456_v45  ;;  %v13504_v45 = vcombine.high %v1013_v39, %v1017_v51  ;;  %v1057_v48 = vld [vmem:[%s19773_s1 + $0x2038] sm:$0xff] }
 0x4ea   :  { %11033 = vmatpush1.bf16.msra.mxu0 %v13453_v62  ;;  %v13501_v62 = vcombine.low %v1012_v38, %v1016_v19  ;;  %v1060_v38 = vld [vmem:[%s19773_s1 + $0x2050] sm:$0xff] }
 0x4eb   :  { %11566 = vmatpush1.bf16.msra.mxu1 %v13455_v50  ;;  %11034 = vmatprep.subr.bf16.mxu0 %v13462_v52  ;;  %v13503_v50 = vcombine.low %v1013_v39, %v1017_v51  ;;  %v13510_v52 = vcombine.high %v1020_v34, %v1024_v46  ;;  %v1064_v19 = vld [vmem:[%s19773_s1 + $0x2070] sm:$0xff]  ;;  %v1061_v39 = vld [vmem:[%s19773_s1 + $0x2058] sm:$0xff] }
 0x4ec   :  { %11567 = vmatprep.subr.bf16.mxu1 %v13464_v54  ;;  %v13512_v54 = vcombine.high %v1021_v49, %v1025_v59  ;;  %v1065_v51 = vld [vmem:[%s19773_s1 + $0x2078] sm:$0xff] }
 0x4ee   :  { %11035 = vmatpush1.bf16.msra.mxu0 %v13461_v63  ;;  %v13509_v63 = vcombine.low %v1020_v34, %v1024_v46  ;;  %v1068_v34 = vld [vmem:[%s19773_s1 + $0x2090] sm:$0xff] }
 0x4ef   :  { %11568 = vmatpush1.bf16.msra.mxu1 %v13463_v44  ;;  %11036 = vmatprep.subr.bf16.mxu0 %v13470_v9  ;;  %v13511_v44 = vcombine.low %v1021_v49, %v1025_v59  ;;  %v13518_v9 = vcombine.high %v1028_v55, %v1032_v60  ;;  %v1072_v46 = vld [vmem:[%s19773_s1 + $0x20b0] sm:$0xff]  ;;  %v1069_v49 = vld [vmem:[%s19773_s1 + $0x2098] sm:$0xff] }
 0x4f0   :  { %11569 = vmatprep.subr.bf16.mxu1 %v13472_v10  ;;  %v13520_v10 = vcombine.high %v1029_v61, %v1033_v0  ;;  %v1073_v59 = vld [vmem:[%s19773_s1 + $0x20b8] sm:$0xff] }
 0x4f2   :  { %11037 = vmatpush1.bf16.msra.mxu0 %v13469_v20  ;;  %v13517_v20 = vcombine.low %v1028_v55, %v1032_v60  ;;  %v1076_v55 = vld [vmem:[%s19773_s1 + $0x20d0] sm:$0xff] }
 0x4f3   :  { %11570 = vmatpush1.bf16.msra.mxu1 %v13471_v21  ;;  %11038 = vmatprep.subr.bf16.mxu0 %v13478_v22  ;;  %v13519_v21 = vcombine.low %v1029_v61, %v1033_v0  ;;  %v13526_v22 = vcombine.high %v1036_v11, %v1040_v12  ;;  %v1080_v60 = vld [vmem:[%s19773_s1 + $0x20f0] sm:$0xff]  ;;  %v1081_v61 = vld [vmem:[%s19773_s1 + $0x20f8] sm:$0xff]  ;;  %v13557_v0 = vcombine.low %v1068_v34, %v1072_v46 }
 0x4f4   :  { %11571 = vmatprep.subr.bf16.mxu1 %v13480_v24  ;;  %v13528_v24 = vcombine.high %v1037_v1, %v1041_v16 }
 0x4f6   :  { %11039 = vmatpush1.bf16.msra.mxu0 %v13477_v47  ;;  %v13525_v47 = vcombine.low %v1036_v11, %v1040_v12  ;;  %v1088_v11 = vld [vmem:[%s19773_s1 + $0x2130] sm:$0xff]  ;;  %v1089_v12 = vld [vmem:[%s19773_s1 + $0x2138] sm:$0xff] }
 0x4f7   :  { %11572 = vmatpush1.bf16.msra.mxu1 %v13479_v28  ;;  %11040 = vmatprep.subr.bf16.mxu0 %v13486_v29  ;;  %v13527_v28 = vcombine.low %v1037_v1, %v1041_v16  ;;  %v13534_v29 = vcombine.high %v1044_v40, %v1048_v33  ;;  %v13565_v1 = vcombine.low %v1076_v55, %v1080_v60 }
 0x4f8   :  { %11573 = vmatprep.subr.bf16.mxu1 %v13488_v30  ;;  %v13536_v30 = vcombine.high %v1045_v7, %v1049_v58 }
 0x4fa   :  { %11041 = vmatpush1.bf16.msra.mxu0 %v13485_v4  ;;  %v13533_v4 = vcombine.low %v1044_v40, %v1048_v33  ;;  %v1093_v40 = vld [vmem:[%s19773_s1 + $0x2158] sm:$0xff] }
 0x4fb   :  { %11574 = vmatpush1.bf16.msra.mxu1 %v13487_v36  ;;  %11042 = vmatprep.subr.bf16.mxu0 %v13494_v27  ;;  %v13535_v36 = vcombine.low %v1045_v7, %v1049_v58  ;;  %v13542_v27 = vcombine.high %v1052_v32, %v1056_v35  ;;  %v1097_v33 = vld [vmem:[%s19773_s1 + $0x2178] sm:$0xff] }
 0x4fc   :  { %11575 = vmatprep.subr.bf16.mxu1 %v13496_v53  ;;  %v13544_v53 = vcombine.high %v1053_v17, %v1057_v48 }
 0x4fe   :  { %11043 = vmatpush1.bf16.msra.mxu0 %v13493_v41  ;;  %v13541_v41 = vcombine.low %v1052_v32, %v1056_v35  ;;  %v1101_v32 = vld [vmem:[%s19773_s1 + $0x2198] sm:$0xff] }
 0x4ff   :  { %11576 = vmatpush1.bf16.msra.mxu1 %v13495_v42  ;;  %11044 = vmatprep.subr.bf16.mxu0 %v13502_v37  ;;  %v13543_v42 = vcombine.low %v1053_v17, %v1057_v48  ;;  %v13550_v37 = vcombine.high %v1060_v38, %v1064_v19  ;;  %v1105_v35 = vld [vmem:[%s19773_s1 + $0x21b8] sm:$0xff]  ;;  %v13583_v48 = vcombine.low %v1093_v40, %v1097_v33 }
 0x500   :  { %11577 = vmatprep.subr.bf16.mxu1 %v13504_v45  ;;  %v13552_v45 = vcombine.high %v1061_v39, %v1065_v51 }
 0x502   :  { %11045 = vmatpush1.bf16.msra.mxu0 %v13501_v62  ;;  %v13549_v62 = vcombine.low %v1060_v38, %v1064_v19  ;;  %v1109_v38 = vld [vmem:[%s19773_s1 + $0x21d8] sm:$0xff] }
 0x503   :  { %11578 = vmatpush1.bf16.msra.mxu1 %v13503_v50  ;;  %11046 = vmatprep.subr.bf16.mxu0 %v13510_v52  ;;  %v13551_v50 = vcombine.low %v1061_v39, %v1065_v51  ;;  %v13558_v52 = vcombine.high %v1068_v34, %v1072_v46  ;;  %v1113_v19 = vld [vmem:[%s19773_s1 + $0x21f8] sm:$0xff]  ;;  %v13591_v51 = vcombine.low %v1101_v32, %v1105_v35 }
 0x504   :  { %11579 = vmatprep.subr.bf16.mxu1 %v13512_v54  ;;  %v13560_v54 = vcombine.high %v1069_v49, %v1073_v59  ;;  %v1117_v34 = vld [vmem:[%s19773_s1 + $0x2218] sm:$0xff] }
 0x505   :  { %v1121_v46 = vld [vmem:[%s19773_s1 + $0x2238] sm:$0xff] }
 0x506   :  { %11047 = vmatpush1.bf16.msra.mxu0 %v13509_v63  ;;  %v13559_v63 = vcombine.low %v1069_v49, %v1073_v59  ;;  %v13599_v59 = vcombine.low %v1109_v38, %v1113_v19 }
 0x507   :  { %11580 = vmatpush1.bf16.msra.mxu1 %v13511_v44  ;;  %11048 = vmatprep.subr.bf16.mxu0 %v13518_v9  ;;  %v13566_v44 = vcombine.high %v1076_v55, %v1080_v60  ;;  %v1125_v55 = vld [vmem:[%s19773_s1 + $0x2258] sm:$0xff] }
 0x508   :  { %11581 = vmatprep.subr.bf16.mxu1 %v13520_v10  ;;  %v1084_v10 = vld [vmem:[%s19773_s1 + $0x2110] sm:$0xff]  ;;  %v1129_v60 = vld [vmem:[%s19773_s1 + $0x2278] sm:$0xff] }
 0x509   :  { %v13573_v7 = vcombine.low %v1084_v10, %v1088_v11 }
 0x50a   :  { %11049 = vmatpush1.bf16.msra.mxu0 %v13517_v20  ;;  %v13574_v20 = vcombine.high %v1084_v10, %v1088_v11  ;;  %v1133_v10 = vld [vmem:[%s19773_s1 + $0x2298] sm:$0xff] }
 0x50b   :  { %11582 = vmatpush1.bf16.msra.mxu1 %v13519_v21  ;;  %11050 = vmatprep.subr.bf16.mxu0 %v13526_v22  ;;  %v1092_v22 = vld [vmem:[%s19773_s1 + $0x2150] sm:$0xff]  ;;  %v1137_v11 = vld [vmem:[%s19773_s1 + $0x22b8] sm:$0xff] }
 0x50c   :  { %11583 = vmatprep.subr.bf16.mxu1 %v13528_v24  ;;  %v1096_v24 = vld [vmem:[%s19773_s1 + $0x2170] sm:$0xff] }
 0x50d   :  { %v13581_v17 = vcombine.low %v1092_v22, %v1096_v24 }
 0x50e   :  { %11051 = vmatpush1.bf16.msra.mxu0 %v13525_v47  ;;  %v13582_v47 = vcombine.high %v1092_v22, %v1096_v24  ;;  %v1141_v22 = vld [vmem:[%s19773_s1 + $0x22d8] sm:$0xff] }
 0x50f   :  { %11584 = vmatpush1.bf16.msra.mxu1 %v13527_v28  ;;  %11052 = vmatprep.subr.bf16.mxu0 %v13534_v29  ;;  %v13584_v28 = vcombine.high %v1093_v40, %v1097_v33  ;;  %v1100_v29 = vld [vmem:[%s19773_s1 + $0x2190] sm:$0xff]  ;;  %v1145_v24 = vld [vmem:[%s19773_s1 + $0x22f8] sm:$0xff]  ;;  %v13623_v33 = vcombine.low %v1133_v10, %v1137_v11 }
 0x510   :  { %11585 = vmatprep.subr.bf16.mxu1 %v13536_v30  ;;  %v1104_v30 = vld [vmem:[%s19773_s1 + $0x21b0] sm:$0xff] }
 0x511   :  { %v13589_v39 = vcombine.low %v1100_v29, %v1104_v30 }
 0x512   :  { %11053 = vmatpush1.bf16.msra.mxu0 %v13533_v4  ;;  %v13590_v4 = vcombine.high %v1100_v29, %v1104_v30  ;;  %v1149_v29 = vld [vmem:[%s19773_s1 + $0x2318] sm:$0xff] }
 0x513   :  { %11586 = vmatpush1.bf16.msra.mxu1 %v13535_v36  ;;  %11063 = vmatprep.subr.bf16.mxu0 %v13542_v27  ;;  %v13592_v36 = vcombine.high %v1101_v32, %v1105_v35  ;;  %v1108_v27 = vld [vmem:[%s19773_s1 + $0x21d0] sm:$0xff]  ;;  %v1153_v30 = vld [vmem:[%s19773_s1 + $0x2338] sm:$0xff]  ;;  %v13631_v35 = vcombine.low %v1141_v22, %v1145_v24 }
 0x514   :  { %11596 = vmatprep.subr.bf16.mxu1 %v13544_v53  ;;  %v1112_v53 = vld [vmem:[%s19773_s1 + $0x21f0] sm:$0xff] }
 0x515   :  { %11055 = vmatmul.mubr.bf16.vlgmr.msra.gmra.mrb[4].mxu0 %v16259_v57  ;;  %v13597_v49 = vcombine.low %v1108_v27, %v1112_v53 }
 0x516   :  { %11064 = vmatpush1.bf16.msra.mxu0 %v13541_v41  ;;  %11588 = vmatmul.mubr.bf16.vlgmr.msra.gmra.mrb[4].mxu1 %v16259_v57  ;;  %v1077_v57 = vld [vmem:[%s19773_s1 + $0x20d8] sm:$0xff]  ;;  %v13598_v41 = vcombine.high %v1108_v27, %v1112_v53 }
 0x517   :  { %11597 = vmatpush1.bf16.msra.mxu1 %v13543_v42  ;;  %11065 = vmatprep.subr.bf16.mxu0 %v13550_v37  ;;  %v13568_v9 = vcombine.high %v1077_v57, %v1081_v61  ;;  %v13567_v16 = vcombine.low %v1077_v57, %v1081_v61  ;;  %v13600_v42 = vcombine.high %v1109_v38, %v1113_v19  ;;  %v1116_v37 = vld [vmem:[%s19773_s1 + $0x2210] sm:$0xff]  ;;  %v1157_v27 = vld [vmem:[%s19773_s1 + $0x2358] sm:$0xff] }
 0x518   :  { %11598 = vmatprep.subr.bf16.mxu1 %v13552_v45  ;;  %11095 = vmatprep.mubr.bf16.mxu0 %v16274_v6  ;;  %v1120_v45 = vld [vmem:[%s19773_s1 + $0x2230] sm:$0xff]  ;;  %v13607_v61 = vcombine.low %v1117_v34, %v1121_v46  ;;  %v1161_v53 = vld [vmem:[%s19773_s1 + $0x2378] sm:$0xff]  ;;  %v13639_v19 = vcombine.low %v1149_v29, %v1153_v30 }
 0x519   :  { %11628 = vmatprep.mubr.bf16.mxu1 %v16274_v6  ;;  %v1085_v6 = vld [vmem:[%s19773_s1 + $0x2118] sm:$0xff]  ;;  %v13605_v57 = vcombine.low %v1116_v37, %v1120_v45 }
 0x51a   :  { %11066 = vmatpush1.bf16.msra.mxu0 %v13549_v62  ;;  %v13576_v21 = vcombine.high %v1085_v6, %v1089_v12  ;;  %v13575_v58 = vcombine.low %v1085_v6, %v1089_v12  ;;  %v13606_v62 = vcombine.high %v1116_v37, %v1120_v45  ;;  %v13615_v12 = vcombine.low %v1125_v55, %v1129_v60  ;;  %v1165_v37 = vld [vmem:[%s19773_s1 + $0x2398] sm:$0xff] }
 0x51b   :  { %11599 = vmatpush1.bf16.msra.mxu1 %v13551_v50  ;;  %11067 = vmatprep.subr.bf16.mxu0 %v13558_v52  ;;  %v13608_v50 = vcombine.high %v1117_v34, %v1121_v46  ;;  %v1124_v52 = vld [vmem:[%s19773_s1 + $0x2250] sm:$0xff]  ;;  %v1169_v45 = vld [vmem:[%s19773_s1 + $0x23b8] sm:$0xff]  ;;  %v13647_v46 = vcombine.low %v1157_v27, %v1161_v53 }
 0x51c   :  { %11600 = vmatprep.subr.bf16.mxu1 %v13560_v54  ;;  %v1128_v54 = vld [vmem:[%s19773_s1 + $0x2270] sm:$0xff] }
 0x51d   :  { %v13613_v6 = vcombine.low %v1124_v52, %v1128_v54 }
 0x51e   :  { %11068 = vmatpush1.bf16.msra.mxu0 %v13557_v0  ;;  %v13614_v0 = vcombine.high %v1124_v52, %v1128_v54  ;;  %v1173_v52 = vld [vmem:[%s19773_s1 + $0x23d8] sm:$0xff] }
 0x51f   :  { %11601 = vmatpush1.bf16.msra.mxu1 %v13559_v63  ;;  %11069 = vmatprep.subr.bf16.mxu0 %v13566_v44  ;;  %v13616_v63 = vcombine.high %v1125_v55, %v1129_v60  ;;  %v1132_v44 = vld [vmem:[%s19773_s1 + $0x2290] sm:$0xff]  ;;  %v1177_v54 = vld [vmem:[%s19773_s1 + $0x23f8] sm:$0xff]  ;;  %v13655_v60 = vcombine.low %v1165_v37, %v1169_v45 }
 0x520   :  { %11602 = vmatprep.subr.bf16.mxu1 %v13568_v9  ;;  %v1136_v9 = vld [vmem:[%s19773_s1 + $0x22b0] sm:$0xff] }
 0x521   :  { %v13621_v40 = vcombine.low %v1132_v44, %v1136_v9 }
 0x522   :  { %11070 = vmatpush1.bf16.msra.mxu0 %v13565_v1  ;;  %v13622_v1 = vcombine.high %v1132_v44, %v1136_v9  ;;  %v1181_v44 = vld [vmem:[%s19773_s1 + $0x2418] sm:$0xff] }
 0x523   :  { %11603 = vmatpush1.bf16.msra.mxu1 %v13567_v16  ;;  %11071 = vmatprep.subr.bf16.mxu0 %v13574_v20  ;;  %v13624_v16 = vcombine.high %v1133_v10, %v1137_v11  ;;  %v1140_v20 = vld [vmem:[%s19773_s1 + $0x22d0] sm:$0xff]  ;;  %v1185_v9 = vld [vmem:[%s19773_s1 + $0x2438] sm:$0xff]  ;;  %v13663_v11 = vcombine.low %v1173_v52, %v1177_v54 }
 0x524   :  { %11604 = vmatprep.subr.bf16.mxu1 %v13576_v21  ;;  %v1144_v21 = vld [vmem:[%s19773_s1 + $0x22f0] sm:$0xff] }
 0x525   :  { %v13629_v32 = vcombine.low %v1140_v20, %v1144_v21 }
 0x526   :  { %11072 = vmatpush1.bf16.msra.mxu0 %v13573_v7  ;;  %v13630_v7 = vcombine.high %v1140_v20, %v1144_v21  ;;  %v1189_v20 = vld [vmem:[%s19773_s1 + $0x2458] sm:$0xff] }
 0x527   :  { %11605 = vmatpush1.bf16.msra.mxu1 %v13575_v58  ;;  %11073 = vmatprep.subr.bf16.mxu0 %v13582_v47  ;;  %v13632_v58 = vcombine.high %v1141_v22, %v1145_v24  ;;  %v1148_v47 = vld [vmem:[%s19773_s1 + $0x2310] sm:$0xff]  ;;  %v1193_v21 = vld [vmem:[%s19773_s1 + $0x2478] sm:$0xff]  ;;  %v13671_v24 = vcombine.low %v1181_v44, %v1185_v9 }
 0x528   :  { %11606 = vmatprep.subr.bf16.mxu1 %v13584_v28  ;;  %v1152_v28 = vld [vmem:[%s19773_s1 + $0x2330] sm:$0xff] }
 0x529   :  { %v13637_v38 = vcombine.low %v1148_v47, %v1152_v28 }
 0x52a   :  { %11074 = vmatpush1.bf16.msra.mxu0 %v13581_v17  ;;  %v13638_v17 = vcombine.high %v1148_v47, %v1152_v28  ;;  %v1197_v47 = vld [vmem:[%s19773_s1 + $0x2498] sm:$0xff] }
 0x52b   :  { %11607 = vmatpush1.bf16.msra.mxu1 %v13583_v48  ;;  %11075 = vmatprep.subr.bf16.mxu0 %v13590_v4  ;;  %v13640_v48 = vcombine.high %v1149_v29, %v1153_v30  ;;  %v1156_v4 = vld [vmem:[%s19773_s1 + $0x2350] sm:$0xff]  ;;  %v1201_v28 = vld [vmem:[%s19773_s1 + $0x24b8] sm:$0xff]  ;;  %v13679_v30 = vcombine.low %v1189_v20, %v1193_v21 }
 0x52c   :  { %11608 = vmatprep.subr.bf16.mxu1 %v13592_v36  ;;  %v1160_v36 = vld [vmem:[%s19773_s1 + $0x2370] sm:$0xff] }
 0x52d   :  { %v13645_v34 = vcombine.low %v1156_v4, %v1160_v36 }
 0x52e   :  { %11076 = vmatpush1.bf16.msra.mxu0 %v13589_v39  ;;  %v13646_v39 = vcombine.high %v1156_v4, %v1160_v36  ;;  %v1209_v4 = vld [vmem:[%s19773_s1 + $0x24f8] sm:$0xff] }
 0x52f   :  { %11609 = vmatpush1.bf16.msra.mxu1 %v13591_v51  ;;  %11077 = vmatprep.subr.bf16.mxu0 %v13598_v41  ;;  %v13648_v51 = vcombine.high %v1157_v27, %v1161_v53  ;;  %v1164_v41 = vld [vmem:[%s19773_s1 + $0x2390] sm:$0xff]  ;;  %v13687_v27 = vcombine.low %v1197_v47, %v1201_v28 }
 0x530   :  { %11610 = vmatprep.subr.bf16.mxu1 %v13600_v42  ;;  %v1168_v42 = vld [vmem:[%s19773_s1 + $0x23b0] sm:$0xff] }
 0x531   :  { %v13653_v55 = vcombine.low %v1164_v41, %v1168_v42 }
 0x532   :  { %11078 = vmatpush1.bf16.msra.mxu0 %v13597_v49  ;;  %v13654_v49 = vcombine.high %v1164_v41, %v1168_v42 }
 0x533   :  { %11611 = vmatpush1.bf16.msra.mxu1 %v13599_v59  ;;  %11079 = vmatprep.subr.bf16.mxu0 %v13606_v62  ;;  %v13656_v59 = vcombine.high %v1165_v37, %v1169_v45  ;;  %v1172_v62 = vld [vmem:[%s19773_s1 + $0x23d0] sm:$0xff] }
 0x534   :  { %11612 = vmatprep.subr.bf16.mxu1 %v13608_v50  ;;  %v1176_v50 = vld [vmem:[%s19773_s1 + $0x23f0] sm:$0xff] }
 0x535   :  { %v13661_v10 = vcombine.low %v1172_v62, %v1176_v50 }
 0x536   :  { %11080 = vmatpush1.bf16.msra.mxu0 %v13605_v57  ;;  %v13662_v57 = vcombine.high %v1172_v62, %v1176_v50 }
 0x537   :  { %11613 = vmatpush1.bf16.msra.mxu1 %v13607_v61  ;;  %11081 = vmatprep.subr.bf16.mxu0 %v13614_v0  ;;  %v13664_v61 = vcombine.high %v1173_v52, %v1177_v54  ;;  %v1180_v0 = vld [vmem:[%s19773_s1 + $0x2410] sm:$0xff] }
 0x538   :  { %11614 = vmatprep.subr.bf16.mxu1 %v13616_v63  ;;  %v1184_v63 = vld [vmem:[%s19773_s1 + $0x2430] sm:$0xff] }
 0x539   :  { %v13669_v22 = vcombine.low %v1180_v0, %v1184_v63 }
 0x53a   :  { %11082 = vmatpush1.bf16.msra.mxu0 %v13613_v6  ;;  %v13670_v6 = vcombine.high %v1180_v0, %v1184_v63 }
 0x53b   :  { %11615 = vmatpush1.bf16.msra.mxu1 %v13615_v12  ;;  %11083 = vmatprep.subr.bf16.mxu0 %v13622_v1  ;;  %v13672_v12 = vcombine.high %v1181_v44, %v1185_v9  ;;  %v1188_v1 = vld [vmem:[%s19773_s1 + $0x2450] sm:$0xff] }
 0x53c   :  { %11616 = vmatprep.subr.bf16.mxu1 %v13624_v16  ;;  %v1192_v16 = vld [vmem:[%s19773_s1 + $0x2470] sm:$0xff] }
 0x53d   :  { %v13677_v29 = vcombine.low %v1188_v1, %v1192_v16 }
 0x53e   :  { %11084 = vmatpush1.bf16.msra.mxu0 %v13621_v40  ;;  %v13678_v40 = vcombine.high %v1188_v1, %v1192_v16 }
 0x53f   :  { %11617 = vmatpush1.bf16.msra.mxu1 %v13623_v33  ;;  %11085 = vmatprep.subr.bf16.mxu0 %v13630_v7  ;;  %v13680_v33 = vcombine.high %v1189_v20, %v1193_v21  ;;  %v1196_v7 = vld [vmem:[%s19773_s1 + $0x2490] sm:$0xff] }
 0x540   :  { %11618 = vmatprep.subr.bf16.mxu1 %v13632_v58  ;;  %v1200_v58 = vld [vmem:[%s19773_s1 + $0x24b0] sm:$0xff] }
 0x541   :  { %v13685_v36 = vcombine.low %v1196_v7, %v1200_v58 }
 0x542   :  { %11086 = vmatpush1.bf16.msra.mxu0 %v13629_v32  ;;  %v13686_v32 = vcombine.high %v1196_v7, %v1200_v58 }
 0x543   :  { %11619 = vmatpush1.bf16.msra.mxu1 %v13631_v35  ;;  %11087 = vmatprep.subr.bf16.mxu0 %v13638_v17  ;;  %v13688_v35 = vcombine.high %v1197_v47, %v1201_v28  ;;  %v1204_v17 = vld [vmem:[%s19773_s1 + $0x24d0] sm:$0xff] }
 0x544   :  { %11620 = vmatprep.subr.bf16.mxu1 %v13640_v48  ;;  %v1208_v48 = vld [vmem:[%s19773_s1 + $0x24f0] sm:$0xff] }
 0x545   :  { %v13694_v53 = vcombine.high %v1204_v17, %v1208_v48  ;;  %v13693_v41 = vcombine.low %v1204_v17, %v1208_v48 }
 0x546   :  { %11088 = vmatpush1.bf16.msra.mxu0 %v13637_v38 }
 0x547   :  { %11621 = vmatpush1.bf16.msra.mxu1 %v13639_v19  ;;  %11089 = vmatprep.subr.bf16.mxu0 %v13646_v39  ;;  %v1212_v19 = vld [vmem:[%s19773_s1 + $0x2510] sm:$0xff] }
 0x548   :  { %11622 = vmatprep.subr.bf16.mxu1 %v13648_v51  ;;  %v1216_v39 = vld [vmem:[%s19773_s1 + $0x2530] sm:$0xff]  ;;  %v1217_v51 = vld [vmem:[%s19773_s1 + $0x2538] sm:$0xff] }
 0x549   :  { %v13702_v37 = vcombine.high %v1212_v19, %v1216_v39  ;;  %v13701_v62 = vcombine.low %v1212_v19, %v1216_v39 }
 0x54a   :  { %11090 = vmatpush1.bf16.msra.mxu0 %v13645_v34  ;;  %v1220_v34 = vld [vmem:[%s19773_s1 + $0x2550] sm:$0xff] }
 0x54b   :  { %11623 = vmatpush1.bf16.msra.mxu1 %v13647_v46  ;;  %11091 = vmatprep.subr.bf16.mxu0 %v13654_v49  ;;  %v1224_v46 = vld [vmem:[%s19773_s1 + $0x2570] sm:$0xff]  ;;  %v1221_v49 = vld [vmem:[%s19773_s1 + $0x2558] sm:$0xff] }
 0x54c   :  { %11624 = vmatprep.subr.bf16.mxu1 %v13656_v59  ;;  %v1225_v59 = vld [vmem:[%s19773_s1 + $0x2578] sm:$0xff]  ;;  %v13710_v52 = vcombine.high %v1220_v34, %v1224_v46  ;;  %v13709_v0 = vcombine.low %v1220_v34, %v1224_v46 }
 0x54d   :  { %v13712_v54 = vcombine.high %v1221_v49, %v1225_v59  ;;  %v13711_v63 = vcombine.low %v1221_v49, %v1225_v59 }
 0x54e   :  { %11092 = vmatpush1.bf16.msra.mxu0 %v13653_v55  ;;  %v1228_v55 = vld [vmem:[%s19773_s1 + $0x2590] sm:$0xff] }
 0x54f   :  { %11625 = vmatpush1.bf16.msra.mxu1 %v13655_v60  ;;  %11093 = vmatprep.subr.bf16.mxu0 %v13662_v57  ;;  %v1232_v60 = vld [vmem:[%s19773_s1 + $0x25b0] sm:$0xff]  ;;  %v1229_v57 = vld [vmem:[%s19773_s1 + $0x2598] sm:$0xff] }
 0x550   :  { %11626 = vmatprep.subr.bf16.mxu1 %v13664_v61  ;;  %v1233_v61 = vld [vmem:[%s19773_s1 + $0x25b8] sm:$0xff]  ;;  %v13718_v44 = vcombine.high %v1228_v55, %v1232_v60  ;;  %v13717_v1 = vcombine.low %v1228_v55, %v1232_v60 }
 0x551   :  { %v13720_v9 = vcombine.high %v1229_v57, %v1233_v61  ;;  %v13719_v16 = vcombine.low %v1229_v57, %v1233_v61 }
 0x552   :  { %11094 = vmatpush1.bf16.msra.mxu0 %v13661_v10  ;;  %v1236_v10 = vld [vmem:[%s19773_s1 + $0x25d0] sm:$0xff] }
 0x553   :  { %11627 = vmatpush1.bf16.msra.mxu1 %v13663_v11  ;;  %11104 = vmatprep.subr.bf16.mxu0 %v13670_v6  ;;  %v1240_v11 = vld [vmem:[%s19773_s1 + $0x25f0] sm:$0xff]  ;;  %v1237_v6 = vld [vmem:[%s19773_s1 + $0x25d8] sm:$0xff] }
 0x554   :  { %11637 = vmatprep.subr.bf16.mxu1 %v13672_v12  ;;  %v1241_v12 = vld [vmem:[%s19773_s1 + $0x25f8] sm:$0xff]  ;;  %v13726_v20 = vcombine.high %v1236_v10, %v1240_v11  ;;  %v13725_v7 = vcombine.low %v1236_v10, %v1240_v11 }
 0x555   :  { %11096 = vmatmul.mubr.bf16.vlgmr.msra.gmra.mrb[4].mxu0 %v16462_v56  ;;  %v13728_v21 = vcombine.high %v1237_v6, %v1241_v12  ;;  %v13727_v58 = vcombine.low %v1237_v6, %v1241_v12 }
 0x556   :  { %11105 = vmatpush1.bf16.msra.mxu0 %v13669_v22  ;;  %11629 = vmatmul.mubr.bf16.vlgmr.msra.gmra.mrb[4].mxu1 %v16462_v56  ;;  %v1205_v56 = vld [vmem:[%s19773_s1 + $0x24d8] sm:$0xff]  ;;  %v1244_v22 = vld [vmem:[%s19773_s1 + $0x2610] sm:$0xff] }
 0x557   :  { %11638 = vmatpush1.bf16.msra.mxu1 %v13671_v24  ;;  %11106 = vmatprep.subr.bf16.mxu0 %v13678_v40  ;;  %v13696_v38 = vcombine.high %v1205_v56, %v1209_v4  ;;  %v13695_v42 = vcombine.low %v1205_v56, %v1209_v4  ;;  %v1248_v24 = vld [vmem:[%s19773_s1 + $0x2630] sm:$0xff]  ;;  %v1245_v40 = vld [vmem:[%s19773_s1 + $0x2618] sm:$0xff] }
 0x558   :  { %11639 = vmatprep.subr.bf16.mxu1 %v13680_v33  ;;  %11136 = vmatprep.mubr.bf16.mxu0 %v16478_v5  ;;  %v1249_v33 = vld [vmem:[%s19773_s1 + $0x2638] sm:$0xff]  ;;  %v13734_v47 = vcombine.high %v1244_v22, %v1248_v24  ;;  %v13733_v17 = vcombine.low %v1244_v22, %v1248_v24 }
 0x559   :  { %11669 = vmatprep.mubr.bf16.mxu1 %v16478_v5  ;;  %v1213_v5 = vld [vmem:[%s19773_s1 + $0x2518] sm:$0xff]  ;;  %v13736_v28 = vcombine.high %v1245_v40, %v1249_v33  ;;  %v13735_v48 = vcombine.low %v1245_v40, %v1249_v33 }
 0x55a   :  { %11107 = vmatpush1.bf16.msra.mxu0 %v13677_v29  ;;  %v13704_v45 = vcombine.high %v1213_v5, %v1217_v51  ;;  %v13703_v50 = vcombine.low %v1213_v5, %v1217_v51  ;;  %v1252_v29 = vld [vmem:[%s19773_s1 + $0x2650] sm:$0xff] }
 0x55b   :  { %11640 = vmatpush1.bf16.msra.mxu1 %v13679_v30  ;;  %11108 = vmatprep.subr.bf16.mxu0 %v13686_v32  ;;  %v1256_v30 = vld [vmem:[%s19773_s1 + $0x2670] sm:$0xff]  ;;  %v1253_v32 = vld [vmem:[%s19773_s1 + $0x2658] sm:$0xff] }
 0x55c   :  { %11641 = vmatprep.subr.bf16.mxu1 %v13688_v35  ;;  %v1257_v35 = vld [vmem:[%s19773_s1 + $0x2678] sm:$0xff]  ;;  %v13742_v56 = vcombine.high %v1252_v29, %v1256_v30  ;;  %v13741_v19 = vcombine.low %v1252_v29, %v1256_v30 }
 0x55d   :  { %v13744_v4 = vcombine.high %v1253_v32, %v1257_v35  ;;  %v13743_v39 = vcombine.low %v1253_v32, %v1257_v35 }
 0x55e   :  { %11109 = vmatpush1.bf16.msra.mxu0 %v13685_v36  ;;  %v1260_v36 = vld [vmem:[%s19773_s1 + $0x2690] sm:$0xff] }
 0x55f   :  { %11642 = vmatpush1.bf16.msra.mxu1 %v13687_v27  ;;  %11110 = vmatprep.subr.bf16.mxu0 %v13694_v53  ;;  %v1264_v27 = vld [vmem:[%s19773_s1 + $0x26b0] sm:$0xff]  ;;  %v1261_v53 = vld [vmem:[%s19773_s1 + $0x2698] sm:$0xff] }
 0x560   :  { %11643 = vmatprep.subr.bf16.mxu1 %v13696_v38  ;;  %v1265_v38 = vld [vmem:[%s19773_s1 + $0x26b8] sm:$0xff]  ;;  %v13750_v5 = vcombine.high %v1260_v36, %v1264_v27  ;;  %v13749_v34 = vcombine.low %v1260_v36, %v1264_v27 }
 0x561   :  { %v13752_v51 = vcombine.high %v1261_v53, %v1265_v38  ;;  %v13751_v46 = vcombine.low %v1261_v53, %v1265_v38 }
 0x562   :  { %11111 = vmatpush1.bf16.msra.mxu0 %v13693_v41  ;;  %v1268_v41 = vld [vmem:[%s19773_s1 + $0x26d0] sm:$0xff] }
 0x563   :  { %11644 = vmatpush1.bf16.msra.mxu1 %v13695_v42  ;;  %11112 = vmatprep.subr.bf16.mxu0 %v13702_v37  ;;  %v1272_v42 = vld [vmem:[%s19773_s1 + $0x26f0] sm:$0xff]  ;;  %v1269_v37 = vld [vmem:[%s19773_s1 + $0x26d8] sm:$0xff] }
 0x564   :  { %11645 = vmatprep.subr.bf16.mxu1 %v13704_v45  ;;  %v1273_v45 = vld [vmem:[%s19773_s1 + $0x26f8] sm:$0xff]  ;;  %v13758_v49 = vcombine.high %v1268_v41, %v1272_v42  ;;  %v13757_v55 = vcombine.low %v1268_v41, %v1272_v42 }
 0x565   :  { %v13760_v59 = vcombine.high %v1269_v37, %v1273_v45  ;;  %v13759_v60 = vcombine.low %v1269_v37, %v1273_v45 }
 0x566   :  { %11113 = vmatpush1.bf16.msra.mxu0 %v13701_v62  ;;  %v1276_v62 = vld [vmem:[%s19773_s1 + $0x2710] sm:$0xff] }
 0x567   :  { %11646 = vmatpush1.bf16.msra.mxu1 %v13703_v50  ;;  %11114 = vmatprep.subr.bf16.mxu0 %v13710_v52  ;;  %v1280_v50 = vld [vmem:[%s19773_s1 + $0x2730] sm:$0xff]  ;;  %v1277_v52 = vld [vmem:[%s19773_s1 + $0x2718] sm:$0xff] }
 0x568   :  { %11647 = vmatprep.subr.bf16.mxu1 %v13712_v54  ;;  %v1281_v54 = vld [vmem:[%s19773_s1 + $0x2738] sm:$0xff]  ;;  %v13766_v57 = vcombine.high %v1276_v62, %v1280_v50  ;;  %v13765_v10 = vcombine.low %v1276_v62, %v1280_v50 }
 0x569   :  { %v13768_v61 = vcombine.high %v1277_v52, %v1281_v54  ;;  %v13767_v11 = vcombine.low %v1277_v52, %v1281_v54 }
 0x56a   :  { %11115 = vmatpush1.bf16.msra.mxu0 %v13709_v0  ;;  %v1284_v0 = vld [vmem:[%s19773_s1 + $0x2750] sm:$0xff] }
 0x56b   :  { %11648 = vmatpush1.bf16.msra.mxu1 %v13711_v63  ;;  %11116 = vmatprep.subr.bf16.mxu0 %v13718_v44  ;;  %v1288_v63 = vld [vmem:[%s19773_s1 + $0x2770] sm:$0xff]  ;;  %v1285_v44 = vld [vmem:[%s19773_s1 + $0x2758] sm:$0xff] }
 0x56c   :  { %11649 = vmatprep.subr.bf16.mxu1 %v13720_v9  ;;  %v1289_v9 = vld [vmem:[%s19773_s1 + $0x2778] sm:$0xff]  ;;  %v13774_v6 = vcombine.high %v1284_v0, %v1288_v63  ;;  %v13773_v22 = vcombine.low %v1284_v0, %v1288_v63 }
 0x56d   :  { %v13776_v12 = vcombine.high %v1285_v44, %v1289_v9  ;;  %v13775_v24 = vcombine.low %v1285_v44, %v1289_v9  ;;  %v1340_v9 = vld [vmem:[%s19773_s1 + $0x2910] sm:$0xff] }
 0x56e   :  { %11117 = vmatpush1.bf16.msra.mxu0 %v13717_v1  ;;  %v1292_v1 = vld [vmem:[%s19773_s1 + $0x2790] sm:$0xff] }
 0x56f   :  { %11650 = vmatpush1.bf16.msra.mxu1 %v13719_v16  ;;  %11118 = vmatprep.subr.bf16.mxu0 %v13726_v20  ;;  %v1296_v16 = vld [vmem:[%s19773_s1 + $0x27b0] sm:$0xff]  ;;  %v1293_v20 = vld [vmem:[%s19773_s1 + $0x2798] sm:$0xff] }
 0x570   :  { %11651 = vmatprep.subr.bf16.mxu1 %v13728_v21  ;;  %v1297_v21 = vld [vmem:[%s19773_s1 + $0x27b8] sm:$0xff]  ;;  %v13782_v40 = vcombine.high %v1292_v1, %v1296_v16  ;;  %v13781_v29 = vcombine.low %v1292_v1, %v1296_v16 }
 0x571   :  { %v13784_v33 = vcombine.high %v1293_v20, %v1297_v21  ;;  %v13783_v30 = vcombine.low %v1293_v20, %v1297_v21  ;;  %v1348_v20 = vld [vmem:[%s19773_s1 + $0x2950] sm:$0xff] }
 0x572   :  { %11119 = vmatpush1.bf16.msra.mxu0 %v13725_v7  ;;  %v1300_v7 = vld [vmem:[%s19773_s1 + $0x27d0] sm:$0xff] }
 0x573   :  { %11652 = vmatpush1.bf16.msra.mxu1 %v13727_v58  ;;  %11120 = vmatprep.subr.bf16.mxu0 %v13734_v47  ;;  %v1304_v58 = vld [vmem:[%s19773_s1 + $0x27f0] sm:$0xff]  ;;  %v1301_v47 = vld [vmem:[%s19773_s1 + $0x27d8] sm:$0xff] }
 0x574   :  { %11653 = vmatprep.subr.bf16.mxu1 %v13736_v28  ;;  %v1305_v28 = vld [vmem:[%s19773_s1 + $0x27f8] sm:$0xff]  ;;  %v13790_v32 = vcombine.high %v1300_v7, %v1304_v58  ;;  %v13789_v36 = vcombine.low %v1300_v7, %v1304_v58  ;;  %v1352_v21 = vld [vmem:[%s19773_s1 + $0x2970] sm:$0xff] }
 0x575   :  { %v13792_v35 = vcombine.high %v1301_v47, %v1305_v28  ;;  %v13791_v27 = vcombine.low %v1301_v47, %v1305_v28  ;;  %v13838_v7 = vcombine.high %v1348_v20, %v1352_v21  ;;  %v1356_v47 = vld [vmem:[%s19773_s1 + $0x2990] sm:$0xff] }
 0x576   :  { %11121 = vmatpush1.bf16.msra.mxu0 %v13733_v17  ;;  %v1308_v17 = vld [vmem:[%s19773_s1 + $0x2810] sm:$0xff] }
 0x577   :  { %11654 = vmatpush1.bf16.msra.mxu1 %v13735_v48  ;;  %11122 = vmatprep.subr.bf16.mxu0 %v13742_v56  ;;  %v1312_v48 = vld [vmem:[%s19773_s1 + $0x2830] sm:$0xff]  ;;  %v1309_v56 = vld [vmem:[%s19773_s1 + $0x2818] sm:$0xff] }
 0x578   :  { %11655 = vmatprep.subr.bf16.mxu1 %v13744_v4  ;;  %v1313_v4 = vld [vmem:[%s19773_s1 + $0x2838] sm:$0xff]  ;;  %v13798_v53 = vcombine.high %v1308_v17, %v1312_v48  ;;  %v13797_v41 = vcombine.low %v1308_v17, %v1312_v48  ;;  %v1360_v28 = vld [vmem:[%s19773_s1 + $0x29b0] sm:$0xff] }
 0x579   :  { %v13800_v38 = vcombine.high %v1309_v56, %v1313_v4  ;;  %v13799_v42 = vcombine.low %v1309_v56, %v1313_v4  ;;  %v13846_v17 = vcombine.high %v1356_v47, %v1360_v28  ;;  %v1364_v56 = vld [vmem:[%s19773_s1 + $0x29d0] sm:$0xff] }
 0x57a   :  { %11123 = vmatpush1.bf16.msra.mxu0 %v13741_v19  ;;  %v1316_v19 = vld [vmem:[%s19773_s1 + $0x2850] sm:$0xff] }
 0x57b   :  { %11656 = vmatpush1.bf16.msra.mxu1 %v13743_v39  ;;  %11124 = vmatprep.subr.bf16.mxu0 %v13750_v5  ;;  %v1320_v39 = vld [vmem:[%s19773_s1 + $0x2870] sm:$0xff]  ;;  %v1317_v5 = vld [vmem:[%s19773_s1 + $0x2858] sm:$0xff] }
 0x57c   :  { %11657 = vmatprep.subr.bf16.mxu1 %v13752_v51  ;;  %v1321_v51 = vld [vmem:[%s19773_s1 + $0x2878] sm:$0xff]  ;;  %v13806_v37 = vcombine.high %v1316_v19, %v1320_v39  ;;  %v13805_v62 = vcombine.low %v1316_v19, %v1320_v39  ;;  %v1368_v4 = vld [vmem:[%s19773_s1 + $0x29f0] sm:$0xff] }
 0x57d   :  { %v13808_v45 = vcombine.high %v1317_v5, %v1321_v51  ;;  %v13807_v50 = vcombine.low %v1317_v5, %v1321_v51  ;;  %v13854_v19 = vcombine.high %v1364_v56, %v1368_v4  ;;  %v1372_v5 = vld [vmem:[%s19773_s1 + $0x2a10] sm:$0xff] }
 0x57e   :  { %11125 = vmatpush1.bf16.msra.mxu0 %v13749_v34  ;;  %v1324_v34 = vld [vmem:[%s19773_s1 + $0x2890] sm:$0xff] }
 0x57f   :  { %11658 = vmatpush1.bf16.msra.mxu1 %v13751_v46  ;;  %11126 = vmatprep.subr.bf16.mxu0 %v13758_v49  ;;  %v1328_v46 = vld [vmem:[%s19773_s1 + $0x28b0] sm:$0xff]  ;;  %v1325_v49 = vld [vmem:[%s19773_s1 + $0x2898] sm:$0xff] }
 0x580   :  { %11659 = vmatprep.subr.bf16.mxu1 %v13760_v59  ;;  %v1329_v59 = vld [vmem:[%s19773_s1 + $0x28b8] sm:$0xff]  ;;  %v13814_v52 = vcombine.high %v1324_v34, %v1328_v46  ;;  %v1376_v51 = vld [vmem:[%s19773_s1 + $0x2a30] sm:$0xff] }
 0x581   :  { %v13816_v54 = vcombine.high %v1325_v49, %v1329_v59  ;;  %v13815_v0 = vcombine.low %v1325_v49, %v1329_v59  ;;  %v1380_v49 = vld [vmem:[%s19773_s1 + $0x2a50] sm:$0xff] }
 0x582   :  { %11127 = vmatpush1.bf16.msra.mxu0 %v13757_v55  ;;  %v1332_v55 = vld [vmem:[%s19773_s1 + $0x28d0] sm:$0xff] }
 0x583   :  { %11660 = vmatpush1.bf16.msra.mxu1 %v13759_v60  ;;  %11128 = vmatprep.subr.bf16.mxu0 %v13766_v57  ;;  %v1336_v60 = vld [vmem:[%s19773_s1 + $0x28f0] sm:$0xff]  ;;  %v1337_v57 = vld [vmem:[%s19773_s1 + $0x28f8] sm:$0xff] }
 0x584   :  { %11661 = vmatprep.subr.bf16.mxu1 %v13768_v61  ;;  %v13813_v61 = vcombine.low %v1324_v34, %v1328_v46  ;;  %v13822_v63 = vcombine.high %v1332_v55, %v1336_v60  ;;  %v13862_v34 = vcombine.high %v1372_v5, %v1376_v51  ;;  %v1384_v59 = vld [vmem:[%s19773_s1 + $0x2a70] sm:$0xff] }
 0x586   :  { %11129 = vmatpush1.bf16.msra.mxu0 %v13765_v10  ;;  %v1344_v10 = vld [vmem:[%s19773_s1 + $0x2930] sm:$0xff] }
 0x587   :  { %11662 = vmatpush1.bf16.msra.mxu1 %v13767_v11  ;;  %11130 = vmatprep.subr.bf16.mxu0 %v13774_v6  ;;  %v1345_v11 = vld [vmem:[%s19773_s1 + $0x2938] sm:$0xff]  ;;  %v13821_v6 = vcombine.low %v1332_v55, %v1336_v60  ;;  %v13830_v1 = vcombine.high %v1340_v9, %v1344_v10  ;;  %v13870_v55 = vcombine.high %v1380_v49, %v1384_v59 }
 0x588   :  { %11663 = vmatprep.subr.bf16.mxu1 %v13776_v12 }
 0x58a   :  { %11131 = vmatpush1.bf16.msra.mxu0 %v13773_v22  ;;  %v1349_v22 = vld [vmem:[%s19773_s1 + $0x2958] sm:$0xff] }
 0x58b   :  { %11664 = vmatpush1.bf16.msra.mxu1 %v13775_v24  ;;  %11132 = vmatprep.subr.bf16.mxu0 %v13782_v40  ;;  %v1353_v24 = vld [vmem:[%s19773_s1 + $0x2978] sm:$0xff]  ;;  %v13829_v40 = vcombine.low %v1340_v9, %v1344_v10 }
 0x58c   :  { %11665 = vmatprep.subr.bf16.mxu1 %v13784_v33  ;;  %v13840_v58 = vcombine.high %v1349_v22, %v1353_v24 }
 0x58e   :  { %11133 = vmatpush1.bf16.msra.mxu0 %v13781_v29  ;;  %v1357_v29 = vld [vmem:[%s19773_s1 + $0x2998] sm:$0xff] }
 0x58f   :  { %11666 = vmatpush1.bf16.msra.mxu1 %v13783_v30  ;;  %11134 = vmatprep.subr.bf16.mxu0 %v13790_v32  ;;  %v1361_v30 = vld [vmem:[%s19773_s1 + $0x29b8] sm:$0xff]  ;;  %v13837_v32 = vcombine.low %v1348_v20, %v1352_v21 }
 0x590   :  { %11667 = vmatprep.subr.bf16.mxu1 %v13792_v35  ;;  %v13839_v35 = vcombine.low %v1349_v22, %v1353_v24  ;;  %v13848_v48 = vcombine.high %v1357_v29, %v1361_v30  ;;  %v1404_v22 = vld [vmem:[%s19773_s1 + $0x2b10] sm:$0xff] }
 0x591   :  { %v1408_v24 = vld [vmem:[%s19773_s1 + $0x2b30] sm:$0xff] }
 0x592   :  { %11135 = vmatpush1.bf16.msra.mxu0 %v13789_v36  ;;  %v1365_v36 = vld [vmem:[%s19773_s1 + $0x29d8] sm:$0xff] }
 0x593   :  { %11668 = vmatpush1.bf16.msra.mxu1 %v13791_v27  ;;  %11145 = vmatprep.subr.bf16.mxu0 %v13798_v53  ;;  %v1369_v27 = vld [vmem:[%s19773_s1 + $0x29f8] sm:$0xff]  ;;  %v13845_v53 = vcombine.low %v1356_v47, %v1360_v28  ;;  %v13894_v47 = vcombine.high %v1404_v22, %v1408_v24 }
 0x594   :  { %11678 = vmatprep.subr.bf16.mxu1 %v13800_v38  ;;  %v13847_v38 = vcombine.low %v1357_v29, %v1361_v30  ;;  %v13856_v39 = vcombine.high %v1365_v36, %v1369_v27  ;;  %v1412_v29 = vld [vmem:[%s19773_s1 + $0x2b50] sm:$0xff] }
 0x595   :  { %11137 = vmatmul.mubr.bf16.vlgmr.msra.gmra.mrb[4].mxu0 %v16673_v2  ;;  %v1416_v30 = vld [vmem:[%s19773_s1 + $0x2b70] sm:$0xff] }
 0x596   :  { %11146 = vmatpush1.bf16.msra.mxu0 %v13797_v41  ;;  %11670 = vmatmul.mubr.bf16.vlgmr.msra.gmra.mrb[4].mxu1 %v16673_v2  ;;  %v1333_v2 = vld [vmem:[%s19773_s1 + $0x28d8] sm:$0xff] }
 0x597   :  { %11679 = vmatpush1.bf16.msra.mxu1 %v13799_v42  ;;  %11147 = vmatprep.subr.bf16.mxu0 %v13806_v37  ;;  %v13824_v44 = vcombine.high %v1333_v2, %v1337_v57  ;;  %v13823_v12 = vcombine.low %v1333_v2, %v1337_v57  ;;  %v1373_v41 = vld [vmem:[%s19773_s1 + $0x2a18] sm:$0xff]  ;;  %v13853_v37 = vcombine.low %v1364_v56, %v1368_v4  ;;  %v1388_v2 = vld [vmem:[%s19773_s1 + $0x2a90] sm:$0xff] }
 0x598   :  { %11680 = vmatprep.subr.bf16.mxu1 %v13808_v45  ;;  %11177 = vmatprep.mubr.bf16.mxu0 %v16688_v14  ;;  %v1377_v42 = vld [vmem:[%s19773_s1 + $0x2a38] sm:$0xff]  ;;  %v13855_v45 = vcombine.low %v1365_v36, %v1369_v27  ;;  %v1392_v57 = vld [vmem:[%s19773_s1 + $0x2ab0] sm:$0xff]  ;;  %v13902_v56 = vcombine.high %v1412_v29, %v1416_v30 }
 0x599   :  { %11710 = vmatprep.mubr.bf16.mxu1 %v16688_v14  ;;  %v1341_v14 = vld [vmem:[%s19773_s1 + $0x2918] sm:$0xff]  ;;  %v13864_v46 = vcombine.high %v1373_v41, %v1377_v42  ;;  %v13878_v9 = vcombine.high %v1388_v2, %v1392_v57  ;;  %v1420_v36 = vld [vmem:[%s19773_s1 + $0x2b90] sm:$0xff] }
 0x59a   :  { %11148 = vmatpush1.bf16.msra.mxu0 %v13805_v62  ;;  %v13832_v16 = vcombine.high %v1341_v14, %v1345_v11  ;;  %v13831_v33 = vcombine.low %v1341_v14, %v1345_v11  ;;  %v1381_v62 = vld [vmem:[%s19773_s1 + $0x2a58] sm:$0xff]  ;;  %v1396_v14 = vld [vmem:[%s19773_s1 + $0x2ad0] sm:$0xff] }
 0x59b   :  { %11681 = vmatpush1.bf16.msra.mxu1 %v13807_v50  ;;  %11149 = vmatprep.subr.bf16.mxu0 %v13814_v52  ;;  %v1385_v50 = vld [vmem:[%s19773_s1 + $0x2a78] sm:$0xff]  ;;  %v13861_v52 = vcombine.low %v1372_v5, %v1376_v51  ;;  %v1400_v11 = vld [vmem:[%s19773_s1 + $0x2af0] sm:$0xff] }
 0x59c   :  { %11682 = vmatprep.subr.bf16.mxu1 %v13816_v54  ;;  %v13863_v54 = vcombine.low %v1373_v41, %v1377_v42  ;;  %v13872_v60 = vcombine.high %v1381_v62, %v1385_v50  ;;  %v13886_v20 = vcombine.high %v1396_v14, %v1400_v11  ;;  %v1424_v27 = vld [vmem:[%s19773_s1 + $0x2bb0] sm:$0xff] }
 0x59d   :  { %v13910_v5 = vcombine.high %v1420_v36, %v1424_v27  ;;  %v1428_v41 = vld [vmem:[%s19773_s1 + $0x2bd0] sm:$0xff] }
 0x59e   :  { %11150 = vmatpush1.bf16.msra.mxu0 %v13813_v61  ;;  %v1389_v61 = vld [vmem:[%s19773_s1 + $0x2a98] sm:$0xff]  ;;  %v1432_v42 = vld [vmem:[%s19773_s1 + $0x2bf0] sm:$0xff] }
 0x59f   :  { %11683 = vmatpush1.bf16.msra.mxu1 %v13815_v0  ;;  %11151 = vmatprep.subr.bf16.mxu0 %v13822_v63  ;;  %v1393_v0 = vld [vmem:[%s19773_s1 + $0x2ab8] sm:$0xff]  ;;  %v13869_v63 = vcombine.low %v1380_v49, %v1384_v59  ;;  %v13918_v49 = vcombine.high %v1428_v41, %v1432_v42 }
 0x5a0   :  { %11684 = vmatprep.subr.bf16.mxu1 %v13824_v44  ;;  %v13871_v44 = vcombine.low %v1381_v62, %v1385_v50  ;;  %v13880_v10 = vcombine.high %v1389_v61, %v1393_v0  ;;  %v1436_v62 = vld [vmem:[%s19773_s1 + $0x2c10] sm:$0xff] }
 0x5a1   :  { %v1440_v50 = vld [vmem:[%s19773_s1 + $0x2c30] sm:$0xff] }
 0x5a2   :  { %11152 = vmatpush1.bf16.msra.mxu0 %v13821_v6  ;;  %v1397_v6 = vld [vmem:[%s19773_s1 + $0x2ad8] sm:$0xff] }
 0x5a3   :  { %11685 = vmatpush1.bf16.msra.mxu1 %v13823_v12  ;;  %11153 = vmatprep.subr.bf16.mxu0 %v13830_v1  ;;  %v1401_v12 = vld [vmem:[%s19773_s1 + $0x2af8] sm:$0xff]  ;;  %v13877_v1 = vcombine.low %v1388_v2, %v1392_v57  ;;  %v13926_v2 = vcombine.high %v1436_v62, %v1440_v50 }
 0x5a4   :  { %11686 = vmatprep.subr.bf16.mxu1 %v13832_v16  ;;  %v13879_v16 = vcombine.low %v1389_v61, %v1393_v0  ;;  %v13888_v21 = vcombine.high %v1397_v6, %v1401_v12  ;;  %v1444_v61 = vld [vmem:[%s19773_s1 + $0x2c50] sm:$0xff] }
 0x5a5   :  { %v1448_v0 = vld [vmem:[%s19773_s1 + $0x2c70] sm:$0xff] }
 0x5a6   :  { %11154 = vmatpush1.bf16.msra.mxu0 %v13829_v40  ;;  %v1405_v40 = vld [vmem:[%s19773_s1 + $0x2b18] sm:$0xff] }
 0x5a7   :  { %11687 = vmatpush1.bf16.msra.mxu1 %v13831_v33  ;;  %11155 = vmatprep.subr.bf16.mxu0 %v13838_v7  ;;  %v1409_v33 = vld [vmem:[%s19773_s1 + $0x2b38] sm:$0xff]  ;;  %v13885_v7 = vcombine.low %v1396_v14, %v1400_v11  ;;  %v13934_v14 = vcombine.high %v1444_v61, %v1448_v0 }
 0x5a8   :  { %11688 = vmatprep.subr.bf16.mxu1 %v13840_v58  ;;  %v13887_v58 = vcombine.low %v1397_v6, %v1401_v12  ;;  %v13896_v28 = vcombine.high %v1405_v40, %v1409_v33  ;;  %v1452_v6 = vld [vmem:[%s19773_s1 + $0x2c90] sm:$0xff] }
 0x5a9   :  { %v1456_v12 = vld [vmem:[%s19773_s1 + $0x2cb0] sm:$0xff] }
 0x5aa   :  { %11156 = vmatpush1.bf16.msra.mxu0 %v13837_v32  ;;  %v1413_v32 = vld [vmem:[%s19773_s1 + $0x2b58] sm:$0xff] }
 0x5ab   :  { %11689 = vmatpush1.bf16.msra.mxu1 %v13839_v35  ;;  %11157 = vmatprep.subr.bf16.mxu0 %v13846_v17  ;;  %v1417_v35 = vld [vmem:[%s19773_s1 + $0x2b78] sm:$0xff]  ;;  %v13893_v17 = vcombine.low %v1404_v22, %v1408_v24  ;;  %v13942_v22 = vcombine.high %v1452_v6, %v1456_v12 }
 0x5ac   :  { %11690 = vmatprep.subr.bf16.mxu1 %v13848_v48  ;;  %v13895_v48 = vcombine.low %v1405_v40, %v1409_v33  ;;  %v13904_v4 = vcombine.high %v1413_v32, %v1417_v35  ;;  %v1460_v40 = vld [vmem:[%s19773_s1 + $0x2cd0] sm:$0xff] }
 0x5ad   :  { %v1464_v33 = vld [vmem:[%s19773_s1 + $0x2cf0] sm:$0xff] }
 0x5ae   :  { %11158 = vmatpush1.bf16.msra.mxu0 %v13845_v53  ;;  %v1421_v53 = vld [vmem:[%s19773_s1 + $0x2b98] sm:$0xff] }
 0x5af   :  { %11691 = vmatpush1.bf16.msra.mxu1 %v13847_v38  ;;  %11159 = vmatprep.subr.bf16.mxu0 %v13854_v19  ;;  %v1425_v38 = vld [vmem:[%s19773_s1 + $0x2bb8] sm:$0xff]  ;;  %v13901_v19 = vcombine.low %v1412_v29, %v1416_v30  ;;  %v1468_v30 = vld [vmem:[%s19773_s1 + $0x2d10] sm:$0xff] }
 0x5b0   :  { %11692 = vmatprep.subr.bf16.mxu1 %v13856_v39  ;;  %v13903_v39 = vcombine.low %v1413_v32, %v1417_v35  ;;  %v13912_v51 = vcombine.high %v1421_v53, %v1425_v38  ;;  %v1472_v32 = vld [vmem:[%s19773_s1 + $0x2d30] sm:$0xff]  ;;  %v1473_v35 = vld [vmem:[%s19773_s1 + $0x2d38] sm:$0xff] }
 0x5b2   :  { %11160 = vmatpush1.bf16.msra.mxu0 %v13853_v37  ;;  %v1429_v37 = vld [vmem:[%s19773_s1 + $0x2bd8] sm:$0xff] }
 0x5b3   :  { %11693 = vmatpush1.bf16.msra.mxu1 %v13855_v45  ;;  %11161 = vmatprep.subr.bf16.mxu0 %v13862_v34  ;;  %v1433_v45 = vld [vmem:[%s19773_s1 + $0x2bf8] sm:$0xff]  ;;  %v13909_v34 = vcombine.low %v1420_v36, %v1424_v27  ;;  %v1476_v36 = vld [vmem:[%s19773_s1 + $0x2d50] sm:$0xff] }
 0x5b4   :  { %11694 = vmatprep.subr.bf16.mxu1 %v13864_v46  ;;  %v13911_v46 = vcombine.low %v1421_v53, %v1425_v38  ;;  %v13920_v59 = vcombine.high %v1429_v37, %v1433_v45  ;;  %v1480_v27 = vld [vmem:[%s19773_s1 + $0x2d70] sm:$0xff]  ;;  %v1477_v53 = vld [vmem:[%s19773_s1 + $0x2d58] sm:$0xff] }
 0x5b5   :  { %v1481_v38 = vld [vmem:[%s19773_s1 + $0x2d78] sm:$0xff] }
 0x5b6   :  { %11162 = vmatpush1.bf16.msra.mxu0 %v13861_v52  ;;  %v1437_v52 = vld [vmem:[%s19773_s1 + $0x2c18] sm:$0xff] }
 0x5b7   :  { %11695 = vmatpush1.bf16.msra.mxu1 %v13863_v54  ;;  %11163 = vmatprep.subr.bf16.mxu0 %v13870_v55  ;;  %v1441_v54 = vld [vmem:[%s19773_s1 + $0x2c38] sm:$0xff]  ;;  %v13917_v55 = vcombine.low %v1428_v41, %v1432_v42  ;;  %v1484_v41 = vld [vmem:[%s19773_s1 + $0x2d90] sm:$0xff] }
 0x5b8   :  { %11696 = vmatprep.subr.bf16.mxu1 %v13872_v60  ;;  %v13919_v60 = vcombine.low %v1429_v37, %v1433_v45  ;;  %v13928_v57 = vcombine.high %v1437_v52, %v1441_v54  ;;  %v1488_v42 = vld [vmem:[%s19773_s1 + $0x2db0] sm:$0xff]  ;;  %v1485_v37 = vld [vmem:[%s19773_s1 + $0x2d98] sm:$0xff] }
 0x5b9   :  { %v1489_v45 = vld [vmem:[%s19773_s1 + $0x2db8] sm:$0xff] }
 0x5ba   :  { %11164 = vmatpush1.bf16.msra.mxu0 %v13869_v63  ;;  %v1445_v63 = vld [vmem:[%s19773_s1 + $0x2c58] sm:$0xff] }
 0x5bb   :  { %11697 = vmatpush1.bf16.msra.mxu1 %v13871_v44  ;;  %11165 = vmatprep.subr.bf16.mxu0 %v13878_v9  ;;  %v1449_v44 = vld [vmem:[%s19773_s1 + $0x2c78] sm:$0xff]  ;;  %v13925_v9 = vcombine.low %v1436_v62, %v1440_v50  ;;  %v1492_v62 = vld [vmem:[%s19773_s1 + $0x2dd0] sm:$0xff] }
 0x5bc   :  { %11698 = vmatprep.subr.bf16.mxu1 %v13880_v10  ;;  %v13927_v10 = vcombine.low %v1437_v52, %v1441_v54  ;;  %v13936_v11 = vcombine.high %v1445_v63, %v1449_v44  ;;  %v1496_v50 = vld [vmem:[%s19773_s1 + $0x2df0] sm:$0xff]  ;;  %v1493_v52 = vld [vmem:[%s19773_s1 + $0x2dd8] sm:$0xff] }
 0x5bd   :  { %v1497_v54 = vld [vmem:[%s19773_s1 + $0x2df8] sm:$0xff] }
 0x5be   :  { %11166 = vmatpush1.bf16.msra.mxu0 %v13877_v1  ;;  %v1453_v1 = vld [vmem:[%s19773_s1 + $0x2c98] sm:$0xff] }
 0x5bf   :  { %11699 = vmatpush1.bf16.msra.mxu1 %v13879_v16  ;;  %11167 = vmatprep.subr.bf16.mxu0 %v13886_v20  ;;  %v1457_v16 = vld [vmem:[%s19773_s1 + $0x2cb8] sm:$0xff]  ;;  %v13933_v20 = vcombine.low %v1444_v61, %v1448_v0  ;;  %v1500_v61 = vld [vmem:[%s19773_s1 + $0x2e10] sm:$0xff] }
 0x5c0   :  { %11700 = vmatprep.subr.bf16.mxu1 %v13888_v21  ;;  %v13935_v21 = vcombine.low %v1445_v63, %v1449_v44  ;;  %v13944_v24 = vcombine.high %v1453_v1, %v1457_v16  ;;  %v1504_v0 = vld [vmem:[%s19773_s1 + $0x2e30] sm:$0xff]  ;;  %v1501_v63 = vld [vmem:[%s19773_s1 + $0x2e18] sm:$0xff] }
 0x5c1   :  { %v1505_v44 = vld [vmem:[%s19773_s1 + $0x2e38] sm:$0xff] }
 0x5c2   :  { %11168 = vmatpush1.bf16.msra.mxu0 %v13885_v7  ;;  %v1465_v7 = vld [vmem:[%s19773_s1 + $0x2cf8] sm:$0xff] }
 0x5c3   :  { %11701 = vmatpush1.bf16.msra.mxu1 %v13887_v58  ;;  %11169 = vmatprep.subr.bf16.mxu0 %v13894_v47  ;;  %v13941_v58 = vcombine.low %v1452_v6, %v1456_v12  ;;  %v13943_v47 = vcombine.low %v1453_v1, %v1457_v16  ;;  %v1508_v6 = vld [vmem:[%s19773_s1 + $0x2e50] sm:$0xff]  ;;  %v1509_v1 = vld [vmem:[%s19773_s1 + $0x2e58] sm:$0xff] }
 0x5c4   :  { %11702 = vmatprep.subr.bf16.mxu1 %v13896_v28  ;;  %v13950_v28 = vcombine.high %v1460_v40, %v1464_v33  ;;  %v1512_v12 = vld [vmem:[%s19773_s1 + $0x2e70] sm:$0xff]  ;;  %v1513_v16 = vld [vmem:[%s19773_s1 + $0x2e78] sm:$0xff] }
 0x5c6   :  { %11170 = vmatpush1.bf16.msra.mxu0 %v13893_v17  ;;  %v13949_v17 = vcombine.low %v1460_v40, %v1464_v33  ;;  %v1516_v40 = vld [vmem:[%s19773_s1 + $0x2e90] sm:$0xff] }
 0x5c7   :  { %11703 = vmatpush1.bf16.msra.mxu1 %v13895_v48  ;;  %11171 = vmatprep.subr.bf16.mxu0 %v13902_v56  ;;  %v13958_v56 = vcombine.high %v1468_v30, %v1472_v32  ;;  %v1520_v33 = vld [vmem:[%s19773_s1 + $0x2eb0] sm:$0xff] }
 0x5c8   :  { %11704 = vmatprep.subr.bf16.mxu1 %v13904_v4 }
 0x5ca   :  { %11172 = vmatpush1.bf16.msra.mxu0 %v13901_v19  ;;  %v13957_v19 = vcombine.low %v1468_v30, %v1472_v32  ;;  %v1524_v30 = vld [vmem:[%s19773_s1 + $0x2ed0] sm:$0xff] }
 0x5cb   :  { %11705 = vmatpush1.bf16.msra.mxu1 %v13903_v39  ;;  %11173 = vmatprep.subr.bf16.mxu0 %v13910_v5  ;;  %v13966_v5 = vcombine.high %v1476_v36, %v1480_v27  ;;  %v1528_v32 = vld [vmem:[%s19773_s1 + $0x2ef0] sm:$0xff] }
 0x5cc   :  { %11706 = vmatprep.subr.bf16.mxu1 %v13912_v51  ;;  %v13968_v51 = vcombine.high %v1477_v53, %v1481_v38 }
 0x5ce   :  { %11174 = vmatpush1.bf16.msra.mxu0 %v13909_v34  ;;  %v13965_v34 = vcombine.low %v1476_v36, %v1480_v27  ;;  %v1532_v36 = vld [vmem:[%s19773_s1 + $0x2f10] sm:$0xff] }
 0x5cf   :  { %11707 = vmatpush1.bf16.msra.mxu1 %v13911_v46  ;;  %11175 = vmatprep.subr.bf16.mxu0 %v13918_v49  ;;  %v13967_v46 = vcombine.low %v1477_v53, %v1481_v38  ;;  %v13974_v49 = vcombine.high %v1484_v41, %v1488_v42  ;;  %v1536_v27 = vld [vmem:[%s19773_s1 + $0x2f30] sm:$0xff]  ;;  %v1533_v53 = vld [vmem:[%s19773_s1 + $0x2f18] sm:$0xff] }
 0x5d0   :  { %11708 = vmatprep.subr.bf16.mxu1 %v13920_v59  ;;  %v13976_v59 = vcombine.high %v1485_v37, %v1489_v45  ;;  %v1537_v38 = vld [vmem:[%s19773_s1 + $0x2f38] sm:$0xff] }
 0x5d2   :  { %11176 = vmatpush1.bf16.msra.mxu0 %v13917_v55  ;;  %v13973_v55 = vcombine.low %v1484_v41, %v1488_v42  ;;  %v1540_v41 = vld [vmem:[%s19773_s1 + $0x2f50] sm:$0xff] }
 0x5d3   :  { %11709 = vmatpush1.bf16.msra.mxu1 %v13919_v60  ;;  %11186 = vmatprep.subr.bf16.mxu0 %v13926_v2  ;;  %v13975_v60 = vcombine.low %v1485_v37, %v1489_v45  ;;  %v13982_v2 = vcombine.high %v1492_v62, %v1496_v50  ;;  %v1544_v42 = vld [vmem:[%s19773_s1 + $0x2f70] sm:$0xff]  ;;  %v1541_v37 = vld [vmem:[%s19773_s1 + $0x2f58] sm:$0xff] }
 0x5d4   :  { %11719 = vmatprep.subr.bf16.mxu1 %v13928_v57  ;;  %v13984_v57 = vcombine.high %v1493_v52, %v1497_v54  ;;  %v1545_v45 = vld [vmem:[%s19773_s1 + $0x2f78] sm:$0xff] }
 0x5d5   :  { %11178 = vmatmul.mubr.bf16.vlgmr.msra.gmra.mrb[4].mxu0 %v16876_v15 }
 0x5d6   :  { %11187 = vmatpush1.bf16.msra.mxu0 %v13925_v9  ;;  %11711 = vmatmul.mubr.bf16.vlgmr.msra.gmra.mrb[4].mxu1 %v16876_v15  ;;  %v1461_v15 = vld [vmem:[%s19773_s1 + $0x2cd8] sm:$0xff]  ;;  %v13981_v9 = vcombine.low %v1492_v62, %v1496_v50  ;;  %v1548_v62 = vld [vmem:[%s19773_s1 + $0x2f90] sm:$0xff] }
 0x5d7   :  { %11720 = vmatpush1.bf16.msra.mxu1 %v13927_v10  ;;  %11188 = vmatprep.subr.bf16.mxu0 %v13934_v14  ;;  %v13952_v29 = vcombine.high %v1461_v15, %v1465_v7  ;;  %v13951_v48 = vcombine.low %v1461_v15, %v1465_v7  ;;  %v13983_v10 = vcombine.low %v1493_v52, %v1497_v54  ;;  %v1517_v15 = vld [vmem:[%s19773_s1 + $0x2e98] sm:$0xff]  ;;  %v1552_v50 = vld [vmem:[%s19773_s1 + $0x2fb0] sm:$0xff] }
 0x5d8   :  { %11721 = vmatprep.subr.bf16.mxu1 %v13936_v11  ;;  %11218 = vmatprep.mubr.bf16.mxu0 %v16892_v26  ;;  %v13990_v14 = vcombine.high %v1500_v61, %v1504_v0  ;;  %v13992_v11 = vcombine.high %v1501_v63, %v1505_v44  ;;  %v1521_v7 = vld [vmem:[%s19773_s1 + $0x2eb8] sm:$0xff] }
 0x5d9   :  { %11751 = vmatprep.mubr.bf16.mxu1 %v16892_v26  ;;  %v1469_v26 = vld [vmem:[%s19773_s1 + $0x2d18] sm:$0xff] }
 0x5da   :  { %11189 = vmatpush1.bf16.msra.mxu0 %v13933_v20  ;;  %v13960_v4 = vcombine.high %v1469_v26, %v1473_v35  ;;  %v13959_v39 = vcombine.low %v1469_v26, %v1473_v35  ;;  %v13989_v20 = vcombine.low %v1500_v61, %v1504_v0  ;;  %v1525_v26 = vld [vmem:[%s19773_s1 + $0x2ed8] sm:$0xff]  ;;  %v1556_v61 = vld [vmem:[%s19773_s1 + $0x2fd0] sm:$0xff] }
 0x5db   :  { %11722 = vmatpush1.bf16.msra.mxu1 %v13935_v21  ;;  %11190 = vmatprep.subr.bf16.mxu0 %v13942_v22  ;;  %v13991_v21 = vcombine.low %v1501_v63, %v1505_v44  ;;  %v13998_v22 = vcombine.high %v1508_v6, %v1512_v12  ;;  %v1529_v35 = vld [vmem:[%s19773_s1 + $0x2ef8] sm:$0xff]  ;;  %v1560_v0 = vld [vmem:[%s19773_s1 + $0x2ff0] sm:$0xff] }
 0x5dc   :  { %11723 = vmatprep.subr.bf16.mxu1 %v13944_v24  ;;  %v14000_v24 = vcombine.high %v1509_v1, %v1513_v16  ;;  %v1549_v52 = vld [vmem:[%s19773_s1 + $0x2f98] sm:$0xff] }
 0x5dd   :  { %v1553_v54 = vld [vmem:[%s19773_s1 + $0x2fb8] sm:$0xff] }
 0x5de   :  { %11191 = vmatpush1.bf16.msra.mxu0 %v13941_v58  ;;  %v13997_v58 = vcombine.low %v1508_v6, %v1512_v12  ;;  %v1557_v63 = vld [vmem:[%s19773_s1 + $0x2fd8] sm:$0xff]  ;;  %v1564_v6 = vld [vmem:[%s19773_s1 + $0x3010] sm:$0xff] }
 0x5df   :  { %11724 = vmatpush1.bf16.msra.mxu1 %v13943_v47  ;;  %11192 = vmatprep.subr.bf16.mxu0 %v13950_v28  ;;  %v13999_v47 = vcombine.low %v1509_v1, %v1513_v16  ;;  %v14006_v28 = vcombine.high %v1516_v40, %v1520_v33  ;;  %v1561_v44 = vld [vmem:[%s19773_s1 + $0x2ff8] sm:$0xff]  ;;  %v1568_v12 = vld [vmem:[%s19773_s1 + $0x3030] sm:$0xff] }
 0x5e0   :  { %11725 = vmatprep.subr.bf16.mxu1 %v13952_v29  ;;  %v14008_v29 = vcombine.high %v1517_v15, %v1521_v7  ;;  %v1565_v1 = vld [vmem:[%s19773_s1 + $0x3018] sm:$0xff] }
 0x5e1   :  { %v1569_v16 = vld [vmem:[%s19773_s1 + $0x3038] sm:$0xff] }
 0x5e2   :  { %11193 = vmatpush1.bf16.msra.mxu0 %v13949_v17  ;;  %v14005_v17 = vcombine.low %v1516_v40, %v1520_v33  ;;  %v1572_v40 = vld [vmem:[%s19773_s1 + $0x3050] sm:$0xff] }
 0x5e3   :  { %11726 = vmatpush1.bf16.msra.mxu1 %v13951_v48  ;;  %11194 = vmatprep.subr.bf16.mxu0 %v13958_v56  ;;  %v14007_v48 = vcombine.low %v1517_v15, %v1521_v7  ;;  %v14014_v56 = vcombine.high %v1524_v30, %v1528_v32  ;;  %v1576_v33 = vld [vmem:[%s19773_s1 + $0x3070] sm:$0xff]  ;;  %v1573_v15 = vld [vmem:[%s19773_s1 + $0x3058] sm:$0xff] }
 0x5e4   :  { %11727 = vmatprep.subr.bf16.mxu1 %v13960_v4  ;;  %v14016_v4 = vcombine.high %v1525_v26, %v1529_v35  ;;  %v1577_v7 = vld [vmem:[%s19773_s1 + $0x3078] sm:$0xff] }
 0x5e6   :  { %11195 = vmatpush1.bf16.msra.mxu0 %v13957_v19  ;;  %v14013_v19 = vcombine.low %v1524_v30, %v1528_v32  ;;  %v1580_v30 = vld [vmem:[%s19773_s1 + $0x3090] sm:$0xff] }
 0x5e7   :  { %11728 = vmatpush1.bf16.msra.mxu1 %v13959_v39  ;;  %11196 = vmatprep.subr.bf16.mxu0 %v13966_v5  ;;  %v14015_v39 = vcombine.low %v1525_v26, %v1529_v35  ;;  %v14022_v5 = vcombine.high %v1532_v36, %v1536_v27  ;;  %v1584_v32 = vld [vmem:[%s19773_s1 + $0x30b0] sm:$0xff]  ;;  %v1602_v26 = vsub.s32 1, %v14631_v43  ;;  %v1581_v35 = vld [vmem:[%s19773_s1 + $0x3098] sm:$0xff] }
 0x5e8   :  { %11729 = vmatprep.subr.bf16.mxu1 %v13968_v51  ;;  %v14024_v51 = vcombine.high %v1533_v53, %v1537_v38 }
 0x5ea   :  { %11197 = vmatpush1.bf16.msra.mxu0 %v13965_v34  ;;  %v14021_v34 = vcombine.low %v1532_v36, %v1536_v27  ;;  %v14063_v36 = vcombine.low %v1573_v15, %v1577_v7  ;;  %v14070_v27 = vcombine.high %v1580_v30, %v1584_v32 }
 0x5eb   :  { %11730 = vmatpush1.bf16.msra.mxu1 %v13967_v46  ;;  %11198 = vmatprep.subr.bf16.mxu0 %v13974_v49  ;;  %v14023_v46 = vcombine.low %v1533_v53, %v1537_v38  ;;  %v14030_v49 = vcombine.high %v1540_v41, %v1544_v42  ;;  %v1588_v38 = vld [vmem:[%s19773_s1 + $0x30d0] sm:$0xff] }
 0x5ec   :  { %11731 = vmatprep.subr.bf16.mxu1 %v13976_v59  ;;  %v14032_v59 = vcombine.high %v1541_v37, %v1545_v45 }
 0x5ee   :  { %11199 = vmatpush1.bf16.msra.mxu0 %v13973_v55  ;;  %v14029_v55 = vcombine.low %v1540_v41, %v1544_v42  ;;  %v14069_v41 = vcombine.low %v1580_v30, %v1584_v32  ;;  %v14471_v30 = vld [vmem:[%s19775_s3 + $0xb0] sm:$0xff]   ;;  %v14472_v32 = vld [vmem:[%s19775_s3 + $0x78] sm:$0xff]  }
 0x5ef   :  { %11732 = vmatpush1.bf16.msra.mxu1 %v13975_v60  ;;  %11200 = vmatprep.subr.bf16.mxu0 %v13982_v2  ;;  %v14031_v60 = vcombine.low %v1541_v37, %v1545_v45  ;;  %v14038_v2 = vcombine.high %v1548_v62, %v1552_v50 }
 0x5f0   :  { %11733 = vmatprep.subr.bf16.mxu1 %v13984_v57  ;;  %v14040_v57 = vcombine.high %v1549_v52, %v1553_v54 }
 0x5f2   :  { %11201 = vmatpush1.bf16.msra.mxu0 %v13981_v9  ;;  %v14037_v9 = vcombine.low %v1548_v62, %v1552_v50  ;;  %v14445_v62 = vld [vmem:[%s19775_s3 + $0xc0] sm:$0xff]  }
 0x5f3   :  { %11734 = vmatpush1.bf16.msra.mxu1 %v13983_v10  ;;  %11202 = vmatprep.subr.bf16.mxu0 %v13990_v14  ;;  %v14039_v10 = vcombine.low %v1549_v52, %v1553_v54  ;;  %v14046_v14 = vcombine.high %v1556_v61, %v1560_v0  ;;  %v14448_v54 = vld [vmem:[%s19775_s3 + $0x48] sm:$0xff]  }
 0x5f4   :  { %11735 = vmatprep.subr.bf16.mxu1 %v13992_v11  ;;  %v14048_v11 = vcombine.high %v1557_v63, %v1561_v44 }
 0x5f6   :  { %11203 = vmatpush1.bf16.msra.mxu0 %v13989_v20  ;;  %v14045_v20 = vcombine.low %v1556_v61, %v1560_v0  ;;  %v14451_v61 = vld [vmem:[%s19775_s3 + $0x88] sm:$0xff]   ;;  %v14452_v0 = vld [vmem:[%s19775_s3 + $0x50] sm:$0xff]  }
 0x5f7   :  { %11736 = vmatpush1.bf16.msra.mxu1 %v13991_v21  ;;  %11204 = vmatprep.subr.bf16.mxu0 %v13998_v22  ;;  %v14047_v21 = vcombine.low %v1557_v63, %v1561_v44  ;;  %v14054_v22 = vcombine.high %v1564_v6, %v1568_v12  ;;  %v14454_v63 = vld [vmem:[%s19775_s3 + $0x10] sm:$0xff]  }
 0x5f8   :  { %11737 = vmatprep.subr.bf16.mxu1 %v14000_v24  ;;  %v14056_v24 = vcombine.high %v1565_v1, %v1569_v16  ;;  %v14455_v44 = vld [vmem:[%s19775_s3 + $0x90] sm:$0xff]  }
 0x5fa   :  { %11205 = vmatpush1.bf16.msra.mxu0 %v13997_v58  ;;  %v14053_v58 = vcombine.low %v1564_v6, %v1568_v12  ;;  %v14460_v6 = vld [vmem:[%s19775_s3 + $0x60] sm:$0xff]  }
 0x5fb   :  { %11738 = vmatpush1.bf16.msra.mxu1 %v13999_v47  ;;  %11206 = vmatprep.subr.bf16.mxu0 %v14006_v28  ;;  %v14055_v47 = vcombine.low %v1565_v1, %v1569_v16  ;;  %v14062_v28 = vcombine.high %v1572_v40, %v1576_v33  ;;  %v14461_v12 = vld [vmem:[%s19775_s3 + $0xe0] sm:$0xff]   ;;  %v1598_v16 = vsub.s32 0, %v14631_v43 }
 0x5fc   :  { %11739 = vmatprep.subr.bf16.mxu1 %v14008_v29  ;;  %v14064_v29 = vcombine.high %v1573_v15, %v1577_v7  ;;  %v14462_v1 = vld [vmem:[%s19775_s3 + $0x20] sm:$0xff]   ;;  %v14467_v15 = vld [vmem:[%s19775_s3 + $0xa8] sm:$0xff]   ;;  %v14468_v7 = vld [vmem:[%s19775_s3 + $0x70] sm:$0xff]  }
 0x5fe   :  { %11207 = vmatpush1.bf16.msra.mxu0 %v14005_v17  ;;  %v1585_v17 = vld [vmem:[%s19773_s1 + $0x30b8] sm:$0xff] }
 0x5ff   :  { %11740 = vmatpush1.bf16.msra.mxu1 %v14007_v48  ;;  %11208 = vmatprep.subr.bf16.mxu0 %v14014_v56  ;;  %v19525_v48 = vld [vmem:[%s19774_s2] sm:$0xff]  ;;  %v1610_v56 = vsub.s32 3, %v14631_v43  ;;  %v14072_v53 = vcombine.high %v1581_v35, %v1585_v17  ;;  %v14071_v42 = vcombine.low %v1581_v35, %v1585_v17  ;;  %v14473_v35 = vld [vmem:[%s19775_s3 + $0xf8] sm:$0xff]  }
 0x600   :  { %11741 = vmatprep.subr.bf16.mxu1 %v14016_v4  ;;  %v14061_v4 = vcombine.low %v1572_v40, %v1576_v33  ;;  %v14466_v40 = vld [vmem:[%s19775_s3 + $0x28] sm:$0xff]   ;;  %v1599_v33 = vrot.slane %v19525_v48, %v1598_v16 }
 0x602   :  { %11209 = vmatpush1.bf16.msra.mxu0 %v14013_v19  ;;  %v1592_v19 = vld [vmem:[%s19773_s1 + $0x30f0] sm:$0xff] }
 0x603   :  { %11742 = vmatpush1.bf16.msra.mxu1 %v14015_v39  ;;  %11210 = vmatprep.subr.bf16.mxu0 %v14022_v5  ;;  %v1603_v39 = vrot.slane %v19525_v48, %v1602_v26  ;;  %v1593_v5 = vld [vmem:[%s19773_s1 + $0x30f8] sm:$0xff]  ;;  %v14078_v37 = vcombine.high %v1588_v38, %v1592_v19 }
 0x604   :  { %11743 = vmatprep.subr.bf16.mxu1 %v14024_v51  ;;  %v1611_v51 = vrot.slane %v19525_v48, %v1610_v56  ;;  %v14475_v56 = vld [vmem:[%s19775_s3 + $0xb8] sm:$0xff]  }
 0x606   :  { %11211 = vmatpush1.bf16.msra.mxu0 %v14021_v34  ;;  %v14239_v34 = vadd.f32 %v17810_v23, %v1603_v39  ;;  %v14446_v23 = vld [vmem:[%s19775_s3] sm:$0xff]  }
 0x607   :  { %11744 = vmatpush1.bf16.msra.mxu1 %v14023_v46  ;;  %11212 = vmatprep.subr.bf16.mxu0 %v14030_v49  ;;  %v14241_v46 = vadd.f32 %v17818_v18, %v1611_v51  ;;  %v14077_v49 = vcombine.low %v1588_v38, %v1592_v19  ;;  %v14447_v18 = vld [vmem:[%s19775_s3 + $0x80] sm:$0xff]   ;;  %v14480_v19 = vld [vmem:[%s19775_s3 + $0x148] sm:$0xff]  }
 0x608   :  { %11745 = vmatprep.subr.bf16.mxu1 %v14032_v59  ;;  %v11802_v50 = vmax.f32 %v14239_v34, 0.0  ;;  %v14479_v38 = vld [vmem:[%s19775_s3 + $0x180] sm:$0xff]   ;;  %v14483_v51 = vld [vmem:[%s19775_s3 + $0x188] sm:$0xff]   ;;  %v14488_v34 = vld [vmem:[%s19775_s3 + $0x158] sm:$0xff]  }
 0x609   :  { %v11804_v52 = vmax.f32 %v14241_v46, 0.0  ;;  %v14489_v46 = vld [vmem:[%s19775_s3 + $0x1d8] sm:$0xff]  }
 0x60a   :  { %11213 = vmatpush1.bf16.msra.mxu0 %v14029_v55  ;;  %v11810_v55 = vpack.c.bf16 %v11802_v50, %v11802_v50  ;;  %v14494_v50 = vld [vmem:[%s19775_s3 + $0x120] sm:$0xff]  }
 0x60b   :  { %11746 = vmatpush1.bf16.msra.mxu1 %v14031_v60  ;;  %11214 = vmatprep.subr.bf16.mxu0 %v14038_v2  ;;  %v14449_v60 = vld [vmem:[%s19775_s3 + $0xc8] sm:$0xff]   ;;  %v11812_v2 = vpack.c.bf16 %v11804_v52, %v11804_v52  ;;  %v14495_v52 = vld [vmem:[%s19775_s3 + $0x1a0] sm:$0xff]  }
 0x60c   :  { %11747 = vmatprep.subr.bf16.mxu1 %v14040_v57  ;;  %v14450_v57 = vld [vmem:[%s19775_s3 + $0x8] sm:$0xff]  }
 0x60e   :  { %11215 = vmatpush1.bf16.msra.mxu0 %v14037_v9  ;;  %v14456_v9 = vld [vmem:[%s19775_s3 + $0x58] sm:$0xff]  }
 0x60f   :  { %11748 = vmatpush1.bf16.msra.mxu1 %v14039_v10  ;;  %11216 = vmatprep.subr.bf16.mxu0 %v14046_v14  ;;  %v14457_v10 = vld [vmem:[%s19775_s3 + $0xd8] sm:$0xff]  }
 0x610   :  { %11749 = vmatprep.subr.bf16.mxu1 %v14048_v11  ;;  %v14458_v14 = vld [vmem:[%s19775_s3 + $0x18] sm:$0xff]  }
 0x611   :  { %v14459_v11 = vld [vmem:[%s19775_s3 + $0x98] sm:$0xff]  }
 0x612   :  { %11217 = vmatpush1.bf16.msra.mxu0 %v14045_v20  ;;  %v14463_v20 = vld [vmem:[%s19775_s3 + $0xa0] sm:$0xff]  }
 0x613   :  { %11750 = vmatpush1.bf16.msra.mxu1 %v14047_v21  ;;  %11227 = vmatprep.subr.bf16.mxu0 %v14054_v22  ;;  %v14464_v21 = vld [vmem:[%s19775_s3 + $0x68] sm:$0xff]   ;;  %v1606_v22 = vsub.s32 2, %v14631_v43 }
 0x614   :  { %11760 = vmatprep.subr.bf16.mxu1 %v14056_v24  ;;  %v14465_v24 = vld [vmem:[%s19775_s3 + $0xe8] sm:$0xff]  }
 0x615   :  { %11219 = vmatmul.mubr.bf16.vlgmr.msra.gmra.mrb[4].mxu0 %v17080_v31 }
 0x616   :  { %11228 = vmatpush1.bf16.msra.mxu0 %v14053_v58  ;;  %11752 = vmatmul.mubr.bf16.vlgmr.msra.gmra.mrb[4].mxu1 %v17080_v31  ;;  %v1589_v31 = vld [vmem:[%s19773_s1 + $0x30d8] sm:$0xff]  ;;  %v1607_v58 = vrot.slane %v19525_v48, %v1606_v22 }
 0x617   :  { %11761 = vmatpush1.bf16.msra.mxu1 %v14055_v47  ;;  %11229 = vmatprep.subr.bf16.mxu0 %v14062_v28  ;;  %v14080_v45 = vcombine.high %v1589_v31, %v1593_v5  ;;  %v14079_v59 = vcombine.low %v1589_v31, %v1593_v5  ;;  %v14469_v47 = vld [vmem:[%s19775_s3 + $0xf0] sm:$0xff]   ;;  %v14481_v31 = vld [vmem:[%s19775_s3 + $0x1c8] sm:$0xff]  }
 0x618   :  { %11762 = vmatprep.subr.bf16.mxu1 %v14064_v29  ;;  %11259 = vmatprep.mubr.bf16.mxu0 %v14533_v8  ;;  %v14470_v28 = vld [vmem:[%s19775_s3 + $0x30] sm:$0xff]   ;;  %v14238_v29 = vadd.f32 %v17800_v3, %v1599_v33  ;;  %v14240_v26 = vadd.f32 %v17808_v13, %v1607_v58  ;;  %v14474_v3 = vld [vmem:[%s19775_s3 + $0x38] sm:$0xff]   ;;  %v14476_v13 = vld [vmem:[%s19775_s3 + $0x140] sm:$0xff]  }
 0x619   :  { %11792 = vmatprep.mubr.bf16.mxu1 %v14533_v8  ;;  %v14444_v8 = vld [vmem:[%s19775_s3 + $0x40] sm:$0xff]   ;;  %v14482_v5 = vld [vmem:[%s19775_s3 + $0x108] sm:$0xff]  }
 0x61a   :  { %11230 = vmatpush1.bf16.msra.mxu0 %v14061_v4  ;;  %v11801_v17 = vmax.f32 %v14238_v29, 0.0  ;;  %v11803_v4 = vmax.f32 %v14240_v26, 0.0 }
 0x61b   :  { %11763 = vmatpush1.bf16.msra.mxu1 %v14063_v36  ;;  %11231 = vmatprep.subr.bf16.mxu0 %v14070_v27  ;;  %v14477_v36 = vld [vmem:[%s19775_s3 + $0x1c0] sm:$0xff]  }
 0x61c   :  { %11764 = vmatprep.subr.bf16.mxu1 %v14072_v53  ;;  %v14478_v27 = vld [vmem:[%s19775_s3 + $0x100] sm:$0xff]   ;;  %v11809_v53 = vpack.c.bf16 %v11801_v17, %v11801_v17  ;;  %v11811_v39 = vpack.c.bf16 %v11803_v4, %v11803_v4 }
 0x61d   :  { %v14085_v4 = vld [vmem:[%s19776_s4] ss:$0 sm:$0xff]  ;;  %s14534_s4 = smov [#allocation2]  }
 0x61e   :  { %11232 = vmatpush1.bf16.msra.mxu0 %v14069_v41  ;;  %v14484_v41 = vld [vmem:[%s19775_s3 + $0x150] sm:$0xff]   ;;  %s12504_s18 = sshll.u32 %s14534_s4, 4  ;;  %s12505_s18 = int_to_ptr.vmem [resolvable:$true] %s12504_s18 }
 0x61f   :  { %11765 = vmatpush1.bf16.msra.mxu1 %v14071_v42  ;;  %11233 = vmatprep.subr.bf16.mxu0 %v14078_v37  ;;  %v14485_v42 = vld [vmem:[%s19775_s3 + $0x1d0] sm:$0xff]   ;;  %s14508_s19 = scalar_lea.vmem %s12505_s18, 32  ;;  %p14513_p1 = scmp.lt.s32.totalorder %s12505_s18, %s12505_s18 }
 0x620   :  { %11766 = vmatprep.subr.bf16.mxu1 %v14080_v45  ;;  %v14486_v37 = vld [vmem:[%s19775_s3 + $0x110] sm:$0xff]   ;;  %p14509_p0 = scmp.ne.s32.totalorder %s12505_s18, %s14508_s19  ;;  %p14514_p2 = scmp.lt.s32.totalorder %s14508_s19, %s14508_s19 }
 0x621   :  { %v14487_v45 = vld [vmem:[%s19775_s3 + $0x190] sm:$0xff]  }
 0x622   :  { %11234 = vmatpush1.bf16.msra.mxu0 %v14077_v49  ;;  %v14490_v49 = vld [vmem:[%s19775_s3 + $0x118] sm:$0xff]   ;;  %p14515_p3 = por %p14514_p2, %p14513_p1 }
 0x623   :  { %11767 = vmatpush1.bf16.msra.mxu1 %v14079_v59  ;;  %14150 = vmatprep.subr.bf16.mxu0 %v14444_v8  ;;  %v14491_v59 = vld [vmem:[%s19775_s3 + $0x198] sm:$0xff]   ;;  %v14492_v8 = vld [vmem:[%s19775_s3 + $0x160] sm:$0xff]  }
 0x624   :  { %14172 = vmatprep.subr.bf16.mxu1 %v14445_v62  ;;  %v14493_v62 = vld [vmem:[%s19775_s3 + $0x1e0] sm:$0xff]   ;;  %p14516_p4 = pnand %p14515_p3, %p14509_p0 }
 0x625   :  { %14083 = vmatmul.mubr.msk.bf16.vlgmr.msra.gmra.mrb[4].mxu0 %vm9665_vm0, %v17138_v25 }
 0x626   :  { %14084 = vmatmul.mubr.msk.bf16.vlgmr.msra.gmra.mrb[4].mxu1 %vm9665_vm0, %v17138_v25  ;;  %14151 = vmatpush3.bf16.msra.mxu0 %v14446_v23  ;;  %v14453_v25 = vld [vmem:[%s19775_s3 + $0xd0] sm:$0xff]   ;;  %v14496_v23 = vld [vmem:[%s19775_s3 + $0x168] sm:$0xff]  }
 0x627   :  { %12368 = vmatprep.mubr.bf16.mxu0 %v11810_v55  ;;  %14173 = vmatpush3.bf16.msra.mxu1 %v14447_v18  ;;  %v14497_v18 = vld [vmem:[%s19775_s3 + $0x1e8] sm:$0xff]  }
 0x628   :  { %12408 = vmatprep.mubr.bf16.mxu1 %v11812_v2  ;;  %14152 = vmatprep.subr.bf16.mxu0 %v14448_v54  ;;  %v14498_v54 = vld [vmem:[%s19775_s3 + $0x128] sm:$0xff]   ;;  %v14501_v2 = vld [vmem:[%s19775_s3 + $0x1f0] sm:$0xff]  }
 0x629   :  { %14174 = vmatprep.subr.bf16.mxu1 %v14449_v60  ;;  %v14499_v55 = vld [vmem:[%s19775_s3 + $0x1a8] sm:$0xff]   ;;  %v14500_v60 = vld [vmem:[%s19775_s3 + $0x170] sm:$0xff]  }
 0x62a   :  { %14153 = vmatpush3.bf16.msra.mxu0 %v14450_v57  ;;  %v14502_v57 = vld [vmem:[%s19775_s3 + $0x130] sm:$0xff]  }
 0x62b   :  { %14175 = vmatpush3.bf16.msra.mxu1 %v14451_v61  ;;  %14154 = vmatprep.subr.bf16.mxu0 %v14452_v0  ;;  %v14503_v61 = vld [vmem:[%s19775_s3 + $0x1b0] sm:$0xff]   ;;  %v14504_v0 = vld [vmem:[%s19775_s3 + $0x178] sm:$0xff]  }
 0x62c   :  { %14176 = vmatprep.subr.bf16.mxu1 %v14453_v25  ;;  %v14505_v25 = vld [vmem:[%s19775_s3 + $0x1f8] sm:$0xff]  }
 0x62e   :  { %14155 = vmatpush3.bf16.msra.mxu0 %v14454_v63  ;;  %v14506_v63 = vld [vmem:[%s19775_s3 + $0x138] sm:$0xff]  }
 0x62f   :  { %14177 = vmatpush3.bf16.msra.mxu1 %v14455_v44  ;;  %14156 = vmatprep.subr.bf16.mxu0 %v14456_v9  ;;  %v14507_v44 = vld [vmem:[%s19775_s3 + $0x1b8] sm:$0xff]   ;;  %v1614_v9 = vsub.s32 4, %v14631_v43 }
 0x630   :  { %14178 = vmatprep.subr.bf16.mxu1 %v14457_v10  ;;  %v1622_v10 = vsub.s32 6, %v14631_v43 }
 0x632   :  { %14157 = vmatpush3.bf16.msra.mxu0 %v14458_v14  ;;  %v1618_v14 = vsub.s32 5, %v14631_v43 }
 0x633   :  { %14179 = vmatpush3.bf16.msra.mxu1 %v14459_v11  ;;  %14158 = vmatprep.subr.bf16.mxu0 %v14460_v6  ;;  %v1626_v11 = vsub.s32 7, %v14631_v43  ;;  %v1615_v6 = vrot.slane %v19525_v48, %v1614_v9 }
 0x634   :  { %14180 = vmatprep.subr.bf16.mxu1 %v14461_v12  ;;  %v1623_v12 = vrot.slane %v19525_v48, %v1622_v10 }
 0x635   :  { %v1627_v16 = vrot.slane %v19525_v48, %v1626_v11 }
 0x636   :  { %14159 = vmatpush3.bf16.msra.mxu0 %v14462_v1  ;;  %v1619_v1 = vrot.slane %v19525_v48, %v1618_v14 }
 0x637   :  { %14181 = vmatpush3.bf16.msra.mxu1 %v14463_v20  ;;  %14160 = vmatprep.subr.bf16.mxu0 %v14464_v21 }
 0x638   :  { %14182 = vmatprep.subr.bf16.mxu1 %v14465_v24 }
 0x63a   :  { %14161 = vmatpush3.bf16.msra.mxu0 %v14466_v40 }
 0x63b   :  { %14183 = vmatpush3.bf16.msra.mxu1 %v14467_v15  ;;  %14162 = vmatprep.subr.bf16.mxu0 %v14468_v7 }
 0x63c   :  { %14184 = vmatprep.subr.bf16.mxu1 %v14469_v47 }
 0x63e   :  { %14163 = vmatpush3.bf16.msra.mxu0 %v14470_v28 }
 0x63f   :  { %14185 = vmatpush3.bf16.msra.mxu1 %v14471_v30  ;;  %14164 = vmatprep.subr.bf16.mxu0 %v14472_v32 }
 0x640   :  { %14186 = vmatprep.subr.bf16.mxu1 %v14473_v35 }
 0x642   :  { %14165 = vmatpush3.bf16.msra.mxu0 %v14474_v3 }
 0x643   :  { %14187 = vmatpush3.bf16.msra.mxu1 %v14475_v56  ;;  %14194 = vmatprep.subr.bf16.mxu0 %v14476_v13 }
 0x644   :  { %14216 = vmatprep.subr.bf16.mxu1 %v14477_v36 }
 0x645   :  { %12369 = vmatmul.mubr.bf16.vlgmr.msra.gmra.mrb[8].mxu0 %v11809_v53 }
 0x646   :  { %12409 = vmatmul.mubr.bf16.vlgmr.msra.gmra.mrb[8].mxu1 %v11811_v39  ;;  %14195 = vmatpush3.bf16.msra.mxu0 %v14478_v27 }
 0x647   :  { %14217 = vmatpush3.bf16.msra.mxu1 %v14479_v38  ;;  %14196 = vmatprep.subr.bf16.mxu0 %v14480_v19 }
 0x648   :  { %14218 = vmatprep.subr.bf16.mxu1 %v14481_v31 }
 0x64a   :  { %14197 = vmatpush3.bf16.msra.mxu0 %v14482_v5 }
 0x64b   :  { %14219 = vmatpush3.bf16.msra.mxu1 %v14483_v51  ;;  %14198 = vmatprep.subr.bf16.mxu0 %v14484_v41 }
 0x64c   :  { %14220 = vmatprep.subr.bf16.mxu1 %v14485_v42 }
 0x64e   :  { %14199 = vmatpush3.bf16.msra.mxu0 %v14486_v37 }
 0x64f   :  { %14221 = vmatpush3.bf16.msra.mxu1 %v14487_v45  ;;  %14200 = vmatprep.subr.bf16.mxu0 %v14488_v34 }
 0x650   :  { %14222 = vmatprep.subr.bf16.mxu1 %v14489_v46 }
 0x652   :  { %14201 = vmatpush3.bf16.msra.mxu0 %v14490_v49 }
 0x653   :  { %14223 = vmatpush3.bf16.msra.mxu1 %v14491_v59  ;;  %14202 = vmatprep.subr.bf16.mxu0 %v14492_v8 }
 0x654   :  { %14224 = vmatprep.subr.bf16.mxu1 %v14493_v62 }
 0x656   :  { %14203 = vmatpush3.bf16.msra.mxu0 %v14494_v50 }
 0x657   :  { %14225 = vmatpush3.bf16.msra.mxu1 %v14495_v52  ;;  %14204 = vmatprep.subr.bf16.mxu0 %v14496_v23 }
 0x658   :  { %14226 = vmatprep.subr.bf16.mxu1 %v14497_v18 }
 0x65a   :  { %14205 = vmatpush3.bf16.msra.mxu0 %v14498_v54 }
 0x65b   :  { %14227 = vmatpush3.bf16.msra.mxu1 %v14499_v55  ;;  %14206 = vmatprep.subr.bf16.mxu0 %v14500_v60 }
 0x65c   :  { %14228 = vmatprep.subr.bf16.mxu1 %v14501_v2 }
 0x65e   :  { %14207 = vmatpush3.bf16.msra.mxu0 %v14502_v57 }
 0x65f   :  { %14229 = vmatpush3.bf16.msra.mxu1 %v14503_v61  ;;  %14208 = vmatprep.subr.bf16.mxu0 %v14504_v0 }
 0x660   :  { %14230 = vmatprep.subr.bf16.mxu1 %v14505_v25 }
 0x662   :  { %14209 = vmatpush3.bf16.msra.mxu0 %v14506_v63 }
 0x663   :  { %14231 = vmatpush3.bf16.msra.mxu1 %v14507_v44 }
 0x6f8   :  { %v11261_v20 = vpop.f32.mrb[4].mxu0 }
 0x6f9   :  { %v14242_v21 = vadd.f32 %v11261_v20, %v1615_v6  ;;  %v11794_v22 = vpop.f32.mrb[4].mxu1  ;;  %v11263_v24 = vpop.f32.mrb[5].mxu0 }
 0x6fa   :  { %v14244_v40 = vadd.f32 %v11794_v22, %v1623_v12  ;;  %v14243_v33 = vadd.f32 %v11263_v24, %v1619_v1  ;;  %v11796_v15 = vpop.f32.mrb[5].mxu1  ;;  %v11265_v7 = vpop.f32.mrb[6].mxu0 }
 0x6fb   :  { %v11805_v58 = vmax.f32 %v14242_v21, 0.0  ;;  %v14245_v47 = vadd.f32 %v11796_v15, %v1627_v16  ;;  %v11798_v28 = vpop.f32.mrb[6].mxu1  ;;  %v11266_v43 = vpop.f32.mrb[7].mxu0 }
 0x6fc   :  { %v11807_v29 = vmax.f32 %v14244_v40, 0.0  ;;  %v11806_v30 = vmax.f32 %v14243_v33, 0.0  ;;  %v11799_v32 = vpop.f32.mrb[7].mxu1 }
 0x6fd   :  { %v11808_v26 = vmax.f32 %v14245_v47, 0.0  ;;  %v11813_v3 = vpack.c.bf16 %v11805_v58, %v11805_v58 }
 0x6fe   :  { %v11814_v35 = vpack.c.bf16 %v11806_v30, %v11806_v30  ;;  %v11815_v48 = vpack.c.bf16 %v11807_v29, %v11807_v29 }
 0x6ff   :  { %v11816_v17 = vpack.c.bf16 %v11808_v26, %v11808_v26 }
 0x700   :  { %12448 = vmatprep.mubr.bf16.mxu0 %v11814_v35 }
 0x701   :  { %12488 = vmatprep.mubr.bf16.mxu1 %v11816_v17  ;;  %12449 = vmatmul.mubr.bf16.vlgmr.msra.gmra.mrb[12].mxu0 %v11813_v3 }
 0x702   :  { %12489 = vmatmul.mubr.bf16.vlgmr.msra.gmra.mrb[12].mxu1 %v11815_v48 }
 0x718   :  { %v14166_v56 = vpop.f32.mrb[8].mxu0 }
 0x719   :  { %v14188_v13 = vpop.f32.mrb[8].mxu1  ;;  %v14167_v36 = vpop.f32.mrb[9].mxu0 }
 0x71a   :  { %v14168_v27 = vadd.f32 %v14167_v36, %v14166_v56  ;;  %v14189_v53 = vpop.f32.mrb[9].mxu1  ;;  %v14169_v38 = vpop.f32.mrb[10].mxu0 }
 0x71b   :  { %v14190_v19 = vadd.f32 %v14189_v53, %v14188_v13  ;;  %v14191_v39 = vpop.f32.mrb[10].mxu1  ;;  %v14170_v31 = vpop.f32.mrb[11].mxu0 }
 0x71c   :  { %v12371_v5 = vadd.f32 %v14168_v27, %v14085_v4  ;;  %v14192_v51 = vpop.f32.mrb[11].mxu1 }
 0x71e   :  { %v12411_v41 = vadd.f32 %v14190_v19, %v12371_v5 }
 0x7d4   :  { %v14210_v42 = vpop.f32.mrb[12].mxu0 }
 0x7d5   :  { %v14232_v37 = vpop.f32.mrb[12].mxu1  ;;  %v14211_v45 = vpop.f32.mrb[13].mxu0 }
 0x7d6   :  { %v14212_v34 = vadd.f32 %v14211_v45, %v14210_v42  ;;  %v14233_v46 = vpop.f32.mrb[13].mxu1  ;;  %v14213_v49 = vpop.f32.mrb[14].mxu0 }
 0x7d7   :  { %v14234_v59 = vadd.f32 %v14233_v46, %v14232_v37  ;;  %v14235_v8 = vpop.f32.mrb[14].mxu1  ;;  %v14214_v62 = vpop.f32.mrb[15].mxu0 }
 0x7d8   :  { %v12451_v50 = vadd.f32 %v14212_v34, %v12411_v41  ;;  %v14236_v52 = vpop.f32.mrb[15].mxu1 }
 0x7da   :  { %v12491_v23 = vadd.f32 %v14234_v59, %v12451_v50 }
 0x7dc   :  { %12497 = vst.msk [vmem:[#allocation2] sm:$0x3] %vm12496_vm1, %v12491_v23 }
 0x7dd   :  { %14519 = shalt.err (!%p14516_p4)
}
 0x7de   :  { %s14520_s22 = scalar_lea.hbm %s19777_s5, 32 }
 0x7df   :  { %p14521_p5 = scmp.ne.s32.totalorder %s19777_s5, %s14520_s22  ;;  %p14524_p6 = scmp.lt.u32.totalorder %s14520_s22, %s19777_s5 }
 0x7e1   :  { %p14526_p7 = pnand %p14524_p6, %p14521_p5 }
 0x7e3   :  { %14529 = shalt.err (!%p14526_p7)
}
 0x7e4   :  { %12507 = dma.vmem_to_hbm [thread:$0]  %s12505_s18, 32, %s19777_s5, [#allocation3]  }
 0x7e5   :  { %14530 = dma.done.wait [#allocation3], 32  }
 0x7e6   :  { %14531 = vsyncadd [#allocation3], 4294967264 }
 0x7e7   :  { %12511 = vsyncpa [#allocation3], 1 }

</bundles_post_ra>
